<compile_context>
chip_gen: v6e
topology: v6e:2x2x1
jax: 0.10.0
libtpu: 0.0.40
codegen_flags: <defaults>
</compile_context>

<pallas_src>
import functools

import jax
import jax.numpy as jnp
from jax.experimental import pallas as pl
from jax.experimental.pallas import tpu as pltpu

LANE = 128                      # TPU lane width; OC / N padding target
_VMEM_LIMIT = 32 * 1024 * 1024  # above v5e's 16 MiB default, safe on v6e/v7x


def _round_up(x, m):
    return (x + m - 1) // m * m


def _pick_tm(m, tm_max):
    """Row tile: whole (16-padded) M if it fits the per-layer cap, else cap."""
    return min(_round_up(m, 16), tm_max)


# ----------------------------------------------------------------------------
# Pallas kernel 1: tiled matmul + bias (+ optional ReLU)
#   y = act(x @ w + b) with x:(M,K) bf16, w:(K,N) bf16, b:(1,N) f32.
#   Grid = (M//tm, N//tn); K kept whole per tile (K <= 6144 here, so the
#   (tm,K)+(K,tn) blocks fit VMEM comfortably with double buffering).
# ----------------------------------------------------------------------------
def _linear_kernel(x_ref, w_ref, b_ref, o_ref, *, apply_relu: bool):
    acc = jnp.dot(x_ref[...], w_ref[...], preferred_element_type=jnp.float32)
    acc = acc + b_ref[...]                       # (1, tn) broadcasts over rows
    if apply_relu:
        acc = jnp.maximum(acc, 0.0)
    o_ref[...] = acc.astype(o_ref.dtype)


def pallas_linear(x, w, b, *, apply_relu, out_dtype=jnp.bfloat16,
                  tm_max=512, tn=LANE):
    M, K = x.shape
    K2, N = w.shape
    assert K == K2 and N % tn == 0 and b.shape == (1, N)
    tm = _pick_tm(M, tm_max)
    m_pad = _round_up(M, tm)
    if m_pad != M:
        x = jnp.pad(x, ((0, m_pad - M), (0, 0)))
    grid = (m_pad // tm, N // tn)
    kernel = functools.partial(_linear_kernel, apply_relu=apply_relu)
    y = pl.pallas_call(
        kernel,
        out_shape=jax.ShapeDtypeStruct((m_pad, N), out_dtype),
        grid_spec=pltpu.PrefetchScalarGridSpec(
            num_scalar_prefetch=0,
            grid=grid,
            in_specs=[
                pl.BlockSpec((tm, K), lambda i, j: (i, 0)),
                pl.BlockSpec((K, tn), lambda i, j: (0, j)),
                pl.BlockSpec((1, tn), lambda i, j: (0, j)),
            ],
            out_specs=pl.BlockSpec((tm, tn), lambda i, j: (i, j)),
        ),
        compiler_params=pltpu.CompilerParams(
            dimension_semantics=("parallel", "parallel"),
            vmem_limit_bytes=_VMEM_LIMIT,
        ),
    )(x, w, b)
    return y[:M] if m_pad != M else y


# ----------------------------------------------------------------------------
# Pallas kernel 2: fused fc head   y = (relu(x @ w1 + b1)) @ w2 + b2
#   x:(M,K1) bf16, w1:(K1,N1) bf16, b1:(1,N1) f32, w2:(N1,N2) bf16, b2:(1,N2) f32
#   Single grid over M tiles; both weight matrices stay resident in VMEM.
# ----------------------------------------------------------------------------
def _mlp_head_kernel(x_ref, w1_ref, b1_ref, w2_ref, b2_ref, o_ref):
    h = jnp.dot(x_ref[...], w1_ref[...], preferred_element_type=jnp.float32)
    h = jnp.maximum(h + b1_ref[...], 0.0)
    y = jnp.dot(h.astype(jnp.bfloat16), w2_ref[...],
                preferred_element_type=jnp.float32)
    o_ref[...] = (y + b2_ref[...]).astype(o_ref.dtype)


def pallas_mlp_head(x, w1, b1, w2, b2, *, tm_max=256):
    M, K1 = x.shape
    K1b, N1 = w1.shape
    N1b, N2 = w2.shape
    assert K1 == K1b and N1 == N1b and N2 % LANE == 0
    tm = _pick_tm(M, tm_max)
    m_pad = _round_up(M, tm)
    if m_pad != M:
        x = jnp.pad(x, ((0, m_pad - M), (0, 0)))
    y = pl.pallas_call(
        _mlp_head_kernel,
        out_shape=jax.ShapeDtypeStruct((m_pad, N2), jnp.float32),
        grid_spec=pltpu.PrefetchScalarGridSpec(
            num_scalar_prefetch=0,
            grid=(m_pad // tm,),
            in_specs=[
                pl.BlockSpec((tm, K1), lambda i: (i, 0)),
                pl.BlockSpec((K1, N1), lambda i: (0, 0)),
                pl.BlockSpec((1, N1), lambda i: (0, 0)),
                pl.BlockSpec((N1, N2), lambda i: (0, 0)),
                pl.BlockSpec((1, N2), lambda i: (0, 0)),
            ],
            out_specs=pl.BlockSpec((tm, N2), lambda i: (i, 0)),
        ),
        compiler_params=pltpu.CompilerParams(
            dimension_semantics=("parallel",),
            vmem_limit_bytes=_VMEM_LIMIT,
        ),
    )(x, w1, b1, w2, b2)
    return y[:M] if m_pad != M else y


# ----------------------------------------------------------------------------
# im2col glue (NHWC-native: strided slices + last-axis concat, no transposes)
# ----------------------------------------------------------------------------
# TODO(synk): the patch gather is still materialized by XLA (4x/9x expansion);
# fully fusing it into the matmul kernel (shifted unit-stride slices of a
# VMEM-resident NHWC block after a stride->depth rewrite) is the remaining
# step, left out here because the in-kernel relayouts it needs are risky to
# lower and the patch tensors are only a few hundred KiB at these shapes.
def im2col_nhwc(x, kh, kw, stride):
    """x: (B, H, W, C) -> (B*OH*OW, KH*KW*C), feature order (kh, kw, c)."""
    B, H, W, C = x.shape
    oh = (H - kh) // stride + 1
    ow = (W - kw) // stride + 1
    cols = []
    for di in range(kh):
        for dj in range(kw):
            cols.append(x[:, di:di + stride * oh:stride,
                             dj:dj + stride * ow:stride, :])   # (B, oh, ow, C)
    p = jnp.concatenate(cols, axis=-1)                          # (B, oh, ow, kh*kw*C)
    return p.reshape(B * oh * ow, kh * kw * C), oh, ow


def conv2d_relu_nhwc(x, w_mat, b, kh, kw, stride, *, tm_max):
    """x: (B,H,W,Cp) bf16; w_mat: (kh*kw*Cp, OCp) bf16; b: (1,OCp) f32.
    Returns (B, OH, OW, OCp) bf16 (OC zero-padded to 128 lanes)."""
    B = x.shape[0]
    patches, oh, ow = im2col_nhwc(x, kh, kw, stride)
    y = pallas_linear(patches, w_mat, b, apply_relu=True,
                      out_dtype=jnp.bfloat16, tm_max=tm_max)
    return y.reshape(B, oh, ow, w_mat.shape[1])


# ----------------------------------------------------------------------------
# Parameter init: PyTorch-layout weights, converted ONCE to the padded bf16
# matmul layouts used by the kernels.
# ----------------------------------------------------------------------------
def _conv_w_to_mat(w, c_pad, oc_pad):
    """(OC, C, KH, KW) torch conv weight -> (KH*KW*Cp, OCp) bf16 matmul weight."""
    oc, c, kh, kw = w.shape
    wm = jnp.transpose(w, (2, 3, 1, 0))                                  # (kh, kw, c, oc)
    wm = jnp.pad(wm, ((0, 0), (0, 0), (0, c_pad - c), (0, oc_pad - oc)))  # zero pad channels
    return wm.reshape(kh * kw * c_pad, oc_pad).astype(jnp.bfloat16)


def init_dqn_params(key, in_channels, out_channels):
    ks = jax.random.split(key, 10)

    def uniform(k, shape, fan_in):
        bound = 1.0 / jnp.sqrt(fan_in)
        return jax.random.uniform(k, shape, jnp.float32, -bound, bound)

    # PyTorch-layout weights (same shapes / default init as nn.Conv2d, nn.Linear).
    w1 = uniform(ks[0], (32, in_channels, 8, 8), in_channels * 64)
    b1 = uniform(ks[1], (32,), in_channels * 64)
    w2 = uniform(ks[2], (64, 32, 4, 4), 32 * 16)
    b2 = uniform(ks[3], (64,), 32 * 16)
    w3 = uniform(ks[4], (64, 64, 3, 3), 64 * 9)
    b3 = uniform(ks[5], (64,), 64 * 9)
    w4 = uniform(ks[6], (3072, 256), 3072)        # rows in torch flatten order (c, h, w)
    b4 = uniform(ks[7], (256,), 3072)
    w5 = uniform(ks[8], (256, out_channels), 256)
    b5 = uniform(ks[9], (out_channels,), 256)

    cp = LANE                                     # padded channel count between conv layers
    p = {}
    # conv weights -> padded matmul layout (conv1 input channels are NOT padded:
    # K = 8*8*in_channels; conv2/conv3 consume the 128-padded activations).
    p["w1m"] = _conv_w_to_mat(w1, in_channels, cp)   # (256, 128)
    p["w2m"] = _conv_w_to_mat(w2, cp, cp)            # (2048, 128)
    p["w3m"] = _conv_w_to_mat(w3, cp, cp)            # (1152, 128)
    p["b1"] = jnp.pad(b1, (0, cp - 32)).reshape(1, cp)
    p["b2"] = jnp.pad(b2, (0, cp - 64)).reshape(1, cp)
    p["b3"] = jnp.pad(b3, (0, cp - 64)).reshape(1, cp)

    # fc1: torch flatten of NCHW uses row order (c, h, w) over the (64, 6, 8)
    # conv3 output; our NHWC-padded flatten is (h, w, c_pad).  Permute + pad
    # the weight rows once here so the forward pass needs no transpose.
    w4_chw = w4.reshape(64, 6, 8, 256)                       # (c, h, w, 256)
    w4_hwc = jnp.transpose(w4_chw, (1, 2, 0, 3))             # (h, w, c, 256)
    w4_hwc = jnp.pad(w4_hwc, ((0, 0), (0, 0), (0, cp - 64), (0, 0)))
    p["w4m"] = w4_hwc.reshape(6 * 8 * cp, 256).astype(jnp.bfloat16)   # (6144, 256)
    p["b4"] = b4.reshape(1, 256)

    # fc2: pad N=out_channels up to a full 128-lane tile; bf16 for the MXU.
    n2 = _round_up(out_channels, LANE)
    p["w5m"] = jnp.pad(w5, ((0, 0), (0, n2 - out_channels))).astype(jnp.bfloat16)
    p["b5"] = jnp.pad(b5, (0, n2 - out_channels)).reshape(1, n2)
    return p


# ----------------------------------------------------------------------------
# DQN forward (semantics of the PyTorch module; NHWC + padded channels inside)
# ----------------------------------------------------------------------------
def dqn_forward(params, x, out_channels):
    # NCHW -> NHWC once at the boundary; bf16 activations through the trunk.
    x = jnp.transpose(x, (0, 2, 3, 1)).astype(jnp.bfloat16)
    # Per-layer tm_max keeps (tm,K)+(K,tn) blocks (double-buffered) well under
    # the VMEM limit while letting small batches run as a single grid step.
    x = conv2d_relu_nhwc(x, params["w1m"], params["b1"], 8, 8, 4, tm_max=1024)
    x = conv2d_relu_nhwc(x, params["w2m"], params["b2"], 4, 4, 2, tm_max=512)
    x = conv2d_relu_nhwc(x, params["w3m"], params["b3"], 3, 3, 1, tm_max=512)
    B = x.shape[0]
    feats = x.reshape(B, -1)                      # (B, 6*8*128), order (h, w, c_pad)
    y = pallas_mlp_head(feats, params["w4m"], params["b4"],
                        params["w5m"], params["b5"], tm_max=256)
    return y[:, :out_channels]                    # drop lane padding of fc2


if __name__ == "__main__":
    # fc expects exactly 3072 = 64*6*8 features after the conv stack, which
    # implies a 76 x 92 input (smallest consistent spatial size).
    B, IN_C, OUT_C = 2, 4, 6
    H, W = 76, 92

    key = jax.random.PRNGKey(0)
    k_params, k_x = jax.random.split(key)
    params = init_dqn_params(k_params, IN_C, OUT_C)
    x = jax.random.normal(k_x, (B, IN_C, H, W), dtype=jnp.float32)

    fwd = jax.jit(dqn_forward, static_argnums=2)
    out = jax.block_until_ready(fwd(params, x, OUT_C))
    assert out.shape == (B, OUT_C), out.shape
    assert out.dtype == jnp.float32
    print("KERNEL_OK")
</pallas_src>

<mosaic_0001>
module attributes {stable_mosaic.version = 11 : i64} {
  func.func @_linear_kernel(%arg0: i32, %arg1: i32, %arg2: memref<800x256xbf16, #tpu.memory_space<vmem>>, %arg3: memref<256x128xbf16, #tpu.memory_space<vmem>>, %arg4: memref<1x128xf32, #tpu.memory_space<vmem>>, %arg5: memref<800x128xbf16, #tpu.memory_space<vmem>>) attributes {dimension_semantics = [#tpu.dimension_semantics<parallel>, #tpu.dimension_semantics<parallel>], iteration_bounds = array<i64: 1, 1>, scalar_prefetch = 0 : i64, scratch_operands = 0 : i64, tpu.core_type = #tpu.core_type<tc>, window_params = [{transform_indices = @transform_0, window_bounds = array<i64: 800, 256>}, {transform_indices = @transform_1, window_bounds = array<i64: 256, 128>}, {transform_indices = @transform_2, window_bounds = array<i64: 1, 128>}, {transform_indices = @transform_3, window_bounds = array<i64: 800, 128>}]} {
    %c0 = arith.constant 0 : index
    %c0_0 = arith.constant 0 : index
    %0 = vector.load %arg2[%c0, %c0_0] : memref<800x256xbf16, #tpu.memory_space<vmem>>, vector<800x256xbf16>
    %c0_1 = arith.constant 0 : index
    %c0_2 = arith.constant 0 : index
    %1 = vector.load %arg3[%c0_1, %c0_2] : memref<256x128xbf16, #tpu.memory_space<vmem>>, vector<256x128xbf16>
    %cst = arith.constant dense<0.000000e+00> : vector<800x128xf32>
    %2 = tpu.matmul %0, %1, %cst {dimension_numbers = #tpu.dot_dimension_numbers<[1], [0], [0], [1], [0, 0, 1, 1], [], []>} : vector<800x256xbf16>, vector<256x128xbf16>, vector<800x128xf32> -> vector<800x128xf32>
    %c0_3 = arith.constant 0 : index
    %c0_4 = arith.constant 0 : index
    %3 = vector.load %arg4[%c0_3, %c0_4] : memref<1x128xf32, #tpu.memory_space<vmem>>, vector<1x128xf32>
    %4 = vector.broadcast %3 : vector<1x128xf32> to vector<800x128xf32>
    %5 = arith.addf %2, %4 : vector<800x128xf32>
    %cst_5 = arith.constant 0.000000e+00 : f32
    %6 = vector.broadcast %cst_5 : f32 to vector<800x128xf32>
    %7 = arith.maximumf %5, %6 : vector<800x128xf32>
    %8 = arith.truncf %7 : vector<800x128xf32> to vector<800x128xbf16>
    %c0_6 = arith.constant 0 : index
    %c0_7 = arith.constant 0 : index
    %9 = vector.load %arg5[%c0_6, %c0_7] : memref<800x128xbf16, #tpu.memory_space<vmem>>, vector<800x128xbf16>
    tpu.vector_store %arg5[%c0_6, %c0_7], %8 {strides = array<i32>} : memref<800x128xbf16, #tpu.memory_space<vmem>>, vector<800x128xbf16>,
    return
  }
  func.func @transform_0(%arg0: i32, %arg1: i32) -> (i32, i32) {
    %c0_i32 = arith.constant 0 : i32
    %c0_i32_0 = arith.constant 0 : i32
    return %arg0, %c0_i32 : i32, i32
  }
  func.func @transform_1(%arg0: i32, %arg1: i32) -> (i32, i32) {
    %c0_i32 = arith.constant 0 : i32
    %c0_i32_0 = arith.constant 0 : i32
    return %c0_i32, %arg1 : i32, i32
  }
  func.func @transform_2(%arg0: i32, %arg1: i32) -> (i32, i32) {
    %c0_i32 = arith.constant 0 : i32
    %c0_i32_0 = arith.constant 0 : i32
    return %c0_i32, %arg1 : i32, i32
  }
  func.func @transform_3(%arg0: i32, %arg1: i32) -> (i32, i32) {
    %c0_i32 = arith.constant 0 : i32
    return %arg0, %arg1 : i32, i32
  }
}

module attributes {stable_mosaic.version = 11 : i64} {
  func.func @_linear_kernel(%arg0: i32, %arg1: i32, %arg2: memref<160x2048xbf16, #tpu.memory_space<vmem>>, %arg3: memref<2048x128xbf16, #tpu.memory_space<vmem>>, %arg4: memref<1x128xf32, #tpu.memory_space<vmem>>, %arg5: memref<160x128xbf16, #tpu.memory_space<vmem>>) attributes {dimension_semantics = [#tpu.dimension_semantics<parallel>, #tpu.dimension_semantics<parallel>], iteration_bounds = array<i64: 1, 1>, scalar_prefetch = 0 : i64, scratch_operands = 0 : i64, tpu.core_type = #tpu.core_type<tc>, window_params = [{transform_indices = @transform_0, window_bounds = array<i64: 160, 2048>}, {transform_indices = @transform_1, window_bounds = array<i64: 2048, 128>}, {transform_indices = @transform_2, window_bounds = array<i64: 1, 128>}, {transform_indices = @transform_3, window_bounds = array<i64: 160, 128>}]} {
    %c0 = arith.constant 0 : index
    %c0_0 = arith.constant 0 : index
    %0 = vector.load %arg2[%c0, %c0_0] : memref<160x2048xbf16, #tpu.memory_space<vmem>>, vector<160x2048xbf16>
    %c0_1 = arith.constant 0 : index
    %c0_2 = arith.constant 0 : index
    %1 = vector.load %arg3[%c0_1, %c0_2] : memref<2048x128xbf16, #tpu.memory_space<vmem>>, vector<2048x128xbf16>
    %cst = arith.constant dense<0.000000e+00> : vector<160x128xf32>
    %2 = tpu.matmul %0, %1, %cst {dimension_numbers = #tpu.dot_dimension_numbers<[1], [0], [0], [1], [0, 0, 1, 1], [], []>} : vector<160x2048xbf16>, vector<2048x128xbf16>, vector<160x128xf32> -> vector<160x128xf32>
    %c0_3 = arith.constant 0 : index
    %c0_4 = arith.constant 0 : index
    %3 = vector.load %arg4[%c0_3, %c0_4] : memref<1x128xf32, #tpu.memory_space<vmem>>, vector<1x128xf32>
    %4 = vector.broadcast %3 : vector<1x128xf32> to vector<160x128xf32>
    %5 = arith.addf %2, %4 : vector<160x128xf32>
    %cst_5 = arith.constant 0.000000e+00 : f32
    %6 = vector.broadcast %cst_5 : f32 to vector<160x128xf32>
    %7 = arith.maximumf %5, %6 : vector<160x128xf32>
    %8 = arith.truncf %7 : vector<160x128xf32> to vector<160x128xbf16>
    %c0_6 = arith.constant 0 : index
    %c0_7 = arith.constant 0 : index
    %9 = vector.load %arg5[%c0_6, %c0_7] : memref<160x128xbf16, #tpu.memory_space<vmem>>, vector<160x128xbf16>
    tpu.vector_store %arg5[%c0_6, %c0_7], %8 {strides = array<i32>} : memref<160x128xbf16, #tpu.memory_space<vmem>>, vector<160x128xbf16>,
    return
  }
  func.func @transform_0(%arg0: i32, %arg1: i32) -> (i32, i32) {
    %c0_i32 = arith.constant 0 : i32
    %c0_i32_0 = arith.constant 0 : i32
    return %arg0, %c0_i32 : i32, i32
  }
  func.func @transform_1(%arg0: i32, %arg1: i32) -> (i32, i32) {
    %c0_i32 = arith.constant 0 : i32
    %c0_i32_0 = arith.constant 0 : i32
    return %c0_i32, %arg1 : i32, i32
  }
  func.func @transform_2(%arg0: i32, %arg1: i32) -> (i32, i32) {
    %c0_i32 = arith.constant 0 : i32
    %c0_i32_0 = arith.constant 0 : i32
    return %c0_i32, %arg1 : i32, i32
  }
  func.func @transform_3(%arg0: i32, %arg1: i32) -> (i32, i32) {
    %c0_i32 = arith.constant 0 : i32
    return %arg0, %arg1 : i32, i32
  }
}

module attributes {stable_mosaic.version = 11 : i64} {
  func.func @_linear_kernel(%arg0: i32, %arg1: i32, %arg2: memref<96x1152xbf16, #tpu.memory_space<vmem>>, %arg3: memref<1152x128xbf16, #tpu.memory_space<vmem>>, %arg4: memref<1x128xf32, #tpu.memory_space<vmem>>, %arg5: memref<96x128xbf16, #tpu.memory_space<vmem>>) attributes {dimension_semantics = [#tpu.dimension_semantics<parallel>, #tpu.dimension_semantics<parallel>], iteration_bounds = array<i64: 1, 1>, scalar_prefetch = 0 : i64, scratch_operands = 0 : i64, tpu.core_type = #tpu.core_type<tc>, window_params = [{transform_indices = @transform_0, window_bounds = array<i64: 96, 1152>}, {transform_indices = @transform_1, window_bounds = array<i64: 1152, 128>}, {transform_indices = @transform_2, window_bounds = array<i64: 1, 128>}, {transform_indices = @transform_3, window_bounds = array<i64: 96, 128>}]} {
    %c0 = arith.constant 0 : index
    %c0_0 = arith.constant 0 : index
    %0 = vector.load %arg2[%c0, %c0_0] : memref<96x1152xbf16, #tpu.memory_space<vmem>>, vector<96x1152xbf16>
    %c0_1 = arith.constant 0 : index
    %c0_2 = arith.constant 0 : index
    %1 = vector.load %arg3[%c0_1, %c0_2] : memref<1152x128xbf16, #tpu.memory_space<vmem>>, vector<1152x128xbf16>
    %cst = arith.constant dense<0.000000e+00> : vector<96x128xf32>
    %2 = tpu.matmul %0, %1, %cst {dimension_numbers = #tpu.dot_dimension_numbers<[1], [0], [0], [1], [0, 0, 1, 1], [], []>} : vector<96x1152xbf16>, vector<1152x128xbf16>, vector<96x128xf32> -> vector<96x128xf32>
    %c0_3 = arith.constant 0 : index
    %c0_4 = arith.constant 0 : index
    %3 = vector.load %arg4[%c0_3, %c0_4] : memref<1x128xf32, #tpu.memory_space<vmem>>, vector<1x128xf32>
    %4 = vector.broadcast %3 : vector<1x128xf32> to vector<96x128xf32>
    %5 = arith.addf %2, %4 : vector<96x128xf32>
    %cst_5 = arith.constant 0.000000e+00 : f32
    %6 = vector.broadcast %cst_5 : f32 to vector<96x128xf32>
    %7 = arith.maximumf %5, %6 : vector<96x128xf32>
    %8 = arith.truncf %7 : vector<96x128xf32> to vector<96x128xbf16>
    %c0_6 = arith.constant 0 : index
    %c0_7 = arith.constant 0 : index
    %9 = vector.load %arg5[%c0_6, %c0_7] : memref<96x128xbf16, #tpu.memory_space<vmem>>, vector<96x128xbf16>
    tpu.vector_store %arg5[%c0_6, %c0_7], %8 {strides = array<i32>} : memref<96x128xbf16, #tpu.memory_space<vmem>>, vector<96x128xbf16>,
    return
  }
  func.func @transform_0(%arg0: i32, %arg1: i32) -> (i32, i32) {
    %c0_i32 = arith.constant 0 : i32
    %c0_i32_0 = arith.constant 0 : i32
    return %arg0, %c0_i32 : i32, i32
  }
  func.func @transform_1(%arg0: i32, %arg1: i32) -> (i32, i32) {
    %c0_i32 = arith.constant 0 : i32
    %c0_i32_0 = arith.constant 0 : i32
    return %c0_i32, %arg1 : i32, i32
  }
  func.func @transform_2(%arg0: i32, %arg1: i32) -> (i32, i32) {
    %c0_i32 = arith.constant 0 : i32
    %c0_i32_0 = arith.constant 0 : i32
    return %c0_i32, %arg1 : i32, i32
  }
  func.func @transform_3(%arg0: i32, %arg1: i32) -> (i32, i32) {
    %c0_i32 = arith.constant 0 : i32
    return %arg0, %arg1 : i32, i32
  }
}

module attributes {stable_mosaic.version = 11 : i64} {
  func.func @_mlp_head_kernel(%arg0: i32, %arg1: memref<16x6144xbf16, #tpu.memory_space<vmem>>, %arg2: memref<6144x256xbf16, #tpu.memory_space<vmem>>, %arg3: memref<1x256xf32, #tpu.memory_space<vmem>>, %arg4: memref<256x128xbf16, #tpu.memory_space<vmem>>, %arg5: memref<1x128xf32, #tpu.memory_space<vmem>>, %arg6: memref<16x128xf32, #tpu.memory_space<vmem>>) attributes {dimension_semantics = [#tpu.dimension_semantics<parallel>], iteration_bounds = array<i64: 1>, scalar_prefetch = 0 : i64, scratch_operands = 0 : i64, tpu.core_type = #tpu.core_type<tc>, window_params = [{transform_indices = @transform_0, window_bounds = array<i64: 16, 6144>}, {pipeline_mode = #tpu.pipeline_mode<synchronous>, transform_indices = @transform_1, window_bounds = array<i64: 6144, 256>}, {pipeline_mode = #tpu.pipeline_mode<synchronous>, transform_indices = @transform_2, window_bounds = array<i64: 1, 256>}, {pipeline_mode = #tpu.pipeline_mode<synchronous>, transform_indices = @transform_3, window_bounds = array<i64: 256, 128>}, {pipeline_mode = #tpu.pipeline_mode<synchronous>, transform_indices = @transform_4, window_bounds = array<i64: 1, 128>}, {transform_indices = @transform_5, window_bounds = array<i64: 16, 128>}]} {
    %c0 = arith.constant 0 : index
    %c0_0 = arith.constant 0 : index
    %0 = vector.load %arg1[%c0, %c0_0] : memref<16x6144xbf16, #tpu.memory_space<vmem>>, vector<16x6144xbf16>
    %c0_1 = arith.constant 0 : index
    %c0_2 = arith.constant 0 : index
    %1 = vector.load %arg2[%c0_1, %c0_2] : memref<6144x256xbf16, #tpu.memory_space<vmem>>, vector<6144x256xbf16>
    %cst = arith.constant dense<0.000000e+00> : vector<16x256xf32>
    %2 = tpu.matmul %0, %1, %cst {dimension_numbers = #tpu.dot_dimension_numbers<[1], [0], [0], [1], [0, 0, 1, 1], [], []>} : vector<16x6144xbf16>, vector<6144x256xbf16>, vector<16x256xf32> -> vector<16x256xf32>
    %c0_3 = arith.constant 0 : index
    %c0_4 = arith.constant 0 : index
    %3 = vector.load %arg3[%c0_3, %c0_4] : memref<1x256xf32, #tpu.memory_space<vmem>>, vector<1x256xf32>
    %4 = vector.broadcast %3 : vector<1x256xf32> to vector<16x256xf32>
    %5 = arith.addf %2, %4 : vector<16x256xf32>
    %cst_5 = arith.constant 0.000000e+00 : f32
    %6 = vector.broadcast %cst_5 : f32 to vector<16x256xf32>
    %7 = arith.maximumf %5, %6 : vector<16x256xf32>
    %8 = arith.truncf %7 : vector<16x256xf32> to vector<16x256xbf16>
    %c0_6 = arith.constant 0 : index
    %c0_7 = arith.constant 0 : index
    %9 = vector.load %arg4[%c0_6, %c0_7] : memref<256x128xbf16, #tpu.memory_space<vmem>>, vector<256x128xbf16>
    %cst_8 = arith.constant dense<0.000000e+00> : vector<16x128xf32>
    %10 = tpu.matmul %8, %9, %cst_8 {dimension_numbers = #tpu.dot_dimension_numbers<[1], [0], [0], [1], [0, 0, 1, 1], [], []>} : vector<16x256xbf16>, vector<256x128xbf16>, vector<16x128xf32> -> vector<16x128xf32>
    %c0_9 = arith.constant 0 : index
    %c0_10 = arith.constant 0 : index
    %11 = vector.load %arg5[%c0_9, %c0_10] : memref<1x128xf32, #tpu.memory_space<vmem>>, vector<1x128xf32>
    %12 = vector.broadcast %11 : vector<1x128xf32> to vector<16x128xf32>
    %13 = arith.addf %10, %12 : vector<16x128xf32>
    %c0_11 = arith.constant 0 : index
    %c0_12 = arith.constant 0 : index
    %14 = vector.load %arg6[%c0_11, %c0_12] : memref<16x128xf32, #tpu.memory_space<vmem>>, vector<16x128xf32>
    tpu.vector_store %arg6[%c0_11, %c0_12], %13 {strides = array<i32>} : memref<16x128xf32, #tpu.memory_space<vmem>>, vector<16x128xf32>,
    return
  }
  func.func @transform_0(%arg0: i32) -> (i32, i32) {
    %c0_i32 = arith.constant 0 : i32
    %c0_i32_0 = arith.constant 0 : i32
    return %arg0, %c0_i32 : i32, i32
  }
  func.func @transform_1(%arg0: i32) -> (i32, i32) {
    %c0_i32 = arith.constant 0 : i32
    %c0_i32_0 = arith.constant 0 : i32
    %c0_i32_1 = arith.constant 0 : i32
    return %c0_i32, %c0_i32_0 : i32, i32
  }
  func.func @transform_2(%arg0: i32) -> (i32, i32) {
    %c0_i32 = arith.constant 0 : i32
    %c0_i32_0 = arith.constant 0 : i32
    %c0_i32_1 = arith.constant 0 : i32
    return %c0_i32, %c0_i32_0 : i32, i32
  }
  func.func @transform_3(%arg0: i32) -> (i32, i32) {
    %c0_i32 = arith.constant 0 : i32
    %c0_i32_0 = arith.constant 0 : i32
    %c0_i32_1 = arith.constant 0 : i32
    return %c0_i32, %c0_i32_0 : i32, i32
  }
  func.func @transform_4(%arg0: i32) -> (i32, i32) {
    %c0_i32 = arith.constant 0 : i32
    %c0_i32_0 = arith.constant 0 : i32
    %c0_i32_1 = arith.constant 0 : i32
    return %c0_i32, %c0_i32_0 : i32, i32
  }
  func.func @transform_5(%arg0: i32) -> (i32, i32) {
    %c0_i32 = arith.constant 0 : i32
    %c0_i32_0 = arith.constant 0 : i32
    return %arg0, %c0_i32 : i32, i32
  }
}

</mosaic_0001>

<bundles_post_ra>
// kernel: dqn_forward.4
= control target key start
LH: loop header
LB: loop body
LE: loop exit
PB: predicated region body
PF: predicated region fallthrough
CT: control target
= control target key end

     0   :  { %v2602_v0 = vmov 0   ;;  %s3258_s1 = inlined_call_operand.vmem [shape: bf16[256,128], index: 1, kind: input, shape index: {}]   ;;  %s3259_s0 = inlined_call_operand.vmem [shape: bf16[800,256], index: 0, kind: input, shape index: {}]   ;;  %s3260_s2 = inlined_call_operand.vmem [shape: f32[1,128], index: 2, kind: input, shape index: {}]   ;;  %s3261_s3 = inlined_call_operand.vmem [shape: bf16[800,128], index: 3, kind: output, shape index: {}]  }
   0x1   :  { %750 = vmatprep.subr.bf16.mxu0 %v2602_v0  ;;  %2403 = vmatprep.subr.bf16.mxu1 %v2602_v0  ;;  %v2436_v1 = vld [vmem:[%s3258_s1 + $0x38] sm:$0xff]   ;;  %v2437_v2 = vld [vmem:[%s3258_s1 + $0x30] sm:$0xff]   ;;  %v2438_v3 = vld [vmem:[%s3258_s1 + $0x28] sm:$0xff]  }
   0x2   :  { %751 = vmatpush1.bf16.msra.mxu0 %v2436_v1  ;;  %2419 = vmatpush1.bf16.msra.mxu1 %v2436_v1  ;;  %v2439_v4 = vld [vmem:[%s3258_s1 + $0x20] sm:$0xff]   ;;  %v2440_v5 = vld [vmem:[%s3258_s1 + $0x18] sm:$0xff]   ;;  %v2441_v7 = vld [vmem:[%s3258_s1 + $0x10] sm:$0xff]  }
   0x3   :  { %752 = vmatprep.subr.bf16.mxu0 %v2602_v0  ;;  %2404 = vmatprep.subr.bf16.mxu1 %v2602_v0  ;;  %v2454_v6 = vld [vmem:[%s3259_s0 + $0x4] ss:$8 sps:$4 sm:$0xff]   ;;  %v2457_v8 = vld [vmem:[%s3259_s0 + $0x194] ss:$8 sps:$4 sm:$0xff]   ;;  %v2452_v19 = vld [vmem:[%s3259_s0] ss:$8 sps:$4 sm:$0xff]  }
   0x4   :  { %782 = vmatprep.mubr.bf16.mxu0 %v2454_v6  ;;  %982 = vmatprep.mubr.bf16.mxu1 %v2457_v8  ;;  %v2442_v9 = vld [vmem:[%s3258_s1 + $0x8] sm:$0xff]   ;;  %v2443_v10 = vld [vmem:[%s3258_s1] sm:$0xff]   ;;  %v2444_v11 = vld [vmem:[%s3258_s1 + $0x78] sm:$0xff]  }
   0x5   :  { %v2445_v12 = vld [vmem:[%s3258_s1 + $0x70] sm:$0xff]   ;;  %v2446_v13 = vld [vmem:[%s3258_s1 + $0x68] sm:$0xff]   ;;  %v2447_v14 = vld [vmem:[%s3258_s1 + $0x60] sm:$0xff]  }
   0x6   :  { %753 = vmatpush1.bf16.msra.mxu0 %v2437_v2  ;;  %2420 = vmatpush1.bf16.msra.mxu1 %v2437_v2  ;;  %v2448_v15 = vld [vmem:[%s3258_s1 + $0x58] sm:$0xff]   ;;  %v2449_v16 = vld [vmem:[%s3258_s1 + $0x50] sm:$0xff]   ;;  %v2450_v17 = vld [vmem:[%s3258_s1 + $0x48] sm:$0xff]  }
   0x7   :  { %754 = vmatprep.subr.bf16.mxu0 %v2602_v0  ;;  %2405 = vmatprep.subr.bf16.mxu1 %v2602_v0  ;;  %v2451_v18 = vld [vmem:[%s3258_s1 + $0x40] sm:$0xff]   ;;  %v2455_v20 = vld [vmem:[%s3259_s0 + $0x190] ss:$8 sps:$4 sm:$0xff]   ;;  %v2458_v21 = vld [vmem:[%s3259_s0 + $0x14] ss:$8 sps:$4 sm:$0xff]  }
   0x8   :  { %v2460_v22 = vld [vmem:[%s3259_s0 + $0x1a4] ss:$8 sps:$4 sm:$0xff]   ;;  %v2462_v23 = vld [vmem:[%s3259_s0 + $0x10] ss:$8 sps:$4 sm:$0xff]   ;;  %v2463_v24 = vld [vmem:[%s3259_s0 + $0x1a0] ss:$8 sps:$4 sm:$0xff]  }
   0x9   :  { %v2464_v25 = vld [vmem:[%s3259_s0 + $0x24] ss:$8 sps:$4 sm:$0xff]   ;;  %v2466_v26 = vld [vmem:[%s3259_s0 + $0x1b4] ss:$8 sps:$4 sm:$0xff]   ;;  %v2468_v27 = vld [vmem:[%s3259_s0 + $0x20] ss:$8 sps:$4 sm:$0xff]  }
   0xa   :  { %755 = vmatpush1.bf16.msra.mxu0 %v2438_v3  ;;  %2421 = vmatpush1.bf16.msra.mxu1 %v2438_v3  ;;  %v2469_v28 = vld [vmem:[%s3259_s0 + $0x1b0] ss:$8 sps:$4 sm:$0xff]   ;;  %v2470_v29 = vld [vmem:[%s3259_s0 + $0x34] ss:$8 sps:$4 sm:$0xff]   ;;  %v2472_v30 = vld [vmem:[%s3259_s0 + $0x1c4] ss:$8 sps:$4 sm:$0xff]  }
   0xb   :  { %756 = vmatprep.subr.bf16.mxu0 %v2602_v0  ;;  %2406 = vmatprep.subr.bf16.mxu1 %v2602_v0  ;;  %v2474_v31 = vld [vmem:[%s3259_s0 + $0x30] ss:$8 sps:$4 sm:$0xff]   ;;  %v2475_v32 = vld [vmem:[%s3259_s0 + $0x1c0] ss:$8 sps:$4 sm:$0xff]   ;;  %v2476_v33 = vld [vmem:[%s3259_s0 + $0x44] ss:$8 sps:$4 sm:$0xff]  }
   0xc   :  { %v2478_v34 = vld [vmem:[%s3259_s0 + $0x1d4] ss:$8 sps:$4 sm:$0xff]   ;;  %v2480_v35 = vld [vmem:[%s3259_s0 + $0x40] ss:$8 sps:$4 sm:$0xff]   ;;  %v2481_v36 = vld [vmem:[%s3259_s0 + $0x1d0] ss:$8 sps:$4 sm:$0xff]  }
   0xd   :  { %v2482_v37 = vld [vmem:[%s3259_s0 + $0x54] ss:$8 sps:$4 sm:$0xff]   ;;  %v2484_v38 = vld [vmem:[%s3259_s0 + $0x1e4] ss:$8 sps:$4 sm:$0xff]   ;;  %v2486_v39 = vld [vmem:[%s3259_s0 + $0x50] ss:$8 sps:$4 sm:$0xff]  }
   0xe   :  { %757 = vmatpush1.bf16.msra.mxu0 %v2439_v4  ;;  %2422 = vmatpush1.bf16.msra.mxu1 %v2439_v4  ;;  %v2487_v40 = vld [vmem:[%s3259_s0 + $0x1e0] ss:$8 sps:$4 sm:$0xff]   ;;  %v2488_v41 = vld [vmem:[%s3259_s0 + $0x64] ss:$8 sps:$4 sm:$0xff]   ;;  %v2490_v42 = vld [vmem:[%s3259_s0 + $0x1f4] ss:$8 sps:$4 sm:$0xff]  }
   0xf   :  { %758 = vmatprep.subr.bf16.mxu0 %v2602_v0  ;;  %2407 = vmatprep.subr.bf16.mxu1 %v2602_v0  ;;  %v2492_v43 = vld [vmem:[%s3259_s0 + $0x60] ss:$8 sps:$4 sm:$0xff]   ;;  %v2493_v44 = vld [vmem:[%s3259_s0 + $0x1f0] ss:$8 sps:$4 sm:$0xff]   ;;  %v2494_v45 = vld [vmem:[%s3259_s0 + $0x74] ss:$8 sps:$4 sm:$0xff]  }
  0x10   :  { %v2496_v46 = vld [vmem:[%s3259_s0 + $0x204] ss:$8 sps:$4 sm:$0xff]   ;;  %v2498_v47 = vld [vmem:[%s3259_s0 + $0x70] ss:$8 sps:$4 sm:$0xff]   ;;  %v2499_v48 = vld [vmem:[%s3259_s0 + $0x200] ss:$8 sps:$4 sm:$0xff]  }
  0x11   :  { %v2500_v49 = vld [vmem:[%s3259_s0 + $0x84] ss:$8 sps:$4 sm:$0xff]   ;;  %v2502_v50 = vld [vmem:[%s3259_s0 + $0x214] ss:$8 sps:$4 sm:$0xff]   ;;  %v2504_v51 = vld [vmem:[%s3259_s0 + $0x80] ss:$8 sps:$4 sm:$0xff]  }
  0x12   :  { %759 = vmatpush1.bf16.msra.mxu0 %v2440_v5  ;;  %2423 = vmatpush1.bf16.msra.mxu1 %v2440_v5  ;;  %v2505_v52 = vld [vmem:[%s3259_s0 + $0x210] ss:$8 sps:$4 sm:$0xff]   ;;  %v2506_v53 = vld [vmem:[%s3259_s0 + $0x94] ss:$8 sps:$4 sm:$0xff]   ;;  %v2508_v54 = vld [vmem:[%s3259_s0 + $0x224] ss:$8 sps:$4 sm:$0xff]  }
  0x13   :  { %760 = vmatprep.subr.bf16.mxu0 %v2602_v0  ;;  %2408 = vmatprep.subr.bf16.mxu1 %v2602_v0  ;;  %v2510_v55 = vld [vmem:[%s3259_s0 + $0x90] ss:$8 sps:$4 sm:$0xff]   ;;  %v2511_v56 = vld [vmem:[%s3259_s0 + $0x220] ss:$8 sps:$4 sm:$0xff]   ;;  %v2512_v57 = vld [vmem:[%s3259_s0 + $0xa4] ss:$8 sps:$4 sm:$0xff]  }
  0x14   :  { %v2514_v58 = vld [vmem:[%s3259_s0 + $0x234] ss:$8 sps:$4 sm:$0xff]   ;;  %v2516_v59 = vld [vmem:[%s3259_s0 + $0xa0] ss:$8 sps:$4 sm:$0xff]   ;;  %v2517_v60 = vld [vmem:[%s3259_s0 + $0x230] ss:$8 sps:$4 sm:$0xff]  }
  0x15   :  { %v2518_v61 = vld [vmem:[%s3259_s0 + $0xb4] ss:$8 sps:$4 sm:$0xff]   ;;  %v2520_v62 = vld [vmem:[%s3259_s0 + $0x244] ss:$8 sps:$4 sm:$0xff]   ;;  %v2522_v63 = vld [vmem:[%s3259_s0 + $0xb0] ss:$8 sps:$4 sm:$0xff]  }
  0x16   :  { %761 = vmatpush1.bf16.msra.mxu0 %v2441_v7  ;;  %2424 = vmatpush1.bf16.msra.mxu1 %v2441_v7  ;;  %v2524_v1 = vld [vmem:[%s3259_s0 + $0xc4] ss:$8 sps:$4 sm:$0xff]   ;;  %v2526_v2 = vld [vmem:[%s3259_s0 + $0x254] ss:$8 sps:$4 sm:$0xff]   ;;  %v2528_v3 = vld [vmem:[%s3259_s0 + $0xc0] ss:$8 sps:$4 sm:$0xff]  }
  0x17   :  { %762 = vmatprep.subr.bf16.mxu0 %v2602_v0  ;;  %2409 = vmatprep.subr.bf16.mxu1 %v2602_v0  ;;  %v2529_v4 = vld [vmem:[%s3259_s0 + $0x250] ss:$8 sps:$4 sm:$0xff]   ;;  %v2530_v5 = vld [vmem:[%s3259_s0 + $0xd4] ss:$8 sps:$4 sm:$0xff]   ;;  %v2532_v6 = vld [vmem:[%s3259_s0 + $0x264] ss:$8 sps:$4 sm:$0xff]  }
  0x18   :  { %v2534_v7 = vld [vmem:[%s3259_s0 + $0xd0] ss:$8 sps:$4 sm:$0xff]   ;;  %v2535_v8 = vld [vmem:[%s3259_s0 + $0x260] ss:$8 sps:$4 sm:$0xff]  }
  0x1a   :  { %763 = vmatpush1.bf16.msra.mxu0 %v2442_v9  ;;  %2425 = vmatpush1.bf16.msra.mxu1 %v2442_v9  ;;  %v2536_v9 = vld [vmem:[%s3259_s0 + $0xe4] ss:$8 sps:$4 sm:$0xff]  }
  0x1b   :  { %764 = vmatprep.subr.bf16.mxu0 %v2602_v0  ;;  %2410 = vmatprep.subr.bf16.mxu1 %v2602_v0 }
  0x1e   :  { %765 = vmatpush1.bf16.msra.mxu0 %v2443_v10  ;;  %2426 = vmatpush1.bf16.msra.mxu1 %v2443_v10  ;;  %v2538_v10 = vld [vmem:[%s3259_s0 + $0x274] ss:$8 sps:$4 sm:$0xff]  }
  0x1f   :  { %766 = vmatprep.subr.bf16.mxu0 %v2602_v0  ;;  %2411 = vmatprep.subr.bf16.mxu1 %v2602_v0 }
  0x22   :  { %767 = vmatpush2.bf16.msra.mxu0 %v2444_v11  ;;  %2427 = vmatpush2.bf16.msra.mxu1 %v2444_v11  ;;  %v2540_v11 = vld [vmem:[%s3259_s0 + $0xe0] ss:$8 sps:$4 sm:$0xff]  }
  0x23   :  { %768 = vmatprep.subr.bf16.mxu0 %v2602_v0  ;;  %2412 = vmatprep.subr.bf16.mxu1 %v2602_v0 }
  0x26   :  { %769 = vmatpush2.bf16.msra.mxu0 %v2445_v12  ;;  %2428 = vmatpush2.bf16.msra.mxu1 %v2445_v12  ;;  %v2541_v12 = vld [vmem:[%s3259_s0 + $0x270] ss:$8 sps:$4 sm:$0xff]  }
  0x27   :  { %770 = vmatprep.subr.bf16.mxu0 %v2602_v0  ;;  %2413 = vmatprep.subr.bf16.mxu1 %v2602_v0 }
  0x2a   :  { %771 = vmatpush2.bf16.msra.mxu0 %v2446_v13  ;;  %2429 = vmatpush2.bf16.msra.mxu1 %v2446_v13  ;;  %v2542_v13 = vld [vmem:[%s3259_s0 + $0xf4] ss:$8 sps:$4 sm:$0xff]  }
  0x2b   :  { %772 = vmatprep.subr.bf16.mxu0 %v2602_v0  ;;  %2414 = vmatprep.subr.bf16.mxu1 %v2602_v0 }
  0x2e   :  { %773 = vmatpush2.bf16.msra.mxu0 %v2447_v14  ;;  %2430 = vmatpush2.bf16.msra.mxu1 %v2447_v14  ;;  %v2544_v14 = vld [vmem:[%s3259_s0 + $0x284] ss:$8 sps:$4 sm:$0xff]  }
  0x2f   :  { %774 = vmatprep.subr.bf16.mxu0 %v2602_v0  ;;  %2415 = vmatprep.subr.bf16.mxu1 %v2602_v0 }
  0x32   :  { %775 = vmatpush2.bf16.msra.mxu0 %v2448_v15  ;;  %2431 = vmatpush2.bf16.msra.mxu1 %v2448_v15  ;;  %v2546_v15 = vld [vmem:[%s3259_s0 + $0xf0] ss:$8 sps:$4 sm:$0xff]  }
  0x33   :  { %776 = vmatprep.subr.bf16.mxu0 %v2602_v0  ;;  %2416 = vmatprep.subr.bf16.mxu1 %v2602_v0 }
  0x36   :  { %777 = vmatpush2.bf16.msra.mxu0 %v2449_v16  ;;  %2432 = vmatpush2.bf16.msra.mxu1 %v2449_v16  ;;  %v2547_v16 = vld [vmem:[%s3259_s0 + $0x280] ss:$8 sps:$4 sm:$0xff]  }
  0x37   :  { %778 = vmatprep.subr.bf16.mxu0 %v2602_v0  ;;  %2417 = vmatprep.subr.bf16.mxu1 %v2602_v0 }
  0x3a   :  { %779 = vmatpush2.bf16.msra.mxu0 %v2450_v17  ;;  %2433 = vmatpush2.bf16.msra.mxu1 %v2450_v17  ;;  %v2548_v17 = vld [vmem:[%s3259_s0 + $0x104] ss:$8 sps:$4 sm:$0xff]  }
  0x3b   :  { %780 = vmatprep.subr.bf16.mxu0 %v2602_v0  ;;  %2418 = vmatprep.subr.bf16.mxu1 %v2602_v0  ;;  %v2523_v0 = vld [vmem:[%s3259_s0 + $0x240] ss:$8 sps:$4 sm:$0xff]  }
  0x3e   :  { %781 = vmatpush2.bf16.msra.mxu0 %v2451_v18  ;;  %2434 = vmatpush2.bf16.msra.mxu1 %v2451_v18  ;;  %v2550_v18 = vld [vmem:[%s3259_s0 + $0x294] ss:$8 sps:$4 sm:$0xff]  }
  0x41   :  { %783 = vmatmul.mubr.bf16.vlgmr.msra.gmra.mxu0 %v2452_v19  ;;  %983 = vmatmul.mubr.bf16.vlgmr.msra.gmra.mxu1 %v2455_v20  ;;  %v2552_v19 = vld [vmem:[%s3259_s0 + $0x100] ss:$8 sps:$4 sm:$0xff]   ;;  %v2553_v20 = vld [vmem:[%s3259_s0 + $0x290] ss:$8 sps:$4 sm:$0xff]  }
  0x42   :  { %790 = vmatprep.mubr.bf16.mxu0 %v2458_v21  ;;  %990 = vmatprep.mubr.bf16.mxu1 %v2460_v22  ;;  %v2554_v21 = vld [vmem:[%s3259_s0 + $0x114] ss:$8 sps:$4 sm:$0xff]   ;;  %v2556_v22 = vld [vmem:[%s3259_s0 + $0x2a4] ss:$8 sps:$4 sm:$0xff]  }
  0x49   :  { %791 = vmatmul.mubr.bf16.gmra.mxu0 %v2462_v23  ;;  %991 = vmatmul.mubr.bf16.gmra.mxu1 %v2463_v24  ;;  %v2558_v23 = vld [vmem:[%s3259_s0 + $0x110] ss:$8 sps:$4 sm:$0xff]   ;;  %v2559_v24 = vld [vmem:[%s3259_s0 + $0x2a0] ss:$8 sps:$4 sm:$0xff]  }
  0x4a   :  { %798 = vmatprep.mubr.bf16.mxu0 %v2464_v25  ;;  %998 = vmatprep.mubr.bf16.mxu1 %v2466_v26  ;;  %v2560_v25 = vld [vmem:[%s3259_s0 + $0x124] ss:$8 sps:$4 sm:$0xff]   ;;  %v2562_v26 = vld [vmem:[%s3259_s0 + $0x2b4] ss:$8 sps:$4 sm:$0xff]  }
  0x51   :  { %799 = vmatmul.mubr.bf16.gmra.mxu0 %v2468_v27  ;;  %999 = vmatmul.mubr.bf16.gmra.mxu1 %v2469_v28  ;;  %v2564_v27 = vld [vmem:[%s3259_s0 + $0x120] ss:$8 sps:$4 sm:$0xff]   ;;  %v2565_v28 = vld [vmem:[%s3259_s0 + $0x2b0] ss:$8 sps:$4 sm:$0xff]  }
  0x52   :  { %806 = vmatprep.mubr.bf16.mxu0 %v2470_v29  ;;  %1006 = vmatprep.mubr.bf16.mxu1 %v2472_v30  ;;  %v2566_v29 = vld [vmem:[%s3259_s0 + $0x134] ss:$8 sps:$4 sm:$0xff]   ;;  %v2568_v30 = vld [vmem:[%s3259_s0 + $0x2c4] ss:$8 sps:$4 sm:$0xff]  }
  0x59   :  { %807 = vmatmul.mubr.bf16.gmra.mxu0 %v2474_v31  ;;  %1007 = vmatmul.mubr.bf16.gmra.mxu1 %v2475_v32  ;;  %v2570_v31 = vld [vmem:[%s3259_s0 + $0x130] ss:$8 sps:$4 sm:$0xff]   ;;  %v2571_v32 = vld [vmem:[%s3259_s0 + $0x2c0] ss:$8 sps:$4 sm:$0xff]  }
  0x5a   :  { %814 = vmatprep.mubr.bf16.mxu0 %v2476_v33  ;;  %1014 = vmatprep.mubr.bf16.mxu1 %v2478_v34  ;;  %v2572_v33 = vld [vmem:[%s3259_s0 + $0x144] ss:$8 sps:$4 sm:$0xff]   ;;  %v2574_v34 = vld [vmem:[%s3259_s0 + $0x2d4] ss:$8 sps:$4 sm:$0xff]  }
  0x61   :  { %815 = vmatmul.mubr.bf16.gmra.mxu0 %v2480_v35  ;;  %1015 = vmatmul.mubr.bf16.gmra.mxu1 %v2481_v36  ;;  %v2576_v35 = vld [vmem:[%s3259_s0 + $0x140] ss:$8 sps:$4 sm:$0xff]   ;;  %v2577_v36 = vld [vmem:[%s3259_s0 + $0x2d0] ss:$8 sps:$4 sm:$0xff]  }
  0x62   :  { %822 = vmatprep.mubr.bf16.mxu0 %v2482_v37  ;;  %1022 = vmatprep.mubr.bf16.mxu1 %v2484_v38  ;;  %v2578_v37 = vld [vmem:[%s3259_s0 + $0x154] ss:$8 sps:$4 sm:$0xff]   ;;  %v2580_v38 = vld [vmem:[%s3259_s0 + $0x2e4] ss:$8 sps:$4 sm:$0xff]  }
  0x69   :  { %823 = vmatmul.mubr.bf16.gmra.mxu0 %v2486_v39  ;;  %1023 = vmatmul.mubr.bf16.gmra.mxu1 %v2487_v40  ;;  %v2582_v39 = vld [vmem:[%s3259_s0 + $0x150] ss:$8 sps:$4 sm:$0xff]   ;;  %v2583_v40 = vld [vmem:[%s3259_s0 + $0x2e0] ss:$8 sps:$4 sm:$0xff]  }
  0x6a   :  { %830 = vmatprep.mubr.bf16.mxu0 %v2488_v41  ;;  %1030 = vmatprep.mubr.bf16.mxu1 %v2490_v42  ;;  %v2584_v41 = vld [vmem:[%s3259_s0 + $0x164] ss:$8 sps:$4 sm:$0xff]   ;;  %v2586_v42 = vld [vmem:[%s3259_s0 + $0x2f4] ss:$8 sps:$4 sm:$0xff]  }
  0x71   :  { %831 = vmatmul.mubr.bf16.gmra.mxu0 %v2492_v43  ;;  %1031 = vmatmul.mubr.bf16.gmra.mxu1 %v2493_v44  ;;  %v2588_v43 = vld [vmem:[%s3259_s0 + $0x160] ss:$8 sps:$4 sm:$0xff]   ;;  %v2589_v44 = vld [vmem:[%s3259_s0 + $0x2f0] ss:$8 sps:$4 sm:$0xff]  }
  0x72   :  { %838 = vmatprep.mubr.bf16.mxu0 %v2494_v45  ;;  %1038 = vmatprep.mubr.bf16.mxu1 %v2496_v46  ;;  %v2590_v45 = vld [vmem:[%s3259_s0 + $0x174] ss:$8 sps:$4 sm:$0xff]   ;;  %v2592_v46 = vld [vmem:[%s3259_s0 + $0x304] ss:$8 sps:$4 sm:$0xff]  }
  0x79   :  { %839 = vmatmul.mubr.bf16.gmra.mxu0 %v2498_v47  ;;  %1039 = vmatmul.mubr.bf16.gmra.mxu1 %v2499_v48  ;;  %v2594_v47 = vld [vmem:[%s3259_s0 + $0x170] ss:$8 sps:$4 sm:$0xff]   ;;  %v2595_v48 = vld [vmem:[%s3259_s0 + $0x300] ss:$8 sps:$4 sm:$0xff]  }
  0x7a   :  { %846 = vmatprep.mubr.bf16.mxu0 %v2500_v49  ;;  %1046 = vmatprep.mubr.bf16.mxu1 %v2502_v50  ;;  %v2596_v49 = vld [vmem:[%s3259_s0 + $0x184] ss:$8 sps:$4 sm:$0xff]   ;;  %v2598_v50 = vld [vmem:[%s3259_s0 + $0x314] ss:$8 sps:$4 sm:$0xff]  }
  0x81   :  { %847 = vmatmul.mubr.bf16.gmra.mxu0 %v2504_v51  ;;  %1047 = vmatmul.mubr.bf16.gmra.mxu1 %v2505_v52  ;;  %v2600_v51 = vld [vmem:[%s3259_s0 + $0x180] ss:$8 sps:$4 sm:$0xff]   ;;  %v2601_v52 = vld [vmem:[%s3259_s0 + $0x310] ss:$8 sps:$4 sm:$0xff]  }
  0x82   :  { %854 = vmatprep.mubr.bf16.mxu0 %v2506_v53  ;;  %1054 = vmatprep.mubr.bf16.mxu1 %v2508_v54  ;;  %v3006_v53 = vld [vmem:[%s3260_s2] ss:$0 sm:$0xff] }
  0x89   :  { %855 = vmatmul.mubr.bf16.gmra.mxu0 %v2510_v55  ;;  %1055 = vmatmul.mubr.bf16.gmra.mxu1 %v2511_v56 }
  0x8a   :  { %862 = vmatprep.mubr.bf16.mxu0 %v2512_v57  ;;  %1062 = vmatprep.mubr.bf16.mxu1 %v2514_v58 }
  0x91   :  { %863 = vmatmul.mubr.bf16.gmra.mxu0 %v2516_v59  ;;  %1063 = vmatmul.mubr.bf16.gmra.mxu1 %v2517_v60 }
  0x92   :  { %870 = vmatprep.mubr.bf16.mxu0 %v2518_v61  ;;  %1070 = vmatprep.mubr.bf16.mxu1 %v2520_v62 }
  0x99   :  { %871 = vmatmul.mubr.bf16.gmra.mxu0 %v2522_v63  ;;  %1071 = vmatmul.mubr.bf16.gmra.mxu1 %v2523_v0 }
  0x9a   :  { %878 = vmatprep.mubr.bf16.mxu0 %v2524_v1  ;;  %1078 = vmatprep.mubr.bf16.mxu1 %v2526_v2 }
  0xa1   :  { %879 = vmatmul.mubr.bf16.gmra.mxu0 %v2528_v3  ;;  %1079 = vmatmul.mubr.bf16.gmra.mxu1 %v2529_v4 }
  0xa2   :  { %886 = vmatprep.mubr.bf16.mxu0 %v2530_v5  ;;  %1086 = vmatprep.mubr.bf16.mxu1 %v2532_v6 }
  0xa9   :  { %887 = vmatmul.mubr.bf16.gmra.mxu0 %v2534_v7  ;;  %1087 = vmatmul.mubr.bf16.gmra.mxu1 %v2535_v8 }
  0xaa   :  { %894 = vmatprep.mubr.bf16.mxu0 %v2536_v9  ;;  %1094 = vmatprep.mubr.bf16.mxu1 %v2538_v10 }
  0xb1   :  { %895 = vmatmul.mubr.bf16.gmra.mxu0 %v2540_v11  ;;  %1095 = vmatmul.mubr.bf16.gmra.mxu1 %v2541_v12 }
  0xb2   :  { %902 = vmatprep.mubr.bf16.mxu0 %v2542_v13  ;;  %1102 = vmatprep.mubr.bf16.mxu1 %v2544_v14 }
  0xb9   :  { %903 = vmatmul.mubr.bf16.gmra.mxu0 %v2546_v15  ;;  %1103 = vmatmul.mubr.bf16.gmra.mxu1 %v2547_v16 }
  0xba   :  { %910 = vmatprep.mubr.bf16.mxu0 %v2548_v17  ;;  %1110 = vmatprep.mubr.bf16.mxu1 %v2550_v18 }
  0xc1   :  { %911 = vmatmul.mubr.bf16.gmra.mxu0 %v2552_v19  ;;  %1111 = vmatmul.mubr.bf16.gmra.mxu1 %v2553_v20 }
  0xc2   :  { %918 = vmatprep.mubr.bf16.mxu0 %v2554_v21  ;;  %1118 = vmatprep.mubr.bf16.mxu1 %v2556_v22 }
  0xc9   :  { %919 = vmatmul.mubr.bf16.gmra.mxu0 %v2558_v23  ;;  %1119 = vmatmul.mubr.bf16.gmra.mxu1 %v2559_v24 }
  0xca   :  { %926 = vmatprep.mubr.bf16.mxu0 %v2560_v25  ;;  %1126 = vmatprep.mubr.bf16.mxu1 %v2562_v26 }
  0xd1   :  { %927 = vmatmul.mubr.bf16.gmra.mxu0 %v2564_v27  ;;  %1127 = vmatmul.mubr.bf16.gmra.mxu1 %v2565_v28 }
  0xd2   :  { %934 = vmatprep.mubr.bf16.mxu0 %v2566_v29  ;;  %1134 = vmatprep.mubr.bf16.mxu1 %v2568_v30 }
  0xd9   :  { %935 = vmatmul.mubr.bf16.gmra.mxu0 %v2570_v31  ;;  %1135 = vmatmul.mubr.bf16.gmra.mxu1 %v2571_v32 }
  0xda   :  { %942 = vmatprep.mubr.bf16.mxu0 %v2572_v33  ;;  %1142 = vmatprep.mubr.bf16.mxu1 %v2574_v34 }
  0xe1   :  { %943 = vmatmul.mubr.bf16.gmra.mxu0 %v2576_v35  ;;  %1143 = vmatmul.mubr.bf16.gmra.mxu1 %v2577_v36 }
  0xe2   :  { %950 = vmatprep.mubr.bf16.mxu0 %v2578_v37  ;;  %1150 = vmatprep.mubr.bf16.mxu1 %v2580_v38 }
  0xe9   :  { %951 = vmatmul.mubr.bf16.gmra.mxu0 %v2582_v39  ;;  %1151 = vmatmul.mubr.bf16.gmra.mxu1 %v2583_v40 }
  0xea   :  { %958 = vmatprep.mubr.bf16.mxu0 %v2584_v41  ;;  %1158 = vmatprep.mubr.bf16.mxu1 %v2586_v42 }
  0xf1   :  { %959 = vmatmul.mubr.bf16.gmra.mxu0 %v2588_v43  ;;  %1159 = vmatmul.mubr.bf16.gmra.mxu1 %v2589_v44 }
  0xf2   :  { %966 = vmatprep.mubr.bf16.mxu0 %v2590_v45  ;;  %1166 = vmatprep.mubr.bf16.mxu1 %v2592_v46 }
  0xf9   :  { %967 = vmatmul.mubr.bf16.gmra.mxu0 %v2594_v47  ;;  %1167 = vmatmul.mubr.bf16.gmra.mxu1 %v2595_v48 }
  0xfa   :  { %974 = vmatprep.mubr.bf16.mxu0 %v2596_v49  ;;  %1174 = vmatprep.mubr.bf16.mxu1 %v2598_v50 }
 0x101   :  { %v784_v54 = vpop.f32.mrf.mxu0  ;;  %975 = vmatmul.mubr.bf16.gmra.mxu0 %v2600_v51  ;;  %v984_v55 = vpop.f32.mrf.mxu1  ;;  %1175 = vmatmul.mubr.bf16.gmra.mxu1 %v2601_v52 }
 0x102   :  { %v785_v58 = vadd.f32 %v3006_v53, %v784_v54  ;;  %v985_v59 = vadd.f32 %v3006_v53, %v984_v55 }
 0x103   :  { %v786_v56 = vpop.f32.mrf.mxu0  ;;  %v986_v57 = vpop.f32.mrf.mxu1 }
 0x104   :  { %v1183_v2 = vmax.f32 %v785_v58, 0.0  ;;  %v1233_v3 = vmax.f32 %v985_v59, 0.0 }
 0x105   :  { %v787_v60 = vpop.f32.mrf.mxu0  ;;  %v987_v61 = vpop.f32.mrf.mxu1 }
 0x106   :  { %v788_v62 = vadd.f32 %v3006_v53, %v787_v60  ;;  %v988_v63 = vadd.f32 %v3006_v53, %v987_v61 }
 0x107   :  { %v789_v0 = vpop.f32.mrf.mxu0  ;;  %v989_v1 = vpop.f32.mrf.mxu1 }
 0x108   :  { %v1184_v4 = vmax.f32 %v788_v62, 0.0  ;;  %v1234_v5 = vmax.f32 %v988_v63, 0.0 }
 0x109   :  { %v792_v6 = vpop.f32.mrf.mxu0  ;;  %v992_v7 = vpop.f32.mrf.mxu1 }
 0x10a   :  { %v2107_v8 = vpack.c.bf16 %v1184_v4, %v1183_v2  ;;  %v2232_v9 = vpack.c.bf16 %v1234_v5, %v1233_v3  ;;  %v793_v12 = vadd.f32 %v3006_v53, %v792_v6  ;;  %v993_v13 = vadd.f32 %v3006_v53, %v992_v7 }
 0x10b   :  { %v794_v10 = vpop.f32.mrf.mxu0  ;;  %v994_v11 = vpop.f32.mrf.mxu1 }
 0x10c   :  { %2108 = vst [vmem:[%s3261_s3] sm:$0xff] %v2107_v8   ;;  %2378 = vst [vmem:[%s3261_s3 + $0xc8] sm:$0xff] %v2232_v9   ;;  %v1185_v20 = vmax.f32 %v793_v12, 0.0  ;;  %v1235_v21 = vmax.f32 %v993_v13, 0.0 }
 0x10d   :  { %v795_v14 = vpop.f32.mrf.mxu0  ;;  %v995_v15 = vpop.f32.mrf.mxu1 }
 0x10e   :  { %v796_v16 = vadd.f32 %v3006_v53, %v795_v14  ;;  %v996_v17 = vadd.f32 %v3006_v53, %v995_v15 }
 0x10f   :  { %v797_v18 = vpop.f32.mrf.mxu0  ;;  %v997_v19 = vpop.f32.mrf.mxu1 }
 0x110   :  { %v1186_v22 = vmax.f32 %v796_v16, 0.0  ;;  %v1236_v23 = vmax.f32 %v996_v17, 0.0 }
 0x111   :  { %v800_v24 = vpop.f32.mrf.mxu0  ;;  %v1000_v25 = vpop.f32.mrf.mxu1 }
 0x112   :  { %v2112_v26 = vpack.c.bf16 %v1186_v22, %v1185_v20  ;;  %v2237_v27 = vpack.c.bf16 %v1236_v23, %v1235_v21  ;;  %v801_v30 = vadd.f32 %v3006_v53, %v800_v24  ;;  %v1001_v31 = vadd.f32 %v3006_v53, %v1000_v25 }
 0x113   :  { %v802_v28 = vpop.f32.mrf.mxu0  ;;  %v1002_v29 = vpop.f32.mrf.mxu1 }
 0x114   :  { %2354 = vst [vmem:[%s3261_s3 + $0x8] sm:$0xff] %v2112_v26   ;;  %2379 = vst [vmem:[%s3261_s3 + $0xd0] sm:$0xff] %v2237_v27   ;;  %v1187_v38 = vmax.f32 %v801_v30, 0.0  ;;  %v1237_v39 = vmax.f32 %v1001_v31, 0.0 }
 0x115   :  { %v803_v32 = vpop.f32.mrf.mxu0  ;;  %v1003_v33 = vpop.f32.mrf.mxu1 }
 0x116   :  { %v804_v34 = vadd.f32 %v3006_v53, %v803_v32  ;;  %v1004_v35 = vadd.f32 %v3006_v53, %v1003_v33 }
 0x117   :  { %v805_v36 = vpop.f32.mrf.mxu0  ;;  %v1005_v37 = vpop.f32.mrf.mxu1 }
 0x118   :  { %v1188_v40 = vmax.f32 %v804_v34, 0.0  ;;  %v1238_v41 = vmax.f32 %v1004_v35, 0.0 }
 0x119   :  { %v808_v42 = vpop.f32.mrf.mxu0  ;;  %v1008_v43 = vpop.f32.mrf.mxu1 }
 0x11a   :  { %v2117_v44 = vpack.c.bf16 %v1188_v40, %v1187_v38  ;;  %v2242_v45 = vpack.c.bf16 %v1238_v41, %v1237_v39  ;;  %v809_v48 = vadd.f32 %v3006_v53, %v808_v42  ;;  %v1009_v49 = vadd.f32 %v3006_v53, %v1008_v43 }
 0x11b   :  { %v810_v46 = vpop.f32.mrf.mxu0  ;;  %v1010_v47 = vpop.f32.mrf.mxu1 }
 0x11c   :  { %2355 = vst [vmem:[%s3261_s3 + $0x10] sm:$0xff] %v2117_v44   ;;  %2380 = vst [vmem:[%s3261_s3 + $0xd8] sm:$0xff] %v2242_v45   ;;  %v1189_v57 = vmax.f32 %v809_v48, 0.0  ;;  %v1239_v58 = vmax.f32 %v1009_v49, 0.0 }
 0x11d   :  { %v811_v50 = vpop.f32.mrf.mxu0  ;;  %v1011_v51 = vpop.f32.mrf.mxu1 }
 0x11e   :  { %v812_v52 = vadd.f32 %v3006_v53, %v811_v50  ;;  %v1012_v54 = vadd.f32 %v3006_v53, %v1011_v51 }
 0x11f   :  { %v813_v55 = vpop.f32.mrf.mxu0  ;;  %v1013_v56 = vpop.f32.mrf.mxu1 }
 0x120   :  { %v1190_v59 = vmax.f32 %v812_v52, 0.0  ;;  %v1240_v60 = vmax.f32 %v1012_v54, 0.0 }
 0x121   :  { %v816_v61 = vpop.f32.mrf.mxu0  ;;  %v1016_v62 = vpop.f32.mrf.mxu1 }
 0x122   :  { %v2122_v63 = vpack.c.bf16 %v1190_v59, %v1189_v57  ;;  %v2247_v0 = vpack.c.bf16 %v1240_v60, %v1239_v58  ;;  %v817_v3 = vadd.f32 %v3006_v53, %v816_v61  ;;  %v1017_v4 = vadd.f32 %v3006_v53, %v1016_v62 }
 0x123   :  { %v818_v1 = vpop.f32.mrf.mxu0  ;;  %v1018_v2 = vpop.f32.mrf.mxu1 }
 0x124   :  { %2356 = vst [vmem:[%s3261_s3 + $0x18] sm:$0xff] %v2122_v63   ;;  %2381 = vst [vmem:[%s3261_s3 + $0xe0] sm:$0xff] %v2247_v0   ;;  %v1191_v11 = vmax.f32 %v817_v3, 0.0  ;;  %v1241_v12 = vmax.f32 %v1017_v4, 0.0 }
 0x125   :  { %v819_v5 = vpop.f32.mrf.mxu0  ;;  %v1019_v6 = vpop.f32.mrf.mxu1 }
 0x126   :  { %v820_v7 = vadd.f32 %v3006_v53, %v819_v5  ;;  %v1020_v8 = vadd.f32 %v3006_v53, %v1019_v6 }
 0x127   :  { %v821_v9 = vpop.f32.mrf.mxu0  ;;  %v1021_v10 = vpop.f32.mrf.mxu1 }
 0x128   :  { %v1192_v13 = vmax.f32 %v820_v7, 0.0  ;;  %v1242_v14 = vmax.f32 %v1020_v8, 0.0 }
 0x129   :  { %v824_v15 = vpop.f32.mrf.mxu0  ;;  %v1024_v16 = vpop.f32.mrf.mxu1 }
 0x12a   :  { %v2127_v17 = vpack.c.bf16 %v1192_v13, %v1191_v11  ;;  %v2252_v18 = vpack.c.bf16 %v1242_v14, %v1241_v12  ;;  %v825_v21 = vadd.f32 %v3006_v53, %v824_v15  ;;  %v1025_v22 = vadd.f32 %v3006_v53, %v1024_v16 }
 0x12b   :  { %v826_v19 = vpop.f32.mrf.mxu0  ;;  %v1026_v20 = vpop.f32.mrf.mxu1 }
 0x12c   :  { %2357 = vst [vmem:[%s3261_s3 + $0x20] sm:$0xff] %v2127_v17   ;;  %2382 = vst [vmem:[%s3261_s3 + $0xe8] sm:$0xff] %v2252_v18   ;;  %v1193_v29 = vmax.f32 %v825_v21, 0.0  ;;  %v1243_v30 = vmax.f32 %v1025_v22, 0.0 }
 0x12d   :  { %v827_v23 = vpop.f32.mrf.mxu0  ;;  %v1027_v24 = vpop.f32.mrf.mxu1 }
 0x12e   :  { %v828_v25 = vadd.f32 %v3006_v53, %v827_v23  ;;  %v1028_v26 = vadd.f32 %v3006_v53, %v1027_v24 }
 0x12f   :  { %v829_v27 = vpop.f32.mrf.mxu0  ;;  %v1029_v28 = vpop.f32.mrf.mxu1 }
 0x130   :  { %v1194_v31 = vmax.f32 %v828_v25, 0.0  ;;  %v1244_v32 = vmax.f32 %v1028_v26, 0.0 }
 0x131   :  { %v832_v33 = vpop.f32.mrf.mxu0  ;;  %v1032_v34 = vpop.f32.mrf.mxu1 }
 0x132   :  { %v2132_v35 = vpack.c.bf16 %v1194_v31, %v1193_v29  ;;  %v2257_v36 = vpack.c.bf16 %v1244_v32, %v1243_v30  ;;  %v833_v39 = vadd.f32 %v3006_v53, %v832_v33  ;;  %v1033_v40 = vadd.f32 %v3006_v53, %v1032_v34 }
 0x133   :  { %v834_v37 = vpop.f32.mrf.mxu0  ;;  %v1034_v38 = vpop.f32.mrf.mxu1 }
 0x134   :  { %2358 = vst [vmem:[%s3261_s3 + $0x28] sm:$0xff] %v2132_v35   ;;  %2383 = vst [vmem:[%s3261_s3 + $0xf0] sm:$0xff] %v2257_v36   ;;  %v1195_v47 = vmax.f32 %v833_v39, 0.0  ;;  %v1245_v48 = vmax.f32 %v1033_v40, 0.0 }
 0x135   :  { %v835_v41 = vpop.f32.mrf.mxu0  ;;  %v1035_v42 = vpop.f32.mrf.mxu1 }
 0x136   :  { %v836_v43 = vadd.f32 %v3006_v53, %v835_v41  ;;  %v1036_v44 = vadd.f32 %v3006_v53, %v1035_v42 }
 0x137   :  { %v837_v45 = vpop.f32.mrf.mxu0  ;;  %v1037_v46 = vpop.f32.mrf.mxu1 }
 0x138   :  { %v1196_v49 = vmax.f32 %v836_v43, 0.0  ;;  %v1246_v50 = vmax.f32 %v1036_v44, 0.0 }
 0x139   :  { %v840_v51 = vpop.f32.mrf.mxu0  ;;  %v1040_v52 = vpop.f32.mrf.mxu1 }
 0x13a   :  { %v2137_v54 = vpack.c.bf16 %v1196_v49, %v1195_v47  ;;  %v2262_v55 = vpack.c.bf16 %v1246_v50, %v1245_v48  ;;  %v841_v58 = vadd.f32 %v3006_v53, %v840_v51  ;;  %v1041_v59 = vadd.f32 %v3006_v53, %v1040_v52 }
 0x13b   :  { %v842_v56 = vpop.f32.mrf.mxu0  ;;  %v1042_v57 = vpop.f32.mrf.mxu1 }
 0x13c   :  { %2359 = vst [vmem:[%s3261_s3 + $0x30] sm:$0xff] %v2137_v54   ;;  %2384 = vst [vmem:[%s3261_s3 + $0xf8] sm:$0xff] %v2262_v55   ;;  %v1197_v2 = vmax.f32 %v841_v58, 0.0  ;;  %v1247_v3 = vmax.f32 %v1041_v59, 0.0 }
 0x13d   :  { %v843_v60 = vpop.f32.mrf.mxu0  ;;  %v1043_v61 = vpop.f32.mrf.mxu1 }
 0x13e   :  { %v844_v62 = vadd.f32 %v3006_v53, %v843_v60  ;;  %v1044_v63 = vadd.f32 %v3006_v53, %v1043_v61 }
 0x13f   :  { %v845_v0 = vpop.f32.mrf.mxu0  ;;  %v1045_v1 = vpop.f32.mrf.mxu1 }
 0x140   :  { %v1198_v4 = vmax.f32 %v844_v62, 0.0  ;;  %v1248_v5 = vmax.f32 %v1044_v63, 0.0 }
 0x141   :  { %v848_v6 = vpop.f32.mrf.mxu0  ;;  %v1048_v7 = vpop.f32.mrf.mxu1 }
 0x142   :  { %v2142_v8 = vpack.c.bf16 %v1198_v4, %v1197_v2  ;;  %v2267_v9 = vpack.c.bf16 %v1248_v5, %v1247_v3  ;;  %v849_v12 = vadd.f32 %v3006_v53, %v848_v6  ;;  %v1049_v13 = vadd.f32 %v3006_v53, %v1048_v7 }
 0x143   :  { %v850_v10 = vpop.f32.mrf.mxu0  ;;  %v1050_v11 = vpop.f32.mrf.mxu1 }
 0x144   :  { %2360 = vst [vmem:[%s3261_s3 + $0x38] sm:$0xff] %v2142_v8   ;;  %2385 = vst [vmem:[%s3261_s3 + $0x100] sm:$0xff] %v2267_v9   ;;  %v1199_v20 = vmax.f32 %v849_v12, 0.0  ;;  %v1249_v21 = vmax.f32 %v1049_v13, 0.0 }
 0x145   :  { %v851_v14 = vpop.f32.mrf.mxu0  ;;  %v1051_v15 = vpop.f32.mrf.mxu1 }
 0x146   :  { %v852_v16 = vadd.f32 %v3006_v53, %v851_v14  ;;  %v1052_v17 = vadd.f32 %v3006_v53, %v1051_v15 }
 0x147   :  { %v853_v18 = vpop.f32.mrf.mxu0  ;;  %v1053_v19 = vpop.f32.mrf.mxu1 }
 0x148   :  { %v1200_v22 = vmax.f32 %v852_v16, 0.0  ;;  %v1250_v23 = vmax.f32 %v1052_v17, 0.0 }
 0x149   :  { %v856_v24 = vpop.f32.mrf.mxu0  ;;  %v1056_v25 = vpop.f32.mrf.mxu1 }
 0x14a   :  { %v2147_v26 = vpack.c.bf16 %v1200_v22, %v1199_v20  ;;  %v2272_v27 = vpack.c.bf16 %v1250_v23, %v1249_v21  ;;  %v857_v30 = vadd.f32 %v3006_v53, %v856_v24  ;;  %v1057_v31 = vadd.f32 %v3006_v53, %v1056_v25 }
 0x14b   :  { %v858_v28 = vpop.f32.mrf.mxu0  ;;  %v1058_v29 = vpop.f32.mrf.mxu1 }
 0x14c   :  { %2361 = vst [vmem:[%s3261_s3 + $0x40] sm:$0xff] %v2147_v26   ;;  %2386 = vst [vmem:[%s3261_s3 + $0x108] sm:$0xff] %v2272_v27   ;;  %v1201_v38 = vmax.f32 %v857_v30, 0.0  ;;  %v1251_v39 = vmax.f32 %v1057_v31, 0.0 }
 0x14d   :  { %v859_v32 = vpop.f32.mrf.mxu0  ;;  %v1059_v33 = vpop.f32.mrf.mxu1 }
 0x14e   :  { %v860_v34 = vadd.f32 %v3006_v53, %v859_v32  ;;  %v1060_v35 = vadd.f32 %v3006_v53, %v1059_v33 }
 0x14f   :  { %v861_v36 = vpop.f32.mrf.mxu0  ;;  %v1061_v37 = vpop.f32.mrf.mxu1 }
 0x150   :  { %v1202_v40 = vmax.f32 %v860_v34, 0.0  ;;  %v1252_v41 = vmax.f32 %v1060_v35, 0.0 }
 0x151   :  { %v864_v42 = vpop.f32.mrf.mxu0  ;;  %v1064_v43 = vpop.f32.mrf.mxu1 }
 0x152   :  { %v2152_v44 = vpack.c.bf16 %v1202_v40, %v1201_v38  ;;  %v2277_v45 = vpack.c.bf16 %v1252_v41, %v1251_v39  ;;  %v865_v48 = vadd.f32 %v3006_v53, %v864_v42  ;;  %v1065_v49 = vadd.f32 %v3006_v53, %v1064_v43 }
 0x153   :  { %v866_v46 = vpop.f32.mrf.mxu0  ;;  %v1066_v47 = vpop.f32.mrf.mxu1 }
 0x154   :  { %2362 = vst [vmem:[%s3261_s3 + $0x48] sm:$0xff] %v2152_v44   ;;  %2387 = vst [vmem:[%s3261_s3 + $0x110] sm:$0xff] %v2277_v45   ;;  %v1203_v57 = vmax.f32 %v865_v48, 0.0  ;;  %v1253_v58 = vmax.f32 %v1065_v49, 0.0 }
 0x155   :  { %v867_v50 = vpop.f32.mrf.mxu0  ;;  %v1067_v51 = vpop.f32.mrf.mxu1 }
 0x156   :  { %v868_v52 = vadd.f32 %v3006_v53, %v867_v50  ;;  %v1068_v54 = vadd.f32 %v3006_v53, %v1067_v51 }
 0x157   :  { %v869_v55 = vpop.f32.mrf.mxu0  ;;  %v1069_v56 = vpop.f32.mrf.mxu1 }
 0x158   :  { %v1204_v59 = vmax.f32 %v868_v52, 0.0  ;;  %v1254_v60 = vmax.f32 %v1068_v54, 0.0 }
 0x159   :  { %v872_v61 = vpop.f32.mrf.mxu0  ;;  %v1072_v62 = vpop.f32.mrf.mxu1 }
 0x15a   :  { %v2157_v63 = vpack.c.bf16 %v1204_v59, %v1203_v57  ;;  %v2282_v0 = vpack.c.bf16 %v1254_v60, %v1253_v58  ;;  %v873_v3 = vadd.f32 %v3006_v53, %v872_v61  ;;  %v1073_v4 = vadd.f32 %v3006_v53, %v1072_v62 }
 0x15b   :  { %v874_v1 = vpop.f32.mrf.mxu0  ;;  %v1074_v2 = vpop.f32.mrf.mxu1 }
 0x15c   :  { %2363 = vst [vmem:[%s3261_s3 + $0x50] sm:$0xff] %v2157_v63   ;;  %2388 = vst [vmem:[%s3261_s3 + $0x118] sm:$0xff] %v2282_v0   ;;  %v1205_v11 = vmax.f32 %v873_v3, 0.0  ;;  %v1255_v12 = vmax.f32 %v1073_v4, 0.0 }
 0x15d   :  { %v875_v5 = vpop.f32.mrf.mxu0  ;;  %v1075_v6 = vpop.f32.mrf.mxu1 }
 0x15e   :  { %v876_v7 = vadd.f32 %v3006_v53, %v875_v5  ;;  %v1076_v8 = vadd.f32 %v3006_v53, %v1075_v6 }
 0x15f   :  { %v877_v9 = vpop.f32.mrf.mxu0  ;;  %v1077_v10 = vpop.f32.mrf.mxu1 }
 0x160   :  { %v1206_v13 = vmax.f32 %v876_v7, 0.0  ;;  %v1256_v14 = vmax.f32 %v1076_v8, 0.0 }
 0x161   :  { %v880_v15 = vpop.f32.mrf.mxu0  ;;  %v1080_v16 = vpop.f32.mrf.mxu1 }
 0x162   :  { %v2162_v17 = vpack.c.bf16 %v1206_v13, %v1205_v11  ;;  %v2287_v18 = vpack.c.bf16 %v1256_v14, %v1255_v12  ;;  %v881_v21 = vadd.f32 %v3006_v53, %v880_v15  ;;  %v1081_v22 = vadd.f32 %v3006_v53, %v1080_v16 }
 0x163   :  { %v882_v19 = vpop.f32.mrf.mxu0  ;;  %v1082_v20 = vpop.f32.mrf.mxu1 }
 0x164   :  { %2364 = vst [vmem:[%s3261_s3 + $0x58] sm:$0xff] %v2162_v17   ;;  %2389 = vst [vmem:[%s3261_s3 + $0x120] sm:$0xff] %v2287_v18   ;;  %v1207_v29 = vmax.f32 %v881_v21, 0.0  ;;  %v1257_v30 = vmax.f32 %v1081_v22, 0.0 }
 0x165   :  { %v883_v23 = vpop.f32.mrf.mxu0  ;;  %v1083_v24 = vpop.f32.mrf.mxu1 }
 0x166   :  { %v884_v25 = vadd.f32 %v3006_v53, %v883_v23  ;;  %v1084_v26 = vadd.f32 %v3006_v53, %v1083_v24 }
 0x167   :  { %v885_v27 = vpop.f32.mrf.mxu0  ;;  %v1085_v28 = vpop.f32.mrf.mxu1 }
 0x168   :  { %v1208_v31 = vmax.f32 %v884_v25, 0.0  ;;  %v1258_v32 = vmax.f32 %v1084_v26, 0.0 }
 0x169   :  { %v888_v33 = vpop.f32.mrf.mxu0  ;;  %v1088_v34 = vpop.f32.mrf.mxu1 }
 0x16a   :  { %v2167_v35 = vpack.c.bf16 %v1208_v31, %v1207_v29  ;;  %v2292_v36 = vpack.c.bf16 %v1258_v32, %v1257_v30  ;;  %v889_v39 = vadd.f32 %v3006_v53, %v888_v33  ;;  %v1089_v40 = vadd.f32 %v3006_v53, %v1088_v34 }
 0x16b   :  { %v890_v37 = vpop.f32.mrf.mxu0  ;;  %v1090_v38 = vpop.f32.mrf.mxu1 }
 0x16c   :  { %2365 = vst [vmem:[%s3261_s3 + $0x60] sm:$0xff] %v2167_v35   ;;  %2390 = vst [vmem:[%s3261_s3 + $0x128] sm:$0xff] %v2292_v36   ;;  %v1209_v47 = vmax.f32 %v889_v39, 0.0  ;;  %v1259_v48 = vmax.f32 %v1089_v40, 0.0 }
 0x16d   :  { %v891_v41 = vpop.f32.mrf.mxu0  ;;  %v1091_v42 = vpop.f32.mrf.mxu1 }
 0x16e   :  { %v892_v43 = vadd.f32 %v3006_v53, %v891_v41  ;;  %v1092_v44 = vadd.f32 %v3006_v53, %v1091_v42 }
 0x16f   :  { %v893_v45 = vpop.f32.mrf.mxu0  ;;  %v1093_v46 = vpop.f32.mrf.mxu1 }
 0x170   :  { %v1210_v49 = vmax.f32 %v892_v43, 0.0  ;;  %v1260_v50 = vmax.f32 %v1092_v44, 0.0 }
 0x171   :  { %v896_v51 = vpop.f32.mrf.mxu0  ;;  %v1096_v52 = vpop.f32.mrf.mxu1 }
 0x172   :  { %v2172_v54 = vpack.c.bf16 %v1210_v49, %v1209_v47  ;;  %v2297_v55 = vpack.c.bf16 %v1260_v50, %v1259_v48  ;;  %v897_v58 = vadd.f32 %v3006_v53, %v896_v51  ;;  %v1097_v59 = vadd.f32 %v3006_v53, %v1096_v52 }
 0x173   :  { %v898_v56 = vpop.f32.mrf.mxu0  ;;  %v1098_v57 = vpop.f32.mrf.mxu1 }
 0x174   :  { %2366 = vst [vmem:[%s3261_s3 + $0x68] sm:$0xff] %v2172_v54   ;;  %2391 = vst [vmem:[%s3261_s3 + $0x130] sm:$0xff] %v2297_v55   ;;  %v1211_v2 = vmax.f32 %v897_v58, 0.0  ;;  %v1261_v3 = vmax.f32 %v1097_v59, 0.0 }
 0x175   :  { %v899_v60 = vpop.f32.mrf.mxu0  ;;  %v1099_v61 = vpop.f32.mrf.mxu1 }
 0x176   :  { %v900_v62 = vadd.f32 %v3006_v53, %v899_v60  ;;  %v1100_v63 = vadd.f32 %v3006_v53, %v1099_v61 }
 0x177   :  { %v901_v0 = vpop.f32.mrf.mxu0  ;;  %v1101_v1 = vpop.f32.mrf.mxu1 }
 0x178   :  { %v1212_v4 = vmax.f32 %v900_v62, 0.0  ;;  %v1262_v5 = vmax.f32 %v1100_v63, 0.0 }
 0x179   :  { %v904_v6 = vpop.f32.mrf.mxu0  ;;  %v1104_v7 = vpop.f32.mrf.mxu1 }
 0x17a   :  { %v2177_v8 = vpack.c.bf16 %v1212_v4, %v1211_v2  ;;  %v2302_v9 = vpack.c.bf16 %v1262_v5, %v1261_v3  ;;  %v905_v12 = vadd.f32 %v3006_v53, %v904_v6  ;;  %v1105_v13 = vadd.f32 %v3006_v53, %v1104_v7 }
 0x17b   :  { %v906_v10 = vpop.f32.mrf.mxu0  ;;  %v1106_v11 = vpop.f32.mrf.mxu1 }
 0x17c   :  { %2367 = vst [vmem:[%s3261_s3 + $0x70] sm:$0xff] %v2177_v8   ;;  %2392 = vst [vmem:[%s3261_s3 + $0x138] sm:$0xff] %v2302_v9   ;;  %v1213_v20 = vmax.f32 %v905_v12, 0.0  ;;  %v1263_v21 = vmax.f32 %v1105_v13, 0.0 }
 0x17d   :  { %v907_v14 = vpop.f32.mrf.mxu0  ;;  %v1107_v15 = vpop.f32.mrf.mxu1 }
 0x17e   :  { %v908_v16 = vadd.f32 %v3006_v53, %v907_v14  ;;  %v1108_v17 = vadd.f32 %v3006_v53, %v1107_v15 }
 0x17f   :  { %v909_v18 = vpop.f32.mrf.mxu0  ;;  %v1109_v19 = vpop.f32.mrf.mxu1 }
 0x180   :  { %v1214_v22 = vmax.f32 %v908_v16, 0.0  ;;  %v1264_v23 = vmax.f32 %v1108_v17, 0.0 }
 0x181   :  { %v912_v24 = vpop.f32.mrf.mxu0  ;;  %v1112_v25 = vpop.f32.mrf.mxu1 }
 0x182   :  { %v2182_v26 = vpack.c.bf16 %v1214_v22, %v1213_v20  ;;  %v2307_v27 = vpack.c.bf16 %v1264_v23, %v1263_v21  ;;  %v913_v30 = vadd.f32 %v3006_v53, %v912_v24  ;;  %v1113_v31 = vadd.f32 %v3006_v53, %v1112_v25 }
 0x183   :  { %v914_v28 = vpop.f32.mrf.mxu0  ;;  %v1114_v29 = vpop.f32.mrf.mxu1 }
 0x184   :  { %2368 = vst [vmem:[%s3261_s3 + $0x78] sm:$0xff] %v2182_v26   ;;  %2393 = vst [vmem:[%s3261_s3 + $0x140] sm:$0xff] %v2307_v27   ;;  %v1215_v38 = vmax.f32 %v913_v30, 0.0  ;;  %v1265_v39 = vmax.f32 %v1113_v31, 0.0 }
 0x185   :  { %v915_v32 = vpop.f32.mrf.mxu0  ;;  %v1115_v33 = vpop.f32.mrf.mxu1 }
 0x186   :  { %v916_v34 = vadd.f32 %v3006_v53, %v915_v32  ;;  %v1116_v35 = vadd.f32 %v3006_v53, %v1115_v33 }
 0x187   :  { %v917_v36 = vpop.f32.mrf.mxu0  ;;  %v1117_v37 = vpop.f32.mrf.mxu1 }
 0x188   :  { %v1216_v40 = vmax.f32 %v916_v34, 0.0  ;;  %v1266_v41 = vmax.f32 %v1116_v35, 0.0 }
 0x189   :  { %v920_v42 = vpop.f32.mrf.mxu0  ;;  %v1120_v43 = vpop.f32.mrf.mxu1 }
 0x18a   :  { %v2187_v44 = vpack.c.bf16 %v1216_v40, %v1215_v38  ;;  %v2312_v45 = vpack.c.bf16 %v1266_v41, %v1265_v39  ;;  %v921_v48 = vadd.f32 %v3006_v53, %v920_v42  ;;  %v1121_v49 = vadd.f32 %v3006_v53, %v1120_v43 }
 0x18b   :  { %v922_v46 = vpop.f32.mrf.mxu0  ;;  %v1122_v47 = vpop.f32.mrf.mxu1 }
 0x18c   :  { %2369 = vst [vmem:[%s3261_s3 + $0x80] sm:$0xff] %v2187_v44   ;;  %2394 = vst [vmem:[%s3261_s3 + $0x148] sm:$0xff] %v2312_v45   ;;  %v1217_v57 = vmax.f32 %v921_v48, 0.0  ;;  %v1267_v58 = vmax.f32 %v1121_v49, 0.0 }
 0x18d   :  { %v923_v50 = vpop.f32.mrf.mxu0  ;;  %v1123_v51 = vpop.f32.mrf.mxu1 }
 0x18e   :  { %v924_v52 = vadd.f32 %v3006_v53, %v923_v50  ;;  %v1124_v54 = vadd.f32 %v3006_v53, %v1123_v51 }
 0x18f   :  { %v925_v55 = vpop.f32.mrf.mxu0  ;;  %v1125_v56 = vpop.f32.mrf.mxu1 }
 0x190   :  { %v1218_v59 = vmax.f32 %v924_v52, 0.0  ;;  %v1268_v60 = vmax.f32 %v1124_v54, 0.0 }
 0x191   :  { %v928_v61 = vpop.f32.mrf.mxu0  ;;  %v1128_v62 = vpop.f32.mrf.mxu1 }
 0x192   :  { %v2192_v63 = vpack.c.bf16 %v1218_v59, %v1217_v57  ;;  %v2317_v0 = vpack.c.bf16 %v1268_v60, %v1267_v58  ;;  %v929_v3 = vadd.f32 %v3006_v53, %v928_v61  ;;  %v1129_v4 = vadd.f32 %v3006_v53, %v1128_v62 }
 0x193   :  { %v930_v1 = vpop.f32.mrf.mxu0  ;;  %v1130_v2 = vpop.f32.mrf.mxu1 }
 0x194   :  { %2370 = vst [vmem:[%s3261_s3 + $0x88] sm:$0xff] %v2192_v63   ;;  %2395 = vst [vmem:[%s3261_s3 + $0x150] sm:$0xff] %v2317_v0   ;;  %v1219_v11 = vmax.f32 %v929_v3, 0.0  ;;  %v1269_v12 = vmax.f32 %v1129_v4, 0.0 }
 0x195   :  { %v931_v5 = vpop.f32.mrf.mxu0  ;;  %v1131_v6 = vpop.f32.mrf.mxu1 }
 0x196   :  { %v932_v7 = vadd.f32 %v3006_v53, %v931_v5  ;;  %v1132_v8 = vadd.f32 %v3006_v53, %v1131_v6 }
 0x197   :  { %v933_v9 = vpop.f32.mrf.mxu0  ;;  %v1133_v10 = vpop.f32.mrf.mxu1 }
 0x198   :  { %v1220_v13 = vmax.f32 %v932_v7, 0.0  ;;  %v1270_v14 = vmax.f32 %v1132_v8, 0.0 }
 0x199   :  { %v936_v15 = vpop.f32.mrf.mxu0  ;;  %v1136_v16 = vpop.f32.mrf.mxu1 }
 0x19a   :  { %v2197_v17 = vpack.c.bf16 %v1220_v13, %v1219_v11  ;;  %v2322_v18 = vpack.c.bf16 %v1270_v14, %v1269_v12  ;;  %v937_v21 = vadd.f32 %v3006_v53, %v936_v15  ;;  %v1137_v22 = vadd.f32 %v3006_v53, %v1136_v16 }
 0x19b   :  { %v938_v19 = vpop.f32.mrf.mxu0  ;;  %v1138_v20 = vpop.f32.mrf.mxu1 }
 0x19c   :  { %2371 = vst [vmem:[%s3261_s3 + $0x90] sm:$0xff] %v2197_v17   ;;  %2396 = vst [vmem:[%s3261_s3 + $0x158] sm:$0xff] %v2322_v18   ;;  %v1221_v29 = vmax.f32 %v937_v21, 0.0  ;;  %v1271_v30 = vmax.f32 %v1137_v22, 0.0 }
 0x19d   :  { %v939_v23 = vpop.f32.mrf.mxu0  ;;  %v1139_v24 = vpop.f32.mrf.mxu1 }
 0x19e   :  { %v940_v25 = vadd.f32 %v3006_v53, %v939_v23  ;;  %v1140_v26 = vadd.f32 %v3006_v53, %v1139_v24 }
 0x19f   :  { %v941_v27 = vpop.f32.mrf.mxu0  ;;  %v1141_v28 = vpop.f32.mrf.mxu1 }
 0x1a0   :  { %v1222_v31 = vmax.f32 %v940_v25, 0.0  ;;  %v1272_v32 = vmax.f32 %v1140_v26, 0.0 }
 0x1a1   :  { %v944_v33 = vpop.f32.mrf.mxu0  ;;  %v1144_v34 = vpop.f32.mrf.mxu1 }
 0x1a2   :  { %v2202_v35 = vpack.c.bf16 %v1222_v31, %v1221_v29  ;;  %v2327_v36 = vpack.c.bf16 %v1272_v32, %v1271_v30  ;;  %v945_v39 = vadd.f32 %v3006_v53, %v944_v33  ;;  %v1145_v40 = vadd.f32 %v3006_v53, %v1144_v34 }
 0x1a3   :  { %v946_v37 = vpop.f32.mrf.mxu0  ;;  %v1146_v38 = vpop.f32.mrf.mxu1 }
 0x1a4   :  { %2372 = vst [vmem:[%s3261_s3 + $0x98] sm:$0xff] %v2202_v35   ;;  %2397 = vst [vmem:[%s3261_s3 + $0x160] sm:$0xff] %v2327_v36   ;;  %v1223_v47 = vmax.f32 %v945_v39, 0.0  ;;  %v1273_v48 = vmax.f32 %v1145_v40, 0.0 }
 0x1a5   :  { %v947_v41 = vpop.f32.mrf.mxu0  ;;  %v1147_v42 = vpop.f32.mrf.mxu1 }
 0x1a6   :  { %v948_v43 = vadd.f32 %v3006_v53, %v947_v41  ;;  %v1148_v44 = vadd.f32 %v3006_v53, %v1147_v42 }
 0x1a7   :  { %v949_v45 = vpop.f32.mrf.mxu0  ;;  %v1149_v46 = vpop.f32.mrf.mxu1 }
 0x1a8   :  { %v1224_v49 = vmax.f32 %v948_v43, 0.0  ;;  %v1274_v50 = vmax.f32 %v1148_v44, 0.0 }
 0x1a9   :  { %v952_v51 = vpop.f32.mrf.mxu0  ;;  %v1152_v52 = vpop.f32.mrf.mxu1 }
 0x1aa   :  { %v2207_v54 = vpack.c.bf16 %v1224_v49, %v1223_v47  ;;  %v2332_v55 = vpack.c.bf16 %v1274_v50, %v1273_v48  ;;  %v953_v58 = vadd.f32 %v3006_v53, %v952_v51  ;;  %v1153_v59 = vadd.f32 %v3006_v53, %v1152_v52 }
 0x1ab   :  { %v954_v56 = vpop.f32.mrf.mxu0  ;;  %v1154_v57 = vpop.f32.mrf.mxu1 }
 0x1ac   :  { %2373 = vst [vmem:[%s3261_s3 + $0xa0] sm:$0xff] %v2207_v54   ;;  %2398 = vst [vmem:[%s3261_s3 + $0x168] sm:$0xff] %v2332_v55   ;;  %v1225_v2 = vmax.f32 %v953_v58, 0.0  ;;  %v1275_v3 = vmax.f32 %v1153_v59, 0.0 }
 0x1ad   :  { %v955_v60 = vpop.f32.mrf.mxu0  ;;  %v1155_v61 = vpop.f32.mrf.mxu1 }
 0x1ae   :  { %v956_v62 = vadd.f32 %v3006_v53, %v955_v60  ;;  %v1156_v63 = vadd.f32 %v3006_v53, %v1155_v61 }
 0x1af   :  { %v957_v0 = vpop.f32.mrf.mxu0  ;;  %v1157_v1 = vpop.f32.mrf.mxu1 }
 0x1b0   :  { %v1226_v4 = vmax.f32 %v956_v62, 0.0  ;;  %v1276_v5 = vmax.f32 %v1156_v63, 0.0 }
 0x1b1   :  { %v960_v6 = vpop.f32.mrf.mxu0  ;;  %v1160_v7 = vpop.f32.mrf.mxu1 }
 0x1b2   :  { %v2212_v8 = vpack.c.bf16 %v1226_v4, %v1225_v2  ;;  %v2337_v9 = vpack.c.bf16 %v1276_v5, %v1275_v3  ;;  %v961_v12 = vadd.f32 %v3006_v53, %v960_v6  ;;  %v1161_v13 = vadd.f32 %v3006_v53, %v1160_v7 }
 0x1b3   :  { %v962_v10 = vpop.f32.mrf.mxu0  ;;  %v1162_v11 = vpop.f32.mrf.mxu1 }
 0x1b4   :  { %2374 = vst [vmem:[%s3261_s3 + $0xa8] sm:$0xff] %v2212_v8   ;;  %2399 = vst [vmem:[%s3261_s3 + $0x170] sm:$0xff] %v2337_v9   ;;  %v1227_v20 = vmax.f32 %v961_v12, 0.0  ;;  %v1277_v21 = vmax.f32 %v1161_v13, 0.0 }
 0x1b5   :  { %v963_v14 = vpop.f32.mrf.mxu0  ;;  %v1163_v15 = vpop.f32.mrf.mxu1 }
 0x1b6   :  { %v964_v16 = vadd.f32 %v3006_v53, %v963_v14  ;;  %v1164_v17 = vadd.f32 %v3006_v53, %v1163_v15 }
 0x1b7   :  { %v965_v18 = vpop.f32.mrf.mxu0  ;;  %v1165_v19 = vpop.f32.mrf.mxu1 }
 0x1b8   :  { %v1228_v22 = vmax.f32 %v964_v16, 0.0  ;;  %v1278_v23 = vmax.f32 %v1164_v17, 0.0 }
 0x1b9   :  { %v968_v24 = vpop.f32.mrf.mxu0  ;;  %v1168_v25 = vpop.f32.mrf.mxu1 }
 0x1ba   :  { %v2217_v26 = vpack.c.bf16 %v1228_v22, %v1227_v20  ;;  %v2342_v27 = vpack.c.bf16 %v1278_v23, %v1277_v21  ;;  %v969_v30 = vadd.f32 %v3006_v53, %v968_v24  ;;  %v1169_v31 = vadd.f32 %v3006_v53, %v1168_v25 }
 0x1bb   :  { %v970_v28 = vpop.f32.mrf.mxu0  ;;  %v1170_v29 = vpop.f32.mrf.mxu1 }
 0x1bc   :  { %2375 = vst [vmem:[%s3261_s3 + $0xb0] sm:$0xff] %v2217_v26   ;;  %2400 = vst [vmem:[%s3261_s3 + $0x178] sm:$0xff] %v2342_v27   ;;  %v1229_v38 = vmax.f32 %v969_v30, 0.0  ;;  %v1279_v39 = vmax.f32 %v1169_v31, 0.0 }
 0x1bd   :  { %v971_v32 = vpop.f32.mrf.mxu0  ;;  %v1171_v33 = vpop.f32.mrf.mxu1 }
 0x1be   :  { %v972_v34 = vadd.f32 %v3006_v53, %v971_v32  ;;  %v1172_v35 = vadd.f32 %v3006_v53, %v1171_v33 }
 0x1bf   :  { %v973_v36 = vpop.f32.mrf.mxu0  ;;  %v1173_v37 = vpop.f32.mrf.mxu1 }
 0x1c0   :  { %v1230_v40 = vmax.f32 %v972_v34, 0.0  ;;  %v1280_v41 = vmax.f32 %v1172_v35, 0.0 }
 0x1c1   :  { %v976_v42 = vpop.f32.mrf.mxu0  ;;  %v1176_v43 = vpop.f32.mrf.mxu1 }
 0x1c2   :  { %v2222_v44 = vpack.c.bf16 %v1230_v40, %v1229_v38  ;;  %v2347_v45 = vpack.c.bf16 %v1280_v41, %v1279_v39  ;;  %v977_v48 = vadd.f32 %v3006_v53, %v976_v42  ;;  %v1177_v49 = vadd.f32 %v3006_v53, %v1176_v43 }
 0x1c3   :  { %v978_v46 = vpop.f32.mrf.mxu0  ;;  %v1178_v47 = vpop.f32.mrf.mxu1 }
 0x1c4   :  { %2376 = vst [vmem:[%s3261_s3 + $0xb8] sm:$0xff] %v2222_v44   ;;  %2401 = vst [vmem:[%s3261_s3 + $0x180] sm:$0xff] %v2347_v45   ;;  %v1231_v57 = vmax.f32 %v977_v48, 0.0  ;;  %v1281_v58 = vmax.f32 %v1177_v49, 0.0 }
 0x1c5   :  { %v979_v50 = vpop.f32.mrf.mxu0  ;;  %v1179_v51 = vpop.f32.mrf.mxu1 }
 0x1c6   :  { %v980_v52 = vadd.f32 %v3006_v53, %v979_v50  ;;  %v1180_v54 = vadd.f32 %v3006_v53, %v1179_v51 }
 0x1c7   :  { %v981_v55 = vpop.f32.mrf.mxu0  ;;  %v1181_v56 = vpop.f32.mrf.mxu1 }
 0x1c8   :  { %v1232_v59 = vmax.f32 %v980_v52, 0.0  ;;  %v1282_v60 = vmax.f32 %v1180_v54, 0.0 }
 0x1ca   :  { %v2227_v61 = vpack.c.bf16 %v1232_v59, %v1231_v57  ;;  %v2352_v62 = vpack.c.bf16 %v1282_v60, %v1281_v58 }
 0x1cc   :  { %2377 = vst [vmem:[%s3261_s3 + $0xc0] sm:$0xff] %v2227_v61   ;;  %2402 = vst [vmem:[%s3261_s3 + $0x188] sm:$0xff] %v2352_v62  }

// kernel: dqn_forward.5
= control target key start
LH: loop header
LB: loop body
LE: loop exit
PB: predicated region body
PF: predicated region fallthrough
CT: control target
= control target key end

     0   :  { %s5277_s1 = inlined_call_operand.vmem [shape: bf16[2048,128], index: 1, kind: input, shape index: {}]   ;;  %s5278_s0 = inlined_call_operand.vmem [shape: bf16[160,2048], index: 0, kind: input, shape index: {}]   ;;  %s5279_s2 = inlined_call_operand.vmem [shape: f32[1,128], index: 2, kind: input, shape index: {}]   ;;  %s5280_s3 = inlined_call_operand.vmem [shape: bf16[160,128], index: 3, kind: output, shape index: {}]  }
   0x1   :  { %v4030_v0 = vld [vmem:[%s5277_s1 + $0x78] sm:$0xff]   ;;  %v4034_v4 = vld [vmem:[%s5277_s1 + $0x70] sm:$0xff]   ;;  %v4038_v8 = vld [vmem:[%s5277_s1 + $0x68] sm:$0xff]  }
   0x2   :  { %v4031_v1 = vld [vmem:[%s5277_s1 + $0xf8] sm:$0xff]   ;;  %3422 = vmatprep.subr.bf16.mxu0 %v4030_v0  ;;  %v4035_v5 = vld [vmem:[%s5277_s1 + $0xf0] sm:$0xff]   ;;  %v4039_v9 = vld [vmem:[%s5277_s1 + $0xe8] sm:$0xff]  }
   0x3   :  { %v4032_v2 = vld [vmem:[%s5277_s1 + $0x38] sm:$0xff]   ;;  %3498 = vmatprep.subr.bf16.mxu1 %v4031_v1  ;;  %v4036_v6 = vld [vmem:[%s5277_s1 + $0x30] sm:$0xff]   ;;  %v4040_v10 = vld [vmem:[%s5277_s1 + $0x28] sm:$0xff]  }
   0x4   :  { %v4033_v3 = vld [vmem:[%s5277_s1 + $0xb8] sm:$0xff]   ;;  %3423 = vmatpush3.bf16.msra.mxu0 %v4032_v2  ;;  %v4037_v7 = vld [vmem:[%s5277_s1 + $0xb0] sm:$0xff]   ;;  %v4041_v11 = vld [vmem:[%s5277_s1 + $0xa8] sm:$0xff]  }
   0x5   :  { %3499 = vmatpush3.bf16.msra.mxu1 %v4033_v3  ;;  %3424 = vmatprep.subr.bf16.mxu0 %v4034_v4  ;;  %v4042_v12 = vld [vmem:[%s5277_s1 + $0x60] sm:$0xff]   ;;  %v4046_v16 = vld [vmem:[%s5277_s1 + $0x58] sm:$0xff]   ;;  %v4050_v20 = vld [vmem:[%s5277_s1 + $0x50] sm:$0xff]  }
   0x6   :  { %3500 = vmatprep.subr.bf16.mxu1 %v4035_v5  ;;  %v4043_v13 = vld [vmem:[%s5277_s1 + $0xe0] sm:$0xff]   ;;  %v4047_v17 = vld [vmem:[%s5277_s1 + $0xd8] sm:$0xff]   ;;  %v4051_v21 = vld [vmem:[%s5277_s1 + $0xd0] sm:$0xff]  }
   0x7   :  { %v4044_v14 = vld [vmem:[%s5277_s1 + $0x20] sm:$0xff]   ;;  %v4048_v18 = vld [vmem:[%s5277_s1 + $0x18] sm:$0xff]   ;;  %v4052_v22 = vld [vmem:[%s5277_s1 + $0x10] sm:$0xff]  }
   0x8   :  { %3425 = vmatpush3.bf16.msra.mxu0 %v4036_v6  ;;  %v4045_v15 = vld [vmem:[%s5277_s1 + $0xa0] sm:$0xff]   ;;  %v4049_v19 = vld [vmem:[%s5277_s1 + $0x98] sm:$0xff]   ;;  %v4053_v23 = vld [vmem:[%s5277_s1 + $0x90] sm:$0xff]  }
   0x9   :  { %3501 = vmatpush3.bf16.msra.mxu1 %v4037_v7  ;;  %3426 = vmatprep.subr.bf16.mxu0 %v4038_v8  ;;  %v4054_v24 = vld [vmem:[%s5277_s1 + $0x48] sm:$0xff]   ;;  %v4058_v28 = vld [vmem:[%s5277_s1 + $0x40] sm:$0xff]   ;;  %v4062_v40 = vld [vmem:[%s5277_s1 + $0x178] sm:$0xff]  }
   0xa   :  { %3502 = vmatprep.subr.bf16.mxu1 %v4039_v9  ;;  %v4055_v25 = vld [vmem:[%s5277_s1 + $0xc8] sm:$0xff]   ;;  %v4059_v29 = vld [vmem:[%s5277_s1 + $0xc0] sm:$0xff]   ;;  %v4063_v41 = vld [vmem:[%s5277_s1 + $0x138] sm:$0xff]  }
   0xb   :  { %v4056_v26 = vld [vmem:[%s5277_s1 + $0x8] sm:$0xff]   ;;  %v4060_v30 = vld [vmem:[%s5277_s1] sm:$0xff]   ;;  %v4064_v42 = vld [vmem:[%s5277_s1 + $0x1f8] sm:$0xff]  }
   0xc   :  { %3427 = vmatpush3.bf16.msra.mxu0 %v4040_v10  ;;  %v4057_v27 = vld [vmem:[%s5277_s1 + $0x88] sm:$0xff]   ;;  %v4061_v31 = vld [vmem:[%s5277_s1 + $0x80] sm:$0xff]   ;;  %v4065_v43 = vld [vmem:[%s5277_s1 + $0x1b8] sm:$0xff]  }
   0xd   :  { %3503 = vmatpush3.bf16.msra.mxu1 %v4041_v11  ;;  %3428 = vmatprep.subr.bf16.mxu0 %v4042_v12  ;;  %v15_v32 = vld [vmem:[%s5278_s0] sm:$0xff]  ;;  %v16_v34 = vld [vmem:[%s5278_s0 + $0x8] sm:$0xff]  ;;  %v4066_v50 = vld [vmem:[%s5277_s1 + $0x170] sm:$0xff]  }
   0xe   :  { %3504 = vmatprep.subr.bf16.mxu1 %v4043_v13  ;;  %v23_v33 = vld [vmem:[%s5278_s0 + $0x40] sm:$0xff]  ;;  %v24_v37 = vld [vmem:[%s5278_s0 + $0x48] sm:$0xff]  ;;  %v4067_v52 = vld [vmem:[%s5277_s1 + $0x130] sm:$0xff]  }
   0xf   :  { %v3035_v35 = vcombine.low %v15_v32, %v23_v33  ;;  %v3036_v36 = vcombine.high %v15_v32, %v23_v33  ;;  %v3037_v38 = vcombine.low %v16_v34, %v24_v37  ;;  %v3038_v39 = vcombine.high %v16_v34, %v24_v37  ;;  %v31_v44 = vld [vmem:[%s5278_s0 + $0x80] sm:$0xff]  ;;  %v32_v47 = vld [vmem:[%s5278_s0 + $0x88] sm:$0xff]  ;;  %v4068_v54 = vld [vmem:[%s5277_s1 + $0x1f0] sm:$0xff]  }
  0x10   :  { %3429 = vmatpush3.bf16.msra.mxu0 %v4044_v14  ;;  %v39_v45 = vld [vmem:[%s5278_s0 + $0xc0] sm:$0xff]  ;;  %v40_v48 = vld [vmem:[%s5278_s0 + $0xc8] sm:$0xff]  ;;  %v4069_v55 = vld [vmem:[%s5277_s1 + $0x1b0] sm:$0xff]  }
  0x11   :  { %3505 = vmatpush3.bf16.msra.mxu1 %v4045_v15  ;;  %3430 = vmatprep.subr.bf16.mxu0 %v4046_v16  ;;  %v3052_v46 = vcombine.high %v31_v44, %v39_v45  ;;  %v3054_v49 = vcombine.high %v32_v47, %v40_v48  ;;  %v3051_v51 = vcombine.low %v31_v44, %v39_v45  ;;  %v47_v56 = vld [vmem:[%s5278_s0 + $0x100] sm:$0xff]  ;;  %v48_v58 = vld [vmem:[%s5278_s0 + $0x108] sm:$0xff]  ;;  %v4084_v33 = vld [vmem:[%s5277_s1 + $0x1d0] sm:$0xff]  }
  0x12   :  { %3506 = vmatprep.subr.bf16.mxu1 %v4047_v17  ;;  %2038 = vmatprep.mubr.bf16.mxu0 %v3036_v36  ;;  %v3053_v53 = vcombine.low %v32_v47, %v40_v48  ;;  %v55_v57 = vld [vmem:[%s5278_s0 + $0x140] sm:$0xff]  ;;  %v56_v59 = vld [vmem:[%s5278_s0 + $0x148] sm:$0xff]  ;;  %v4085_v36 = vld [vmem:[%s5277_s1 + $0x190] sm:$0xff]  }
  0x13   :  { %2151 = vmatprep.mubr.bf16.mxu1 %v3038_v39  ;;  %v3068_v60 = vcombine.high %v47_v56, %v55_v57  ;;  %v3070_v61 = vcombine.high %v48_v58, %v56_v59  ;;  %v4070_v62 = vld [vmem:[%s5277_s1 + $0x168] sm:$0xff]   ;;  %v63_v1 = vld [vmem:[%s5278_s0 + $0x180] sm:$0xff]  ;;  %v3067_v4 = vcombine.low %v47_v56, %v55_v57  ;;  %v3069_v6 = vcombine.low %v48_v58, %v56_v59  ;;  %v4094_v58 = vld [vmem:[%s5277_s1 + $0x278] sm:$0xff]  }
  0x14   :  { %3431 = vmatpush3.bf16.msra.mxu0 %v4048_v18  ;;  %v4071_v63 = vld [vmem:[%s5277_s1 + $0x128] sm:$0xff]   ;;  %v71_v2 = vld [vmem:[%s5278_s0 + $0x1c0] sm:$0xff] }
  0x15   :  { %3507 = vmatpush3.bf16.msra.mxu1 %v4049_v19  ;;  %3432 = vmatprep.subr.bf16.mxu0 %v4050_v20  ;;  %v4072_v0 = vld [vmem:[%s5277_s1 + $0x1e8] sm:$0xff]   ;;  %v3084_v7 = vcombine.high %v63_v1, %v71_v2  ;;  %v4074_v10 = vld [vmem:[%s5277_s1 + $0x160] sm:$0xff]   ;;  %v3083_v18 = vcombine.low %v63_v1, %v71_v2  ;;  %v4078_v19 = vld [vmem:[%s5277_s1 + $0x158] sm:$0xff]  }
  0x16   :  { %3508 = vmatprep.subr.bf16.mxu1 %v4051_v21  ;;  %v64_v3 = vld [vmem:[%s5278_s0 + $0x188] sm:$0xff]  ;;  %v79_v11 = vld [vmem:[%s5278_s0 + $0x200] sm:$0xff] }
  0x17   :  { %v72_v5 = vld [vmem:[%s5278_s0 + $0x1c8] sm:$0xff]  ;;  %v4075_v12 = vld [vmem:[%s5277_s1 + $0x120] sm:$0xff]  }
  0x18   :  { %3433 = vmatpush3.bf16.msra.mxu0 %v4052_v22  ;;  %v4073_v8 = vld [vmem:[%s5277_s1 + $0x1a8] sm:$0xff]   ;;  %v3086_v9 = vcombine.high %v64_v3, %v72_v5  ;;  %v4076_v13 = vld [vmem:[%s5277_s1 + $0x1e0] sm:$0xff]   ;;  %v3085_v20 = vcombine.low %v64_v3, %v72_v5  ;;  %v4079_v22 = vld [vmem:[%s5277_s1 + $0x118] sm:$0xff]  }
  0x19   :  { %3509 = vmatpush3.bf16.msra.mxu1 %v4053_v23  ;;  %3434 = vmatprep.subr.bf16.mxu0 %v4054_v24  ;;  %v87_v14 = vld [vmem:[%s5278_s0 + $0x240] sm:$0xff]  ;;  %v80_v16 = vld [vmem:[%s5278_s0 + $0x208] sm:$0xff]  ;;  %v4080_v24 = vld [vmem:[%s5277_s1 + $0x1d8] sm:$0xff]  }
  0x1a   :  { %3510 = vmatprep.subr.bf16.mxu1 %v4055_v25  ;;  %v4077_v15 = vld [vmem:[%s5277_s1 + $0x1a0] sm:$0xff]   ;;  %v88_v17 = vld [vmem:[%s5278_s0 + $0x248] sm:$0xff]  ;;  %v3100_v21 = vcombine.high %v79_v11, %v87_v14  ;;  %v4081_v25 = vld [vmem:[%s5277_s1 + $0x198] sm:$0xff]   ;;  %v3099_v32 = vcombine.low %v79_v11, %v87_v14 }
  0x1b   :  { %v3102_v23 = vcombine.high %v80_v16, %v88_v17  ;;  %v3101_v34 = vcombine.low %v80_v16, %v88_v17  ;;  %v4087_v39 = vld [vmem:[%s5277_s1 + $0x108] sm:$0xff]   ;;  %v4090_v47 = vld [vmem:[%s5277_s1 + $0x140] sm:$0xff]   ;;  %v17_v16 = vld [vmem:[%s5278_s0 + $0x10] sm:$0xff] }
  0x1c   :  { %3435 = vmatpush3.bf16.msra.mxu0 %v4056_v26  ;;  %v95_v26 = vld [vmem:[%s5278_s0 + $0x280] sm:$0xff]  ;;  %v120_v44 = vld [vmem:[%s5278_s0 + $0x348] sm:$0xff]  ;;  %v25_v17 = vld [vmem:[%s5278_s0 + $0x50] sm:$0xff] }
  0x1d   :  { %3511 = vmatpush3.bf16.msra.mxu1 %v4057_v27  ;;  %3436 = vmatprep.subr.bf16.mxu0 %v4058_v28  ;;  %v103_v27 = vld [vmem:[%s5278_s0 + $0x2c0] sm:$0xff]  ;;  %v96_v28 = vld [vmem:[%s5278_s0 + $0x288] sm:$0xff] }
  0x1e   :  { %3512 = vmatprep.subr.bf16.mxu1 %v4059_v29  ;;  %v104_v29 = vld [vmem:[%s5278_s0 + $0x2c8] sm:$0xff]  ;;  %v151_v1 = vld [vmem:[%s5278_s0 + $0x440] sm:$0xff] }
  0x1f   :  { %v3118_v37 = vcombine.high %v96_v28, %v104_v29  ;;  %v4089_v45 = vld [vmem:[%s5277_s1 + $0x188] sm:$0xff]   ;;  %v3117_v48 = vcombine.low %v96_v28, %v104_v29  ;;  %v42_v28 = vld [vmem:[%s5278_s0 + $0xd8] sm:$0xff] }
  0x20   :  { %3437 = vmatpush3.bf16.msra.mxu0 %v4060_v30  ;;  %v4082_v30 = vld [vmem:[%s5277_s1 + $0x150] sm:$0xff]   ;;  %v128_v56 = vld [vmem:[%s5278_s0 + $0x388] sm:$0xff] }
  0x21   :  { %3513 = vmatpush3.bf16.msra.mxu1 %v4061_v31  ;;  %3574 = vmatprep.subr.bf16.mxu0 %v4062_v40  ;;  %v4083_v31 = vld [vmem:[%s5277_s1 + $0x110] sm:$0xff]   ;;  %v111_v40 = vld [vmem:[%s5278_s0 + $0x300] sm:$0xff]  ;;  %v136_v57 = vld [vmem:[%s5278_s0 + $0x3c8] sm:$0xff] }
  0x22   :  { %3650 = vmatprep.subr.bf16.mxu1 %v4064_v42  ;;  %v119_v42 = vld [vmem:[%s5278_s0 + $0x340] sm:$0xff]  ;;  %v144_v2 = vld [vmem:[%s5278_s0 + $0x408] sm:$0xff]  ;;  %v3149_v5 = vcombine.low %v128_v56, %v136_v57 }
  0x23   :  { %2039 = vmatmul.mubr.bf16.vlgmr.msra.gmra.mxu0 %v3035_v35  ;;  %v3116_v35 = vcombine.high %v95_v26, %v103_v27  ;;  %v3131_v59 = vcombine.low %v111_v40, %v119_v42  ;;  %v152_v3 = vld [vmem:[%s5278_s0 + $0x448] sm:$0xff] }
  0x24   :  { %2152 = vmatmul.mubr.bf16.vlgmr.msra.gmra.mxu1 %v3037_v38  ;;  %3575 = vmatpush3.bf16.msra.mxu0 %v4063_v41  ;;  %v4086_v38 = vld [vmem:[%s5277_s1 + $0x148] sm:$0xff]  }
  0x25   :  { %3651 = vmatpush3.bf16.msra.mxu1 %v4065_v43  ;;  %2046 = vmatprep.mubr.bf16.mxu0 %v3052_v46  ;;  %v4088_v41 = vld [vmem:[%s5277_s1 + $0x1c8] sm:$0xff]   ;;  %v3115_v46 = vcombine.low %v95_v26, %v103_v27  ;;  %v34_v26 = vld [vmem:[%s5278_s0 + $0x98] sm:$0xff]  ;;  %v3039_v27 = vcombine.low %v17_v16, %v25_v17 }
  0x26   :  { %2159 = vmatprep.mubr.bf16.mxu1 %v3054_v49  ;;  %3576 = vmatprep.subr.bf16.mxu0 %v4066_v50  ;;  %v112_v43 = vld [vmem:[%s5278_s0 + $0x308] sm:$0xff]  ;;  %v3132_v49 = vcombine.high %v111_v40, %v119_v42  ;;  %v50_v40 = vld [vmem:[%s5278_s0 + $0x118] sm:$0xff] }
  0x27   :  { %3652 = vmatprep.subr.bf16.mxu1 %v4068_v54  ;;  %v3134_v50 = vcombine.high %v112_v43, %v120_v44  ;;  %v135_v54 = vld [vmem:[%s5278_s0 + $0x3c0] sm:$0xff]  ;;  %v168_v11 = vld [vmem:[%s5278_s0 + $0x4c8] sm:$0xff]  ;;  %v58_v42 = vld [vmem:[%s5278_s0 + $0x158] sm:$0xff] }
  0x28   :  { %3577 = vmatpush3.bf16.msra.mxu0 %v4067_v52  ;;  %v4092_v52 = vld [vmem:[%s5277_s1 + $0x1c0] sm:$0xff]  }
  0x29   :  { %3653 = vmatpush3.bf16.msra.mxu1 %v4069_v55  ;;  %3578 = vmatprep.subr.bf16.mxu0 %v4070_v62  ;;  %v4093_v55 = vld [vmem:[%s5277_s1 + $0x180] sm:$0xff]   ;;  %v4096_v62 = vld [vmem:[%s5277_s1 + $0x2f8] sm:$0xff]  }
  0x2a   :  { %3654 = vmatprep.subr.bf16.mxu1 %v4072_v0  ;;  %v143_v0 = vld [vmem:[%s5278_s0 + $0x400] sm:$0xff] }
  0x2b   :  { %2047 = vmatmul.mubr.bf16.gmra.mxu0 %v3051_v51  ;;  %v4091_v51 = vld [vmem:[%s5277_s1 + $0x100] sm:$0xff]  }
  0x2c   :  { %2160 = vmatmul.mubr.bf16.gmra.mxu1 %v3053_v53  ;;  %2054 = vmatprep.mubr.bf16.mxu0 %v3068_v60  ;;  %v127_v53 = vld [vmem:[%s5278_s0 + $0x380] sm:$0xff]  ;;  %v3133_v60 = vcombine.low %v112_v43, %v120_v44  ;;  %v4104_v43 = vld [vmem:[%s5277_s1 + $0x2e8] sm:$0xff]  }
  0x2d   :  { %2167 = vmatprep.mubr.bf16.mxu1 %v3070_v61  ;;  %3579 = vmatpush3.bf16.msra.mxu0 %v4071_v63  ;;  %v3148_v61 = vcombine.high %v127_v53, %v135_v54  ;;  %v3150_v63 = vcombine.high %v128_v56, %v136_v57  ;;  %v4107_v56 = vld [vmem:[%s5277_s1 + $0x220] sm:$0xff]  }
  0x2e   :  { %3655 = vmatpush3.bf16.msra.mxu1 %v4073_v8  ;;  %3580 = vmatprep.subr.bf16.mxu0 %v4074_v10  ;;  %v159_v8 = vld [vmem:[%s5278_s0 + $0x480] sm:$0xff]  ;;  %v160_v10 = vld [vmem:[%s5278_s0 + $0x488] sm:$0xff] }
  0x2f   :  { %3656 = vmatprep.subr.bf16.mxu1 %v4076_v13  ;;  %v3165_v13 = vcombine.low %v144_v2, %v152_v3  ;;  %v4109_v57 = vld [vmem:[%s5277_s1 + $0x2a0] sm:$0xff]  }
  0x31   :  { %3581 = vmatpush3.bf16.msra.mxu0 %v4075_v12  ;;  %v3163_v12 = vcombine.low %v143_v0, %v151_v1 }
  0x32   :  { %3657 = vmatpush3.bf16.msra.mxu1 %v4077_v15  ;;  %3582 = vmatprep.subr.bf16.mxu0 %v4078_v19  ;;  %v3182_v15 = vcombine.high %v160_v10, %v168_v11  ;;  %v26_v19 = vld [vmem:[%s5278_s0 + $0x58] sm:$0xff] }
  0x33   :  { %2055 = vmatmul.mubr.bf16.gmra.mxu0 %v3067_v4  ;;  %3658 = vmatprep.subr.bf16.mxu1 %v4080_v24  ;;  %v3147_v4 = vcombine.low %v127_v53, %v135_v54  ;;  %v33_v24 = vld [vmem:[%s5278_s0 + $0x90] sm:$0xff]  ;;  %v4108_v53 = vld [vmem:[%s5277_s1 + $0x2e0] sm:$0xff]   ;;  %v66_v54 = vld [vmem:[%s5278_s0 + $0x198] sm:$0xff] }
  0x34   :  { %2168 = vmatmul.mubr.bf16.gmra.mxu1 %v3069_v6  ;;  %2062 = vmatprep.mubr.bf16.mxu0 %v3084_v7  ;;  %v3164_v6 = vcombine.high %v143_v0, %v151_v1  ;;  %v3166_v7 = vcombine.high %v144_v2, %v152_v3  ;;  %v4113_v1 = vld [vmem:[%s5277_s1 + $0x298] sm:$0xff]   ;;  %v4114_v2 = vld [vmem:[%s5277_s1 + $0x250] sm:$0xff]  }
  0x35   :  { %2175 = vmatprep.mubr.bf16.mxu1 %v3086_v9  ;;  %3583 = vmatpush3.bf16.msra.mxu0 %v4079_v22  ;;  %v167_v9 = vld [vmem:[%s5278_s0 + $0x4c0] sm:$0xff]  ;;  %v3040_v22 = vcombine.high %v17_v16, %v25_v17  ;;  %v81_v3 = vld [vmem:[%s5278_s0 + $0x210] sm:$0xff]  ;;  %v4119_v16 = vld [vmem:[%s5277_s1 + $0x208] sm:$0xff]  }
  0x36   :  { %3659 = vmatpush3.bf16.msra.mxu1 %v4081_v25  ;;  %3584 = vmatprep.subr.bf16.mxu0 %v4082_v30  ;;  %v3180_v14 = vcombine.high %v159_v8, %v167_v9  ;;  %v41_v25 = vld [vmem:[%s5278_s0 + $0xd0] sm:$0xff]  ;;  %v4095_v30 = vld [vmem:[%s5277_s1 + $0x238] sm:$0xff]   ;;  %v4121_v17 = vld [vmem:[%s5277_s1 + $0x288] sm:$0xff]  }
  0x37   :  { %3660 = vmatprep.subr.bf16.mxu1 %v4084_v33  ;;  %v3058_v33 = vcombine.high %v34_v26, %v42_v28  ;;  %v3055_v44 = vcombine.low %v33_v24, %v41_v25 }
  0x39   :  { %3585 = vmatpush3.bf16.msra.mxu0 %v4083_v31  ;;  %v4097_v31 = vld [vmem:[%s5277_s1 + $0x2b8] sm:$0xff]  }
  0x3a   :  { %3661 = vmatpush3.bf16.msra.mxu1 %v4085_v36  ;;  %3586 = vmatprep.subr.bf16.mxu0 %v4086_v38  ;;  %v4100_v36 = vld [vmem:[%s5277_s1 + $0x2f0] sm:$0xff]  }
  0x3b   :  { %2063 = vmatmul.mubr.bf16.gmra.mxu0 %v3083_v18  ;;  %3662 = vmatprep.subr.bf16.mxu1 %v4088_v41  ;;  %v18_v18 = vld [vmem:[%s5278_s0 + $0x18] sm:$0xff]  ;;  %v49_v38 = vld [vmem:[%s5278_s0 + $0x110] sm:$0xff]  ;;  %v4102_v41 = vld [vmem:[%s5277_s1 + $0x268] sm:$0xff]  }
  0x3c   :  { %2176 = vmatmul.mubr.bf16.gmra.mxu1 %v3085_v20  ;;  %2070 = vmatprep.mubr.bf16.mxu0 %v3100_v21  ;;  %v3179_v20 = vcombine.low %v159_v8, %v167_v9  ;;  %v3181_v21 = vcombine.low %v160_v10, %v168_v11  ;;  %v3041_v29 = vcombine.low %v18_v18, %v26_v19  ;;  %v4115_v8 = vld [vmem:[%s5277_s1 + $0x210] sm:$0xff]   ;;  %v4118_v10 = vld [vmem:[%s5277_s1 + $0x248] sm:$0xff]  }
  0x3d   :  { %2183 = vmatprep.mubr.bf16.mxu1 %v3102_v23  ;;  %3587 = vmatpush3.bf16.msra.mxu0 %v4087_v39  ;;  %v3042_v23 = vcombine.high %v18_v18, %v26_v19  ;;  %v57_v39 = vld [vmem:[%s5278_s0 + $0x150] sm:$0xff]  ;;  %v4122_v18 = vld [vmem:[%s5277_s1 + $0x240] sm:$0xff]  }
  0x3e   :  { %3663 = vmatpush3.bf16.msra.mxu1 %v4089_v45  ;;  %3588 = vmatprep.subr.bf16.mxu0 %v4090_v47  ;;  %v3057_v45 = vcombine.low %v34_v26, %v42_v28  ;;  %v3074_v47 = vcombine.high %v50_v40, %v58_v42  ;;  %v4117_v9 = vld [vmem:[%s5277_s1 + $0x290] sm:$0xff]   ;;  %v4126_v26 = vld [vmem:[%s5277_s1 + $0x378] sm:$0xff]  }
  0x3f   :  { %3664 = vmatprep.subr.bf16.mxu1 %v4092_v52  ;;  %v73_v52 = vld [vmem:[%s5278_s0 + $0x1d0] sm:$0xff]  ;;  %v4128_v28 = vld [vmem:[%s5277_s1 + $0x3f8] sm:$0xff]  }
  0x40   :  { %v97_v19 = vld [vmem:[%s5278_s0 + $0x290] sm:$0xff] }
  0x41   :  { %3589 = vmatpush3.bf16.msra.mxu0 %v4091_v51  ;;  %v65_v51 = vld [vmem:[%s5278_s0 + $0x190] sm:$0xff] }
  0x42   :  { %3665 = vmatpush3.bf16.msra.mxu1 %v4093_v55  ;;  %3726 = vmatprep.subr.bf16.mxu0 %v4094_v58  ;;  %v74_v55 = vld [vmem:[%s5278_s0 + $0x1d8] sm:$0xff]  ;;  %v3087_v11 = vcombine.low %v65_v51, %v73_v52 }
  0x43   :  { %2071 = vmatmul.mubr.bf16.gmra.mxu0 %v3099_v32  ;;  %3802 = vmatprep.subr.bf16.mxu1 %v4096_v62  ;;  %v3056_v32 = vcombine.high %v33_v24, %v41_v25  ;;  %v4110_v58 = vld [vmem:[%s5277_s1 + $0x258] sm:$0xff]   ;;  %v3088_v62 = vcombine.high %v65_v51, %v73_v52  ;;  %v3090_v0 = vcombine.high %v66_v54, %v74_v55  ;;  %v4123_v24 = vld [vmem:[%s5277_s1 + $0x200] sm:$0xff]  }
  0x44   :  { %2184 = vmatmul.mubr.bf16.gmra.mxu1 %v3101_v34  ;;  %2078 = vmatprep.mubr.bf16.mxu0 %v3116_v35  ;;  %v4098_v34 = vld [vmem:[%s5277_s1 + $0x270] sm:$0xff]   ;;  %v4125_v25 = vld [vmem:[%s5277_s1 + $0x280] sm:$0xff]   ;;  %v154_v51 = vld [vmem:[%s5278_s0 + $0x458] sm:$0xff] }
  0x45   :  { %2191 = vmatprep.mubr.bf16.mxu1 %v3118_v37  ;;  %v4099_v35 = vld [vmem:[%s5277_s1 + $0x230] sm:$0xff]  }
  0x46   :  { %v4101_v37 = vld [vmem:[%s5277_s1 + $0x2b0] sm:$0xff]  }
  0x4b   :  { %2079 = vmatmul.mubr.bf16.gmra.mxu0 %v3115_v46  ;;  %v3072_v46 = vcombine.high %v49_v38, %v57_v39 }
  0x4c   :  { %2192 = vmatmul.mubr.bf16.gmra.mxu1 %v3117_v48  ;;  %2086 = vmatprep.mubr.bf16.mxu0 %v3132_v49  ;;  %v4103_v48 = vld [vmem:[%s5277_s1 + $0x228] sm:$0xff]  }
  0x4d   :  { %2199 = vmatprep.mubr.bf16.mxu1 %v3134_v50  ;;  %v4105_v49 = vld [vmem:[%s5277_s1 + $0x2a8] sm:$0xff]   ;;  %v4106_v50 = vld [vmem:[%s5277_s1 + $0x260] sm:$0xff]  }
  0x53   :  { %2087 = vmatmul.mubr.bf16.gmra.mxu0 %v3131_v59  ;;  %v3071_v59 = vcombine.low %v49_v38, %v57_v39 }
  0x54   :  { %2200 = vmatmul.mubr.bf16.gmra.mxu1 %v3133_v60  ;;  %2094 = vmatprep.mubr.bf16.mxu0 %v3148_v61  ;;  %v4112_v60 = vld [vmem:[%s5277_s1 + $0x2d8] sm:$0xff]   ;;  %v3073_v61 = vcombine.low %v50_v40, %v58_v42  ;;  %v129_v40 = vld [vmem:[%s5278_s0 + $0x390] sm:$0xff] }
  0x55   :  { %2207 = vmatprep.mubr.bf16.mxu1 %v3150_v63  ;;  %v4111_v63 = vld [vmem:[%s5277_s1 + $0x218] sm:$0xff]  }
  0x56   :  { %v130_v42 = vld [vmem:[%s5278_s0 + $0x398] sm:$0xff] }
  0x5b   :  { %2095 = vmatmul.mubr.bf16.gmra.mxu0 %v3147_v4  ;;  %v4116_v4 = vld [vmem:[%s5277_s1 + $0x2d0] sm:$0xff]  }
  0x5c   :  { %2208 = vmatmul.mubr.bf16.gmra.mxu1 %v3149_v5  ;;  %2102 = vmatprep.mubr.bf16.mxu0 %v3164_v6  ;;  %v89_v5 = vld [vmem:[%s5278_s0 + $0x250] sm:$0xff]  ;;  %v82_v6 = vld [vmem:[%s5278_s0 + $0x218] sm:$0xff] }
  0x5d   :  { %2215 = vmatprep.mubr.bf16.mxu1 %v3166_v7  ;;  %v90_v7 = vld [vmem:[%s5278_s0 + $0x258] sm:$0xff] }
  0x63   :  { %2103 = vmatmul.mubr.bf16.gmra.mxu0 %v3163_v12  ;;  %v4120_v12 = vld [vmem:[%s5277_s1 + $0x2c8] sm:$0xff]  }
  0x64   :  { %2216 = vmatmul.mubr.bf16.gmra.mxu1 %v3165_v13  ;;  %2110 = vmatprep.mubr.bf16.mxu0 %v3180_v14  ;;  %v3089_v13 = vcombine.low %v66_v54, %v74_v55  ;;  %v3104_v14 = vcombine.high %v81_v3, %v89_v5 }
  0x65   :  { %2223 = vmatprep.mubr.bf16.mxu1 %v3182_v15  ;;  %v3106_v15 = vcombine.high %v82_v6, %v90_v7 }
  0x6b   :  { %2111 = vmatmul.mubr.bf16.gmra.mxu0 %v3179_v20  ;;  %v105_v20 = vld [vmem:[%s5278_s0 + $0x2d0] sm:$0xff] }
  0x6c   :  { %2224 = vmatmul.mubr.bf16.gmra.mxu1 %v3181_v21  ;;  %2264 = vmatprep.mubr.bf16.mxu0 %v3040_v22  ;;  %v4124_v21 = vld [vmem:[%s5277_s1 + $0x2c0] sm:$0xff]   ;;  %v98_v22 = vld [vmem:[%s5278_s0 + $0x298] sm:$0xff] }
  0x6d   :  { %2377 = vmatprep.mubr.bf16.mxu1 %v3042_v23  ;;  %v106_v23 = vld [vmem:[%s5278_s0 + $0x2d8] sm:$0xff] }
  0x73   :  { %2265 = vmatmul.mubr.bf16.vlgmr.msra.gmra.mxu0 %v3039_v27  ;;  %v3103_v27 = vcombine.low %v81_v3, %v89_v5  ;;  %v28_v3 = vld [vmem:[%s5278_s0 + $0x68] sm:$0xff] }
  0x74   :  { %2378 = vmatmul.mubr.bf16.vlgmr.msra.gmra.mxu1 %v3041_v29  ;;  %3727 = vmatpush3.bf16.msra.mxu0 %v4095_v30  ;;  %v3105_v29 = vcombine.low %v82_v6, %v90_v7  ;;  %v3120_v30 = vcombine.high %v97_v19, %v105_v20 }
  0x75   :  { %3803 = vmatpush3.bf16.msra.mxu1 %v4097_v31  ;;  %2272 = vmatprep.mubr.bf16.mxu0 %v3056_v32  ;;  %v3122_v31 = vcombine.high %v98_v22, %v106_v23  ;;  %v113_v32 = vld [vmem:[%s5278_s0 + $0x310] sm:$0xff] }
  0x76   :  { %2385 = vmatprep.mubr.bf16.mxu1 %v3058_v33  ;;  %3728 = vmatprep.subr.bf16.mxu0 %v4098_v34  ;;  %v121_v33 = vld [vmem:[%s5278_s0 + $0x350] sm:$0xff]  ;;  %v114_v34 = vld [vmem:[%s5278_s0 + $0x318] sm:$0xff] }
  0x77   :  { %3804 = vmatprep.subr.bf16.mxu1 %v4100_v36  ;;  %v3119_v36 = vcombine.low %v97_v19, %v105_v20  ;;  %v3136_v38 = vcombine.high %v113_v32, %v121_v33  ;;  %v4132_v19 = vld [vmem:[%s5277_s1 + $0x3f0] sm:$0xff]  }
  0x78   :  { %3729 = vmatpush3.bf16.msra.mxu0 %v4099_v35  ;;  %v122_v35 = vld [vmem:[%s5278_s0 + $0x358] sm:$0xff]  ;;  %v4131_v20 = vld [vmem:[%s5277_s1 + $0x330] sm:$0xff]  }
  0x79   :  { %3805 = vmatpush3.bf16.msra.mxu1 %v4101_v37  ;;  %3730 = vmatprep.subr.bf16.mxu0 %v4102_v41  ;;  %v3121_v37 = vcombine.low %v98_v22, %v106_v23  ;;  %v3138_v39 = vcombine.high %v114_v34, %v122_v35  ;;  %v137_v41 = vld [vmem:[%s5278_s0 + $0x3d0] sm:$0xff]  ;;  %v51_v22 = vld [vmem:[%s5278_s0 + $0x120] sm:$0xff] }
  0x7a   :  { %3806 = vmatprep.subr.bf16.mxu1 %v4104_v43  ;;  %v138_v43 = vld [vmem:[%s5278_s0 + $0x3d8] sm:$0xff]  ;;  %v3151_v52 = vcombine.low %v129_v40, %v137_v41  ;;  %v59_v23 = vld [vmem:[%s5278_s0 + $0x160] sm:$0xff] }
  0x7b   :  { %2273 = vmatmul.mubr.bf16.gmra.mxu0 %v3055_v44  ;;  %v3135_v44 = vcombine.low %v113_v32, %v121_v33  ;;  %v4135_v32 = vld [vmem:[%s5277_s1 + $0x328] sm:$0xff]  }
  0x7c   :  { %2386 = vmatmul.mubr.bf16.gmra.mxu1 %v3057_v45  ;;  %2280 = vmatprep.mubr.bf16.mxu0 %v3072_v46  ;;  %v3137_v45 = vcombine.low %v114_v34, %v122_v35  ;;  %v3152_v46 = vcombine.high %v129_v40, %v137_v41  ;;  %v4137_v33 = vld [vmem:[%s5277_s1 + $0x3a8] sm:$0xff]   ;;  %v4138_v34 = vld [vmem:[%s5277_s1 + $0x360] sm:$0xff]  }
  0x7d   :  { %2393 = vmatprep.mubr.bf16.mxu1 %v3074_v47  ;;  %3731 = vmatpush3.bf16.msra.mxu0 %v4103_v48  ;;  %v3154_v47 = vcombine.high %v130_v42, %v138_v43  ;;  %v145_v48 = vld [vmem:[%s5278_s0 + $0x410] sm:$0xff]  ;;  %v4140_v35 = vld [vmem:[%s5277_s1 + $0x3e0] sm:$0xff]   ;;  %v76_v40 = vld [vmem:[%s5278_s0 + $0x1e8] sm:$0xff] }
  0x7e   :  { %3807 = vmatpush3.bf16.msra.mxu1 %v4105_v49  ;;  %3732 = vmatprep.subr.bf16.mxu0 %v4106_v50  ;;  %v153_v49 = vld [vmem:[%s5278_s0 + $0x450] sm:$0xff]  ;;  %v146_v50 = vld [vmem:[%s5278_s0 + $0x418] sm:$0xff]  ;;  %v4141_v41 = vld [vmem:[%s5277_s1 + $0x3a0] sm:$0xff]  }
  0x7f   :  { %3808 = vmatprep.subr.bf16.mxu1 %v4108_v53  ;;  %v3153_v53 = vcombine.low %v130_v42, %v138_v43  ;;  %v3168_v54 = vcombine.high %v145_v48, %v153_v49  ;;  %v3170_v55 = vcombine.high %v146_v50, %v154_v51  ;;  %v4142_v42 = vld [vmem:[%s5277_s1 + $0x358] sm:$0xff]   ;;  %v3075_v43 = vcombine.low %v51_v22, %v59_v23 }
  0x81   :  { %3733 = vmatpush3.bf16.msra.mxu0 %v4107_v56  ;;  %v161_v56 = vld [vmem:[%s5278_s0 + $0x490] sm:$0xff] }
  0x82   :  { %3809 = vmatpush3.bf16.msra.mxu1 %v4109_v57  ;;  %3734 = vmatprep.subr.bf16.mxu0 %v4110_v58  ;;  %v169_v57 = vld [vmem:[%s5278_s0 + $0x4d0] sm:$0xff]  ;;  %v162_v58 = vld [vmem:[%s5278_s0 + $0x498] sm:$0xff] }
  0x83   :  { %2281 = vmatmul.mubr.bf16.gmra.mxu0 %v3071_v59  ;;  %3810 = vmatprep.subr.bf16.mxu1 %v4112_v60  ;;  %v170_v59 = vld [vmem:[%s5278_s0 + $0x4d8] sm:$0xff]  ;;  %v3167_v60 = vcombine.low %v145_v48, %v153_v49 }
  0x84   :  { %2394 = vmatmul.mubr.bf16.gmra.mxu1 %v3073_v61  ;;  %2288 = vmatprep.mubr.bf16.mxu0 %v3088_v62  ;;  %v3169_v61 = vcombine.low %v146_v50, %v154_v51  ;;  %v3184_v62 = vcombine.high %v161_v56, %v169_v57  ;;  %v3185_v5 = vcombine.low %v162_v58, %v170_v59  ;;  %v4143_v48 = vld [vmem:[%s5277_s1 + $0x318] sm:$0xff]   ;;  %v4146_v50 = vld [vmem:[%s5277_s1 + $0x350] sm:$0xff]  }
  0x85   :  { %2401 = vmatprep.mubr.bf16.mxu1 %v3090_v0  ;;  %3735 = vmatpush3.bf16.msra.mxu0 %v4111_v63  ;;  %v3186_v63 = vcombine.high %v162_v58, %v170_v59  ;;  %v19_v0 = vld [vmem:[%s5278_s0 + $0x20] sm:$0xff]  ;;  %v4145_v49 = vld [vmem:[%s5277_s1 + $0x398] sm:$0xff]   ;;  %v4148_v51 = vld [vmem:[%s5277_s1 + $0x3d0] sm:$0xff]  }
  0x86   :  { %3811 = vmatpush3.bf16.msra.mxu1 %v4113_v1  ;;  %3736 = vmatprep.subr.bf16.mxu0 %v4114_v2  ;;  %v27_v1 = vld [vmem:[%s5278_s0 + $0x60] sm:$0xff]  ;;  %v20_v2 = vld [vmem:[%s5278_s0 + $0x28] sm:$0xff] }
  0x87   :  { %3812 = vmatprep.subr.bf16.mxu1 %v4116_v4  ;;  %v3183_v4 = vcombine.low %v161_v56, %v169_v57  ;;  %v3044_v6 = vcombine.high %v19_v0, %v27_v1  ;;  %v3046_v7 = vcombine.high %v20_v2, %v28_v3  ;;  %v92_v56 = vld [vmem:[%s5278_s0 + $0x268] sm:$0xff]  ;;  %v4149_v57 = vld [vmem:[%s5277_s1 + $0x390] sm:$0xff]  }
  0x88   :  { %v4150_v58 = vld [vmem:[%s5277_s1 + $0x348] sm:$0xff]  }
  0x89   :  { %3737 = vmatpush3.bf16.msra.mxu0 %v4115_v8  ;;  %v35_v8 = vld [vmem:[%s5278_s0 + $0xa0] sm:$0xff] }
  0x8a   :  { %3813 = vmatpush3.bf16.msra.mxu1 %v4117_v9  ;;  %3738 = vmatprep.subr.bf16.mxu0 %v4118_v10  ;;  %v43_v9 = vld [vmem:[%s5278_s0 + $0xe0] sm:$0xff]  ;;  %v3043_v10 = vcombine.low %v19_v0, %v27_v1  ;;  %v4151_v0 = vld [vmem:[%s5277_s1 + $0x308] sm:$0xff]  }
  0x8b   :  { %2289 = vmatmul.mubr.bf16.gmra.mxu0 %v3087_v11  ;;  %3814 = vmatprep.subr.bf16.mxu1 %v4120_v12  ;;  %v36_v11 = vld [vmem:[%s5278_s0 + $0xa8] sm:$0xff] }
  0x8c   :  { %2402 = vmatmul.mubr.bf16.gmra.mxu1 %v3089_v13  ;;  %2296 = vmatprep.mubr.bf16.mxu0 %v3104_v14  ;;  %v44_v12 = vld [vmem:[%s5278_s0 + $0xe8] sm:$0xff]  ;;  %v3045_v13 = vcombine.low %v20_v2, %v28_v3  ;;  %v4127_v14 = vld [vmem:[%s5277_s1 + $0x338] sm:$0xff]   ;;  %v4154_v2 = vld [vmem:[%s5277_s1 + $0x340] sm:$0xff]  }
  0x8d   :  { %2409 = vmatprep.mubr.bf16.mxu1 %v3106_v15  ;;  %3739 = vmatpush3.bf16.msra.mxu0 %v4119_v16  ;;  %v4129_v15 = vld [vmem:[%s5277_s1 + $0x3b8] sm:$0xff]   ;;  %v3060_v16 = vcombine.high %v35_v8, %v43_v9  ;;  %v4153_v1 = vld [vmem:[%s5277_s1 + $0x388] sm:$0xff]   ;;  %v4156_v3 = vld [vmem:[%s5277_s1 + $0x3c0] sm:$0xff]  }
  0x8e   :  { %3815 = vmatpush3.bf16.msra.mxu1 %v4121_v17  ;;  %3740 = vmatprep.subr.bf16.mxu0 %v4122_v18  ;;  %v3062_v17 = vcombine.high %v36_v11, %v44_v12  ;;  %v4130_v18 = vld [vmem:[%s5277_s1 + $0x370] sm:$0xff]  }
  0x8f   :  { %3816 = vmatprep.subr.bf16.mxu1 %v4124_v21  ;;  %v4133_v21 = vld [vmem:[%s5277_s1 + $0x3b0] sm:$0xff]  }
  0x91   :  { %3741 = vmatpush3.bf16.msra.mxu0 %v4123_v24  ;;  %v4134_v24 = vld [vmem:[%s5277_s1 + $0x368] sm:$0xff]  }
  0x92   :  { %3817 = vmatpush3.bf16.msra.mxu1 %v4125_v25  ;;  %3878 = vmatprep.subr.bf16.mxu0 %v4126_v26  ;;  %v52_v25 = vld [vmem:[%s5278_s0 + $0x128] sm:$0xff] }
  0x93   :  { %2297 = vmatmul.mubr.bf16.gmra.mxu0 %v3103_v27  ;;  %3954 = vmatprep.subr.bf16.mxu1 %v4128_v28  ;;  %v60_v26 = vld [vmem:[%s5278_s0 + $0x168] sm:$0xff]  ;;  %v3059_v28 = vcombine.low %v35_v8, %v43_v9  ;;  %v4157_v9 = vld [vmem:[%s5277_s1 + $0x380] sm:$0xff]  }
  0x94   :  { %2410 = vmatmul.mubr.bf16.gmra.mxu1 %v3105_v29  ;;  %2304 = vmatprep.mubr.bf16.mxu0 %v3120_v30  ;;  %v4136_v27 = vld [vmem:[%s5277_s1 + $0x3e8] sm:$0xff]   ;;  %v3061_v29 = vcombine.low %v36_v11, %v44_v12  ;;  %v3076_v30 = vcombine.high %v51_v22, %v59_v23 }
  0x95   :  { %2417 = vmatprep.mubr.bf16.mxu1 %v3122_v31  ;;  %v3078_v31 = vcombine.high %v52_v25, %v60_v26  ;;  %v108_v8 = vld [vmem:[%s5278_s0 + $0x2e8] sm:$0xff] }
  0x96   :  { %v116_v22 = vld [vmem:[%s5278_s0 + $0x328] sm:$0xff] }
  0x97   :  { %v124_v23 = vld [vmem:[%s5278_s0 + $0x368] sm:$0xff] }
  0x9b   :  { %2305 = vmatmul.mubr.bf16.gmra.mxu0 %v3119_v36  ;;  %v67_v36 = vld [vmem:[%s5278_s0 + $0x1a0] sm:$0xff] }
  0x9c   :  { %2418 = vmatmul.mubr.bf16.gmra.mxu1 %v3121_v37  ;;  %2312 = vmatprep.mubr.bf16.mxu0 %v3136_v38  ;;  %v75_v37 = vld [vmem:[%s5278_s0 + $0x1e0] sm:$0xff]  ;;  %v68_v38 = vld [vmem:[%s5278_s0 + $0x1a8] sm:$0xff] }
  0x9d   :  { %2425 = vmatprep.mubr.bf16.mxu1 %v3138_v39  ;;  %v4139_v39 = vld [vmem:[%s5277_s1 + $0x320] sm:$0xff]   ;;  %v3091_v59 = vcombine.low %v67_v36, %v75_v37 }
  0xa3   :  { %2313 = vmatmul.mubr.bf16.gmra.mxu0 %v3135_v44  ;;  %v4144_v44 = vld [vmem:[%s5277_s1 + $0x3d8] sm:$0xff]  }
  0xa4   :  { %2426 = vmatmul.mubr.bf16.gmra.mxu1 %v3137_v45  ;;  %2320 = vmatprep.mubr.bf16.mxu0 %v3152_v46  ;;  %v3077_v45 = vcombine.low %v52_v25, %v60_v26  ;;  %v3092_v46 = vcombine.high %v67_v36, %v75_v37 }
  0xa5   :  { %2433 = vmatprep.mubr.bf16.mxu1 %v3154_v47  ;;  %v3094_v47 = vcombine.high %v68_v38, %v76_v40 }
  0xab   :  { %2321 = vmatmul.mubr.bf16.gmra.mxu0 %v3151_v52  ;;  %v83_v52 = vld [vmem:[%s5278_s0 + $0x220] sm:$0xff] }
  0xac   :  { %2434 = vmatmul.mubr.bf16.gmra.mxu1 %v3153_v53  ;;  %2328 = vmatprep.mubr.bf16.mxu0 %v3168_v54  ;;  %v91_v53 = vld [vmem:[%s5278_s0 + $0x260] sm:$0xff]  ;;  %v84_v54 = vld [vmem:[%s5278_s0 + $0x228] sm:$0xff] }
  0xad   :  { %2441 = vmatprep.mubr.bf16.mxu1 %v3170_v55  ;;  %v4147_v55 = vld [vmem:[%s5277_s1 + $0x310] sm:$0xff]   ;;  %v3109_v11 = vcombine.low %v84_v54, %v92_v56 }
  0xb3   :  { %2329 = vmatmul.mubr.bf16.gmra.mxu0 %v3167_v60  ;;  %v4152_v60 = vld [vmem:[%s5277_s1 + $0x3c8] sm:$0xff]  }
  0xb4   :  { %2442 = vmatmul.mubr.bf16.gmra.mxu1 %v3169_v61  ;;  %2336 = vmatprep.mubr.bf16.mxu0 %v3184_v62  ;;  %v3093_v61 = vcombine.low %v68_v38, %v76_v40  ;;  %v3108_v62 = vcombine.high %v83_v52, %v91_v53 }
  0xb5   :  { %2449 = vmatprep.mubr.bf16.mxu1 %v3186_v63  ;;  %v3110_v63 = vcombine.high %v84_v54, %v92_v56 }
  0xbb   :  { %2337 = vmatmul.mubr.bf16.gmra.mxu0 %v3183_v4  ;;  %v99_v4 = vld [vmem:[%s5278_s0 + $0x2a0] sm:$0xff] }
  0xbc   :  { %2450 = vmatmul.mubr.bf16.gmra.mxu1 %v3185_v5  ;;  %2490 = vmatprep.mubr.bf16.mxu0 %v3044_v6  ;;  %v107_v5 = vld [vmem:[%s5278_s0 + $0x2e0] sm:$0xff] }
  0xbd   :  { %2603 = vmatprep.mubr.bf16.mxu1 %v3046_v7  ;;  %v4155_v6 = vld [vmem:[%s5277_s1 + $0x300] sm:$0xff]   ;;  %v100_v7 = vld [vmem:[%s5278_s0 + $0x2a8] sm:$0xff]  ;;  %v3124_v12 = vcombine.high %v99_v4, %v107_v5  ;;  %v3123_v26 = vcombine.low %v99_v4, %v107_v5 }
  0xc3   :  { %2491 = vmatmul.mubr.bf16.vlgmr.msra.gmra.mxu0 %v3043_v10  ;;  %v3107_v10 = vcombine.low %v83_v52, %v91_v53  ;;  %v3141_v53 = vcombine.low %v116_v22, %v124_v23 }
  0xc4   :  { %2604 = vmatmul.mubr.bf16.vlgmr.msra.gmra.mxu1 %v3045_v13  ;;  %3879 = vmatpush3.bf16.msra.mxu0 %v4127_v14  ;;  %v3126_v13 = vcombine.high %v100_v7, %v108_v8 }
  0xc5   :  { %3955 = vmatpush3.bf16.msra.mxu1 %v4129_v15  ;;  %2498 = vmatprep.mubr.bf16.mxu0 %v3060_v16  ;;  %v4877_v16 = vld [vmem:[%s5279_s2] ss:$0 sm:$0xff] }
  0xc6   :  { %2611 = vmatprep.mubr.bf16.mxu1 %v3062_v17  ;;  %3880 = vmatprep.subr.bf16.mxu0 %v4130_v18  ;;  %v115_v18 = vld [vmem:[%s5278_s0 + $0x320] sm:$0xff] }
  0xc7   :  { %3956 = vmatprep.subr.bf16.mxu1 %v4132_v19  ;;  %v123_v19 = vld [vmem:[%s5278_s0 + $0x360] sm:$0xff] }
  0xc8   :  { %3881 = vmatpush3.bf16.msra.mxu0 %v4131_v20 }
  0xc9   :  { %3957 = vmatpush3.bf16.msra.mxu1 %v4133_v21  ;;  %3882 = vmatprep.subr.bf16.mxu0 %v4134_v24 }
  0xca   :  { %3958 = vmatprep.subr.bf16.mxu1 %v4136_v27 }
  0xcb   :  { %2499 = vmatmul.mubr.bf16.gmra.mxu0 %v3059_v28 }
  0xcc   :  { %2612 = vmatmul.mubr.bf16.gmra.mxu1 %v3061_v29  ;;  %2506 = vmatprep.mubr.bf16.mxu0 %v3076_v30  ;;  %v3125_v29 = vcombine.low %v100_v7, %v108_v8  ;;  %v3140_v30 = vcombine.high %v115_v18, %v123_v19  ;;  %v156_v7 = vld [vmem:[%s5278_s0 + $0x468] sm:$0xff] }
  0xcd   :  { %2619 = vmatprep.mubr.bf16.mxu1 %v3078_v31  ;;  %3883 = vmatpush3.bf16.msra.mxu0 %v4135_v32  ;;  %v3142_v32 = vcombine.high %v116_v22, %v124_v23 }
  0xce   :  { %3959 = vmatpush3.bf16.msra.mxu1 %v4137_v33  ;;  %3884 = vmatprep.subr.bf16.mxu0 %v4138_v34 }
  0xcf   :  { %3960 = vmatprep.subr.bf16.mxu1 %v4140_v35 }
  0xd1   :  { %3885 = vmatpush3.bf16.msra.mxu0 %v4139_v39 }
  0xd2   :  { %3961 = vmatpush3.bf16.msra.mxu1 %v4141_v41  ;;  %3886 = vmatprep.subr.bf16.mxu0 %v4142_v42  ;;  %v131_v41 = vld [vmem:[%s5278_s0 + $0x3a0] sm:$0xff] }
  0xd3   :  { %2507 = vmatmul.mubr.bf16.gmra.mxu0 %v3075_v43  ;;  %3962 = vmatprep.subr.bf16.mxu1 %v4144_v44  ;;  %v139_v42 = vld [vmem:[%s5278_s0 + $0x3e0] sm:$0xff] }
  0xd4   :  { %2620 = vmatmul.mubr.bf16.gmra.mxu1 %v3077_v45  ;;  %2514 = vmatprep.mubr.bf16.mxu0 %v3092_v46  ;;  %v132_v46 = vld [vmem:[%s5278_s0 + $0x3a8] sm:$0xff]  ;;  %v3156_v54 = vcombine.high %v131_v41, %v139_v42 }
  0xd5   :  { %2627 = vmatprep.mubr.bf16.mxu1 %v3094_v47  ;;  %3887 = vmatpush3.bf16.msra.mxu0 %v4143_v48  ;;  %v140_v47 = vld [vmem:[%s5278_s0 + $0x3e8] sm:$0xff] }
  0xd6   :  { %3963 = vmatpush3.bf16.msra.mxu1 %v4145_v49  ;;  %3888 = vmatprep.subr.bf16.mxu0 %v4146_v50  ;;  %v3139_v50 = vcombine.low %v115_v18, %v123_v19  ;;  %v3158_v56 = vcombine.high %v132_v46, %v140_v47 }
  0xd7   :  { %3964 = vmatprep.subr.bf16.mxu1 %v4148_v51 }
  0xd9   :  { %3889 = vmatpush3.bf16.msra.mxu0 %v4147_v55 }
  0xda   :  { %3965 = vmatpush3.bf16.msra.mxu1 %v4149_v57  ;;  %3890 = vmatprep.subr.bf16.mxu0 %v4150_v58 }
  0xdb   :  { %2515 = vmatmul.mubr.bf16.gmra.mxu0 %v3091_v59  ;;  %3966 = vmatprep.subr.bf16.mxu1 %v4152_v60 }
  0xdc   :  { %2628 = vmatmul.mubr.bf16.gmra.mxu1 %v3093_v61  ;;  %2522 = vmatprep.mubr.bf16.mxu0 %v3108_v62 }
  0xdd   :  { %2635 = vmatprep.mubr.bf16.mxu1 %v3110_v63  ;;  %3891 = vmatpush3.bf16.msra.mxu0 %v4151_v0 }
  0xde   :  { %3967 = vmatpush3.bf16.msra.mxu1 %v4153_v1  ;;  %3892 = vmatprep.subr.bf16.mxu0 %v4154_v2  ;;  %v147_v1 = vld [vmem:[%s5278_s0 + $0x420] sm:$0xff] }
  0xdf   :  { %3968 = vmatprep.subr.bf16.mxu1 %v4156_v3  ;;  %v155_v2 = vld [vmem:[%s5278_s0 + $0x460] sm:$0xff] }
  0xe1   :  { %3893 = vmatpush3.bf16.msra.mxu0 %v4155_v6  ;;  %v148_v6 = vld [vmem:[%s5278_s0 + $0x428] sm:$0xff] }
  0xe2   :  { %3969 = vmatpush3.bf16.msra.mxu1 %v4157_v9 }
  0xe3   :  { %v3438_v14 = vpop.f32.mrf.mxu0  ;;  %2523 = vmatmul.mubr.bf16.gmra.mxu0 %v3107_v10  ;;  %v3155_v10 = vcombine.low %v131_v41, %v139_v42 }
  0xe4   :  { %v3514_v15 = vpop.f32.mrf.mxu1  ;;  %2636 = vmatmul.mubr.bf16.gmra.mxu1 %v3109_v11  ;;  %2530 = vmatprep.mubr.bf16.mxu0 %v3124_v12 }
  0xe5   :  { %v3439_v17 = vpop.f32.mrf.mxu0  ;;  %2643 = vmatprep.mubr.bf16.mxu1 %v3126_v13  ;;  %v3157_v13 = vcombine.low %v132_v46, %v140_v47 }
  0xe6   :  { %v3440_v20 = vadd.f32 %v3439_v17, %v3438_v14  ;;  %v3515_v21 = vpop.f32.mrf.mxu1  ;;  %v3172_v14 = vcombine.high %v147_v1, %v155_v2  ;;  %v3174_v17 = vcombine.high %v148_v6, %v156_v7 }
  0xe7   :  { %v3516_v24 = vadd.f32 %v3515_v21, %v3514_v15  ;;  %v3441_v25 = vpop.f32.mrf.mxu0 }
  0xe8   :  { %v2041_v27 = vadd.f32 %v3440_v20, %v4877_v16  ;;  %v3517_v28 = vpop.f32.mrf.mxu1 }
  0xe9   :  { %v3442_v31 = vpop.f32.mrf.mxu0 }
  0xea   :  { %v4892_v33 = vadd.f32 %v3516_v24, %v2041_v27  ;;  %v3443_v34 = vadd.f32 %v3442_v31, %v3441_v25  ;;  %v3518_v35 = vpop.f32.mrf.mxu1  ;;  %v171_v27 = vld [vmem:[%s5278_s0 + $0x4e0] sm:$0xff]  ;;  %v164_v31 = vld [vmem:[%s5278_s0 + $0x4a8] sm:$0xff] }
  0xeb   :  { %v3519_v36 = vadd.f32 %v3518_v35, %v3517_v28  ;;  %v3444_v37 = vpop.f32.mrf.mxu0  ;;  %2531 = vmatmul.mubr.bf16.gmra.mxu0 %v3123_v26  ;;  %v163_v26 = vld [vmem:[%s5278_s0 + $0x4a0] sm:$0xff] }
  0xec   :  { %v2044_v38 = vadd.f32 %v3443_v34, %v4877_v16  ;;  %v3520_v39 = vpop.f32.mrf.mxu1  ;;  %2644 = vmatmul.mubr.bf16.gmra.mxu1 %v3125_v29  ;;  %2538 = vmatprep.mubr.bf16.mxu0 %v3140_v30 }
  0xed   :  { %v3445_v40 = vpop.f32.mrf.mxu0  ;;  %2651 = vmatprep.mubr.bf16.mxu1 %v3142_v32  ;;  %v172_v32 = vld [vmem:[%s5278_s0 + $0x4e8] sm:$0xff] }
  0xee   :  { %v4901_v43 = vadd.f32 %v3519_v36, %v2044_v38  ;;  %v3446_v44 = vadd.f32 %v3445_v40, %v3444_v37  ;;  %v3521_v45 = vpop.f32.mrf.mxu1  ;;  %v3171_v36 = vcombine.low %v147_v1, %v155_v2  ;;  %v3188_v40 = vcombine.high %v163_v26, %v171_v27 }
  0xef   :  { %v3522_v48 = vadd.f32 %v3521_v45, %v3520_v39  ;;  %v3447_v49 = vpop.f32.mrf.mxu0  ;;  %v3173_v39 = vcombine.low %v148_v6, %v156_v7  ;;  %v3190_v42 = vcombine.high %v164_v31, %v172_v32  ;;  %v3189_v1 = vcombine.low %v164_v31, %v172_v32 }
  0xf0   :  { %v2049_v51 = vadd.f32 %v3446_v44, %v4877_v16  ;;  %v3523_v52 = vpop.f32.mrf.mxu1 }
  0xf1   :  { %v3448_v55 = vpop.f32.mrf.mxu0 }
  0xf2   :  { %v4910_v57 = vadd.f32 %v3522_v48, %v2049_v51  ;;  %v3449_v58 = vadd.f32 %v3448_v55, %v3447_v49  ;;  %v3524_v59 = vpop.f32.mrf.mxu1 }
  0xf3   :  { %v3525_v60 = vadd.f32 %v3524_v59, %v3523_v52  ;;  %v3450_v61 = vpop.f32.mrf.mxu0  ;;  %2539 = vmatmul.mubr.bf16.gmra.mxu0 %v3139_v50  ;;  %v21_v52 = vld [vmem:[%s5278_s0 + $0x30] sm:$0xff]  ;;  %v30_v59 = vld [vmem:[%s5278_s0 + $0x78] sm:$0xff] }
  0xf4   :  { %v2052_v62 = vadd.f32 %v3449_v58, %v4877_v16  ;;  %v3526_v63 = vpop.f32.mrf.mxu1  ;;  %2652 = vmatmul.mubr.bf16.gmra.mxu1 %v3141_v53  ;;  %2546 = vmatprep.mubr.bf16.mxu0 %v3156_v54  ;;  %v29_v53 = vld [vmem:[%s5278_s0 + $0x70] sm:$0xff]  ;;  %v22_v58 = vld [vmem:[%s5278_s0 + $0x38] sm:$0xff] }
  0xf5   :  { %v3451_v0 = vpop.f32.mrf.mxu0  ;;  %2659 = vmatprep.mubr.bf16.mxu1 %v3158_v56  ;;  %v3048_v2 = vcombine.high %v21_v52, %v29_v53 }
  0xf6   :  { %v4919_v3 = vadd.f32 %v3525_v60, %v2052_v62  ;;  %v3452_v4 = vadd.f32 %v3451_v0, %v3450_v61  ;;  %v3527_v5 = vpop.f32.mrf.mxu1  ;;  %v3187_v62 = vcombine.low %v163_v26, %v171_v27 }
  0xf7   :  { %v3528_v8 = vadd.f32 %v3527_v5, %v3526_v63  ;;  %v3453_v9 = vpop.f32.mrf.mxu0  ;;  %v3050_v5 = vcombine.high %v22_v58, %v30_v59 }
  0xf8   :  { %v2057_v11 = vadd.f32 %v3452_v4, %v4877_v16  ;;  %v3529_v12 = vpop.f32.mrf.mxu1 }
  0xf9   :  { %v3454_v15 = vpop.f32.mrf.mxu0 }
  0xfa   :  { %v4928_v18 = vadd.f32 %v3528_v8, %v2057_v11  ;;  %v3455_v19 = vadd.f32 %v3454_v15, %v3453_v9  ;;  %v3530_v20 = vpop.f32.mrf.mxu1  ;;  %v45_v15 = vld [vmem:[%s5278_s0 + $0xf0] sm:$0xff] }
  0xfb   :  { %v3531_v21 = vadd.f32 %v3530_v20, %v3529_v12  ;;  %v3456_v22 = vpop.f32.mrf.mxu0  ;;  %2547 = vmatmul.mubr.bf16.gmra.mxu0 %v3155_v10 }
  0xfc   :  { %v2060_v23 = vadd.f32 %v3455_v19, %v4877_v16  ;;  %v3532_v24 = vpop.f32.mrf.mxu1  ;;  %2660 = vmatmul.mubr.bf16.gmra.mxu1 %v3157_v13  ;;  %2554 = vmatprep.mubr.bf16.mxu0 %v3172_v14  ;;  %v37_v14 = vld [vmem:[%s5278_s0 + $0xb0] sm:$0xff] }
  0xfd   :  { %v3457_v25 = vpop.f32.mrf.mxu0  ;;  %2667 = vmatprep.mubr.bf16.mxu1 %v3174_v17 }
  0xfe   :  { %v4937_v28 = vadd.f32 %v3531_v21, %v2060_v23  ;;  %v3458_v29 = vadd.f32 %v3457_v25, %v3456_v22  ;;  %v3533_v30 = vpop.f32.mrf.mxu1  ;;  %v38_v21 = vld [vmem:[%s5278_s0 + $0xb8] sm:$0xff]  ;;  %v3047_v25 = vcombine.low %v21_v52, %v29_v53  ;;  %v3063_v53 = vcombine.low %v37_v14, %v45_v15 }
  0xff   :  { %v3534_v34 = vadd.f32 %v3533_v30, %v3532_v24  ;;  %v3459_v35 = vpop.f32.mrf.mxu0  ;;  %v46_v22 = vld [vmem:[%s5278_s0 + $0xf8] sm:$0xff]  ;;  %v3064_v30 = vcombine.high %v37_v14, %v45_v15 }
 0x100   :  { %v2065_v37 = vadd.f32 %v3458_v29, %v4877_v16  ;;  %v3535_v38 = vpop.f32.mrf.mxu1  ;;  %v3049_v29 = vcombine.low %v22_v58, %v30_v59  ;;  %v3066_v32 = vcombine.high %v38_v21, %v46_v22  ;;  %v3065_v58 = vcombine.low %v38_v21, %v46_v22  ;;  %v78_v14 = vld [vmem:[%s5278_s0 + $0x1f8] sm:$0xff] }
 0x101   :  { %v3460_v41 = vpop.f32.mrf.mxu0 }
 0x102   :  { %v4946_v44 = vadd.f32 %v3534_v34, %v2065_v37  ;;  %v3461_v45 = vadd.f32 %v3460_v41, %v3459_v35  ;;  %v3536_v46 = vpop.f32.mrf.mxu1 }
 0x103   :  { %v3537_v47 = vadd.f32 %v3536_v46, %v3535_v38  ;;  %v3462_v48 = vpop.f32.mrf.mxu0  ;;  %2555 = vmatmul.mubr.bf16.gmra.mxu0 %v3171_v36 }
 0x104   :  { %v2068_v49 = vadd.f32 %v3461_v45, %v4877_v16  ;;  %v3538_v50 = vpop.f32.mrf.mxu1  ;;  %2668 = vmatmul.mubr.bf16.gmra.mxu1 %v3173_v39  ;;  %2562 = vmatprep.mubr.bf16.mxu0 %v3188_v40  ;;  %v61_v45 = vld [vmem:[%s5278_s0 + $0x170] sm:$0xff] }
 0x105   :  { %v3463_v51 = vpop.f32.mrf.mxu0  ;;  %2675 = vmatprep.mubr.bf16.mxu1 %v3190_v42  ;;  %v53_v42 = vld [vmem:[%s5278_s0 + $0x130] sm:$0xff] }
 0x106   :  { %v4955_v54 = vadd.f32 %v3537_v47, %v2068_v49  ;;  %v3464_v55 = vadd.f32 %v3463_v51, %v3462_v48  ;;  %v3539_v56 = vpop.f32.mrf.mxu1  ;;  %v54_v49 = vld [vmem:[%s5278_s0 + $0x138] sm:$0xff]  ;;  %v3080_v59 = vcombine.high %v53_v42, %v61_v45 }
 0x107   :  { %v3540_v60 = vadd.f32 %v3539_v56, %v3538_v50  ;;  %v3465_v61 = vpop.f32.mrf.mxu0  ;;  %v62_v50 = vld [vmem:[%s5278_s0 + $0x178] sm:$0xff] }
 0x108   :  { %v2073_v63 = vadd.f32 %v3464_v55, %v4877_v16  ;;  %v3541_v0 = vpop.f32.mrf.mxu1 }
 0x109   :  { %v3466_v4 = vpop.f32.mrf.mxu0 }
 0x10a   :  { %v4964_v6 = vadd.f32 %v3540_v60, %v2073_v63  ;;  %v3467_v7 = vadd.f32 %v3466_v4, %v3465_v61  ;;  %v3542_v8 = vpop.f32.mrf.mxu1  ;;  %v3082_v61 = vcombine.high %v54_v49, %v62_v50 }
 0x10b   :  { %v3543_v9 = vadd.f32 %v3542_v8, %v3541_v0  ;;  %v3468_v10 = vpop.f32.mrf.mxu0  ;;  %2563 = vmatmul.mubr.bf16.gmra.mxu0 %v3187_v62  ;;  %v69_v8 = vld [vmem:[%s5278_s0 + $0x1b0] sm:$0xff] }
 0x10c   :  { %v2076_v11 = vadd.f32 %v3467_v7, %v4877_v16  ;;  %v3544_v12 = vpop.f32.mrf.mxu1  ;;  %2676 = vmatmul.mubr.bf16.gmra.mxu1 %v3189_v1  ;;  %2716 = vmatprep.mubr.bf16.mxu0 %v3048_v2 }
 0x10d   :  { %v3469_v13 = vpop.f32.mrf.mxu0  ;;  %2829 = vmatprep.mubr.bf16.mxu1 %v3050_v5 }
 0x10e   :  { %v4973_v17 = vadd.f32 %v3543_v9, %v2076_v11  ;;  %v3470_v19 = vadd.f32 %v3469_v13, %v3468_v10  ;;  %v3545_v20 = vpop.f32.mrf.mxu1  ;;  %v77_v9 = vld [vmem:[%s5278_s0 + $0x1f0] sm:$0xff]  ;;  %v70_v13 = vld [vmem:[%s5278_s0 + $0x1b8] sm:$0xff] }
 0x10f   :  { %v3546_v23 = vadd.f32 %v3545_v20, %v3544_v12  ;;  %v3471_v24 = vpop.f32.mrf.mxu0  ;;  %v3079_v20 = vcombine.low %v53_v42, %v61_v45  ;;  %v86_v45 = vld [vmem:[%s5278_s0 + $0x238] sm:$0xff] }
 0x110   :  { %v2081_v26 = vadd.f32 %v3470_v19, %v4877_v16  ;;  %v3547_v27 = vpop.f32.mrf.mxu1 }
 0x111   :  { %v3472_v31 = vpop.f32.mrf.mxu0 }
 0x112   :  { %v4982_v34 = vadd.f32 %v3546_v23, %v2081_v26  ;;  %v3473_v35 = vadd.f32 %v3472_v31, %v3471_v24  ;;  %v3548_v36 = vpop.f32.mrf.mxu1  ;;  %v3081_v23 = vcombine.low %v54_v49, %v62_v50  ;;  %v3096_v24 = vcombine.high %v69_v8, %v77_v9 }
 0x113   :  { %v3549_v37 = vadd.f32 %v3548_v36, %v3547_v27  ;;  %v3474_v38 = vpop.f32.mrf.mxu0  ;;  %2717 = vmatmul.mubr.bf16.vlgmr.msra.gmra.mxu0 %v3047_v25  ;;  %v3098_v26 = vcombine.high %v70_v13, %v78_v14  ;;  %v3095_v50 = vcombine.low %v69_v8, %v77_v9 }
 0x114   :  { %v2084_v39 = vadd.f32 %v3473_v35, %v4877_v16  ;;  %v3550_v40 = vpop.f32.mrf.mxu1  ;;  %2830 = vmatmul.mubr.bf16.vlgmr.msra.gmra.mxu1 %v3049_v29  ;;  %2724 = vmatprep.mubr.bf16.mxu0 %v3064_v30 }
 0x115   :  { %v3475_v41 = vpop.f32.mrf.mxu0  ;;  %2837 = vmatprep.mubr.bf16.mxu1 %v3066_v32 }
 0x116   :  { %v4991_v46 = vadd.f32 %v3549_v37, %v2084_v39  ;;  %v3476_v47 = vadd.f32 %v3475_v41, %v3474_v38  ;;  %v3551_v48 = vpop.f32.mrf.mxu1  ;;  %v85_v38 = vld [vmem:[%s5278_s0 + $0x230] sm:$0xff] }
 0x117   :  { %v3552_v51 = vadd.f32 %v3551_v48, %v3550_v40  ;;  %v3477_v52 = vpop.f32.mrf.mxu0  ;;  %v93_v39 = vld [vmem:[%s5278_s0 + $0x270] sm:$0xff] }
 0x118   :  { %v2089_v55 = vadd.f32 %v3476_v47, %v4877_v16  ;;  %v3553_v56 = vpop.f32.mrf.mxu1  ;;  %v94_v47 = vld [vmem:[%s5278_s0 + $0x278] sm:$0xff] }
 0x119   :  { %v3478_v60 = vpop.f32.mrf.mxu0 }
 0x11a   :  { %v5000_v62 = vadd.f32 %v3552_v51, %v2089_v55  ;;  %v3479_v63 = vadd.f32 %v3478_v60, %v3477_v52  ;;  %v3554_v0 = vpop.f32.mrf.mxu1  ;;  %v3112_v55 = vcombine.high %v85_v38, %v93_v39 }
 0x11b   :  { %v3555_v1 = vadd.f32 %v3554_v0, %v3553_v56  ;;  %v3480_v2 = vpop.f32.mrf.mxu0  ;;  %2725 = vmatmul.mubr.bf16.gmra.mxu0 %v3063_v53  ;;  %v3097_v53 = vcombine.low %v70_v13, %v78_v14  ;;  %v110_v13 = vld [vmem:[%s5278_s0 + $0x2f8] sm:$0xff] }
 0x11c   :  { %v2092_v4 = vadd.f32 %v3479_v63, %v4877_v16  ;;  %v3556_v5 = vpop.f32.mrf.mxu1  ;;  %2838 = vmatmul.mubr.bf16.gmra.mxu1 %v3065_v58  ;;  %2732 = vmatprep.mubr.bf16.mxu0 %v3080_v59  ;;  %v3114_v58 = vcombine.high %v86_v45, %v94_v47 }
 0x11d   :  { %v3481_v7 = vpop.f32.mrf.mxu0  ;;  %2845 = vmatprep.mubr.bf16.mxu1 %v3082_v61 }
 0x11e   :  { %v5009_v10 = vadd.f32 %v3555_v1, %v2092_v4  ;;  %v3482_v11 = vadd.f32 %v3481_v7, %v3480_v2  ;;  %v3557_v12 = vpop.f32.mrf.mxu1  ;;  %v109_v7 = vld [vmem:[%s5278_s0 + $0x2f0] sm:$0xff] }
 0x11f   :  { %v3558_v15 = vadd.f32 %v3557_v12, %v3556_v5  ;;  %v3483_v19 = vpop.f32.mrf.mxu0  ;;  %v101_v5 = vld [vmem:[%s5278_s0 + $0x2b0] sm:$0xff]  ;;  %v102_v12 = vld [vmem:[%s5278_s0 + $0x2b8] sm:$0xff] }
 0x120   :  { %v2097_v21 = vadd.f32 %v3482_v11, %v4877_v16  ;;  %v3559_v22 = vpop.f32.mrf.mxu1 }
 0x121   :  { %v3484_v25 = vpop.f32.mrf.mxu0 }
 0x122   :  { %v5018_v27 = vadd.f32 %v3558_v15, %v2097_v21  ;;  %v3485_v29 = vadd.f32 %v3484_v25, %v3483_v19  ;;  %v3560_v30 = vpop.f32.mrf.mxu1  ;;  %v3111_v19 = vcombine.low %v85_v38, %v93_v39  ;;  %v3130_v25 = vcombine.high %v102_v12, %v110_v13  ;;  %v117_v38 = vld [vmem:[%s5278_s0 + $0x330] sm:$0xff] }
 0x123   :  { %v3561_v31 = vadd.f32 %v3560_v30, %v3559_v22  ;;  %v3486_v32 = vpop.f32.mrf.mxu0  ;;  %2733 = vmatmul.mubr.bf16.gmra.mxu0 %v3079_v20  ;;  %v3113_v22 = vcombine.low %v86_v45, %v94_v47  ;;  %v125_v39 = vld [vmem:[%s5278_s0 + $0x370] sm:$0xff]  ;;  %v126_v47 = vld [vmem:[%s5278_s0 + $0x378] sm:$0xff] }
 0x124   :  { %v2100_v35 = vadd.f32 %v3485_v29, %v4877_v16  ;;  %v3562_v36 = vpop.f32.mrf.mxu1  ;;  %2846 = vmatmul.mubr.bf16.gmra.mxu1 %v3081_v23  ;;  %2740 = vmatprep.mubr.bf16.mxu0 %v3096_v24  ;;  %v3128_v23 = vcombine.high %v101_v5, %v109_v7 }
 0x125   :  { %v3487_v37 = vpop.f32.mrf.mxu0  ;;  %2853 = vmatprep.mubr.bf16.mxu1 %v3098_v26 }
 0x126   :  { %v5027_v40 = vadd.f32 %v3561_v31, %v2100_v35  ;;  %v3488_v41 = vadd.f32 %v3487_v37, %v3486_v32  ;;  %v3563_v42 = vpop.f32.mrf.mxu1 }
 0x127   :  { %v3564_v48 = vadd.f32 %v3563_v42, %v3562_v36  ;;  %v3489_v49 = vpop.f32.mrf.mxu0 }
 0x128   :  { %v2105_v51 = vadd.f32 %v3488_v41, %v4877_v16  ;;  %v3565_v52 = vpop.f32.mrf.mxu1 }
 0x129   :  { %v3490_v56 = vpop.f32.mrf.mxu0 }
 0x12a   :  { %v5036_v59 = vadd.f32 %v3564_v48, %v2105_v51  ;;  %v3491_v60 = vadd.f32 %v3490_v56, %v3489_v49  ;;  %v3566_v61 = vpop.f32.mrf.mxu1 }
 0x12b   :  { %v3567_v63 = vadd.f32 %v3566_v61, %v3565_v52  ;;  %v3492_v0 = vpop.f32.mrf.mxu0  ;;  %2741 = vmatmul.mubr.bf16.gmra.mxu0 %v3095_v50  ;;  %v3127_v50 = vcombine.low %v101_v5, %v109_v7  ;;  %v141_v7 = vld [vmem:[%s5278_s0 + $0x3f0] sm:$0xff] }
 0x12c   :  { %v2108_v1 = vadd.f32 %v3491_v60, %v4877_v16  ;;  %v3568_v2 = vpop.f32.mrf.mxu1  ;;  %2854 = vmatmul.mubr.bf16.gmra.mxu1 %v3097_v53  ;;  %2748 = vmatprep.mubr.bf16.mxu0 %v3112_v55  ;;  %v3129_v53 = vcombine.low %v102_v12, %v110_v13  ;;  %v3144_v55 = vcombine.high %v117_v38, %v125_v39  ;;  %v142_v13 = vld [vmem:[%s5278_s0 + $0x3f8] sm:$0xff] }
 0x12d   :  { %v3493_v4 = vpop.f32.mrf.mxu0  ;;  %2861 = vmatprep.mubr.bf16.mxu1 %v3114_v58 }
 0x12e   :  { %v5045_v8 = vadd.f32 %v3567_v63, %v2108_v1  ;;  %v3494_v9 = vadd.f32 %v3493_v4, %v3492_v0  ;;  %v3569_v11 = vpop.f32.mrf.mxu1 }
 0x12f   :  { %v3570_v14 = vadd.f32 %v3569_v11, %v3568_v2  ;;  %v3495_v15 = vpop.f32.mrf.mxu0 }
 0x130   :  { %v2113_v20 = vadd.f32 %v3494_v9, %v4877_v16  ;;  %v3571_v21 = vpop.f32.mrf.mxu1 }
 0x131   :  { %v3496_v24 = vpop.f32.mrf.mxu0 }
 0x132   :  { %v5054_v26 = vadd.f32 %v3570_v14, %v2113_v20  ;;  %v3497_v29 = vadd.f32 %v3496_v24, %v3495_v15  ;;  %v3572_v30 = vpop.f32.mrf.mxu1 }
 0x133   :  { %v3573_v31 = vadd.f32 %v3572_v30, %v3571_v21  ;;  %v3590_v32 = vpop.f32.mrf.mxu0  ;;  %2749 = vmatmul.mubr.bf16.gmra.mxu0 %v3111_v19  ;;  %v3143_v19 = vcombine.low %v117_v38, %v125_v39  ;;  %v157_v39 = vld [vmem:[%s5278_s0 + $0x470] sm:$0xff] }
 0x134   :  { %v2116_v35 = vadd.f32 %v3497_v29, %v4877_v16  ;;  %v3666_v36 = vpop.f32.mrf.mxu1  ;;  %2862 = vmatmul.mubr.bf16.gmra.mxu1 %v3113_v22  ;;  %2756 = vmatprep.mubr.bf16.mxu0 %v3128_v23  ;;  %v118_v16 = vld [vmem:[%s5278_s0 + $0x338] sm:$0xff] }
 0x135   :  { %v3591_v37 = vpop.f32.mrf.mxu0  ;;  %2869 = vmatprep.mubr.bf16.mxu1 %v3130_v25  ;;  %v3146_v58 = vcombine.high %v118_v16, %v126_v47  ;;  %v3145_v22 = vcombine.low %v118_v16, %v126_v47  ;;  %v158_v47 = vld [vmem:[%s5278_s0 + $0x478] sm:$0xff] }
 0x136   :  { %v5063_v41 = vadd.f32 %v3573_v31, %v2116_v35  ;;  %v3592_v42 = vadd.f32 %v3591_v37, %v3590_v32  ;;  %v3667_v45 = vpop.f32.mrf.mxu1 }
 0x137   :  { %v3668_v48 = vadd.f32 %v3667_v45, %v3666_v36  ;;  %v3593_v49 = vpop.f32.mrf.mxu0 }
 0x138   :  { %v2267_v51 = vadd.f32 %v3592_v42, %v4892_v33  ;;  %v3669_v52 = vpop.f32.mrf.mxu1  ;;  %v133_v33 = vld [vmem:[%s5278_s0 + $0x3b0] sm:$0xff] }
 0x139   :  { %v3594_v56 = vpop.f32.mrf.mxu0  ;;  %v3160_v23 = vcombine.high %v133_v33, %v141_v7 }
 0x13a   :  { %v5072_v60 = vadd.f32 %v3668_v48, %v2267_v51  ;;  %v3595_v61 = vadd.f32 %v3594_v56, %v3593_v49  ;;  %v3670_v63 = vpop.f32.mrf.mxu1 }
 0x13b   :  { %v3671_v0 = vadd.f32 %v3670_v63, %v3669_v52  ;;  %v3596_v1 = vpop.f32.mrf.mxu0  ;;  %2757 = vmatmul.mubr.bf16.gmra.mxu0 %v3127_v50  ;;  %v3159_v50 = vcombine.low %v133_v33, %v141_v7  ;;  %v173_v7 = vld [vmem:[%s5278_s0 + $0x4f0] sm:$0xff] }
 0x13c   :  { %v2270_v2 = vadd.f32 %v3595_v61, %v4901_v43  ;;  %v3672_v4 = vpop.f32.mrf.mxu1  ;;  %2870 = vmatmul.mubr.bf16.gmra.mxu1 %v3129_v53  ;;  %2764 = vmatprep.mubr.bf16.mxu0 %v3144_v55  ;;  %v134_v43 = vld [vmem:[%s5278_s0 + $0x3b8] sm:$0xff] }
 0x13d   :  { %v3597_v5 = vpop.f32.mrf.mxu0  ;;  %2877 = vmatprep.mubr.bf16.mxu1 %v3146_v58  ;;  %v3162_v25 = vcombine.high %v134_v43, %v142_v13  ;;  %v3161_v53 = vcombine.low %v134_v43, %v142_v13  ;;  %v174_v13 = vld [vmem:[%s5278_s0 + $0x4f8] sm:$0xff] }
 0x13e   :  { %v5081_v9 = vadd.f32 %v3671_v0, %v2270_v2  ;;  %v3598_v11 = vadd.f32 %v3597_v5, %v3596_v1  ;;  %v3673_v12 = vpop.f32.mrf.mxu1 }
 0x13f   :  { %v3674_v14 = vadd.f32 %v3673_v12, %v3672_v4  ;;  %v3599_v15 = vpop.f32.mrf.mxu0 }
 0x140   :  { %v2275_v20 = vadd.f32 %v3598_v11, %v4910_v57  ;;  %v3675_v21 = vpop.f32.mrf.mxu1  ;;  %v149_v57 = vld [vmem:[%s5278_s0 + $0x430] sm:$0xff] }
 0x141   :  { %v3600_v24 = vpop.f32.mrf.mxu0  ;;  %v3176_v55 = vcombine.high %v149_v57, %v157_v39 }
 0x142   :  { %v5090_v29 = vadd.f32 %v3674_v14, %v2275_v20  ;;  %v3601_v30 = vadd.f32 %v3600_v24, %v3599_v15  ;;  %v3676_v31 = vpop.f32.mrf.mxu1 }
 0x143   :  { %v3677_v32 = vadd.f32 %v3676_v31, %v3675_v21  ;;  %v3602_v35 = vpop.f32.mrf.mxu0  ;;  %2765 = vmatmul.mubr.bf16.gmra.mxu0 %v3143_v19  ;;  %v3175_v19 = vcombine.low %v149_v57, %v157_v39 }
 0x144   :  { %v2278_v36 = vadd.f32 %v3601_v30, %v4919_v3  ;;  %v3678_v37 = vpop.f32.mrf.mxu1  ;;  %2878 = vmatmul.mubr.bf16.gmra.mxu1 %v3145_v22  ;;  %2772 = vmatprep.mubr.bf16.mxu0 %v3160_v23  ;;  %v150_v3 = vld [vmem:[%s5278_s0 + $0x438] sm:$0xff] }
 0x145   :  { %v3603_v38 = vpop.f32.mrf.mxu0  ;;  %2885 = vmatprep.mubr.bf16.mxu1 %v3162_v25  ;;  %v3178_v58 = vcombine.high %v150_v3, %v158_v47  ;;  %v3177_v22 = vcombine.low %v150_v3, %v158_v47 }
 0x146   :  { %v5099_v42 = vadd.f32 %v3677_v32, %v2278_v36  ;;  %v3604_v45 = vadd.f32 %v3603_v38, %v3602_v35  ;;  %v3679_v16 = vpop.f32.mrf.mxu1 }
 0x147   :  { %v3680_v48 = vadd.f32 %v3679_v16, %v3678_v37  ;;  %v3605_v49 = vpop.f32.mrf.mxu0 }
 0x148   :  { %v2283_v51 = vadd.f32 %v3604_v45, %v4928_v18  ;;  %v3681_v52 = vpop.f32.mrf.mxu1  ;;  %v165_v18 = vld [vmem:[%s5278_s0 + $0x4b0] sm:$0xff] }
 0x149   :  { %v3606_v56 = vpop.f32.mrf.mxu0  ;;  %v3192_v23 = vcombine.high %v165_v18, %v173_v7  ;;  %v3191_v47 = vcombine.low %v165_v18, %v173_v7 }
 0x14a   :  { %v5108_v61 = vadd.f32 %v3680_v48, %v2283_v51  ;;  %v3607_v63 = vadd.f32 %v3606_v56, %v3605_v49  ;;  %v3682_v0 = vpop.f32.mrf.mxu1 }
 0x14b   :  { %v3683_v1 = vadd.f32 %v3682_v0, %v3681_v52  ;;  %v3608_v2 = vpop.f32.mrf.mxu0  ;;  %2773 = vmatmul.mubr.bf16.gmra.mxu0 %v3159_v50 }
 0x14c   :  { %v2286_v4 = vadd.f32 %v3607_v63, %v4937_v28  ;;  %v3684_v5 = vpop.f32.mrf.mxu1  ;;  %2886 = vmatmul.mubr.bf16.gmra.mxu1 %v3161_v53  ;;  %2780 = vmatprep.mubr.bf16.mxu0 %v3176_v55  ;;  %v166_v28 = vld [vmem:[%s5278_s0 + $0x4b8] sm:$0xff] }
 0x14d   :  { %v3609_v33 = vpop.f32.mrf.mxu0  ;;  %2893 = vmatprep.mubr.bf16.mxu1 %v3178_v58  ;;  %v3194_v25 = vcombine.high %v166_v28, %v174_v13  ;;  %v3193_v50 = vcombine.low %v166_v28, %v174_v13 }
 0x14e   :  { %v5117_v11 = vadd.f32 %v3683_v1, %v2286_v4  ;;  %v3610_v12 = vadd.f32 %v3609_v33, %v3608_v2  ;;  %v3685_v43 = vpop.f32.mrf.mxu1 }
 0x14f   :  { %v3686_v14 = vadd.f32 %v3685_v43, %v3684_v5  ;;  %v3611_v15 = vpop.f32.mrf.mxu0 }
 0x150   :  { %v2291_v20 = vadd.f32 %v3610_v12, %v4946_v44  ;;  %v3687_v21 = vpop.f32.mrf.mxu1 }
 0x151   :  { %v3612_v24 = vpop.f32.mrf.mxu0 }
 0x152   :  { %v5126_v30 = vadd.f32 %v3686_v14, %v2291_v20  ;;  %v3613_v31 = vadd.f32 %v3612_v24, %v3611_v15  ;;  %v3688_v32 = vpop.f32.mrf.mxu1 }
 0x153   :  { %v3689_v35 = vadd.f32 %v3688_v32, %v3687_v21  ;;  %v3614_v36 = vpop.f32.mrf.mxu0  ;;  %2781 = vmatmul.mubr.bf16.gmra.mxu0 %v3175_v19 }
 0x154   :  { %v2294_v37 = vadd.f32 %v3613_v31, %v4955_v54  ;;  %v3690_v38 = vpop.f32.mrf.mxu1  ;;  %2894 = vmatmul.mubr.bf16.gmra.mxu1 %v3177_v22  ;;  %2788 = vmatprep.mubr.bf16.mxu0 %v3192_v23 }
 0x155   :  { %v3615_v57 = vpop.f32.mrf.mxu0  ;;  %2901 = vmatprep.mubr.bf16.mxu1 %v3194_v25 }
 0x156   :  { %v5129_v44 = vadd.f32 %v3689_v35, %v2294_v37  ;;  %v3616_v39 = vadd.f32 %v3615_v57, %v3614_v36  ;;  %v3691_v45 = vpop.f32.mrf.mxu1 }
 0x157   :  { %v3692_v16 = vadd.f32 %v3691_v45, %v3690_v38  ;;  %v3617_v3 = vpop.f32.mrf.mxu0 }
 0x158   :  { %v2299_v48 = vadd.f32 %v3616_v39, %v4964_v6  ;;  %v3693_v49 = vpop.f32.mrf.mxu1 }
 0x159   :  { %v3618_v51 = vpop.f32.mrf.mxu0 }
 0x15a   :  { %v5132_v52 = vadd.f32 %v3692_v16, %v2299_v48  ;;  %v3619_v54 = vadd.f32 %v3618_v51, %v3617_v3  ;;  %v3694_v53 = vpop.f32.mrf.mxu1 }
 0x15b   :  { %v3695_v55 = vadd.f32 %v3694_v53, %v3693_v49  ;;  %v3620_v56 = vpop.f32.mrf.mxu0  ;;  %2789 = vmatmul.mubr.bf16.gmra.mxu0 %v3191_v47 }
 0x15c   :  { %v2302_v58 = vadd.f32 %v3619_v54, %v4973_v17  ;;  %v3696_v63 = vpop.f32.mrf.mxu1  ;;  %2902 = vmatmul.mubr.bf16.gmra.mxu1 %v3193_v50 }
 0x15d   :  { %v3621_v0 = vpop.f32.mrf.mxu0 }
 0x15e   :  { %v5135_v1 = vadd.f32 %v3695_v55, %v2302_v58  ;;  %v3622_v2 = vadd.f32 %v3621_v0, %v3620_v56  ;;  %v3697_v4 = vpop.f32.mrf.mxu1 }
 0x15f   :  { %v3698_v6 = vadd.f32 %v3697_v4, %v3696_v63  ;;  %v3623_v5 = vpop.f32.mrf.mxu0 }
 0x160   :  { %v2307_v33 = vadd.f32 %v3622_v2, %v4982_v34  ;;  %v3699_v18 = vpop.f32.mrf.mxu1 }
 0x161   :  { %v3624_v7 = vpop.f32.mrf.mxu0 }
 0x162   :  { %v5138_v12 = vadd.f32 %v3698_v6, %v2307_v33  ;;  %v3625_v43 = vadd.f32 %v3624_v7, %v3623_v5  ;;  %v3700_v28 = vpop.f32.mrf.mxu1 }
 0x163   :  { %v3701_v13 = vadd.f32 %v3700_v28, %v3699_v18  ;;  %v3626_v14 = vpop.f32.mrf.mxu0 }
 0x164   :  { %v2310_v17 = vadd.f32 %v3625_v43, %v4991_v46  ;;  %v3702_v15 = vpop.f32.mrf.mxu1 }
 0x165   :  { %v3627_v19 = vpop.f32.mrf.mxu0 }
 0x166   :  { %v5141_v20 = vadd.f32 %v3701_v13, %v2310_v17  ;;  %v3628_v21 = vadd.f32 %v3627_v19, %v3626_v14  ;;  %v3703_v22 = vpop.f32.mrf.mxu1 }
 0x167   :  { %v3704_v23 = vadd.f32 %v3703_v22, %v3702_v15  ;;  %v3629_v24 = vpop.f32.mrf.mxu0 }
 0x168   :  { %v2315_v34 = vadd.f32 %v3628_v21, %v5000_v62  ;;  %v3705_v25 = vpop.f32.mrf.mxu1 }
 0x169   :  { %v3630_v31 = vpop.f32.mrf.mxu0 }
 0x16a   :  { %v5144_v32 = vadd.f32 %v3704_v23, %v2315_v34  ;;  %v3631_v35 = vadd.f32 %v3630_v31, %v3629_v24  ;;  %v3706_v36 = vpop.f32.mrf.mxu1 }
 0x16b   :  { %v3707_v37 = vadd.f32 %v3706_v36, %v3705_v25  ;;  %v3632_v38 = vpop.f32.mrf.mxu0 }
 0x16c   :  { %v2318_v46 = vadd.f32 %v3631_v35, %v5009_v10  ;;  %v3708_v57 = vpop.f32.mrf.mxu1 }
 0x16d   :  { %v3633_v39 = vpop.f32.mrf.mxu0 }
 0x16e   :  { %v5147_v45 = vadd.f32 %v3707_v37, %v2318_v46  ;;  %v3634_v16 = vadd.f32 %v3633_v39, %v3632_v38  ;;  %v3709_v3 = vpop.f32.mrf.mxu1 }
 0x16f   :  { %v3710_v47 = vadd.f32 %v3709_v3, %v3708_v57  ;;  %v3635_v48 = vpop.f32.mrf.mxu0 }
 0x170   :  { %v2323_v62 = vadd.f32 %v3634_v16, %v5018_v27  ;;  %v3711_v49 = vpop.f32.mrf.mxu1 }
 0x171   :  { %v3636_v50 = vpop.f32.mrf.mxu0 }
 0x172   :  { %v5150_v51 = vadd.f32 %v3710_v47, %v2323_v62  ;;  %v3637_v54 = vadd.f32 %v3636_v50, %v3635_v48  ;;  %v3712_v53 = vpop.f32.mrf.mxu1 }
 0x173   :  { %v3713_v55 = vadd.f32 %v3712_v53, %v3711_v49  ;;  %v3638_v56 = vpop.f32.mrf.mxu0 }
 0x174   :  { %v2326_v10 = vadd.f32 %v3637_v54, %v5027_v40  ;;  %v3714_v58 = vpop.f32.mrf.mxu1 }
 0x175   :  { %v3639_v63 = vpop.f32.mrf.mxu0 }
 0x176   :  { %v5153_v0 = vadd.f32 %v3713_v55, %v2326_v10  ;;  %v3640_v2 = vadd.f32 %v3639_v63, %v3638_v56  ;;  %v3715_v4 = vpop.f32.mrf.mxu1 }
 0x177   :  { %v3716_v6 = vadd.f32 %v3715_v4, %v3714_v58  ;;  %v3641_v5 = vpop.f32.mrf.mxu0 }
 0x178   :  { %v2331_v27 = vadd.f32 %v3640_v2, %v5036_v59  ;;  %v3717_v33 = vpop.f32.mrf.mxu1 }
 0x179   :  { %v3642_v18 = vpop.f32.mrf.mxu0 }
 0x17a   :  { %v5156_v7 = vadd.f32 %v3716_v6, %v2331_v27  ;;  %v3643_v43 = vadd.f32 %v3642_v18, %v3641_v5  ;;  %v3718_v28 = vpop.f32.mrf.mxu1 }
 0x17b   :  { %v3719_v13 = vadd.f32 %v3718_v28, %v3717_v33  ;;  %v3644_v14 = vpop.f32.mrf.mxu0 }
 0x17c   :  { %v2334_v40 = vadd.f32 %v3643_v43, %v5045_v8  ;;  %v3720_v17 = vpop.f32.mrf.mxu1 }
 0x17d   :  { %v3645_v15 = vpop.f32.mrf.mxu0 }
 0x17e   :  { %v5159_v19 = vadd.f32 %v3719_v13, %v2334_v40  ;;  %v3646_v21 = vadd.f32 %v3645_v15, %v3644_v14  ;;  %v3721_v22 = vpop.f32.mrf.mxu1 }
 0x17f   :  { %v3722_v23 = vadd.f32 %v3721_v22, %v3720_v17  ;;  %v3647_v24 = vpop.f32.mrf.mxu0 }
 0x180   :  { %v2339_v59 = vadd.f32 %v3646_v21, %v5054_v26  ;;  %v3723_v34 = vpop.f32.mrf.mxu1 }
 0x181   :  { %v3648_v25 = vpop.f32.mrf.mxu0 }
 0x182   :  { %v5162_v31 = vadd.f32 %v3722_v23, %v2339_v59  ;;  %v3649_v35 = vadd.f32 %v3648_v25, %v3647_v24  ;;  %v3724_v36 = vpop.f32.mrf.mxu1 }
 0x183   :  { %v3725_v37 = vadd.f32 %v3724_v36, %v3723_v34  ;;  %v3742_v38 = vpop.f32.mrf.mxu0 }
 0x184   :  { %v2342_v8 = vadd.f32 %v3649_v35, %v5063_v41  ;;  %v3818_v46 = vpop.f32.mrf.mxu1 }
 0x185   :  { %v3743_v57 = vpop.f32.mrf.mxu0 }
 0x186   :  { %v5165_v39 = vadd.f32 %v3725_v37, %v2342_v8  ;;  %v3744_v16 = vadd.f32 %v3743_v57, %v3742_v38  ;;  %v3819_v3 = vpop.f32.mrf.mxu1 }
 0x187   :  { %v3820_v47 = vadd.f32 %v3819_v3, %v3818_v46  ;;  %v3745_v48 = vpop.f32.mrf.mxu0 }
 0x188   :  { %v2493_v26 = vadd.f32 %v3744_v16, %v5072_v60  ;;  %v3821_v62 = vpop.f32.mrf.mxu1 }
 0x189   :  { %v3746_v49 = vpop.f32.mrf.mxu0 }
 0x18a   :  { %v5168_v50 = vadd.f32 %v3820_v47, %v2493_v26  ;;  %v3747_v54 = vadd.f32 %v3746_v49, %v3745_v48  ;;  %v3822_v53 = vpop.f32.mrf.mxu1 }
 0x18b   :  { %v3823_v55 = vadd.f32 %v3822_v53, %v3821_v62  ;;  %v3748_v56 = vpop.f32.mrf.mxu0 }
 0x18c   :  { %v2496_v41 = vadd.f32 %v3747_v54, %v5081_v9  ;;  %v3824_v10 = vpop.f32.mrf.mxu1 }
 0x18d   :  { %v3749_v58 = vpop.f32.mrf.mxu0 }
 0x18e   :  { %v5171_v63 = vadd.f32 %v3823_v55, %v2496_v41  ;;  %v3750_v2 = vadd.f32 %v3749_v58, %v3748_v56  ;;  %v3825_v4 = vpop.f32.mrf.mxu1 }
 0x18f   :  { %v3826_v6 = vadd.f32 %v3825_v4, %v3824_v10  ;;  %v3751_v5 = vpop.f32.mrf.mxu0 }
 0x190   :  { %v2501_v60 = vadd.f32 %v3750_v2, %v5090_v29  ;;  %v3827_v27 = vpop.f32.mrf.mxu1 }
 0x191   :  { %v3752_v33 = vpop.f32.mrf.mxu0 }
 0x192   :  { %v5174_v18 = vadd.f32 %v3826_v6, %v2501_v60  ;;  %v3753_v43 = vadd.f32 %v3752_v33, %v3751_v5  ;;  %v3828_v28 = vpop.f32.mrf.mxu1 }
 0x193   :  { %v3829_v13 = vadd.f32 %v3828_v28, %v3827_v27  ;;  %v3754_v14 = vpop.f32.mrf.mxu0 }
 0x194   :  { %v2504_v9 = vadd.f32 %v3753_v43, %v5099_v42  ;;  %v3830_v40 = vpop.f32.mrf.mxu1 }
 0x195   :  { %v3755_v17 = vpop.f32.mrf.mxu0 }
 0x196   :  { %v5177_v15 = vadd.f32 %v3829_v13, %v2504_v9  ;;  %v3756_v21 = vadd.f32 %v3755_v17, %v3754_v14  ;;  %v3831_v22 = vpop.f32.mrf.mxu1 }
 0x197   :  { %v3832_v23 = vadd.f32 %v3831_v22, %v3830_v40  ;;  %v3757_v24 = vpop.f32.mrf.mxu0 }
 0x198   :  { %v2509_v29 = vadd.f32 %v3756_v21, %v5108_v61  ;;  %v3833_v59 = vpop.f32.mrf.mxu1 }
 0x199   :  { %v3758_v34 = vpop.f32.mrf.mxu0 }
 0x19a   :  { %v5180_v25 = vadd.f32 %v3832_v23, %v2509_v29  ;;  %v3759_v35 = vadd.f32 %v3758_v34, %v3757_v24  ;;  %v3834_v36 = vpop.f32.mrf.mxu1 }
 0x19b   :  { %v3835_v37 = vadd.f32 %v3834_v36, %v3833_v59  ;;  %v3760_v38 = vpop.f32.mrf.mxu0 }
 0x19c   :  { %v2512_v42 = vadd.f32 %v3759_v35, %v5117_v11  ;;  %v3836_v8 = vpop.f32.mrf.mxu1 }
 0x19d   :  { %v3761_v46 = vpop.f32.mrf.mxu0 }
 0x19e   :  { %v5183_v57 = vadd.f32 %v3835_v37, %v2512_v42  ;;  %v3762_v16 = vadd.f32 %v3761_v46, %v3760_v38  ;;  %v3837_v3 = vpop.f32.mrf.mxu1 }
 0x19f   :  { %v3838_v47 = vadd.f32 %v3837_v3, %v3836_v8  ;;  %v3763_v48 = vpop.f32.mrf.mxu0 }
 0x1a0   :  { %v2517_v61 = vadd.f32 %v3762_v16, %v5126_v30  ;;  %v3839_v26 = vpop.f32.mrf.mxu1 }
 0x1a1   :  { %v3764_v62 = vpop.f32.mrf.mxu0 }
 0x1a2   :  { %v5186_v49 = vadd.f32 %v3838_v47, %v2517_v61  ;;  %v3765_v54 = vadd.f32 %v3764_v62, %v3763_v48  ;;  %v3840_v53 = vpop.f32.mrf.mxu1 }
 0x1a3   :  { %v3841_v55 = vadd.f32 %v3840_v53, %v3839_v26  ;;  %v3766_v56 = vpop.f32.mrf.mxu0 }
 0x1a4   :  { %v2520_v11 = vadd.f32 %v3765_v54, %v5129_v44  ;;  %v3842_v41 = vpop.f32.mrf.mxu1 }
 0x1a5   :  { %v3767_v10 = vpop.f32.mrf.mxu0 }
 0x1a6   :  { %v5189_v58 = vadd.f32 %v3841_v55, %v2520_v11  ;;  %v3768_v2 = vadd.f32 %v3767_v10, %v3766_v56  ;;  %v3843_v4 = vpop.f32.mrf.mxu1 }
 0x1a7   :  { %v3844_v6 = vadd.f32 %v3843_v4, %v3842_v41  ;;  %v3769_v5 = vpop.f32.mrf.mxu0 }
 0x1a8   :  { %v2525_v30 = vadd.f32 %v3768_v2, %v5132_v52  ;;  %v3845_v60 = vpop.f32.mrf.mxu1 }
 0x1a9   :  { %v3770_v27 = vpop.f32.mrf.mxu0 }
 0x1aa   :  { %v5192_v33 = vadd.f32 %v3844_v6, %v2525_v30  ;;  %v3771_v43 = vadd.f32 %v3770_v27, %v3769_v5  ;;  %v3846_v28 = vpop.f32.mrf.mxu1 }
 0x1ab   :  { %v3847_v13 = vadd.f32 %v3846_v28, %v3845_v60  ;;  %v3772_v14 = vpop.f32.mrf.mxu0 }
 0x1ac   :  { %v2528_v44 = vadd.f32 %v3771_v43, %v5135_v1  ;;  %v3848_v9 = vpop.f32.mrf.mxu1 }
 0x1ad   :  { %v3773_v40 = vpop.f32.mrf.mxu0 }
 0x1ae   :  { %v5195_v17 = vadd.f32 %v3847_v13, %v2528_v44  ;;  %v3774_v21 = vadd.f32 %v3773_v40, %v3772_v14  ;;  %v3849_v22 = vpop.f32.mrf.mxu1 }
 0x1af   :  { %v3850_v23 = vadd.f32 %v3849_v22, %v3848_v9  ;;  %v3775_v24 = vpop.f32.mrf.mxu0 }
 0x1b0   :  { %v2533_v52 = vadd.f32 %v3774_v21, %v5138_v12  ;;  %v3851_v29 = vpop.f32.mrf.mxu1 }
 0x1b1   :  { %v3776_v59 = vpop.f32.mrf.mxu0 }
 0x1b2   :  { %v5198_v34 = vadd.f32 %v3850_v23, %v2533_v52  ;;  %v3777_v35 = vadd.f32 %v3776_v59, %v3775_v24  ;;  %v3852_v36 = vpop.f32.mrf.mxu1 }
 0x1b3   :  { %v3853_v37 = vadd.f32 %v3852_v36, %v3851_v29  ;;  %v3778_v38 = vpop.f32.mrf.mxu0 }
 0x1b4   :  { %v2536_v1 = vadd.f32 %v3777_v35, %v5141_v20  ;;  %v3854_v42 = vpop.f32.mrf.mxu1 }
 0x1b5   :  { %v3779_v8 = vpop.f32.mrf.mxu0 }
 0x1b6   :  { %v5201_v46 = vadd.f32 %v3853_v37, %v2536_v1  ;;  %v3780_v16 = vadd.f32 %v3779_v8, %v3778_v38  ;;  %v3855_v3 = vpop.f32.mrf.mxu1 }
 0x1b7   :  { %v3856_v47 = vadd.f32 %v3855_v3, %v3854_v42  ;;  %v3781_v48 = vpop.f32.mrf.mxu0 }
 0x1b8   :  { %v2541_v12 = vadd.f32 %v3780_v16, %v5144_v32  ;;  %v3857_v61 = vpop.f32.mrf.mxu1 }
 0x1b9   :  { %v3782_v26 = vpop.f32.mrf.mxu0 }
 0x1ba   :  { %v5204_v62 = vadd.f32 %v3856_v47, %v2541_v12  ;;  %v3783_v54 = vadd.f32 %v3782_v26, %v3781_v48  ;;  %v3858_v53 = vpop.f32.mrf.mxu1 }
 0x1bb   :  { %v3859_v55 = vadd.f32 %v3858_v53, %v3857_v61  ;;  %v3784_v56 = vpop.f32.mrf.mxu0 }
 0x1bc   :  { %v2544_v20 = vadd.f32 %v3783_v54, %v5147_v45  ;;  %v3860_v11 = vpop.f32.mrf.mxu1 }
 0x1bd   :  { %v3785_v41 = vpop.f32.mrf.mxu0 }
 0x1be   :  { %v5207_v10 = vadd.f32 %v3859_v55, %v2544_v20  ;;  %v3786_v2 = vadd.f32 %v3785_v41, %v3784_v56  ;;  %v3861_v4 = vpop.f32.mrf.mxu1 }
 0x1bf   :  { %v3862_v6 = vadd.f32 %v3861_v4, %v3860_v11  ;;  %v3787_v5 = vpop.f32.mrf.mxu0 }
 0x1c0   :  { %v2549_v32 = vadd.f32 %v3786_v2, %v5150_v51  ;;  %v3863_v30 = vpop.f32.mrf.mxu1 }
 0x1c1   :  { %v3788_v60 = vpop.f32.mrf.mxu0 }
 0x1c2   :  { %v5210_v27 = vadd.f32 %v3862_v6, %v2549_v32  ;;  %v3789_v43 = vadd.f32 %v3788_v60, %v3787_v5  ;;  %v3864_v28 = vpop.f32.mrf.mxu1 }
 0x1c3   :  { %v3865_v13 = vadd.f32 %v3864_v28, %v3863_v30  ;;  %v3790_v14 = vpop.f32.mrf.mxu0 }
 0x1c4   :  { %v2552_v45 = vadd.f32 %v3789_v43, %v5153_v0  ;;  %v3866_v44 = vpop.f32.mrf.mxu1 }
 0x1c5   :  { %v3791_v9 = vpop.f32.mrf.mxu0 }
 0x1c6   :  { %v5213_v40 = vadd.f32 %v3865_v13, %v2552_v45  ;;  %v3792_v21 = vadd.f32 %v3791_v9, %v3790_v14  ;;  %v3867_v22 = vpop.f32.mrf.mxu1 }
 0x1c7   :  { %v3868_v23 = vadd.f32 %v3867_v22, %v3866_v44  ;;  %v3793_v24 = vpop.f32.mrf.mxu0 }
 0x1c8   :  { %v2557_v51 = vadd.f32 %v3792_v21, %v5156_v7  ;;  %v3869_v52 = vpop.f32.mrf.mxu1 }
 0x1c9   :  { %v3794_v29 = vpop.f32.mrf.mxu0 }
 0x1ca   :  { %v5216_v59 = vadd.f32 %v3868_v23, %v2557_v51  ;;  %v3795_v35 = vadd.f32 %v3794_v29, %v3793_v24  ;;  %v3870_v36 = vpop.f32.mrf.mxu1 }
 0x1cb   :  { %v3871_v37 = vadd.f32 %v3870_v36, %v3869_v52  ;;  %v3796_v38 = vpop.f32.mrf.mxu0 }
 0x1cc   :  { %v2560_v0 = vadd.f32 %v3795_v35, %v5159_v19  ;;  %v3872_v1 = vpop.f32.mrf.mxu1 }
 0x1cd   :  { %v3797_v42 = vpop.f32.mrf.mxu0 }
 0x1ce   :  { %v5219_v8 = vadd.f32 %v3871_v37, %v2560_v0  ;;  %v3798_v16 = vadd.f32 %v3797_v42, %v3796_v38  ;;  %v3873_v3 = vpop.f32.mrf.mxu1 }
 0x1cf   :  { %v3874_v47 = vadd.f32 %v3873_v3, %v3872_v1  ;;  %v3799_v48 = vpop.f32.mrf.mxu0 }
 0x1d0   :  { %v2565_v7 = vadd.f32 %v3798_v16, %v5162_v31  ;;  %v3875_v12 = vpop.f32.mrf.mxu1 }
 0x1d1   :  { %v3800_v61 = vpop.f32.mrf.mxu0 }
 0x1d2   :  { %v5222_v26 = vadd.f32 %v3874_v47, %v2565_v7  ;;  %v3801_v54 = vadd.f32 %v3800_v61, %v3799_v48  ;;  %v3876_v53 = vpop.f32.mrf.mxu1 }
 0x1d3   :  { %v3877_v55 = vadd.f32 %v3876_v53, %v3875_v12  ;;  %v3894_v56 = vpop.f32.mrf.mxu0 }
 0x1d4   :  { %v2568_v19 = vadd.f32 %v3801_v54, %v5165_v39  ;;  %v3970_v20 = vpop.f32.mrf.mxu1 }
 0x1d5   :  { %v3895_v11 = vpop.f32.mrf.mxu0 }
 0x1d6   :  { %v5225_v41 = vadd.f32 %v3877_v55, %v2568_v19  ;;  %v3896_v2 = vadd.f32 %v3895_v11, %v3894_v56  ;;  %v3971_v4 = vpop.f32.mrf.mxu1 }
 0x1d7   :  { %v3897_v6 = vpop.f32.mrf.mxu0  ;;  %v3972_v30 = vadd.f32 %v3971_v4, %v3970_v20 }
 0x1d8   :  { %v2719_v5 = vadd.f32 %v3896_v2, %v5168_v50  ;;  %v3973_v31 = vpop.f32.mrf.mxu1 }
 0x1d9   :  { %v3898_v32 = vpop.f32.mrf.mxu0 }
 0x1da   :  { %v3899_v60 = vadd.f32 %v3898_v32, %v3897_v6  ;;  %v3974_v43 = vpop.f32.mrf.mxu1  ;;  %v2832_v13 = vadd.f32 %v3972_v30, %v2719_v5 }
 0x1db   :  { %v3900_v28 = vpop.f32.mrf.mxu0  ;;  %v3975_v45 = vadd.f32 %v3974_v43, %v3973_v31 }
 0x1dc   :  { %v2722_v14 = vadd.f32 %v3899_v60, %v5171_v63  ;;  %v3976_v39 = vpop.f32.mrf.mxu1  ;;  %v2910_v24 = vmax.f32 %v2832_v13, 0.0 }
 0x1dd   :  { %v3901_v44 = vpop.f32.mrf.mxu0 }
 0x1de   :  { %v2835_v9 = vadd.f32 %v3975_v45, %v2722_v14  ;;  %v3902_v21 = vadd.f32 %v3901_v44, %v3900_v28  ;;  %v3977_v22 = vpop.f32.mrf.mxu1 }
 0x1df   :  { %v3903_v23 = vpop.f32.mrf.mxu0  ;;  %v3978_v36 = vadd.f32 %v3977_v22, %v3976_v39 }
 0x1e0   :  { %v2911_v51 = vmax.f32 %v2835_v9, 0.0  ;;  %v2727_v50 = vadd.f32 %v3902_v21, %v5174_v18  ;;  %v3979_v52 = vpop.f32.mrf.mxu1 }
 0x1e1   :  { %v3904_v29 = vpop.f32.mrf.mxu0 }
 0x1e2   :  { %v3366_v35 = vpack.c.bf16 %v2911_v51, %v2910_v24  ;;  %v3905_v37 = vadd.f32 %v3904_v29, %v3903_v23  ;;  %v3980_v38 = vpop.f32.mrf.mxu1  ;;  %v2840_v63 = vadd.f32 %v3978_v36, %v2727_v50 }
 0x1e3   :  { %v3906_v0 = vpop.f32.mrf.mxu0  ;;  %v3981_v42 = vadd.f32 %v3980_v38, %v3979_v52 }
 0x1e4   :  { %3367 = vst [vmem:[%s5280_s3] sm:$0xff] %v3366_v35   ;;  %v2730_v1 = vadd.f32 %v3905_v37, %v5177_v15  ;;  %v3982_v16 = vpop.f32.mrf.mxu1  ;;  %v2912_v12 = vmax.f32 %v2840_v63, 0.0 }
 0x1e5   :  { %v3907_v3 = vpop.f32.mrf.mxu0 }
 0x1e6   :  { %v2843_v47 = vadd.f32 %v3981_v42, %v2730_v1  ;;  %v3908_v48 = vadd.f32 %v3907_v3, %v3906_v0  ;;  %v3983_v18 = vpop.f32.mrf.mxu1 }
 0x1e7   :  { %v3909_v7 = vpop.f32.mrf.mxu0  ;;  %v3984_v19 = vadd.f32 %v3983_v18, %v3982_v16 }
 0x1e8   :  { %v2913_v61 = vmax.f32 %v2843_v47, 0.0  ;;  %v2735_v54 = vadd.f32 %v3908_v48, %v5180_v25  ;;  %v3985_v53 = vpop.f32.mrf.mxu1 }
 0x1e9   :  { %v3910_v55 = vpop.f32.mrf.mxu0 }
 0x1ea   :  { %v3371_v56 = vpack.c.bf16 %v2913_v61, %v2912_v12  ;;  %v3911_v20 = vadd.f32 %v3910_v55, %v3909_v7  ;;  %v3986_v11 = vpop.f32.mrf.mxu1  ;;  %v2848_v15 = vadd.f32 %v3984_v19, %v2735_v54 }
 0x1eb   :  { %v3912_v2 = vpop.f32.mrf.mxu0  ;;  %v3987_v6 = vadd.f32 %v3986_v11, %v3985_v53 }
 0x1ec   :  { %3413 = vst [vmem:[%s5280_s3 + $0x8] sm:$0xff] %v3371_v56   ;;  %v2738_v4 = vadd.f32 %v3911_v20, %v5183_v57  ;;  %v3988_v5 = vpop.f32.mrf.mxu1  ;;  %v2914_v43 = vmax.f32 %v2848_v15, 0.0 }
 0x1ed   :  { %v3913_v31 = vpop.f32.mrf.mxu0 }
 0x1ee   :  { %v2851_v32 = vadd.f32 %v3987_v6, %v2738_v4  ;;  %v3914_v30 = vadd.f32 %v3913_v31, %v3912_v2  ;;  %v3989_v25 = vpop.f32.mrf.mxu1 }
 0x1ef   :  { %v3915_v60 = vpop.f32.mrf.mxu0  ;;  %v3990_v44 = vadd.f32 %v3989_v25, %v3988_v5 }
 0x1f0   :  { %v2915_v28 = vmax.f32 %v2851_v32, 0.0  ;;  %v2743_v13 = vadd.f32 %v3914_v30, %v5186_v49  ;;  %v3991_v14 = vpop.f32.mrf.mxu1 }
 0x1f1   :  { %v3916_v45 = vpop.f32.mrf.mxu0 }
 0x1f2   :  { %v3376_v39 = vpack.c.bf16 %v2915_v28, %v2914_v43  ;;  %v3917_v9 = vadd.f32 %v3916_v45, %v3915_v60  ;;  %v3992_v21 = vpop.f32.mrf.mxu1  ;;  %v2856_v57 = vadd.f32 %v3990_v44, %v2743_v13 }
 0x1f3   :  { %v3918_v22 = vpop.f32.mrf.mxu0  ;;  %v3993_v24 = vadd.f32 %v3992_v21, %v3991_v14 }
 0x1f4   :  { %3414 = vst [vmem:[%s5280_s3 + $0x10] sm:$0xff] %v3376_v39   ;;  %v2746_v23 = vadd.f32 %v3917_v9, %v5189_v58  ;;  %v3994_v51 = vpop.f32.mrf.mxu1  ;;  %v2916_v36 = vmax.f32 %v2856_v57, 0.0 }
 0x1f5   :  { %v3919_v50 = vpop.f32.mrf.mxu0 }
 0x1f6   :  { %v2859_v52 = vadd.f32 %v3993_v24, %v2746_v23  ;;  %v3920_v29 = vadd.f32 %v3919_v50, %v3918_v22  ;;  %v3995_v49 = vpop.f32.mrf.mxu1 }
 0x1f7   :  { %v3921_v35 = vpop.f32.mrf.mxu0  ;;  %v3996_v42 = vadd.f32 %v3995_v49, %v3994_v51 }
 0x1f8   :  { %v2917_v37 = vmax.f32 %v2859_v52, 0.0  ;;  %v2751_v38 = vadd.f32 %v3920_v29, %v5192_v33  ;;  %v3997_v0 = vpop.f32.mrf.mxu1 }
 0x1f9   :  { %v3922_v63 = vpop.f32.mrf.mxu0 }
 0x1fa   :  { %v3381_v1 = vpack.c.bf16 %v2917_v37, %v2916_v36  ;;  %v3923_v16 = vadd.f32 %v3922_v63, %v3921_v35  ;;  %v3998_v3 = vpop.f32.mrf.mxu1  ;;  %v2864_v58 = vadd.f32 %v3996_v42, %v2751_v38 }
 0x1fb   :  { %v3924_v47 = vpop.f32.mrf.mxu0  ;;  %v3999_v18 = vadd.f32 %v3998_v3, %v3997_v0 }
 0x1fc   :  { %3415 = vst [vmem:[%s5280_s3 + $0x18] sm:$0xff] %v3381_v1   ;;  %v2754_v48 = vadd.f32 %v3923_v16, %v5195_v17  ;;  %v4000_v7 = vpop.f32.mrf.mxu1  ;;  %v2918_v55 = vmax.f32 %v2864_v58, 0.0 }
 0x1fd   :  { %v3925_v12 = vpop.f32.mrf.mxu0 }
 0x1fe   :  { %v2867_v61 = vadd.f32 %v3999_v18, %v2754_v48  ;;  %v3926_v54 = vadd.f32 %v3925_v12, %v3924_v47  ;;  %v4001_v33 = vpop.f32.mrf.mxu1 }
 0x1ff   :  { %v3927_v53 = vpop.f32.mrf.mxu0  ;;  %v4002_v15 = vadd.f32 %v4001_v33, %v4000_v7 }
 0x200   :  { %v2919_v56 = vmax.f32 %v2867_v61, 0.0  ;;  %v2759_v19 = vadd.f32 %v3926_v54, %v5198_v34  ;;  %v4003_v20 = vpop.f32.mrf.mxu1 }
 0x201   :  { %v3928_v11 = vpop.f32.mrf.mxu0 }
 0x202   :  { %v3386_v2 = vpack.c.bf16 %v2919_v56, %v2918_v55  ;;  %v3929_v4 = vadd.f32 %v3928_v11, %v3927_v53  ;;  %v4004_v6 = vpop.f32.mrf.mxu1  ;;  %v2872_v17 = vadd.f32 %v4002_v15, %v2759_v19 }
 0x203   :  { %v3930_v5 = vpop.f32.mrf.mxu0  ;;  %v4005_v32 = vadd.f32 %v4004_v6, %v4003_v20 }
 0x204   :  { %3416 = vst [vmem:[%s5280_s3 + $0x20] sm:$0xff] %v3386_v2   ;;  %v2762_v31 = vadd.f32 %v3929_v4, %v5201_v46  ;;  %v4006_v30 = vpop.f32.mrf.mxu1  ;;  %v2920_v13 = vmax.f32 %v2872_v17, 0.0 }
 0x205   :  { %v3931_v25 = vpop.f32.mrf.mxu0 }
 0x206   :  { %v2875_v60 = vadd.f32 %v4005_v32, %v2762_v31  ;;  %v3932_v43 = vadd.f32 %v3931_v25, %v3930_v5  ;;  %v4007_v34 = vpop.f32.mrf.mxu1 }
 0x207   :  { %v3933_v28 = vpop.f32.mrf.mxu0  ;;  %v4008_v21 = vadd.f32 %v4007_v34, %v4006_v30 }
 0x208   :  { %v2921_v14 = vmax.f32 %v2875_v60, 0.0  ;;  %v2767_v45 = vadd.f32 %v3932_v43, %v5204_v62  ;;  %v4009_v39 = vpop.f32.mrf.mxu1 }
 0x209   :  { %v3934_v44 = vpop.f32.mrf.mxu0 }
 0x20a   :  { %v3391_v9 = vpack.c.bf16 %v2921_v14, %v2920_v13  ;;  %v3935_v22 = vadd.f32 %v3934_v44, %v3933_v28  ;;  %v4010_v57 = vpop.f32.mrf.mxu1  ;;  %v2880_v46 = vadd.f32 %v4008_v21, %v2767_v45 }
 0x20b   :  { %v3936_v23 = vpop.f32.mrf.mxu0  ;;  %v4011_v51 = vadd.f32 %v4010_v57, %v4009_v39 }
 0x20c   :  { %3417 = vst [vmem:[%s5280_s3 + $0x28] sm:$0xff] %v3391_v9   ;;  %v2770_v24 = vadd.f32 %v3935_v22, %v5207_v10  ;;  %v4012_v50 = vpop.f32.mrf.mxu1  ;;  %v2922_v36 = vmax.f32 %v2880_v46, 0.0 }
 0x20d   :  { %v3937_v52 = vpop.f32.mrf.mxu0 }
 0x20e   :  { %v2883_v29 = vadd.f32 %v4011_v51, %v2770_v24  ;;  %v3938_v49 = vadd.f32 %v3937_v52, %v3936_v23  ;;  %v4013_v62 = vpop.f32.mrf.mxu1 }
 0x20f   :  { %v3939_v35 = vpop.f32.mrf.mxu0  ;;  %v4014_v42 = vadd.f32 %v4013_v62, %v4012_v50 }
 0x210   :  { %v2923_v37 = vmax.f32 %v2883_v29, 0.0  ;;  %v2775_v38 = vadd.f32 %v3938_v49, %v5210_v27  ;;  %v4015_v0 = vpop.f32.mrf.mxu1 }
 0x211   :  { %v3940_v63 = vpop.f32.mrf.mxu0 }
 0x212   :  { %v3396_v1 = vpack.c.bf16 %v2923_v37, %v2922_v36  ;;  %v3941_v16 = vadd.f32 %v3940_v63, %v3939_v35  ;;  %v4016_v3 = vpop.f32.mrf.mxu1  ;;  %v2888_v10 = vadd.f32 %v4014_v42, %v2775_v38 }
 0x213   :  { %v3942_v47 = vpop.f32.mrf.mxu0  ;;  %v4017_v48 = vadd.f32 %v4016_v3, %v4015_v0 }
 0x214   :  { %3418 = vst [vmem:[%s5280_s3 + $0x30] sm:$0xff] %v3396_v1   ;;  %v2778_v58 = vadd.f32 %v3941_v16, %v5213_v40  ;;  %v4018_v18 = vpop.f32.mrf.mxu1  ;;  %v2924_v33 = vmax.f32 %v2888_v10, 0.0 }
 0x215   :  { %v3943_v7 = vpop.f32.mrf.mxu0 }
 0x216   :  { %v2891_v12 = vadd.f32 %v4017_v48, %v2778_v58  ;;  %v3944_v61 = vadd.f32 %v3943_v7, %v3942_v47  ;;  %v4019_v27 = vpop.f32.mrf.mxu1 }
 0x217   :  { %v3945_v54 = vpop.f32.mrf.mxu0  ;;  %v4020_v11 = vadd.f32 %v4019_v27, %v4018_v18 }
 0x218   :  { %v2925_v53 = vmax.f32 %v2891_v12, 0.0  ;;  %v2783_v55 = vadd.f32 %v3944_v61, %v5216_v59  ;;  %v4021_v56 = vpop.f32.mrf.mxu1 }
 0x219   :  { %v3946_v19 = vpop.f32.mrf.mxu0 }
 0x21a   :  { %v3401_v20 = vpack.c.bf16 %v2925_v53, %v2924_v33  ;;  %v3947_v2 = vadd.f32 %v3946_v19, %v3945_v54  ;;  %v4022_v15 = vpop.f32.mrf.mxu1  ;;  %v2896_v40 = vadd.f32 %v4020_v11, %v2783_v55 }
 0x21b   :  { %v3948_v4 = vpop.f32.mrf.mxu0  ;;  %v4023_v5 = vadd.f32 %v4022_v15, %v4021_v56 }
 0x21c   :  { %3419 = vst [vmem:[%s5280_s3 + $0x38] sm:$0xff] %v3401_v20   ;;  %v2786_v6 = vadd.f32 %v3947_v2, %v5219_v8  ;;  %v4024_v17 = vpop.f32.mrf.mxu1  ;;  %v2926_v60 = vmax.f32 %v2896_v40, 0.0 }
 0x21d   :  { %v3949_v31 = vpop.f32.mrf.mxu0 }
 0x21e   :  { %v2899_v32 = vadd.f32 %v4023_v5, %v2786_v6  ;;  %v3950_v30 = vadd.f32 %v3949_v31, %v3948_v4  ;;  %v4025_v59 = vpop.f32.mrf.mxu1 }
 0x21f   :  { %v3951_v25 = vpop.f32.mrf.mxu0  ;;  %v4026_v45 = vadd.f32 %v4025_v59, %v4024_v17 }
 0x220   :  { %v2927_v43 = vmax.f32 %v2899_v32, 0.0  ;;  %v2791_v34 = vadd.f32 %v3950_v30, %v5222_v26  ;;  %v4027_v28 = vpop.f32.mrf.mxu1 }
 0x221   :  { %v3952_v13 = vpop.f32.mrf.mxu0 }
 0x222   :  { %v3406_v14 = vpack.c.bf16 %v2927_v43, %v2926_v60  ;;  %v3953_v39 = vadd.f32 %v3952_v13, %v3951_v25  ;;  %v4028_v44 = vpop.f32.mrf.mxu1  ;;  %v2904_v8 = vadd.f32 %v4026_v45, %v2791_v34 }
 0x223   :  { %v4029_v21 = vadd.f32 %v4028_v44, %v4027_v28 }
 0x224   :  { %3420 = vst [vmem:[%s5280_s3 + $0x40] sm:$0xff] %v3406_v14   ;;  %v2794_v9 = vadd.f32 %v3953_v39, %v5225_v41  ;;  %v2928_v57 = vmax.f32 %v2904_v8, 0.0 }
 0x226   :  { %v2907_v22 = vadd.f32 %v4029_v21, %v2794_v9 }
 0x228   :  { %v2929_v23 = vmax.f32 %v2907_v22, 0.0 }
 0x22a   :  { %v3411_v46 = vpack.c.bf16 %v2929_v23, %v2928_v57 }
 0x22c   :  { %3421 = vst [vmem:[%s5280_s3 + $0x48] sm:$0xff] %v3411_v46  }

// kernel: dqn_forward.6
= control target key start
LH: loop header
LB: loop body
LE: loop exit
PB: predicated region body
PF: predicated region fallthrough
CT: control target
= control target key end

     0   :  { %s2525_s1 = inlined_call_operand.vmem [shape: bf16[1152,128], index: 1, kind: input, shape index: {}]   ;;  %s2526_s0 = inlined_call_operand.vmem [shape: bf16[96,1152], index: 0, kind: input, shape index: {}]   ;;  %s2527_s2 = inlined_call_operand.vmem [shape: f32[1,128], index: 2, kind: input, shape index: {}]   ;;  %s2528_s3 = inlined_call_operand.vmem [shape: bf16[96,128], index: 3, kind: output, shape index: {}]  }
   0x1   :  { %v1867_v0 = vld [vmem:[%s2525_s1 + $0x78] sm:$0xff]   ;;  %v1871_v4 = vld [vmem:[%s2525_s1 + $0x70] sm:$0xff]   ;;  %v1875_v8 = vld [vmem:[%s2525_s1 + $0x68] sm:$0xff]  }
   0x2   :  { %v1868_v1 = vld [vmem:[%s2525_s1 + $0xf8] sm:$0xff]   ;;  %1601 = vmatprep.subr.bf16.mxu0 %v1867_v0  ;;  %v1872_v5 = vld [vmem:[%s2525_s1 + $0xf0] sm:$0xff]   ;;  %v1876_v9 = vld [vmem:[%s2525_s1 + $0xe8] sm:$0xff]  }
   0x3   :  { %v1869_v2 = vld [vmem:[%s2525_s1 + $0x38] sm:$0xff]   ;;  %1653 = vmatprep.subr.bf16.mxu1 %v1868_v1  ;;  %v1873_v6 = vld [vmem:[%s2525_s1 + $0x30] sm:$0xff]   ;;  %v1877_v10 = vld [vmem:[%s2525_s1 + $0x28] sm:$0xff]  }
   0x4   :  { %v1870_v3 = vld [vmem:[%s2525_s1 + $0xb8] sm:$0xff]   ;;  %1602 = vmatpush3.bf16.msra.mxu0 %v1869_v2  ;;  %v1874_v7 = vld [vmem:[%s2525_s1 + $0xb0] sm:$0xff]   ;;  %v1878_v11 = vld [vmem:[%s2525_s1 + $0xa8] sm:$0xff]  }
   0x5   :  { %1654 = vmatpush3.bf16.msra.mxu1 %v1870_v3  ;;  %1603 = vmatprep.subr.bf16.mxu0 %v1871_v4  ;;  %v1879_v12 = vld [vmem:[%s2525_s1 + $0x60] sm:$0xff]   ;;  %v1883_v16 = vld [vmem:[%s2525_s1 + $0x58] sm:$0xff]   ;;  %v1887_v20 = vld [vmem:[%s2525_s1 + $0x50] sm:$0xff]  }
   0x6   :  { %1655 = vmatprep.subr.bf16.mxu1 %v1872_v5  ;;  %v1880_v13 = vld [vmem:[%s2525_s1 + $0xe0] sm:$0xff]   ;;  %v1884_v17 = vld [vmem:[%s2525_s1 + $0xd8] sm:$0xff]   ;;  %v1888_v21 = vld [vmem:[%s2525_s1 + $0xd0] sm:$0xff]  }
   0x7   :  { %v1881_v14 = vld [vmem:[%s2525_s1 + $0x20] sm:$0xff]   ;;  %v1885_v18 = vld [vmem:[%s2525_s1 + $0x18] sm:$0xff]   ;;  %v1889_v22 = vld [vmem:[%s2525_s1 + $0x10] sm:$0xff]  }
   0x8   :  { %1604 = vmatpush3.bf16.msra.mxu0 %v1873_v6  ;;  %v1882_v15 = vld [vmem:[%s2525_s1 + $0xa0] sm:$0xff]   ;;  %v1886_v19 = vld [vmem:[%s2525_s1 + $0x98] sm:$0xff]   ;;  %v1890_v23 = vld [vmem:[%s2525_s1 + $0x90] sm:$0xff]  }
   0x9   :  { %1656 = vmatpush3.bf16.msra.mxu1 %v1874_v7  ;;  %1605 = vmatprep.subr.bf16.mxu0 %v1875_v8  ;;  %v1891_v24 = vld [vmem:[%s2525_s1 + $0x48] sm:$0xff]   ;;  %v1895_v28 = vld [vmem:[%s2525_s1 + $0x40] sm:$0xff]   ;;  %v1905_v36 = vld [vmem:[%s2525_s1 + $0x1f8] sm:$0xff]  }
   0xa   :  { %1657 = vmatprep.subr.bf16.mxu1 %v1876_v9  ;;  %v1892_v25 = vld [vmem:[%s2525_s1 + $0xc8] sm:$0xff]   ;;  %v1896_v29 = vld [vmem:[%s2525_s1 + $0xc0] sm:$0xff]   ;;  %v1906_v37 = vld [vmem:[%s2525_s1 + $0x1b8] sm:$0xff]  }
   0xb   :  { %v1893_v26 = vld [vmem:[%s2525_s1 + $0x8] sm:$0xff]   ;;  %v1897_v30 = vld [vmem:[%s2525_s1] sm:$0xff]   ;;  %v1907_v38 = vld [vmem:[%s2525_s1 + $0x1f0] sm:$0xff]  }
   0xc   :  { %1606 = vmatpush3.bf16.msra.mxu0 %v1877_v10  ;;  %v1894_v27 = vld [vmem:[%s2525_s1 + $0x88] sm:$0xff]   ;;  %v1898_v31 = vld [vmem:[%s2525_s1 + $0x80] sm:$0xff]   ;;  %v1910_v40 = vld [vmem:[%s2526_s0 + $0x54] ss:$36 sps:$4 sm:$0xff]  }
   0xd   :  { %1658 = vmatpush3.bf16.msra.mxu1 %v1878_v11  ;;  %1607 = vmatprep.subr.bf16.mxu0 %v1879_v12  ;;  %v1899_v32 = vld [vmem:[%s2526_s0] ss:$36 sps:$4 sm:$0xff]   ;;  %v1902_v34 = vld [vmem:[%s2526_s0 + $0x8] ss:$36 sps:$4 sm:$0xff]   ;;  %v1912_v41 = vld [vmem:[%s2525_s1 + $0x1b0] sm:$0xff]  }
   0xe   :  { %1659 = vmatprep.subr.bf16.mxu1 %v1880_v13  ;;  %v1901_v33 = vld [vmem:[%s2526_s0 + $0x4] ss:$36 sps:$4 sm:$0xff]   ;;  %v1904_v35 = vld [vmem:[%s2526_s0 + $0xc] ss:$36 sps:$4 sm:$0xff]   ;;  %v1915_v44 = vld [vmem:[%s2525_s1 + $0x178] sm:$0xff]  }
   0xf   :  { %966 = vmatprep.mubr.bf16.mxu0 %v1901_v33  ;;  %1047 = vmatprep.mubr.bf16.mxu1 %v1904_v35  ;;  %v1908_v39 = vld [vmem:[%s2526_s0 + $0x4c] ss:$36 sps:$4 sm:$0xff]   ;;  %v1916_v45 = vld [vmem:[%s2525_s1 + $0x138] sm:$0xff]   ;;  %v1927_v54 = vld [vmem:[%s2525_s1 + $0x1e0] sm:$0xff]  }
  0x10   :  { %1608 = vmatpush3.bf16.msra.mxu0 %v1881_v14  ;;  %v1913_v42 = vld [vmem:[%s2526_s0 + $0x48] ss:$36 sps:$4 sm:$0xff]   ;;  %v1914_v43 = vld [vmem:[%s2526_s0 + $0x50] ss:$36 sps:$4 sm:$0xff]   ;;  %v1922_v50 = vld [vmem:[%s2526_s0 + $0x9c] ss:$36 sps:$4 sm:$0xff]  }
  0x11   :  { %1660 = vmatpush3.bf16.msra.mxu1 %v1882_v15  ;;  %1609 = vmatprep.subr.bf16.mxu0 %v1883_v16  ;;  %v1917_v46 = vld [vmem:[%s2525_s1 + $0x1e8] sm:$0xff]   ;;  %v1919_v48 = vld [vmem:[%s2525_s1 + $0x170] sm:$0xff]   ;;  %v1926_v53 = vld [vmem:[%s2526_s0 + $0x98] ss:$36 sps:$4 sm:$0xff]  }
  0x12   :  { %1661 = vmatprep.subr.bf16.mxu1 %v1884_v17  ;;  %v1918_v47 = vld [vmem:[%s2525_s1 + $0x1a8] sm:$0xff]   ;;  %v1920_v49 = vld [vmem:[%s2526_s0 + $0x94] ss:$36 sps:$4 sm:$0xff]   ;;  %v1928_v55 = vld [vmem:[%s2525_s1 + $0x1a0] sm:$0xff]  }
  0x13   :  { %v1924_v51 = vld [vmem:[%s2525_s1 + $0x130] sm:$0xff]   ;;  %v1929_v56 = vld [vmem:[%s2525_s1 + $0x168] sm:$0xff]   ;;  %v1931_v58 = vld [vmem:[%s2526_s0 + $0xdc] ss:$36 sps:$4 sm:$0xff]  }
  0x14   :  { %1610 = vmatpush3.bf16.msra.mxu0 %v1885_v18  ;;  %v1925_v52 = vld [vmem:[%s2526_s0 + $0x90] ss:$36 sps:$4 sm:$0xff]   ;;  %v1930_v57 = vld [vmem:[%s2525_s1 + $0x128] sm:$0xff]   ;;  %v1935_v60 = vld [vmem:[%s2526_s0 + $0xd8] ss:$36 sps:$4 sm:$0xff]  }
  0x15   :  { %1662 = vmatpush3.bf16.msra.mxu1 %v1886_v19  ;;  %1611 = vmatprep.subr.bf16.mxu0 %v1887_v20  ;;  %v1933_v59 = vld [vmem:[%s2526_s0 + $0xe4] ss:$36 sps:$4 sm:$0xff]   ;;  %v1937_v62 = vld [vmem:[%s2525_s1 + $0x1d8] sm:$0xff]   ;;  %v1941_v2 = vld [vmem:[%s2525_s1 + $0x1d0] sm:$0xff]  }
  0x16   :  { %1663 = vmatprep.subr.bf16.mxu1 %v1888_v21  ;;  %v1936_v61 = vld [vmem:[%s2526_s0 + $0xe0] ss:$36 sps:$4 sm:$0xff]   ;;  %v1938_v63 = vld [vmem:[%s2525_s1 + $0x198] sm:$0xff]   ;;  %v1944_v4 = vld [vmem:[%s2526_s0 + $0x12c] ss:$36 sps:$4 sm:$0xff]  }
  0x17   :  { %v1939_v0 = vld [vmem:[%s2525_s1 + $0x160] sm:$0xff]   ;;  %v1946_v5 = vld [vmem:[%s2525_s1 + $0x190] sm:$0xff]   ;;  %v1948_v7 = vld [vmem:[%s2526_s0 + $0x128] ss:$36 sps:$4 sm:$0xff]  }
  0x18   :  { %1612 = vmatpush3.bf16.msra.mxu0 %v1889_v22  ;;  %v1940_v1 = vld [vmem:[%s2525_s1 + $0x120] sm:$0xff]   ;;  %v1949_v8 = vld [vmem:[%s2525_s1 + $0x158] sm:$0xff]   ;;  %v1951_v10 = vld [vmem:[%s2525_s1 + $0x150] sm:$0xff]  }
  0x19   :  { %1664 = vmatpush3.bf16.msra.mxu1 %v1890_v23  ;;  %1613 = vmatprep.subr.bf16.mxu0 %v1891_v24  ;;  %v1942_v3 = vld [vmem:[%s2526_s0 + $0x124] ss:$36 sps:$4 sm:$0xff]   ;;  %v1950_v9 = vld [vmem:[%s2525_s1 + $0x118] sm:$0xff]   ;;  %v1953_v12 = vld [vmem:[%s2525_s1 + $0x110] sm:$0xff]  }
  0x1a   :  { %1665 = vmatprep.subr.bf16.mxu1 %v1892_v25  ;;  %v1947_v6 = vld [vmem:[%s2526_s0 + $0x120] ss:$36 sps:$4 sm:$0xff]   ;;  %v1952_v11 = vld [vmem:[%s2525_s1 + $0x1c8] sm:$0xff]   ;;  %v1957_v15 = vld [vmem:[%s2526_s0 + $0x174] ss:$36 sps:$4 sm:$0xff]  }
  0x1b   :  { %v1954_v13 = vld [vmem:[%s2525_s1 + $0x188] sm:$0xff]   ;;  %v1960_v17 = vld [vmem:[%s2526_s0 + $0x170] ss:$36 sps:$4 sm:$0xff]   ;;  %v1963_v20 = vld [vmem:[%s2525_s1 + $0x1c0] sm:$0xff]  }
  0x1c   :  { %1614 = vmatpush3.bf16.msra.mxu0 %v1893_v26  ;;  %v1955_v14 = vld [vmem:[%s2526_s0 + $0x16c] ss:$36 sps:$4 sm:$0xff]   ;;  %v1964_v21 = vld [vmem:[%s2525_s1 + $0x180] sm:$0xff]   ;;  %v1969_v25 = vld [vmem:[%s2526_s0 + $0x14] ss:$36 sps:$4 sm:$0xff]  }
  0x1d   :  { %1666 = vmatpush3.bf16.msra.mxu1 %v1894_v27  ;;  %1615 = vmatprep.subr.bf16.mxu0 %v1895_v28  ;;  %v1959_v16 = vld [vmem:[%s2526_s0 + $0x168] ss:$36 sps:$4 sm:$0xff]   ;;  %v1965_v22 = vld [vmem:[%s2525_s1 + $0x140] sm:$0xff]   ;;  %v1967_v24 = vld [vmem:[%s2526_s0 + $0x10] ss:$36 sps:$4 sm:$0xff]  }
  0x1e   :  { %1667 = vmatprep.subr.bf16.mxu1 %v1896_v29  ;;  %v1961_v18 = vld [vmem:[%s2525_s1 + $0x148] sm:$0xff]   ;;  %v1966_v23 = vld [vmem:[%s2525_s1 + $0x100] sm:$0xff]   ;;  %v1970_v26 = vld [vmem:[%s2526_s0 + $0x18] ss:$36 sps:$4 sm:$0xff]  }
  0x1f   :  { %v1962_v19 = vld [vmem:[%s2525_s1 + $0x108] sm:$0xff]   ;;  %v1972_v27 = vld [vmem:[%s2526_s0 + $0x1c] ss:$36 sps:$4 sm:$0xff]   ;;  %v1974_v29 = vld [vmem:[%s2525_s1 + $0x230] sm:$0xff]  }
  0x20   :  { %1616 = vmatpush3.bf16.msra.mxu0 %v1897_v30  ;;  %v1973_v28 = vld [vmem:[%s2525_s1 + $0x238] sm:$0xff]   ;;  %v1980_v33 = vld [vmem:[%s2526_s0 + $0x60] ss:$36 sps:$4 sm:$0xff]  }
  0x21   :  { %1668 = vmatpush3.bf16.msra.mxu1 %v1898_v31  ;;  %1705 = vmatprep.subr.bf16.mxu0 %v1915_v44  ;;  %v1975_v30 = vld [vmem:[%s2526_s0 + $0x5c] ss:$36 sps:$4 sm:$0xff]   ;;  %v1977_v31 = vld [vmem:[%s2526_s0 + $0x64] ss:$36 sps:$4 sm:$0xff]  }
  0x22   :  { %1757 = vmatprep.subr.bf16.mxu1 %v1905_v36  ;;  %v1982_v35 = vld [vmem:[%s2526_s0 + $0xa4] ss:$36 sps:$4 sm:$0xff]   ;;  %v1984_v36 = vld [vmem:[%s2526_s0 + $0xac] ss:$36 sps:$4 sm:$0xff]  }
  0x23   :  { %967 = vmatmul.mubr.bf16.vlgmr.msra.gmra.mxu0 %v1899_v32  ;;  %v1979_v32 = vld [vmem:[%s2526_s0 + $0x58] ss:$36 sps:$4 sm:$0xff]   ;;  %v1993_v44 = vld [vmem:[%s2526_s0 + $0xe8] ss:$36 sps:$4 sm:$0xff]  }
  0x24   :  { %1048 = vmatmul.mubr.bf16.vlgmr.msra.gmra.mxu1 %v1902_v34  ;;  %974 = vmatprep.mubr.bf16.mxu0 %v1908_v39  ;;  %v1981_v34 = vld [vmem:[%s2525_s1 + $0x228] sm:$0xff]   ;;  %v1995_v39 = vld [vmem:[%s2525_s1 + $0x218] sm:$0xff]  }
  0x25   :  { %1758 = vmatpush3.bf16.msra.mxu1 %v1906_v37  ;;  %1055 = vmatprep.mubr.bf16.mxu1 %v1910_v40  ;;  %v1988_v37 = vld [vmem:[%s2525_s1 + $0x220] sm:$0xff]   ;;  %v1987_v40 = vld [vmem:[%s2526_s0 + $0xa8] ss:$36 sps:$4 sm:$0xff]  }
  0x26   :  { %1759 = vmatprep.subr.bf16.mxu1 %v1907_v38  ;;  %1706 = vmatpush3.bf16.msra.mxu0 %v1916_v45  ;;  %v1986_v38 = vld [vmem:[%s2526_s0 + $0xa0] ss:$36 sps:$4 sm:$0xff]   ;;  %v2003_v45 = vld [vmem:[%s2525_s1 + $0x208] sm:$0xff]  }
  0x27   :  { %1707 = vmatprep.subr.bf16.mxu0 %v1919_v48  ;;  %v1999_v48 = vld [vmem:[%s2526_s0 + $0x13c] ss:$36 sps:$4 sm:$0xff]  }
  0x29   :  { %1760 = vmatpush3.bf16.msra.mxu1 %v1912_v41  ;;  %v1989_v41 = vld [vmem:[%s2526_s0 + $0xec] ss:$36 sps:$4 sm:$0xff]  }
  0x2a   :  { %1761 = vmatprep.subr.bf16.mxu1 %v1917_v46  ;;  %1708 = vmatpush3.bf16.msra.mxu0 %v1924_v51  ;;  %v1994_v46 = vld [vmem:[%s2526_s0 + $0xf0] ss:$36 sps:$4 sm:$0xff]   ;;  %v2002_v51 = vld [vmem:[%s2526_s0 + $0x138] ss:$36 sps:$4 sm:$0xff]  }
  0x2b   :  { %975 = vmatmul.mubr.bf16.gmra.mxu0 %v1913_v42  ;;  %1709 = vmatprep.subr.bf16.mxu0 %v1929_v56  ;;  %v1991_v42 = vld [vmem:[%s2526_s0 + $0xf4] ss:$36 sps:$4 sm:$0xff]   ;;  %v2011_v56 = vld [vmem:[%s2526_s0 + $0x20] ss:$36 sps:$4 sm:$0xff]  }
  0x2c   :  { %1056 = vmatmul.mubr.bf16.gmra.mxu1 %v1914_v43  ;;  %982 = vmatprep.mubr.bf16.mxu0 %v1920_v49  ;;  %v1996_v43 = vld [vmem:[%s2525_s1 + $0x210] sm:$0xff]   ;;  %v2010_v49 = vld [vmem:[%s2525_s1 + $0x200] sm:$0xff]  }
  0x2d   :  { %1762 = vmatpush3.bf16.msra.mxu1 %v1918_v47  ;;  %1063 = vmatprep.mubr.bf16.mxu1 %v1922_v50  ;;  %v1997_v47 = vld [vmem:[%s2526_s0 + $0x134] ss:$36 sps:$4 sm:$0xff]  }
  0x2e   :  { %1763 = vmatprep.subr.bf16.mxu1 %v1927_v54  ;;  %1710 = vmatpush3.bf16.msra.mxu0 %v1930_v57  ;;  %v2001_v50 = vld [vmem:[%s2526_s0 + $0x130] ss:$36 sps:$4 sm:$0xff]   ;;  %v2008_v54 = vld [vmem:[%s2526_s0 + $0x178] ss:$36 sps:$4 sm:$0xff]  }
  0x2f   :  { %1711 = vmatprep.subr.bf16.mxu0 %v1939_v0  ;;  %v2012_v57 = vld [vmem:[%s2526_s0 + $0xb0] ss:$36 sps:$4 sm:$0xff]   ;;  %v2418_v0 = vld [vmem:[%s2527_s2] ss:$0 sm:$0xff] }
  0x31   :  { %1764 = vmatpush3.bf16.msra.mxu1 %v1928_v55  ;;  %v2009_v55 = vld [vmem:[%s2526_s0 + $0x180] ss:$36 sps:$4 sm:$0xff]  }
  0x32   :  { %1765 = vmatprep.subr.bf16.mxu1 %v1937_v62  ;;  %1712 = vmatpush3.bf16.msra.mxu0 %v1940_v1 }
  0x33   :  { %983 = vmatmul.mubr.bf16.gmra.mxu0 %v1925_v52  ;;  %1713 = vmatprep.subr.bf16.mxu0 %v1949_v8  ;;  %v2004_v52 = vld [vmem:[%s2526_s0 + $0x17c] ss:$36 sps:$4 sm:$0xff]  }
  0x34   :  { %1064 = vmatmul.mubr.bf16.gmra.mxu1 %v1926_v53  ;;  %990 = vmatprep.mubr.bf16.mxu0 %v1931_v58  ;;  %v2006_v53 = vld [vmem:[%s2526_s0 + $0x184] ss:$36 sps:$4 sm:$0xff]  }
  0x35   :  { %1071 = vmatprep.mubr.bf16.mxu1 %v1933_v59  ;;  %1766 = vmatpush3.bf16.msra.mxu1 %v1938_v63  ;;  %v2013_v58 = vld [vmem:[%s2526_s0 + $0x68] ss:$36 sps:$4 sm:$0xff]   ;;  %v2014_v59 = vld [vmem:[%s2526_s0 + $0xf8] ss:$36 sps:$4 sm:$0xff]  }
  0x36   :  { %1767 = vmatprep.subr.bf16.mxu1 %v1941_v2  ;;  %1714 = vmatpush3.bf16.msra.mxu0 %v1950_v9 }
  0x37   :  { %1715 = vmatprep.subr.bf16.mxu0 %v1951_v10 }
  0x39   :  { %1768 = vmatpush3.bf16.msra.mxu1 %v1946_v5 }
  0x3a   :  { %1769 = vmatprep.subr.bf16.mxu1 %v1952_v11  ;;  %1716 = vmatpush3.bf16.msra.mxu0 %v1953_v12 }
  0x3b   :  { %991 = vmatmul.mubr.bf16.gmra.mxu0 %v1935_v60  ;;  %1717 = vmatprep.subr.bf16.mxu0 %v1961_v18  ;;  %v2015_v60 = vld [vmem:[%s2526_s0 + $0x140] ss:$36 sps:$4 sm:$0xff]  }
  0x3c   :  { %1072 = vmatmul.mubr.bf16.gmra.mxu1 %v1936_v61  ;;  %998 = vmatprep.mubr.bf16.mxu0 %v1942_v3  ;;  %v2016_v61 = vld [vmem:[%s2526_s0 + $0x188] ss:$36 sps:$4 sm:$0xff]  }
  0x3d   :  { %1079 = vmatprep.mubr.bf16.mxu1 %v1944_v4  ;;  %1770 = vmatpush3.bf16.msra.mxu1 %v1954_v13 }
  0x3e   :  { %1718 = vmatpush3.bf16.msra.mxu0 %v1962_v19  ;;  %1771 = vmatprep.subr.bf16.mxu1 %v1963_v20 }
  0x3f   :  { %1719 = vmatprep.subr.bf16.mxu0 %v1965_v22 }
  0x41   :  { %1772 = vmatpush3.bf16.msra.mxu1 %v1964_v21 }
  0x42   :  { %1720 = vmatpush3.bf16.msra.mxu0 %v1966_v23  ;;  %1851 = vmatprep.subr.bf16.mxu1 %v1973_v28 }
  0x43   :  { %999 = vmatmul.mubr.bf16.gmra.mxu0 %v1947_v6  ;;  %1823 = vmatprep.subr.bf16.mxu0 %v1973_v28 }
  0x44   :  { %1080 = vmatmul.mubr.bf16.gmra.mxu1 %v1948_v7  ;;  %1006 = vmatprep.mubr.bf16.mxu0 %v1955_v14 }
  0x45   :  { %1087 = vmatprep.mubr.bf16.mxu1 %v1957_v15 }
  0x4b   :  { %1007 = vmatmul.mubr.bf16.gmra.mxu0 %v1959_v16 }
  0x4c   :  { %1088 = vmatmul.mubr.bf16.gmra.mxu1 %v1960_v17  ;;  %1128 = vmatprep.mubr.bf16.mxu0 %v1969_v25 }
  0x4d   :  { %1209 = vmatprep.mubr.bf16.mxu1 %v1972_v27 }
  0x53   :  { %1129 = vmatmul.mubr.bf16.vlgmr.msra.gmra.mxu0 %v1967_v24 }
  0x54   :  { %1210 = vmatmul.mubr.bf16.vlgmr.msra.gmra.mxu1 %v1970_v26  ;;  %1136 = vmatprep.mubr.bf16.mxu0 %v1975_v30 }
  0x55   :  { %1859 = vmatpush3.bf16.msra.mxu1 %v1973_v28  ;;  %1217 = vmatprep.mubr.bf16.mxu1 %v1977_v31 }
  0x56   :  { %1852 = vmatprep.subr.bf16.mxu1 %v1974_v29  ;;  %1824 = vmatpush3.bf16.msra.mxu0 %v1973_v28 }
  0x57   :  { %1825 = vmatprep.subr.bf16.mxu0 %v1974_v29 }
  0x59   :  { %1860 = vmatpush3.bf16.msra.mxu1 %v1974_v29 }
  0x5a   :  { %1853 = vmatprep.subr.bf16.mxu1 %v1981_v34  ;;  %1826 = vmatpush3.bf16.msra.mxu0 %v1974_v29 }
  0x5b   :  { %1137 = vmatmul.mubr.bf16.gmra.mxu0 %v1979_v32  ;;  %1827 = vmatprep.subr.bf16.mxu0 %v1981_v34 }
  0x5c   :  { %1218 = vmatmul.mubr.bf16.gmra.mxu1 %v1980_v33  ;;  %1144 = vmatprep.mubr.bf16.mxu0 %v1982_v35 }
  0x5d   :  { %1861 = vmatpush3.bf16.msra.mxu1 %v1981_v34  ;;  %1225 = vmatprep.mubr.bf16.mxu1 %v1984_v36 }
  0x5e   :  { %1854 = vmatprep.subr.bf16.mxu1 %v1988_v37  ;;  %1828 = vmatpush3.bf16.msra.mxu0 %v1981_v34 }
  0x5f   :  { %1829 = vmatprep.subr.bf16.mxu0 %v1988_v37 }
  0x61   :  { %1862 = vmatpush3.bf16.msra.mxu1 %v1988_v37 }
  0x62   :  { %1855 = vmatprep.subr.bf16.mxu1 %v1995_v39  ;;  %1830 = vmatpush3.bf16.msra.mxu0 %v1988_v37 }
  0x63   :  { %1145 = vmatmul.mubr.bf16.gmra.mxu0 %v1986_v38  ;;  %1831 = vmatprep.subr.bf16.mxu0 %v1995_v39 }
  0x64   :  { %1226 = vmatmul.mubr.bf16.gmra.mxu1 %v1987_v40  ;;  %1152 = vmatprep.mubr.bf16.mxu0 %v1989_v41 }
  0x65   :  { %1233 = vmatprep.mubr.bf16.mxu1 %v1991_v42  ;;  %1863 = vmatpush3.bf16.msra.mxu1 %v1995_v39 }
  0x66   :  { %1856 = vmatprep.subr.bf16.mxu1 %v1996_v43  ;;  %1832 = vmatpush3.bf16.msra.mxu0 %v1995_v39 }
  0x67   :  { %1833 = vmatprep.subr.bf16.mxu0 %v1996_v43 }
  0x69   :  { %1864 = vmatpush3.bf16.msra.mxu1 %v1996_v43 }
  0x6a   :  { %1857 = vmatprep.subr.bf16.mxu1 %v2003_v45  ;;  %1834 = vmatpush3.bf16.msra.mxu0 %v1996_v43 }
  0x6b   :  { %1153 = vmatmul.mubr.bf16.gmra.mxu0 %v1993_v44  ;;  %1835 = vmatprep.subr.bf16.mxu0 %v2003_v45 }
  0x6c   :  { %1234 = vmatmul.mubr.bf16.gmra.mxu1 %v1994_v46  ;;  %1160 = vmatprep.mubr.bf16.mxu0 %v1997_v47 }
  0x6d   :  { %1241 = vmatprep.mubr.bf16.mxu1 %v1999_v48  ;;  %1865 = vmatpush3.bf16.msra.mxu1 %v2003_v45 }
  0x6e   :  { %1858 = vmatprep.subr.bf16.mxu1 %v2010_v49  ;;  %1836 = vmatpush3.bf16.msra.mxu0 %v2003_v45 }
  0x6f   :  { %1837 = vmatprep.subr.bf16.mxu0 %v2010_v49 }
  0x71   :  { %1866 = vmatpush3.bf16.msra.mxu1 %v2010_v49 }
  0x72   :  { %1838 = vmatpush3.bf16.msra.mxu0 %v2010_v49 }
  0x73   :  { %1161 = vmatmul.mubr.bf16.gmra.mxu0 %v2001_v50 }
  0x74   :  { %1242 = vmatmul.mubr.bf16.gmra.mxu1 %v2002_v51  ;;  %1168 = vmatprep.mubr.bf16.mxu0 %v2004_v52 }
  0x75   :  { %1249 = vmatprep.mubr.bf16.mxu1 %v2006_v53 }
  0x7b   :  { %1169 = vmatmul.mubr.bf16.gmra.mxu0 %v2008_v54 }
  0x7c   :  { %1250 = vmatmul.mubr.bf16.gmra.mxu1 %v2009_v55  ;;  %1839 = vmatprep.mubr.bf16.mxu0 %v2011_v56 }
  0x7d   :  { %1843 = vmatprep.mubr.bf16.mxu1 %v2012_v57 }
  0x83   :  { %1840 = vmatmul.mubr.bf16.vlgmr.msra.gmra.mxu0 %v2013_v58 }
  0x84   :  { %1844 = vmatmul.mubr.bf16.vlgmr.msra.gmra.mxu1 %v2014_v59 }
  0x85   :  { %1847 = vmatprep.mubr.bf16.mxu1 %v2015_v60 }
  0x8c   :  { %1848 = vmatmul.mubr.bf16.gmra.mxu1 %v2016_v61 }
  0xe3   :  { %v1617_v62 = vpop.f32.mrf.mxu0 }
  0xe4   :  { %v1669_v63 = vpop.f32.mrf.mxu1 }
  0xe5   :  { %v1618_v1 = vpop.f32.mrf.mxu0 }
  0xe6   :  { %v1619_v2 = vadd.f32 %v1618_v1, %v1617_v62  ;;  %v1670_v3 = vpop.f32.mrf.mxu1 }
  0xe7   :  { %v1671_v4 = vadd.f32 %v1670_v3, %v1669_v63  ;;  %v1620_v5 = vpop.f32.mrf.mxu0 }
  0xe8   :  { %v969_v6 = vadd.f32 %v1619_v2, %v2418_v0  ;;  %v1672_v7 = vpop.f32.mrf.mxu1 }
  0xe9   :  { %v1621_v8 = vpop.f32.mrf.mxu0 }
  0xea   :  { %v2421_v9 = vadd.f32 %v1671_v4, %v969_v6  ;;  %v1622_v10 = vadd.f32 %v1621_v8, %v1620_v5  ;;  %v1673_v11 = vpop.f32.mrf.mxu1 }
  0xeb   :  { %v1674_v12 = vadd.f32 %v1673_v11, %v1672_v7  ;;  %v1623_v13 = vpop.f32.mrf.mxu0 }
  0xec   :  { %v972_v14 = vadd.f32 %v1622_v10, %v2418_v0  ;;  %v1675_v15 = vpop.f32.mrf.mxu1 }
  0xed   :  { %v1624_v16 = vpop.f32.mrf.mxu0 }
  0xee   :  { %v2424_v17 = vadd.f32 %v1674_v12, %v972_v14  ;;  %v1625_v18 = vadd.f32 %v1624_v16, %v1623_v13  ;;  %v1676_v19 = vpop.f32.mrf.mxu1 }
  0xef   :  { %v1677_v20 = vadd.f32 %v1676_v19, %v1675_v15  ;;  %v1626_v21 = vpop.f32.mrf.mxu0 }
  0xf0   :  { %v977_v22 = vadd.f32 %v1625_v18, %v2418_v0  ;;  %v1678_v23 = vpop.f32.mrf.mxu1 }
  0xf1   :  { %v1627_v24 = vpop.f32.mrf.mxu0 }
  0xf2   :  { %v2427_v25 = vadd.f32 %v1677_v20, %v977_v22  ;;  %v1628_v26 = vadd.f32 %v1627_v24, %v1626_v21  ;;  %v1679_v27 = vpop.f32.mrf.mxu1 }
  0xf3   :  { %v1680_v28 = vadd.f32 %v1679_v27, %v1678_v23  ;;  %v1629_v29 = vpop.f32.mrf.mxu0 }
  0xf4   :  { %v980_v30 = vadd.f32 %v1628_v26, %v2418_v0  ;;  %v1681_v31 = vpop.f32.mrf.mxu1 }
  0xf5   :  { %v1630_v32 = vpop.f32.mrf.mxu0 }
  0xf6   :  { %v2430_v33 = vadd.f32 %v1680_v28, %v980_v30  ;;  %v1631_v34 = vadd.f32 %v1630_v32, %v1629_v29  ;;  %v1682_v35 = vpop.f32.mrf.mxu1 }
  0xf7   :  { %v1683_v36 = vadd.f32 %v1682_v35, %v1681_v31  ;;  %v1632_v37 = vpop.f32.mrf.mxu0 }
  0xf8   :  { %v985_v38 = vadd.f32 %v1631_v34, %v2418_v0  ;;  %v1684_v39 = vpop.f32.mrf.mxu1 }
  0xf9   :  { %v1633_v40 = vpop.f32.mrf.mxu0 }
  0xfa   :  { %v2433_v41 = vadd.f32 %v1683_v36, %v985_v38  ;;  %v1634_v42 = vadd.f32 %v1633_v40, %v1632_v37  ;;  %v1685_v43 = vpop.f32.mrf.mxu1 }
  0xfb   :  { %v1686_v44 = vadd.f32 %v1685_v43, %v1684_v39  ;;  %v1635_v45 = vpop.f32.mrf.mxu0 }
  0xfc   :  { %v988_v46 = vadd.f32 %v1634_v42, %v2418_v0  ;;  %v1687_v47 = vpop.f32.mrf.mxu1 }
  0xfd   :  { %v1636_v48 = vpop.f32.mrf.mxu0 }
  0xfe   :  { %v2436_v49 = vadd.f32 %v1686_v44, %v988_v46  ;;  %v1637_v50 = vadd.f32 %v1636_v48, %v1635_v45  ;;  %v1688_v51 = vpop.f32.mrf.mxu1 }
  0xff   :  { %v1689_v52 = vadd.f32 %v1688_v51, %v1687_v47  ;;  %v2438_v53 = vpop.f32.mrf.mxu0 }
 0x100   :  { %v993_v54 = vadd.f32 %v1637_v50, %v2418_v0  ;;  %v2441_v55 = vpop.f32.mrf.mxu1 }
 0x101   :  { %v2443_v56 = vpop.f32.mrf.mxu0 }
 0x102   :  { %v2445_v57 = vadd.f32 %v1689_v52, %v993_v54  ;;  %v2447_v58 = vpop.f32.mrf.mxu1 }
 0x103   :  { %v1641_v59 = vpop.f32.mrf.mxu0 }
 0x104   :  { %v1693_v60 = vpop.f32.mrf.mxu1 }
 0x105   :  { %v1642_v61 = vpop.f32.mrf.mxu0 }
 0x106   :  { %v1643_v62 = vadd.f32 %v1642_v61, %v1641_v59  ;;  %v1694_v63 = vpop.f32.mrf.mxu1 }
 0x107   :  { %v1695_v1 = vadd.f32 %v1694_v63, %v1693_v60  ;;  %v1644_v2 = vpop.f32.mrf.mxu0 }
 0x108   :  { %v1001_v3 = vadd.f32 %v1643_v62, %v2418_v0  ;;  %v1696_v4 = vpop.f32.mrf.mxu1 }
 0x109   :  { %v1645_v5 = vpop.f32.mrf.mxu0 }
 0x10a   :  { %v2450_v6 = vadd.f32 %v1695_v1, %v1001_v3  ;;  %v1646_v7 = vadd.f32 %v1645_v5, %v1644_v2  ;;  %v1697_v8 = vpop.f32.mrf.mxu1  ;;  %v1640_v5 = vadd.f32 %v2443_v56, %v2438_v53 }
 0x10b   :  { %v1698_v10 = vadd.f32 %v1697_v8, %v1696_v4  ;;  %v1647_v11 = vpop.f32.mrf.mxu0 }
 0x10c   :  { %2529 = vst [vmem:[#allocation2_spill] sm:$0xff] %v2450_v6  ;;  %v1004_v12 = vadd.f32 %v1646_v7, %v2418_v0  ;;  %v1699_v13 = vpop.f32.mrf.mxu1 }
 0x10d   :  { %v1648_v14 = vpop.f32.mrf.mxu0 }
 0x10e   :  { %v2453_v15 = vadd.f32 %v1698_v10, %v1004_v12  ;;  %v1700_v16 = vpop.f32.mrf.mxu1  ;;  %v1649_v7 = vadd.f32 %v1648_v14, %v1647_v11 }
 0x10f   :  { %v1650_v18 = vpop.f32.mrf.mxu0  ;;  %v1701_v53 = vadd.f32 %v1700_v16, %v1699_v13 }
 0x110   :  { %2530 = vst [vmem:[#allocation3_spill] sm:$0xff] %v2453_v15  ;;  %v1702_v19 = vpop.f32.mrf.mxu1 }
 0x111   :  { %v1651_v20 = vpop.f32.mrf.mxu0 }
 0x112   :  { %v1703_v21 = vpop.f32.mrf.mxu1  ;;  %v1652_v10 = vadd.f32 %v1651_v20, %v1650_v18 }
 0x113   :  { %v1721_v22 = vpop.f32.mrf.mxu0  ;;  %v1704_v20 = vadd.f32 %v1703_v21, %v1702_v19 }
 0x114   :  { %v1773_v23 = vpop.f32.mrf.mxu1  ;;  %v1012_v56 = vadd.f32 %v1652_v10, %v2418_v0 }
 0x115   :  { %v1722_v24 = vpop.f32.mrf.mxu0 }
 0x116   :  { %v1774_v26 = vpop.f32.mrf.mxu1  ;;  %v1723_v12 = vadd.f32 %v1722_v24, %v1721_v22  ;;  %v1093_v16 = vadd.f32 %v1704_v20, %v1012_v56 }
 0x117   :  { %v1724_v27 = vpop.f32.mrf.mxu0 }
 0x118   :  { %v2455_v28 = vpop.f32.mrf.mxu1  ;;  %v1131_v11 = vadd.f32 %v1723_v12, %v2421_v9 }
 0x119   :  { %v1725_v29 = vpop.f32.mrf.mxu0 }
 0x11a   :  { %v2457_v30 = vpop.f32.mrf.mxu1  ;;  %v1726_v22 = vadd.f32 %v1725_v29, %v1724_v27 }
 0x11b   :  { %v1727_v31 = vpop.f32.mrf.mxu0  ;;  %v1778_v21 = vadd.f32 %v2457_v30, %v2455_v28 }
 0x11c   :  { %v1779_v32 = vpop.f32.mrf.mxu1  ;;  %v1134_v19 = vadd.f32 %v1726_v22, %v2424_v17 }
 0x11d   :  { %v1728_v34 = vpop.f32.mrf.mxu0 }
 0x11e   :  { %v1780_v35 = vpop.f32.mrf.mxu1 }
 0x11f   :  { %v1730_v36 = vpop.f32.mrf.mxu0 }
 0x120   :  { %v2459_v37 = vpop.f32.mrf.mxu1 }
 0x121   :  { %v1731_v38 = vpop.f32.mrf.mxu0 }
 0x122   :  { %v2461_v39 = vpop.f32.mrf.mxu1  ;;  %v1732_v24 = vadd.f32 %v1731_v38, %v1730_v36 }
 0x123   :  { %2531 = vst [vmem:[#allocation4_spill] sm:$0xff] %v2461_v39  ;;  %v1733_v40 = vpop.f32.mrf.mxu0 }
 0x124   :  { %v2463_v42 = vpop.f32.mrf.mxu1 }
 0x125   :  { %2532 = vst [vmem:[#allocation5_spill] sm:$0xff] %v2463_v42  ;;  %v1734_v43 = vpop.f32.mrf.mxu0  ;;  %v996_v42 = vadd.f32 %v1640_v5, %v2418_v0  ;;  %v1775_v5 = vadd.f32 %v1774_v26, %v1773_v23  ;;  %v1142_v23 = vadd.f32 %v1732_v24, %v2430_v33 }
 0x126   :  { %v2465_v44 = vpop.f32.mrf.mxu1 }
 0x127   :  { %2533 = vst [vmem:[#allocation6_spill] sm:$0xff] %v2465_v44  ;;  %v1736_v45 = vpop.f32.mrf.mxu0 }
 0x128   :  { %v2467_v46 = vpop.f32.mrf.mxu1 }
 0x129   :  { %2534 = vst [vmem:[#allocation7_spill] sm:$0xff] %v2467_v46  ;;  %v1737_v47 = vpop.f32.mrf.mxu0  ;;  %v1729_v46 = vadd.f32 %v1728_v34, %v1727_v31  ;;  %v1735_v31 = vadd.f32 %v1734_v43, %v1733_v40 }
 0x12a   :  { %v1789_v48 = vpop.f32.mrf.mxu1 }
 0x12b   :  { %v1739_v50 = vpop.f32.mrf.mxu0 }
 0x12c   :  { %v1791_v51 = vpop.f32.mrf.mxu1  ;;  %v2541_v40 = vld [vmem:[#allocation5_spill] sm:$0xff] }
 0x12d   :  { %v1740_v52 = vpop.f32.mrf.mxu0 }
 0x12e   :  { %v1792_v54 = vpop.f32.mrf.mxu1  ;;  %v1741_v14 = vadd.f32 %v1740_v52, %v1739_v50  ;;  %v1212_v52 = vadd.f32 %v1775_v5, %v1131_v11 }
 0x12f   :  { %v1742_v59 = vpop.f32.mrf.mxu0  ;;  %v1793_v29 = vadd.f32 %v1792_v54, %v1791_v51 }
 0x130   :  { %v1794_v60 = vpop.f32.mrf.mxu1  ;;  %v1155_v9 = vadd.f32 %v1741_v14, %v2445_v57  ;;  %v2540_v57 = vld [vmem:[#allocation4_spill] sm:$0xff]  ;;  %v2543_v43 = vld [vmem:[#allocation7_spill] sm:$0xff] }
 0x131   :  { %v1743_v61 = vpop.f32.mrf.mxu0 }
 0x132   :  { %v1795_v62 = vpop.f32.mrf.mxu1 }
 0x133   :  { %v1745_v63 = vpop.f32.mrf.mxu0  ;;  %v1796_v33 = vadd.f32 %v1795_v62, %v1794_v60 }
 0x134   :  { %v2469_v1 = vpop.f32.mrf.mxu1 }
 0x135   :  { %2535 = vst [vmem:[#allocation8_spill] sm:$0xff] %v2469_v1  ;;  %v1746_v2 = vpop.f32.mrf.mxu0  ;;  %v1692_v1 = vadd.f32 %v2447_v58, %v2441_v55  ;;  %v1738_v55 = vadd.f32 %v1737_v47, %v1736_v45  ;;  %v1744_v58 = vadd.f32 %v1743_v61, %v1742_v59  ;;  %v1790_v45 = vadd.f32 %v1789_v48, %v2543_v43 }
 0x136   :  { %v2471_v3 = vpop.f32.mrf.mxu1  ;;  %v1236_v47 = vadd.f32 %v1793_v29, %v1155_v9  ;;  %v1215_v61 = vadd.f32 %v1778_v21, %v1134_v19 }
 0x137   :  { %2536 = vst [vmem:[#allocation9_spill] sm:$0xff] %v2471_v3  ;;  %v1748_v4 = vpop.f32.mrf.mxu0  ;;  %v1009_v3 = vadd.f32 %v1649_v7, %v2418_v0  ;;  %v1781_v0 = vadd.f32 %v1780_v35, %v1779_v32  ;;  %v1150_v27 = vadd.f32 %v1738_v55, %v2436_v49  ;;  %v1784_v35 = vadd.f32 %v2540_v57, %v2459_v37 }
 0x138   :  { %v2475_v8 = vpop.f32.mrf.mxu1 }
 0x139   :  { %2537 = vst [vmem:[#allocation10_spill] sm:$0xff] %v2475_v8  ;;  %v1749_v15 = vpop.f32.mrf.mxu0  ;;  %v1077_v8 = vadd.f32 %v1692_v1, %v996_v42  ;;  %v2542_v42 = vld [vmem:[#allocation6_spill] sm:$0xff]  ;;  %v1231_v10 = vadd.f32 %v1790_v45, %v1150_v27 }
 0x13a   :  { %v2477_v6 = vpop.f32.mrf.mxu1  ;;  %v1787_v17 = vadd.f32 %v2542_v42, %v2541_v40 }
 0x13b   :  { %2538 = vst [vmem:[#allocation11_spill] sm:$0xff] %v2477_v6  ;;  %v1751_v44 = vpop.f32.mrf.mxu0  ;;  %v1139_v6 = vadd.f32 %v1729_v46, %v2427_v25  ;;  %v1147_v25 = vadd.f32 %v1735_v31, %v2433_v41  ;;  %v1158_v36 = vadd.f32 %v1744_v58, %v1077_v8  ;;  %v1747_v46 = vadd.f32 %v1746_v2, %v1745_v63  ;;  %v2547_v2 = vld [vmem:[#allocation3_spill] sm:$0xff] }
 0x13c   :  { %v2483_v39 = vpop.f32.mrf.mxu1  ;;  %v1750_v41 = vadd.f32 %v1749_v15, %v1748_v4  ;;  %v2544_v12 = vld [vmem:[#allocation8_spill] sm:$0xff]  ;;  %v2546_v15 = vld [vmem:[#allocation2_spill] sm:$0xff] }
 0x13d   :  { %2539 = vst [vmem:[#allocation12_spill] sm:$0xff] %v2483_v39  ;;  %v1752_v18 = vpop.f32.mrf.mxu0  ;;  %v1090_v39 = vadd.f32 %v1701_v53, %v1009_v3  ;;  %v1220_v38 = vadd.f32 %v1781_v0, %v1139_v6  ;;  %v1228_v51 = vadd.f32 %v1787_v17, %v1147_v25  ;;  %v1223_v6 = vadd.f32 %v1784_v35, %v1142_v23 }
 0x13e   :  { %v1804_v34 = vpop.f32.mrf.mxu1  ;;  %v1753_v28 = vadd.f32 %v1752_v18, %v1751_v44  ;;  %v1239_v8 = vadd.f32 %v1796_v33, %v1158_v36  ;;  %v2545_v53 = vld [vmem:[#allocation9_spill] sm:$0xff]  ;;  %v1163_v63 = vadd.f32 %v1747_v46, %v2546_v15  ;;  %v1166_v4 = vadd.f32 %v1750_v41, %v2547_v2 }
 0x13f   :  { %v1754_v7 = vpop.f32.mrf.mxu0  ;;  %v1799_v48 = vadd.f32 %v2545_v53, %v2544_v12 }
 0x140   :  { %v1806_v13 = vpop.f32.mrf.mxu1  ;;  %v1171_v44 = vadd.f32 %v1753_v28, %v1090_v39 }
 0x141   :  { %v1755_v50 = vpop.f32.mrf.mxu0  ;;  %v1244_v36 = vadd.f32 %v1799_v48, %v1163_v63 }
 0x142   :  { %v1807_v26 = vpop.f32.mrf.mxu1  ;;  %v1756_v1 = vadd.f32 %v1755_v50, %v1754_v7 }
 0x143   :  { %v1841_v32 = vpop.f32.mrf.mxu0  ;;  %v1808_v23 = vadd.f32 %v1807_v26, %v1806_v13 }
 0x144   :  { %v1845_v30 = vpop.f32.mrf.mxu1  ;;  %v1301_v49 = vadd.f32 %v1841_v32, %v1220_v38  ;;  %v2548_v20 = vld [vmem:[#allocation12_spill] sm:$0xff]  ;;  %v1174_v58 = vadd.f32 %v1756_v1, %v1093_v16  ;;  %v2549_v16 = vld [vmem:[#allocation10_spill] sm:$0xff]  ;;  %v2550_v32 = vld [vmem:[#allocation11_spill] sm:$0xff] }
 0x145   :  { %v1292_v59 = vpop.f32.mrf.mxu0  ;;  %v1317_v3 = vadd.f32 %v1845_v30, %v1236_v47  ;;  %v1805_v22 = vadd.f32 %v1804_v34, %v2548_v20  ;;  %v1802_v57 = vadd.f32 %v2550_v32, %v2549_v16 }
 0x146   :  { %v1308_v54 = vpop.f32.mrf.mxu1  ;;  %v1293_v56 = vadd.f32 %v1292_v59, %v1212_v52  ;;  %v1341_v24 = vmax.f32 %v1301_v49, 0.0  ;;  %v1255_v13 = vadd.f32 %v1808_v23, %v1174_v58 }
 0x147   :  { %v1842_v37 = vpop.f32.mrf.mxu0  ;;  %v1309_v11 = vadd.f32 %v1308_v54, %v1228_v51  ;;  %v1345_v7 = vmax.f32 %v1317_v3, 0.0  ;;  %v1252_v19 = vadd.f32 %v1805_v22, %v1171_v44  ;;  %v1247_v43 = vadd.f32 %v1802_v57, %v1166_v4 }
 0x148   :  { %v1304_v60 = vadd.f32 %v1842_v37, %v1223_v6  ;;  %v1846_v62 = vpop.f32.mrf.mxu1  ;;  %v1339_v9 = vmax.f32 %v1293_v56, 0.0 }
 0x149   :  { %v1320_v14 = vadd.f32 %v1846_v62, %v1239_v8  ;;  %v1295_v18 = vpop.f32.mrf.mxu0  ;;  %v1343_v25 = vmax.f32 %v1309_v11, 0.0 }
 0x14a   :  { %v1342_v31 = vmax.f32 %v1304_v60, 0.0  ;;  %v1296_v5 = vadd.f32 %v1295_v18, %v1215_v61  ;;  %v1311_v55 = vpop.f32.mrf.mxu1 }
 0x14b   :  { %v1346_v0 = vmax.f32 %v1320_v14, 0.0  ;;  %v1312_v39 = vadd.f32 %v1311_v55, %v1231_v10 }
 0x14c   :  { %v1574_v50 = vpack.c.bf16 %v1342_v31, %v1341_v24  ;;  %v1340_v52 = vmax.f32 %v1296_v5, 0.0  ;;  %v1849_v21 = vpop.f32.mrf.mxu1 }
 0x14d   :  { %v1584_v27 = vpack.c.bf16 %v1346_v0, %v1345_v7  ;;  %v1344_v29 = vmax.f32 %v1312_v39, 0.0  ;;  %v1333_v40 = vadd.f32 %v1849_v21, %v1252_v19 }
 0x14e   :  { %1596 = vst [vmem:[%s2528_s3 + $0x8] sm:$0xff] %v1574_v50   ;;  %v1569_v34 = vpack.c.bf16 %v1340_v52, %v1339_v9  ;;  %v1324_v38 = vpop.f32.mrf.mxu1 }
 0x14f   :  { %1598 = vst [vmem:[%s2528_s3 + $0x18] sm:$0xff] %v1584_v27   ;;  %v1579_v35 = vpack.c.bf16 %v1344_v29, %v1343_v25  ;;  %v1325_v42 = vadd.f32 %v1324_v38, %v1244_v36  ;;  %v1349_v28 = vmax.f32 %v1333_v40, 0.0 }
 0x150   :  { %1570 = vst [vmem:[%s2528_s3] sm:$0xff] %v1569_v34   ;;  %v1850_v26 = vpop.f32.mrf.mxu1 }
 0x151   :  { %1597 = vst [vmem:[%s2528_s3 + $0x10] sm:$0xff] %v1579_v35   ;;  %v1336_v17 = vadd.f32 %v1850_v26, %v1255_v13  ;;  %v1347_v46 = vmax.f32 %v1325_v42, 0.0 }
 0x152   :  { %v1327_v45 = vpop.f32.mrf.mxu1 }
 0x153   :  { %v1350_v30 = vmax.f32 %v1336_v17, 0.0  ;;  %v1328_v33 = vadd.f32 %v1327_v45, %v1247_v43 }
 0x155   :  { %v1594_v41 = vpack.c.bf16 %v1350_v30, %v1349_v28  ;;  %v1348_v47 = vmax.f32 %v1328_v33, 0.0 }
 0x157   :  { %1600 = vst [vmem:[%s2528_s3 + $0x28] sm:$0xff] %v1594_v41   ;;  %v1589_v59 = vpack.c.bf16 %v1348_v47, %v1347_v46 }
 0x159   :  { %1599 = vst [vmem:[%s2528_s3 + $0x20] sm:$0xff] %v1589_v59  }

// kernel: dqn_forward.7
= control target key start
LH: loop header
LB: loop body
LE: loop exit
PB: predicated region body
PF: predicated region fallthrough
CT: control target
= control target key end

     0   :  { %s11063_s1 = inlined_call_operand.vmem [shape: bf16[6144,256], index: 1, kind: input, shape index: {}]   ;;  %s11064_s0 = inlined_call_operand.vmem [shape: bf16[16,6144], index: 0, kind: input, shape index: {}]   ;;  %s11065_s3 = inlined_call_operand.vmem [shape: bf16[256,128], index: 3, kind: input, shape index: {}]   ;;  %s11066_s2 = inlined_call_operand.vmem [shape: f32[1,256], index: 2, kind: input, shape index: {}]   ;;  %s11067_s4 = inlined_call_operand.vmem [shape: f32[1,128], index: 4, kind: input, shape index: {}]   ;;  %s11068_s5 = inlined_call_operand.vmem [shape: f32[16,128], index: 5, kind: output, shape index: {}]  }
   0x1   :  { %v7004_v0 = vld [vmem:[%s11063_s1 + $0x74] ss:$8 sps:$4 sm:$0xff]   ;;  %v7008_v2 = vld [vmem:[%s11063_s1 + $0x70] ss:$8 sps:$4 sm:$0xff]   ;;  %v7010_v4 = vld [vmem:[%s11063_s1 + $0x64] ss:$8 sps:$4 sm:$0xff]  }
   0x2   :  { %v7006_v1 = vld [vmem:[%s11063_s1 + $0x174] ss:$8 sps:$4 sm:$0xff]   ;;  %4929 = vmatprep.subr.bf16.mxu0 %v7004_v0  ;;  %v7009_v3 = vld [vmem:[%s11063_s1 + $0x170] ss:$8 sps:$4 sm:$0xff]   ;;  %v7012_v5 = vld [vmem:[%s11063_s1 + $0x164] ss:$8 sps:$4 sm:$0xff]  }
   0x3   :  { %4972 = vmatprep.subr.bf16.mxu1 %v7006_v1  ;;  %4930 = vmatpush1.bf16.msra.mxu0 %v7008_v2  ;;  %v7014_v6 = vld [vmem:[%s11063_s1 + $0x60] ss:$8 sps:$4 sm:$0xff]   ;;  %v7016_v8 = vld [vmem:[%s11063_s1 + $0x54] ss:$8 sps:$4 sm:$0xff]   ;;  %v7020_v10 = vld [vmem:[%s11063_s1 + $0x50] ss:$8 sps:$4 sm:$0xff]  }
   0x4   :  { %4973 = vmatpush1.bf16.msra.mxu1 %v7009_v3  ;;  %4931 = vmatprep.subr.bf16.mxu0 %v7010_v4  ;;  %v7015_v7 = vld [vmem:[%s11063_s1 + $0x160] ss:$8 sps:$4 sm:$0xff]   ;;  %v7018_v9 = vld [vmem:[%s11063_s1 + $0x154] ss:$8 sps:$4 sm:$0xff]   ;;  %v7021_v11 = vld [vmem:[%s11063_s1 + $0x150] ss:$8 sps:$4 sm:$0xff]  }
   0x5   :  { %4974 = vmatprep.subr.bf16.mxu1 %v7012_v5  ;;  %v7022_v12 = vld [vmem:[%s11063_s1 + $0x44] ss:$8 sps:$4 sm:$0xff]   ;;  %v7026_v14 = vld [vmem:[%s11063_s1 + $0x40] ss:$8 sps:$4 sm:$0xff]   ;;  %v7028_v16 = vld [vmem:[%s11063_s1 + $0x34] ss:$8 sps:$4 sm:$0xff]  }
   0x6   :  { %v7024_v13 = vld [vmem:[%s11063_s1 + $0x144] ss:$8 sps:$4 sm:$0xff]   ;;  %v7027_v15 = vld [vmem:[%s11063_s1 + $0x140] ss:$8 sps:$4 sm:$0xff]   ;;  %v7030_v17 = vld [vmem:[%s11063_s1 + $0x134] ss:$8 sps:$4 sm:$0xff]  }
   0x7   :  { %4932 = vmatpush1.bf16.msra.mxu0 %v7014_v6  ;;  %v7032_v18 = vld [vmem:[%s11063_s1 + $0x30] ss:$8 sps:$4 sm:$0xff]   ;;  %v7034_v20 = vld [vmem:[%s11063_s1 + $0x24] ss:$8 sps:$4 sm:$0xff]   ;;  %v7038_v22 = vld [vmem:[%s11063_s1 + $0x20] ss:$8 sps:$4 sm:$0xff]  }
   0x8   :  { %4975 = vmatpush1.bf16.msra.mxu1 %v7015_v7  ;;  %4933 = vmatprep.subr.bf16.mxu0 %v7016_v8  ;;  %v7033_v19 = vld [vmem:[%s11063_s1 + $0x130] ss:$8 sps:$4 sm:$0xff]   ;;  %v7036_v21 = vld [vmem:[%s11063_s1 + $0x124] ss:$8 sps:$4 sm:$0xff]   ;;  %v7039_v23 = vld [vmem:[%s11063_s1 + $0x120] ss:$8 sps:$4 sm:$0xff]  }
   0x9   :  { %4976 = vmatprep.subr.bf16.mxu1 %v7018_v9  ;;  %v7040_v24 = vld [vmem:[%s11063_s1 + $0x14] ss:$8 sps:$4 sm:$0xff]   ;;  %v7044_v26 = vld [vmem:[%s11063_s1 + $0x10] ss:$8 sps:$4 sm:$0xff]   ;;  %v7046_v28 = vld [vmem:[%s11063_s1 + $0x4] ss:$8 sps:$4 sm:$0xff]  }
   0xa   :  { %v7042_v25 = vld [vmem:[%s11063_s1 + $0x114] ss:$8 sps:$4 sm:$0xff]   ;;  %v7045_v27 = vld [vmem:[%s11063_s1 + $0x110] ss:$8 sps:$4 sm:$0xff]   ;;  %v7048_v29 = vld [vmem:[%s11063_s1 + $0x104] ss:$8 sps:$4 sm:$0xff]  }
   0xb   :  { %4934 = vmatpush1.bf16.msra.mxu0 %v7020_v10  ;;  %v7050_v30 = vld [vmem:[%s11063_s1] ss:$8 sps:$4 sm:$0xff]   ;;  %v7052_v32 = vld [vmem:[%s11063_s1 + $0xf4] ss:$8 sps:$4 sm:$0xff]   ;;  %v7056_v34 = vld [vmem:[%s11063_s1 + $0xf0] ss:$8 sps:$4 sm:$0xff]  }
   0xc   :  { %4977 = vmatpush1.bf16.msra.mxu1 %v7021_v11  ;;  %4935 = vmatprep.subr.bf16.mxu0 %v7022_v12  ;;  %v7051_v31 = vld [vmem:[%s11063_s1 + $0x100] ss:$8 sps:$4 sm:$0xff]   ;;  %v7054_v33 = vld [vmem:[%s11063_s1 + $0x1f4] ss:$8 sps:$4 sm:$0xff]   ;;  %v7057_v35 = vld [vmem:[%s11063_s1 + $0x1f0] ss:$8 sps:$4 sm:$0xff]  }
   0xd   :  { %4978 = vmatprep.subr.bf16.mxu1 %v7024_v13  ;;  %v7058_v36 = vld [vmem:[%s11063_s1 + $0xe4] ss:$8 sps:$4 sm:$0xff]   ;;  %v7062_v38 = vld [vmem:[%s11063_s1 + $0xe0] ss:$8 sps:$4 sm:$0xff]   ;;  %v7064_v40 = vld [vmem:[%s11063_s1 + $0xd4] ss:$8 sps:$4 sm:$0xff]  }
   0xe   :  { %v7060_v37 = vld [vmem:[%s11063_s1 + $0x1e4] ss:$8 sps:$4 sm:$0xff]   ;;  %v7063_v39 = vld [vmem:[%s11063_s1 + $0x1e0] ss:$8 sps:$4 sm:$0xff]   ;;  %v7066_v41 = vld [vmem:[%s11063_s1 + $0x1d4] ss:$8 sps:$4 sm:$0xff]  }
   0xf   :  { %4936 = vmatpush1.bf16.msra.mxu0 %v7026_v14  ;;  %v7068_v42 = vld [vmem:[%s11063_s1 + $0xd0] ss:$8 sps:$4 sm:$0xff]   ;;  %v7070_v44 = vld [vmem:[%s11063_s1 + $0xc4] ss:$8 sps:$4 sm:$0xff]   ;;  %v7074_v46 = vld [vmem:[%s11063_s1 + $0xc0] ss:$8 sps:$4 sm:$0xff]  }
  0x10   :  { %4979 = vmatpush1.bf16.msra.mxu1 %v7027_v15  ;;  %4937 = vmatprep.subr.bf16.mxu0 %v7028_v16  ;;  %v7069_v43 = vld [vmem:[%s11063_s1 + $0x1d0] ss:$8 sps:$4 sm:$0xff]   ;;  %v7072_v45 = vld [vmem:[%s11063_s1 + $0x1c4] ss:$8 sps:$4 sm:$0xff]   ;;  %v7075_v47 = vld [vmem:[%s11063_s1 + $0x1c0] ss:$8 sps:$4 sm:$0xff]  }
  0x11   :  { %4980 = vmatprep.subr.bf16.mxu1 %v7030_v17  ;;  %v21_v48 = vld [vmem:[%s11064_s0] sm:$0xff]  ;;  %v22_v50 = vld [vmem:[%s11064_s0 + $0x8] sm:$0xff]  ;;  %v7076_v52 = vld [vmem:[%s11063_s1 + $0xb4] ss:$8 sps:$4 sm:$0xff]  }
  0x12   :  { %v45_v49 = vld [vmem:[%s11064_s0 + $0xc0] sm:$0xff]  ;;  %v46_v51 = vld [vmem:[%s11064_s0 + $0xc8] sm:$0xff]  ;;  %v7078_v54 = vld [vmem:[%s11063_s1 + $0x1b4] ss:$8 sps:$4 sm:$0xff]  }
  0x13   :  { %4938 = vmatpush1.bf16.msra.mxu0 %v7032_v18  ;;  %v6150_v53 = vcombine.high %v21_v48, %v45_v49  ;;  %v6152_v55 = vcombine.high %v22_v50, %v46_v51  ;;  %v7080_v56 = vld [vmem:[%s11063_s1 + $0xb0] ss:$8 sps:$4 sm:$0xff]   ;;  %v7082_v58 = vld [vmem:[%s11063_s1 + $0xa4] ss:$8 sps:$4 sm:$0xff]   ;;  %v7086_v60 = vld [vmem:[%s11063_s1 + $0xa0] ss:$8 sps:$4 sm:$0xff]   ;;  %v6149_v8 = vcombine.low %v21_v48, %v45_v49  ;;  %v6151_v9 = vcombine.low %v22_v50, %v46_v51 }
  0x14   :  { %4981 = vmatpush1.bf16.msra.mxu1 %v7033_v19  ;;  %4939 = vmatprep.subr.bf16.mxu0 %v7034_v20  ;;  %v7081_v57 = vld [vmem:[%s11063_s1 + $0x1b0] ss:$8 sps:$4 sm:$0xff]   ;;  %v7084_v59 = vld [vmem:[%s11063_s1 + $0x1a4] ss:$8 sps:$4 sm:$0xff]   ;;  %v7087_v61 = vld [vmem:[%s11063_s1 + $0x1a0] ss:$8 sps:$4 sm:$0xff]  }
  0x15   :  { %4982 = vmatprep.subr.bf16.mxu1 %v7036_v21  ;;  %4961 = vmatprep.mubr.bf16.mxu0 %v6150_v53  ;;  %v7088_v62 = vld [vmem:[%s11063_s1 + $0x94] ss:$8 sps:$4 sm:$0xff]   ;;  %v7092_v0 = vld [vmem:[%s11063_s1 + $0x90] ss:$8 sps:$4 sm:$0xff]   ;;  %v7094_v2 = vld [vmem:[%s11063_s1 + $0x84] ss:$8 sps:$4 sm:$0xff]  }
  0x16   :  { %5004 = vmatprep.mubr.bf16.mxu1 %v6152_v55  ;;  %v7090_v63 = vld [vmem:[%s11063_s1 + $0x194] ss:$8 sps:$4 sm:$0xff]   ;;  %v7093_v1 = vld [vmem:[%s11063_s1 + $0x190] ss:$8 sps:$4 sm:$0xff]   ;;  %v7096_v3 = vld [vmem:[%s11063_s1 + $0x184] ss:$8 sps:$4 sm:$0xff]  }
  0x17   :  { %4940 = vmatpush1.bf16.msra.mxu0 %v7038_v22  ;;  %v7098_v4 = vld [vmem:[%s11063_s1 + $0x80] ss:$8 sps:$4 sm:$0xff]   ;;  %v7102_v6 = vld [vmem:[%s11063_s1 + $0x274] ss:$8 sps:$4 sm:$0xff]   ;;  %v7100_v10 = vld [vmem:[%s11063_s1 + $0x270] ss:$8 sps:$4 sm:$0xff]  }
  0x18   :  { %4983 = vmatpush1.bf16.msra.mxu1 %v7039_v23  ;;  %4941 = vmatprep.subr.bf16.mxu0 %v7040_v24  ;;  %v7099_v5 = vld [vmem:[%s11063_s1 + $0x180] ss:$8 sps:$4 sm:$0xff]   ;;  %v7105_v7 = vld [vmem:[%s11063_s1 + $0x374] ss:$8 sps:$4 sm:$0xff]   ;;  %v7103_v11 = vld [vmem:[%s11063_s1 + $0x370] ss:$8 sps:$4 sm:$0xff]  }
  0x19   :  { %4984 = vmatprep.subr.bf16.mxu1 %v7042_v25  ;;  %v7108_v12 = vld [vmem:[%s11063_s1 + $0x264] ss:$8 sps:$4 sm:$0xff]   ;;  %v7106_v14 = vld [vmem:[%s11063_s1 + $0x260] ss:$8 sps:$4 sm:$0xff]   ;;  %v7114_v16 = vld [vmem:[%s11063_s1 + $0x254] ss:$8 sps:$4 sm:$0xff]  }
  0x1a   :  { %v7111_v13 = vld [vmem:[%s11063_s1 + $0x364] ss:$8 sps:$4 sm:$0xff]   ;;  %v7109_v15 = vld [vmem:[%s11063_s1 + $0x360] ss:$8 sps:$4 sm:$0xff]   ;;  %v7117_v17 = vld [vmem:[%s11063_s1 + $0x354] ss:$8 sps:$4 sm:$0xff]  }
  0x1b   :  { %4942 = vmatpush1.bf16.msra.mxu0 %v7044_v26  ;;  %v7112_v18 = vld [vmem:[%s11063_s1 + $0x250] ss:$8 sps:$4 sm:$0xff]   ;;  %v7120_v20 = vld [vmem:[%s11063_s1 + $0x244] ss:$8 sps:$4 sm:$0xff]   ;;  %v7118_v22 = vld [vmem:[%s11063_s1 + $0x240] ss:$8 sps:$4 sm:$0xff]  }
  0x1c   :  { %4985 = vmatpush1.bf16.msra.mxu1 %v7045_v27  ;;  %4943 = vmatprep.subr.bf16.mxu0 %v7046_v28  ;;  %v7115_v19 = vld [vmem:[%s11063_s1 + $0x350] ss:$8 sps:$4 sm:$0xff]   ;;  %v7123_v21 = vld [vmem:[%s11063_s1 + $0x344] ss:$8 sps:$4 sm:$0xff]   ;;  %v7121_v23 = vld [vmem:[%s11063_s1 + $0x340] ss:$8 sps:$4 sm:$0xff]  }
  0x1d   :  { %4986 = vmatprep.subr.bf16.mxu1 %v7048_v29  ;;  %v7126_v24 = vld [vmem:[%s11063_s1 + $0x234] ss:$8 sps:$4 sm:$0xff]   ;;  %v7124_v26 = vld [vmem:[%s11063_s1 + $0x230] ss:$8 sps:$4 sm:$0xff]   ;;  %v7132_v28 = vld [vmem:[%s11063_s1 + $0x224] ss:$8 sps:$4 sm:$0xff]  }
  0x1e   :  { %v7129_v25 = vld [vmem:[%s11063_s1 + $0x334] ss:$8 sps:$4 sm:$0xff]   ;;  %v7127_v27 = vld [vmem:[%s11063_s1 + $0x330] ss:$8 sps:$4 sm:$0xff]   ;;  %v7135_v29 = vld [vmem:[%s11063_s1 + $0x324] ss:$8 sps:$4 sm:$0xff]  }
  0x1f   :  { %4944 = vmatpush1.bf16.msra.mxu0 %v7050_v30  ;;  %v7130_v30 = vld [vmem:[%s11063_s1 + $0x220] ss:$8 sps:$4 sm:$0xff]   ;;  %v7148_v48 = vld [vmem:[%s11063_s1 + $0x2f0] ss:$8 sps:$4 sm:$0xff]   ;;  %v7156_v50 = vld [vmem:[%s11063_s1 + $0x2e4] ss:$8 sps:$4 sm:$0xff]  }
  0x20   :  { %4987 = vmatpush1.bf16.msra.mxu1 %v7051_v31  ;;  %4945 = vmatprep.subr.bf16.mxu0 %v7052_v32  ;;  %v7133_v31 = vld [vmem:[%s11063_s1 + $0x320] ss:$8 sps:$4 sm:$0xff]   ;;  %v7138_v32 = vld [vmem:[%s11063_s1 + $0x214] ss:$8 sps:$4 sm:$0xff]   ;;  %v7151_v49 = vld [vmem:[%s11063_s1 + $0x3f0] ss:$8 sps:$4 sm:$0xff]  }
  0x21   :  { %4988 = vmatprep.subr.bf16.mxu1 %v7054_v33  ;;  %v7141_v33 = vld [vmem:[%s11063_s1 + $0x314] ss:$8 sps:$4 sm:$0xff]   ;;  %v7159_v51 = vld [vmem:[%s11063_s1 + $0x3e4] ss:$8 sps:$4 sm:$0xff]   ;;  %v7157_v53 = vld [vmem:[%s11063_s1 + $0x3e0] ss:$8 sps:$4 sm:$0xff]  }
  0x22   :  { %v7165_v55 = vld [vmem:[%s11063_s1 + $0x3d4] ss:$8 sps:$4 sm:$0xff]  }
  0x23   :  { %4946 = vmatpush2.bf16.msra.mxu0 %v7056_v34  ;;  %v7136_v34 = vld [vmem:[%s11063_s1 + $0x210] ss:$8 sps:$4 sm:$0xff]  }
  0x24   :  { %4989 = vmatpush2.bf16.msra.mxu1 %v7057_v35  ;;  %4947 = vmatprep.subr.bf16.mxu0 %v7058_v36  ;;  %v7139_v35 = vld [vmem:[%s11063_s1 + $0x310] ss:$8 sps:$4 sm:$0xff]  }
  0x25   :  { %4990 = vmatprep.subr.bf16.mxu1 %v7060_v37  ;;  %v8493_v36 = vld [vmem:[%s11064_s0 + $0x10] sm:$0xff] }
  0x26   :  { %v8498_v37 = vld [vmem:[%s11064_s0 + $0xd0] sm:$0xff] }
  0x27   :  { %4948 = vmatpush2.bf16.msra.mxu0 %v7062_v38  ;;  %v8503_v38 = vld [vmem:[%s11064_s0 + $0x18] sm:$0xff] }
  0x28   :  { %4991 = vmatpush2.bf16.msra.mxu1 %v7063_v39  ;;  %4949 = vmatprep.subr.bf16.mxu0 %v7064_v40  ;;  %v8508_v39 = vld [vmem:[%s11064_s0 + $0xd8] sm:$0xff]  ;;  %v7144_v40 = vld [vmem:[%s11063_s1 + $0x204] ss:$8 sps:$4 sm:$0xff]  }
  0x29   :  { %4992 = vmatprep.subr.bf16.mxu1 %v7066_v41  ;;  %v6154_v41 = vcombine.high %v8493_v36, %v8498_v37 }
  0x2b   :  { %4950 = vmatpush2.bf16.msra.mxu0 %v7068_v42  ;;  %v7147_v42 = vld [vmem:[%s11063_s1 + $0x304] ss:$8 sps:$4 sm:$0xff]  }
  0x2c   :  { %4993 = vmatpush2.bf16.msra.mxu1 %v7069_v43  ;;  %4951 = vmatprep.subr.bf16.mxu0 %v7070_v44  ;;  %v6156_v43 = vcombine.high %v8503_v38, %v8508_v39  ;;  %v7142_v44 = vld [vmem:[%s11063_s1 + $0x200] ss:$8 sps:$4 sm:$0xff]  }
  0x2d   :  { %4994 = vmatprep.subr.bf16.mxu1 %v7072_v45  ;;  %v7145_v45 = vld [vmem:[%s11063_s1 + $0x300] ss:$8 sps:$4 sm:$0xff]  }
  0x2f   :  { %4952 = vmatpush2.bf16.msra.mxu0 %v7074_v46  ;;  %v7150_v46 = vld [vmem:[%s11063_s1 + $0x2f4] ss:$8 sps:$4 sm:$0xff]  }
  0x30   :  { %4995 = vmatpush2.bf16.msra.mxu1 %v7075_v47  ;;  %4953 = vmatprep.subr.bf16.mxu0 %v7076_v52  ;;  %v7153_v47 = vld [vmem:[%s11063_s1 + $0x3f4] ss:$8 sps:$4 sm:$0xff]   ;;  %v7154_v52 = vld [vmem:[%s11063_s1 + $0x2e0] ss:$8 sps:$4 sm:$0xff]  }
  0x31   :  { %4996 = vmatprep.subr.bf16.mxu1 %v7078_v54  ;;  %v7162_v54 = vld [vmem:[%s11063_s1 + $0x2d4] ss:$8 sps:$4 sm:$0xff]  }
  0x33   :  { %4954 = vmatpush2.bf16.msra.mxu0 %v7080_v56  ;;  %v7160_v56 = vld [vmem:[%s11063_s1 + $0x2d0] ss:$8 sps:$4 sm:$0xff]  }
  0x34   :  { %4997 = vmatpush2.bf16.msra.mxu1 %v7081_v57  ;;  %4955 = vmatprep.subr.bf16.mxu0 %v7082_v58  ;;  %v7163_v57 = vld [vmem:[%s11063_s1 + $0x3d0] ss:$8 sps:$4 sm:$0xff]   ;;  %v7168_v58 = vld [vmem:[%s11063_s1 + $0x2c4] ss:$8 sps:$4 sm:$0xff]  }
  0x35   :  { %4998 = vmatprep.subr.bf16.mxu1 %v7084_v59  ;;  %v7171_v59 = vld [vmem:[%s11063_s1 + $0x3c4] ss:$8 sps:$4 sm:$0xff]  }
  0x37   :  { %4956 = vmatpush2.bf16.msra.mxu0 %v7086_v60  ;;  %v7166_v60 = vld [vmem:[%s11063_s1 + $0x2c0] ss:$8 sps:$4 sm:$0xff]  }
  0x38   :  { %4999 = vmatpush2.bf16.msra.mxu1 %v7087_v61  ;;  %4957 = vmatprep.subr.bf16.mxu0 %v7088_v62  ;;  %v7169_v61 = vld [vmem:[%s11063_s1 + $0x3c0] ss:$8 sps:$4 sm:$0xff]   ;;  %v7174_v62 = vld [vmem:[%s11063_s1 + $0x2b4] ss:$8 sps:$4 sm:$0xff]  }
  0x39   :  { %5000 = vmatprep.subr.bf16.mxu1 %v7090_v63  ;;  %v7177_v63 = vld [vmem:[%s11063_s1 + $0x3b4] ss:$8 sps:$4 sm:$0xff]  }
  0x3b   :  { %4958 = vmatpush2.bf16.msra.mxu0 %v7092_v0  ;;  %v7172_v0 = vld [vmem:[%s11063_s1 + $0x2b0] ss:$8 sps:$4 sm:$0xff]  }
  0x3c   :  { %5001 = vmatpush2.bf16.msra.mxu1 %v7093_v1  ;;  %4959 = vmatprep.subr.bf16.mxu0 %v7094_v2  ;;  %v7175_v1 = vld [vmem:[%s11063_s1 + $0x3b0] ss:$8 sps:$4 sm:$0xff]   ;;  %v7180_v2 = vld [vmem:[%s11063_s1 + $0x2a4] ss:$8 sps:$4 sm:$0xff]  }
  0x3d   :  { %5002 = vmatprep.subr.bf16.mxu1 %v7096_v3  ;;  %v7183_v3 = vld [vmem:[%s11063_s1 + $0x3a4] ss:$8 sps:$4 sm:$0xff]  }
  0x3f   :  { %4960 = vmatpush2.bf16.msra.mxu0 %v7098_v4  ;;  %v7178_v4 = vld [vmem:[%s11063_s1 + $0x2a0] ss:$8 sps:$4 sm:$0xff]  }
  0x40   :  { %5003 = vmatpush2.bf16.msra.mxu1 %v7099_v5  ;;  %5015 = vmatprep.subr.bf16.mxu0 %v7102_v6  ;;  %v7181_v5 = vld [vmem:[%s11063_s1 + $0x3a0] ss:$8 sps:$4 sm:$0xff]   ;;  %v7186_v6 = vld [vmem:[%s11063_s1 + $0x294] ss:$8 sps:$4 sm:$0xff]  }
  0x41   :  { %5058 = vmatprep.subr.bf16.mxu1 %v7105_v7  ;;  %v7189_v7 = vld [vmem:[%s11063_s1 + $0x394] ss:$8 sps:$4 sm:$0xff]  }
  0x42   :  { %4962 = vmatmul.mubr.bf16.vlgmr.msra.gmra.mxu0 %v6149_v8  ;;  %v7184_v8 = vld [vmem:[%s11063_s1 + $0x290] ss:$8 sps:$4 sm:$0xff]  }
  0x43   :  { %5005 = vmatmul.mubr.bf16.vlgmr.msra.gmra.mxu1 %v6151_v9  ;;  %5016 = vmatpush1.bf16.msra.mxu0 %v7100_v10  ;;  %v7187_v9 = vld [vmem:[%s11063_s1 + $0x390] ss:$8 sps:$4 sm:$0xff]   ;;  %v7192_v10 = vld [vmem:[%s11063_s1 + $0x284] ss:$8 sps:$4 sm:$0xff]  }
  0x44   :  { %5059 = vmatpush1.bf16.msra.mxu1 %v7103_v11  ;;  %5017 = vmatprep.subr.bf16.mxu0 %v7108_v12  ;;  %v7195_v11 = vld [vmem:[%s11063_s1 + $0x384] ss:$8 sps:$4 sm:$0xff]   ;;  %v7190_v12 = vld [vmem:[%s11063_s1 + $0x280] ss:$8 sps:$4 sm:$0xff]  }
  0x45   :  { %5060 = vmatprep.subr.bf16.mxu1 %v7111_v13  ;;  %5047 = vmatprep.mubr.bf16.mxu0 %v6154_v41  ;;  %v7193_v13 = vld [vmem:[%s11063_s1 + $0x380] ss:$8 sps:$4 sm:$0xff]   ;;  %v7223_v41 = vld [vmem:[%s11063_s1 + $0x530] ss:$8 sps:$4 sm:$0xff]  }
  0x46   :  { %5090 = vmatprep.mubr.bf16.mxu1 %v6156_v43  ;;  %v7231_v43 = vld [vmem:[%s11063_s1 + $0x524] ss:$8 sps:$4 sm:$0xff]  }
  0x47   :  { %5018 = vmatpush1.bf16.msra.mxu0 %v7106_v14  ;;  %v7198_v14 = vld [vmem:[%s11063_s1 + $0x474] ss:$8 sps:$4 sm:$0xff]  }
  0x48   :  { %5061 = vmatpush1.bf16.msra.mxu1 %v7109_v15  ;;  %5019 = vmatprep.subr.bf16.mxu0 %v7114_v16  ;;  %v7201_v15 = vld [vmem:[%s11063_s1 + $0x574] ss:$8 sps:$4 sm:$0xff]   ;;  %v6153_v16 = vcombine.low %v8493_v36, %v8498_v37  ;;  %v7214_v36 = vld [vmem:[%s11063_s1 + $0x440] ss:$8 sps:$4 sm:$0xff]  }
  0x49   :  { %5062 = vmatprep.subr.bf16.mxu1 %v7117_v17  ;;  %v6155_v17 = vcombine.low %v8503_v38, %v8508_v39  ;;  %v7217_v37 = vld [vmem:[%s11063_s1 + $0x540] ss:$8 sps:$4 sm:$0xff]   ;;  %v7222_v38 = vld [vmem:[%s11063_s1 + $0x434] ss:$8 sps:$4 sm:$0xff]  }
  0x4a   :  { %v7225_v39 = vld [vmem:[%s11063_s1 + $0x534] ss:$8 sps:$4 sm:$0xff]  }
  0x4b   :  { %5020 = vmatpush1.bf16.msra.mxu0 %v7112_v18  ;;  %v7196_v18 = vld [vmem:[%s11063_s1 + $0x470] ss:$8 sps:$4 sm:$0xff]  }
  0x4c   :  { %5063 = vmatpush1.bf16.msra.mxu1 %v7115_v19  ;;  %5021 = vmatprep.subr.bf16.mxu0 %v7120_v20  ;;  %v7199_v19 = vld [vmem:[%s11063_s1 + $0x570] ss:$8 sps:$4 sm:$0xff]   ;;  %v7204_v20 = vld [vmem:[%s11063_s1 + $0x464] ss:$8 sps:$4 sm:$0xff]  }
  0x4d   :  { %5064 = vmatprep.subr.bf16.mxu1 %v7123_v21  ;;  %v7207_v21 = vld [vmem:[%s11063_s1 + $0x564] ss:$8 sps:$4 sm:$0xff]  }
  0x4f   :  { %5022 = vmatpush1.bf16.msra.mxu0 %v7118_v22  ;;  %v7202_v22 = vld [vmem:[%s11063_s1 + $0x460] ss:$8 sps:$4 sm:$0xff]  }
  0x50   :  { %5065 = vmatpush1.bf16.msra.mxu1 %v7121_v23  ;;  %5023 = vmatprep.subr.bf16.mxu0 %v7126_v24  ;;  %v7205_v23 = vld [vmem:[%s11063_s1 + $0x560] ss:$8 sps:$4 sm:$0xff]  }
  0x51   :  { %5066 = vmatprep.subr.bf16.mxu1 %v7129_v25  ;;  %v8653_v24 = vld [vmem:[%s11064_s0 + $0x20] sm:$0xff] }
  0x52   :  { %v8658_v25 = vld [vmem:[%s11064_s0 + $0xe0] sm:$0xff] }
  0x53   :  { %5024 = vmatpush1.bf16.msra.mxu0 %v7124_v26  ;;  %v8663_v26 = vld [vmem:[%s11064_s0 + $0x28] sm:$0xff] }
  0x54   :  { %5067 = vmatpush1.bf16.msra.mxu1 %v7127_v27  ;;  %5025 = vmatprep.subr.bf16.mxu0 %v7132_v28  ;;  %v8668_v27 = vld [vmem:[%s11064_s0 + $0xe8] sm:$0xff]  ;;  %v7210_v28 = vld [vmem:[%s11063_s1 + $0x454] ss:$8 sps:$4 sm:$0xff]  }
  0x55   :  { %5068 = vmatprep.subr.bf16.mxu1 %v7135_v29  ;;  %v6158_v29 = vcombine.high %v8653_v24, %v8658_v25 }
  0x57   :  { %5026 = vmatpush1.bf16.msra.mxu0 %v7130_v30  ;;  %v7213_v30 = vld [vmem:[%s11063_s1 + $0x554] ss:$8 sps:$4 sm:$0xff]  }
  0x58   :  { %5069 = vmatpush1.bf16.msra.mxu1 %v7133_v31  ;;  %5027 = vmatprep.subr.bf16.mxu0 %v7138_v32  ;;  %v6160_v31 = vcombine.high %v8663_v26, %v8668_v27  ;;  %v7208_v32 = vld [vmem:[%s11063_s1 + $0x450] ss:$8 sps:$4 sm:$0xff]  }
  0x59   :  { %5070 = vmatprep.subr.bf16.mxu1 %v7141_v33  ;;  %v7211_v33 = vld [vmem:[%s11063_s1 + $0x550] ss:$8 sps:$4 sm:$0xff]  }
  0x5b   :  { %5028 = vmatpush1.bf16.msra.mxu0 %v7136_v34  ;;  %v7216_v34 = vld [vmem:[%s11063_s1 + $0x444] ss:$8 sps:$4 sm:$0xff]  }
  0x5c   :  { %5071 = vmatpush1.bf16.msra.mxu1 %v7139_v35  ;;  %5029 = vmatprep.subr.bf16.mxu0 %v7144_v40  ;;  %v7219_v35 = vld [vmem:[%s11063_s1 + $0x544] ss:$8 sps:$4 sm:$0xff]   ;;  %v7220_v40 = vld [vmem:[%s11063_s1 + $0x430] ss:$8 sps:$4 sm:$0xff]  }
  0x5d   :  { %5072 = vmatprep.subr.bf16.mxu1 %v7147_v42  ;;  %v7228_v42 = vld [vmem:[%s11063_s1 + $0x424] ss:$8 sps:$4 sm:$0xff]  }
  0x5f   :  { %5030 = vmatpush1.bf16.msra.mxu0 %v7142_v44  ;;  %v7226_v44 = vld [vmem:[%s11063_s1 + $0x420] ss:$8 sps:$4 sm:$0xff]  }
  0x60   :  { %5073 = vmatpush1.bf16.msra.mxu1 %v7145_v45  ;;  %5031 = vmatprep.subr.bf16.mxu0 %v7150_v46  ;;  %v7229_v45 = vld [vmem:[%s11063_s1 + $0x520] ss:$8 sps:$4 sm:$0xff]   ;;  %v7234_v46 = vld [vmem:[%s11063_s1 + $0x414] ss:$8 sps:$4 sm:$0xff]  }
  0x61   :  { %5074 = vmatprep.subr.bf16.mxu1 %v7153_v47  ;;  %v7237_v47 = vld [vmem:[%s11063_s1 + $0x514] ss:$8 sps:$4 sm:$0xff]  }
  0x63   :  { %5032 = vmatpush2.bf16.msra.mxu0 %v7148_v48  ;;  %v7232_v48 = vld [vmem:[%s11063_s1 + $0x410] ss:$8 sps:$4 sm:$0xff]  }
  0x64   :  { %5075 = vmatpush2.bf16.msra.mxu1 %v7151_v49  ;;  %5033 = vmatprep.subr.bf16.mxu0 %v7156_v50  ;;  %v7235_v49 = vld [vmem:[%s11063_s1 + $0x510] ss:$8 sps:$4 sm:$0xff]   ;;  %v7240_v50 = vld [vmem:[%s11063_s1 + $0x404] ss:$8 sps:$4 sm:$0xff]  }
  0x65   :  { %5076 = vmatprep.subr.bf16.mxu1 %v7159_v51  ;;  %v7243_v51 = vld [vmem:[%s11063_s1 + $0x504] ss:$8 sps:$4 sm:$0xff]  }
  0x67   :  { %5034 = vmatpush2.bf16.msra.mxu0 %v7154_v52  ;;  %v7238_v52 = vld [vmem:[%s11063_s1 + $0x400] ss:$8 sps:$4 sm:$0xff]  }
  0x68   :  { %5077 = vmatpush2.bf16.msra.mxu1 %v7157_v53  ;;  %5035 = vmatprep.subr.bf16.mxu0 %v7162_v54  ;;  %v7241_v53 = vld [vmem:[%s11063_s1 + $0x500] ss:$8 sps:$4 sm:$0xff]   ;;  %v7246_v54 = vld [vmem:[%s11063_s1 + $0x4f4] ss:$8 sps:$4 sm:$0xff]  }
  0x69   :  { %5078 = vmatprep.subr.bf16.mxu1 %v7165_v55  ;;  %v7249_v55 = vld [vmem:[%s11063_s1 + $0x5f4] ss:$8 sps:$4 sm:$0xff]  }
  0x6b   :  { %5036 = vmatpush2.bf16.msra.mxu0 %v7160_v56  ;;  %v7244_v56 = vld [vmem:[%s11063_s1 + $0x4f0] ss:$8 sps:$4 sm:$0xff]  }
  0x6c   :  { %5079 = vmatpush2.bf16.msra.mxu1 %v7163_v57  ;;  %5037 = vmatprep.subr.bf16.mxu0 %v7168_v58  ;;  %v7247_v57 = vld [vmem:[%s11063_s1 + $0x5f0] ss:$8 sps:$4 sm:$0xff]   ;;  %v7252_v58 = vld [vmem:[%s11063_s1 + $0x4e4] ss:$8 sps:$4 sm:$0xff]  }
  0x6d   :  { %5080 = vmatprep.subr.bf16.mxu1 %v7171_v59  ;;  %v7255_v59 = vld [vmem:[%s11063_s1 + $0x5e4] ss:$8 sps:$4 sm:$0xff]  }
  0x6f   :  { %5038 = vmatpush2.bf16.msra.mxu0 %v7166_v60  ;;  %v7250_v60 = vld [vmem:[%s11063_s1 + $0x4e0] ss:$8 sps:$4 sm:$0xff]  }
  0x70   :  { %5081 = vmatpush2.bf16.msra.mxu1 %v7169_v61  ;;  %5039 = vmatprep.subr.bf16.mxu0 %v7174_v62  ;;  %v7253_v61 = vld [vmem:[%s11063_s1 + $0x5e0] ss:$8 sps:$4 sm:$0xff]   ;;  %v7258_v62 = vld [vmem:[%s11063_s1 + $0x4d4] ss:$8 sps:$4 sm:$0xff]  }
  0x71   :  { %5082 = vmatprep.subr.bf16.mxu1 %v7177_v63  ;;  %v7261_v63 = vld [vmem:[%s11063_s1 + $0x5d4] ss:$8 sps:$4 sm:$0xff]  }
  0x73   :  { %5040 = vmatpush2.bf16.msra.mxu0 %v7172_v0  ;;  %v7256_v0 = vld [vmem:[%s11063_s1 + $0x4d0] ss:$8 sps:$4 sm:$0xff]  }
  0x74   :  { %5083 = vmatpush2.bf16.msra.mxu1 %v7175_v1  ;;  %5041 = vmatprep.subr.bf16.mxu0 %v7180_v2  ;;  %v7259_v1 = vld [vmem:[%s11063_s1 + $0x5d0] ss:$8 sps:$4 sm:$0xff]   ;;  %v7264_v2 = vld [vmem:[%s11063_s1 + $0x4c4] ss:$8 sps:$4 sm:$0xff]  }
  0x75   :  { %5084 = vmatprep.subr.bf16.mxu1 %v7183_v3  ;;  %v7267_v3 = vld [vmem:[%s11063_s1 + $0x5c4] ss:$8 sps:$4 sm:$0xff]  }
  0x77   :  { %5042 = vmatpush2.bf16.msra.mxu0 %v7178_v4  ;;  %v7262_v4 = vld [vmem:[%s11063_s1 + $0x4c0] ss:$8 sps:$4 sm:$0xff]  }
  0x78   :  { %5085 = vmatpush2.bf16.msra.mxu1 %v7181_v5  ;;  %5043 = vmatprep.subr.bf16.mxu0 %v7186_v6  ;;  %v7265_v5 = vld [vmem:[%s11063_s1 + $0x5c0] ss:$8 sps:$4 sm:$0xff]   ;;  %v7270_v6 = vld [vmem:[%s11063_s1 + $0x4b4] ss:$8 sps:$4 sm:$0xff]  }
  0x79   :  { %5086 = vmatprep.subr.bf16.mxu1 %v7189_v7  ;;  %v7273_v7 = vld [vmem:[%s11063_s1 + $0x5b4] ss:$8 sps:$4 sm:$0xff]  }
  0x7b   :  { %5044 = vmatpush2.bf16.msra.mxu0 %v7184_v8  ;;  %v7268_v8 = vld [vmem:[%s11063_s1 + $0x4b0] ss:$8 sps:$4 sm:$0xff]  }
  0x7c   :  { %5087 = vmatpush2.bf16.msra.mxu1 %v7187_v9  ;;  %5045 = vmatprep.subr.bf16.mxu0 %v7192_v10  ;;  %v7271_v9 = vld [vmem:[%s11063_s1 + $0x5b0] ss:$8 sps:$4 sm:$0xff]   ;;  %v7276_v10 = vld [vmem:[%s11063_s1 + $0x4a4] ss:$8 sps:$4 sm:$0xff]  }
  0x7d   :  { %5088 = vmatprep.subr.bf16.mxu1 %v7195_v11  ;;  %v7279_v11 = vld [vmem:[%s11063_s1 + $0x5a4] ss:$8 sps:$4 sm:$0xff]  }
  0x7f   :  { %5046 = vmatpush2.bf16.msra.mxu0 %v7190_v12  ;;  %v7274_v12 = vld [vmem:[%s11063_s1 + $0x4a0] ss:$8 sps:$4 sm:$0xff]  }
  0x80   :  { %5089 = vmatpush2.bf16.msra.mxu1 %v7193_v13  ;;  %5101 = vmatprep.subr.bf16.mxu0 %v7198_v14  ;;  %v7277_v13 = vld [vmem:[%s11063_s1 + $0x5a0] ss:$8 sps:$4 sm:$0xff]   ;;  %v7282_v14 = vld [vmem:[%s11063_s1 + $0x494] ss:$8 sps:$4 sm:$0xff]  }
  0x81   :  { %5144 = vmatprep.subr.bf16.mxu1 %v7201_v15  ;;  %v7285_v15 = vld [vmem:[%s11063_s1 + $0x594] ss:$8 sps:$4 sm:$0xff]  }
  0x82   :  { %5048 = vmatmul.mubr.bf16.vlgmr.msra.gmra.mxu0 %v6153_v16  ;;  %v7280_v16 = vld [vmem:[%s11063_s1 + $0x490] ss:$8 sps:$4 sm:$0xff]  }
  0x83   :  { %5091 = vmatmul.mubr.bf16.vlgmr.msra.gmra.mxu1 %v6155_v17  ;;  %5102 = vmatpush1.bf16.msra.mxu0 %v7196_v18  ;;  %v7283_v17 = vld [vmem:[%s11063_s1 + $0x590] ss:$8 sps:$4 sm:$0xff]   ;;  %v7288_v18 = vld [vmem:[%s11063_s1 + $0x484] ss:$8 sps:$4 sm:$0xff]  }
  0x84   :  { %5145 = vmatpush1.bf16.msra.mxu1 %v7199_v19  ;;  %5103 = vmatprep.subr.bf16.mxu0 %v7204_v20  ;;  %v7291_v19 = vld [vmem:[%s11063_s1 + $0x584] ss:$8 sps:$4 sm:$0xff]   ;;  %v7286_v20 = vld [vmem:[%s11063_s1 + $0x480] ss:$8 sps:$4 sm:$0xff]  }
  0x85   :  { %5146 = vmatprep.subr.bf16.mxu1 %v7207_v21  ;;  %5133 = vmatprep.mubr.bf16.mxu0 %v6158_v29  ;;  %v7289_v21 = vld [vmem:[%s11063_s1 + $0x580] ss:$8 sps:$4 sm:$0xff]   ;;  %v7292_v29 = vld [vmem:[%s11063_s1 + $0x670] ss:$8 sps:$4 sm:$0xff]  }
  0x86   :  { %5176 = vmatprep.mubr.bf16.mxu1 %v6160_v31  ;;  %v8864_v31 = vld [vmem:[%s11064_s0 + $0x38] sm:$0xff] }
  0x87   :  { %5104 = vmatpush1.bf16.msra.mxu0 %v7202_v22  ;;  %v7294_v22 = vld [vmem:[%s11063_s1 + $0x674] ss:$8 sps:$4 sm:$0xff]  }
  0x88   :  { %5147 = vmatpush1.bf16.msra.mxu1 %v7205_v23  ;;  %5105 = vmatprep.subr.bf16.mxu0 %v7210_v28  ;;  %v7297_v23 = vld [vmem:[%s11063_s1 + $0x774] ss:$8 sps:$4 sm:$0xff]  }
  0x89   :  { %5148 = vmatprep.subr.bf16.mxu1 %v7213_v30  ;;  %v8851_v28 = vld [vmem:[%s11064_s0 + $0x30] sm:$0xff] }
  0x8a   :  { %v8859_v30 = vld [vmem:[%s11064_s0 + $0xf0] sm:$0xff] }
  0x8b   :  { %5106 = vmatpush1.bf16.msra.mxu0 %v7208_v32  ;;  %v6157_v32 = vcombine.low %v8653_v24, %v8658_v25  ;;  %v7300_v24 = vld [vmem:[%s11063_s1 + $0x664] ss:$8 sps:$4 sm:$0xff]  }
  0x8c   :  { %5149 = vmatpush1.bf16.msra.mxu1 %v7211_v33  ;;  %5107 = vmatprep.subr.bf16.mxu0 %v7216_v34  ;;  %v6159_v33 = vcombine.low %v8663_v26, %v8668_v27  ;;  %v8873_v34 = vld [vmem:[%s11064_s0 + $0xf8] sm:$0xff]  ;;  %v7303_v25 = vld [vmem:[%s11063_s1 + $0x764] ss:$8 sps:$4 sm:$0xff]   ;;  %v6162_v26 = vcombine.high %v8851_v28, %v8859_v30 }
  0x8d   :  { %5150 = vmatprep.subr.bf16.mxu1 %v7219_v35  ;;  %v7295_v35 = vld [vmem:[%s11063_s1 + $0x770] ss:$8 sps:$4 sm:$0xff]   ;;  %v6164_v27 = vcombine.high %v8864_v31, %v8873_v34 }
  0x8f   :  { %5108 = vmatpush1.bf16.msra.mxu0 %v7214_v36  ;;  %v7298_v36 = vld [vmem:[%s11063_s1 + $0x660] ss:$8 sps:$4 sm:$0xff]  }
  0x90   :  { %5151 = vmatpush1.bf16.msra.mxu1 %v7217_v37  ;;  %5109 = vmatprep.subr.bf16.mxu0 %v7222_v38  ;;  %v7301_v37 = vld [vmem:[%s11063_s1 + $0x760] ss:$8 sps:$4 sm:$0xff]   ;;  %v7306_v38 = vld [vmem:[%s11063_s1 + $0x654] ss:$8 sps:$4 sm:$0xff]  }
  0x91   :  { %5152 = vmatprep.subr.bf16.mxu1 %v7225_v39  ;;  %v7309_v39 = vld [vmem:[%s11063_s1 + $0x754] ss:$8 sps:$4 sm:$0xff]  }
  0x93   :  { %5110 = vmatpush1.bf16.msra.mxu0 %v7220_v40  ;;  %v7304_v40 = vld [vmem:[%s11063_s1 + $0x650] ss:$8 sps:$4 sm:$0xff]  }
  0x94   :  { %5153 = vmatpush1.bf16.msra.mxu1 %v7223_v41  ;;  %5111 = vmatprep.subr.bf16.mxu0 %v7228_v42  ;;  %v7307_v41 = vld [vmem:[%s11063_s1 + $0x750] ss:$8 sps:$4 sm:$0xff]   ;;  %v7312_v42 = vld [vmem:[%s11063_s1 + $0x644] ss:$8 sps:$4 sm:$0xff]  }
  0x95   :  { %5154 = vmatprep.subr.bf16.mxu1 %v7231_v43  ;;  %v7315_v43 = vld [vmem:[%s11063_s1 + $0x744] ss:$8 sps:$4 sm:$0xff]  }
  0x97   :  { %5112 = vmatpush1.bf16.msra.mxu0 %v7226_v44  ;;  %v7310_v44 = vld [vmem:[%s11063_s1 + $0x640] ss:$8 sps:$4 sm:$0xff]  }
  0x98   :  { %5155 = vmatpush1.bf16.msra.mxu1 %v7229_v45  ;;  %5113 = vmatprep.subr.bf16.mxu0 %v7234_v46  ;;  %v7313_v45 = vld [vmem:[%s11063_s1 + $0x740] ss:$8 sps:$4 sm:$0xff]   ;;  %v7318_v46 = vld [vmem:[%s11063_s1 + $0x634] ss:$8 sps:$4 sm:$0xff]  }
  0x99   :  { %5156 = vmatprep.subr.bf16.mxu1 %v7237_v47  ;;  %v7321_v47 = vld [vmem:[%s11063_s1 + $0x734] ss:$8 sps:$4 sm:$0xff]  }
  0x9b   :  { %5114 = vmatpush1.bf16.msra.mxu0 %v7232_v48  ;;  %v7316_v48 = vld [vmem:[%s11063_s1 + $0x630] ss:$8 sps:$4 sm:$0xff]  }
  0x9c   :  { %5157 = vmatpush1.bf16.msra.mxu1 %v7235_v49  ;;  %5115 = vmatprep.subr.bf16.mxu0 %v7240_v50  ;;  %v7319_v49 = vld [vmem:[%s11063_s1 + $0x730] ss:$8 sps:$4 sm:$0xff]   ;;  %v7324_v50 = vld [vmem:[%s11063_s1 + $0x624] ss:$8 sps:$4 sm:$0xff]  }
  0x9d   :  { %5158 = vmatprep.subr.bf16.mxu1 %v7243_v51  ;;  %v7327_v51 = vld [vmem:[%s11063_s1 + $0x724] ss:$8 sps:$4 sm:$0xff]  }
  0x9f   :  { %5116 = vmatpush1.bf16.msra.mxu0 %v7238_v52  ;;  %v7322_v52 = vld [vmem:[%s11063_s1 + $0x620] ss:$8 sps:$4 sm:$0xff]  }
  0xa0   :  { %5159 = vmatpush1.bf16.msra.mxu1 %v7241_v53  ;;  %5117 = vmatprep.subr.bf16.mxu0 %v7246_v54  ;;  %v7325_v53 = vld [vmem:[%s11063_s1 + $0x720] ss:$8 sps:$4 sm:$0xff]   ;;  %v7330_v54 = vld [vmem:[%s11063_s1 + $0x614] ss:$8 sps:$4 sm:$0xff]  }
  0xa1   :  { %5160 = vmatprep.subr.bf16.mxu1 %v7249_v55  ;;  %v7333_v55 = vld [vmem:[%s11063_s1 + $0x714] ss:$8 sps:$4 sm:$0xff]  }
  0xa3   :  { %5118 = vmatpush2.bf16.msra.mxu0 %v7244_v56  ;;  %v7328_v56 = vld [vmem:[%s11063_s1 + $0x610] ss:$8 sps:$4 sm:$0xff]  }
  0xa4   :  { %5161 = vmatpush2.bf16.msra.mxu1 %v7247_v57  ;;  %5119 = vmatprep.subr.bf16.mxu0 %v7252_v58  ;;  %v7331_v57 = vld [vmem:[%s11063_s1 + $0x710] ss:$8 sps:$4 sm:$0xff]   ;;  %v7336_v58 = vld [vmem:[%s11063_s1 + $0x604] ss:$8 sps:$4 sm:$0xff]  }
  0xa5   :  { %5162 = vmatprep.subr.bf16.mxu1 %v7255_v59  ;;  %v7339_v59 = vld [vmem:[%s11063_s1 + $0x704] ss:$8 sps:$4 sm:$0xff]  }
  0xa7   :  { %5120 = vmatpush2.bf16.msra.mxu0 %v7250_v60  ;;  %v7334_v60 = vld [vmem:[%s11063_s1 + $0x600] ss:$8 sps:$4 sm:$0xff]  }
  0xa8   :  { %5163 = vmatpush2.bf16.msra.mxu1 %v7253_v61  ;;  %5121 = vmatprep.subr.bf16.mxu0 %v7258_v62  ;;  %v7337_v61 = vld [vmem:[%s11063_s1 + $0x700] ss:$8 sps:$4 sm:$0xff]   ;;  %v7342_v62 = vld [vmem:[%s11063_s1 + $0x6f4] ss:$8 sps:$4 sm:$0xff]  }
  0xa9   :  { %5164 = vmatprep.subr.bf16.mxu1 %v7261_v63  ;;  %v7345_v63 = vld [vmem:[%s11063_s1 + $0x7f4] ss:$8 sps:$4 sm:$0xff]  }
  0xab   :  { %5122 = vmatpush2.bf16.msra.mxu0 %v7256_v0  ;;  %v7340_v0 = vld [vmem:[%s11063_s1 + $0x6f0] ss:$8 sps:$4 sm:$0xff]  }
  0xac   :  { %5165 = vmatpush2.bf16.msra.mxu1 %v7259_v1  ;;  %5123 = vmatprep.subr.bf16.mxu0 %v7264_v2  ;;  %v7343_v1 = vld [vmem:[%s11063_s1 + $0x7f0] ss:$8 sps:$4 sm:$0xff]   ;;  %v7348_v2 = vld [vmem:[%s11063_s1 + $0x6e4] ss:$8 sps:$4 sm:$0xff]  }
  0xad   :  { %5166 = vmatprep.subr.bf16.mxu1 %v7267_v3  ;;  %v7351_v3 = vld [vmem:[%s11063_s1 + $0x7e4] ss:$8 sps:$4 sm:$0xff]  }
  0xaf   :  { %5124 = vmatpush2.bf16.msra.mxu0 %v7262_v4  ;;  %v7346_v4 = vld [vmem:[%s11063_s1 + $0x6e0] ss:$8 sps:$4 sm:$0xff]  }
  0xb0   :  { %5167 = vmatpush2.bf16.msra.mxu1 %v7265_v5  ;;  %5125 = vmatprep.subr.bf16.mxu0 %v7270_v6  ;;  %v7349_v5 = vld [vmem:[%s11063_s1 + $0x7e0] ss:$8 sps:$4 sm:$0xff]   ;;  %v7354_v6 = vld [vmem:[%s11063_s1 + $0x6d4] ss:$8 sps:$4 sm:$0xff]  }
  0xb1   :  { %5168 = vmatprep.subr.bf16.mxu1 %v7273_v7  ;;  %v7357_v7 = vld [vmem:[%s11063_s1 + $0x7d4] ss:$8 sps:$4 sm:$0xff]  }
  0xb3   :  { %5126 = vmatpush2.bf16.msra.mxu0 %v7268_v8  ;;  %v7352_v8 = vld [vmem:[%s11063_s1 + $0x6d0] ss:$8 sps:$4 sm:$0xff]  }
  0xb4   :  { %5169 = vmatpush2.bf16.msra.mxu1 %v7271_v9  ;;  %5127 = vmatprep.subr.bf16.mxu0 %v7276_v10  ;;  %v7355_v9 = vld [vmem:[%s11063_s1 + $0x7d0] ss:$8 sps:$4 sm:$0xff]   ;;  %v7360_v10 = vld [vmem:[%s11063_s1 + $0x6c4] ss:$8 sps:$4 sm:$0xff]  }
  0xb5   :  { %5170 = vmatprep.subr.bf16.mxu1 %v7279_v11  ;;  %v7363_v11 = vld [vmem:[%s11063_s1 + $0x7c4] ss:$8 sps:$4 sm:$0xff]  }
  0xb7   :  { %5128 = vmatpush2.bf16.msra.mxu0 %v7274_v12  ;;  %v7358_v12 = vld [vmem:[%s11063_s1 + $0x6c0] ss:$8 sps:$4 sm:$0xff]  }
  0xb8   :  { %5171 = vmatpush2.bf16.msra.mxu1 %v7277_v13  ;;  %5129 = vmatprep.subr.bf16.mxu0 %v7282_v14  ;;  %v7361_v13 = vld [vmem:[%s11063_s1 + $0x7c0] ss:$8 sps:$4 sm:$0xff]   ;;  %v7366_v14 = vld [vmem:[%s11063_s1 + $0x6b4] ss:$8 sps:$4 sm:$0xff]  }
  0xb9   :  { %5172 = vmatprep.subr.bf16.mxu1 %v7285_v15  ;;  %v7369_v15 = vld [vmem:[%s11063_s1 + $0x7b4] ss:$8 sps:$4 sm:$0xff]  }
  0xbb   :  { %5130 = vmatpush2.bf16.msra.mxu0 %v7280_v16  ;;  %v7364_v16 = vld [vmem:[%s11063_s1 + $0x6b0] ss:$8 sps:$4 sm:$0xff]  }
  0xbc   :  { %5173 = vmatpush2.bf16.msra.mxu1 %v7283_v17  ;;  %5131 = vmatprep.subr.bf16.mxu0 %v7288_v18  ;;  %v7367_v17 = vld [vmem:[%s11063_s1 + $0x7b0] ss:$8 sps:$4 sm:$0xff]   ;;  %v7372_v18 = vld [vmem:[%s11063_s1 + $0x6a4] ss:$8 sps:$4 sm:$0xff]  }
  0xbd   :  { %5174 = vmatprep.subr.bf16.mxu1 %v7291_v19  ;;  %v7375_v19 = vld [vmem:[%s11063_s1 + $0x7a4] ss:$8 sps:$4 sm:$0xff]  }
  0xbf   :  { %5132 = vmatpush2.bf16.msra.mxu0 %v7286_v20  ;;  %v7370_v20 = vld [vmem:[%s11063_s1 + $0x6a0] ss:$8 sps:$4 sm:$0xff]  }
  0xc0   :  { %5175 = vmatpush2.bf16.msra.mxu1 %v7289_v21  ;;  %5187 = vmatprep.subr.bf16.mxu0 %v7294_v22  ;;  %v7373_v21 = vld [vmem:[%s11063_s1 + $0x7a0] ss:$8 sps:$4 sm:$0xff]   ;;  %v7378_v22 = vld [vmem:[%s11063_s1 + $0x694] ss:$8 sps:$4 sm:$0xff]  }
  0xc1   :  { %5230 = vmatprep.subr.bf16.mxu1 %v7297_v23  ;;  %v7381_v23 = vld [vmem:[%s11063_s1 + $0x794] ss:$8 sps:$4 sm:$0xff]  }
  0xc2   :  { %5134 = vmatmul.mubr.bf16.vlgmr.msra.gmra.mxu0 %v6157_v32  ;;  %v7379_v32 = vld [vmem:[%s11063_s1 + $0x790] ss:$8 sps:$4 sm:$0xff]  }
  0xc3   :  { %5177 = vmatmul.mubr.bf16.vlgmr.msra.gmra.mxu1 %v6159_v33  ;;  %5188 = vmatpush1.bf16.msra.mxu0 %v7292_v29  ;;  %v7376_v29 = vld [vmem:[%s11063_s1 + $0x690] ss:$8 sps:$4 sm:$0xff]   ;;  %v7384_v33 = vld [vmem:[%s11063_s1 + $0x684] ss:$8 sps:$4 sm:$0xff]  }
  0xc4   :  { %5231 = vmatpush1.bf16.msra.mxu1 %v7295_v35  ;;  %5189 = vmatprep.subr.bf16.mxu0 %v7300_v24  ;;  %v7387_v35 = vld [vmem:[%s11063_s1 + $0x784] ss:$8 sps:$4 sm:$0xff]   ;;  %v7382_v24 = vld [vmem:[%s11063_s1 + $0x680] ss:$8 sps:$4 sm:$0xff]  }
  0xc5   :  { %5232 = vmatprep.subr.bf16.mxu1 %v7303_v25  ;;  %5219 = vmatprep.mubr.bf16.mxu0 %v6162_v26  ;;  %v7385_v25 = vld [vmem:[%s11063_s1 + $0x780] ss:$8 sps:$4 sm:$0xff]   ;;  %v7390_v26 = vld [vmem:[%s11063_s1 + $0x874] ss:$8 sps:$4 sm:$0xff]  }
  0xc6   :  { %5262 = vmatprep.mubr.bf16.mxu1 %v6164_v27  ;;  %v7393_v27 = vld [vmem:[%s11063_s1 + $0x974] ss:$8 sps:$4 sm:$0xff]  }
  0xc7   :  { %5190 = vmatpush1.bf16.msra.mxu0 %v7298_v36  ;;  %v9071_v36 = vld [vmem:[%s11064_s0 + $0x40] sm:$0xff] }
  0xc8   :  { %5233 = vmatpush1.bf16.msra.mxu1 %v7301_v37  ;;  %5191 = vmatprep.subr.bf16.mxu0 %v7306_v38  ;;  %v7388_v37 = vld [vmem:[%s11063_s1 + $0x870] ss:$8 sps:$4 sm:$0xff]   ;;  %v9079_v38 = vld [vmem:[%s11064_s0 + $0x100] sm:$0xff] }
  0xc9   :  { %5234 = vmatprep.subr.bf16.mxu1 %v7309_v39  ;;  %v9084_v39 = vld [vmem:[%s11064_s0 + $0x48] sm:$0xff] }
  0xcb   :  { %5192 = vmatpush1.bf16.msra.mxu0 %v7304_v40  ;;  %v6161_v40 = vcombine.low %v8851_v28, %v8859_v30  ;;  %v7396_v28 = vld [vmem:[%s11063_s1 + $0x864] ss:$8 sps:$4 sm:$0xff]  }
  0xcc   :  { %5235 = vmatpush1.bf16.msra.mxu1 %v7307_v41  ;;  %5193 = vmatprep.subr.bf16.mxu0 %v7312_v42  ;;  %v6163_v41 = vcombine.low %v8864_v31, %v8873_v34  ;;  %v9093_v42 = vld [vmem:[%s11064_s0 + $0x108] sm:$0xff]  ;;  %v6166_v31 = vcombine.high %v9071_v36, %v9079_v38 }
  0xcd   :  { %5236 = vmatprep.subr.bf16.mxu1 %v7315_v43  ;;  %v7391_v43 = vld [vmem:[%s11063_s1 + $0x970] ss:$8 sps:$4 sm:$0xff]   ;;  %v7399_v30 = vld [vmem:[%s11063_s1 + $0x964] ss:$8 sps:$4 sm:$0xff]   ;;  %v6168_v34 = vcombine.high %v9084_v39, %v9093_v42 }
  0xcf   :  { %5194 = vmatpush1.bf16.msra.mxu0 %v7310_v44  ;;  %v7394_v44 = vld [vmem:[%s11063_s1 + $0x860] ss:$8 sps:$4 sm:$0xff]  }
  0xd0   :  { %5237 = vmatpush1.bf16.msra.mxu1 %v7313_v45  ;;  %5195 = vmatprep.subr.bf16.mxu0 %v7318_v46  ;;  %v7397_v45 = vld [vmem:[%s11063_s1 + $0x960] ss:$8 sps:$4 sm:$0xff]   ;;  %v7402_v46 = vld [vmem:[%s11063_s1 + $0x854] ss:$8 sps:$4 sm:$0xff]  }
  0xd1   :  { %5238 = vmatprep.subr.bf16.mxu1 %v7321_v47  ;;  %v7405_v47 = vld [vmem:[%s11063_s1 + $0x954] ss:$8 sps:$4 sm:$0xff]  }
  0xd3   :  { %5196 = vmatpush1.bf16.msra.mxu0 %v7316_v48  ;;  %v7400_v48 = vld [vmem:[%s11063_s1 + $0x850] ss:$8 sps:$4 sm:$0xff]  }
  0xd4   :  { %5239 = vmatpush1.bf16.msra.mxu1 %v7319_v49  ;;  %5197 = vmatprep.subr.bf16.mxu0 %v7324_v50  ;;  %v7403_v49 = vld [vmem:[%s11063_s1 + $0x950] ss:$8 sps:$4 sm:$0xff]   ;;  %v7408_v50 = vld [vmem:[%s11063_s1 + $0x844] ss:$8 sps:$4 sm:$0xff]  }
  0xd5   :  { %5240 = vmatprep.subr.bf16.mxu1 %v7327_v51  ;;  %v7411_v51 = vld [vmem:[%s11063_s1 + $0x944] ss:$8 sps:$4 sm:$0xff]  }
  0xd7   :  { %5198 = vmatpush1.bf16.msra.mxu0 %v7322_v52  ;;  %v7406_v52 = vld [vmem:[%s11063_s1 + $0x840] ss:$8 sps:$4 sm:$0xff]  }
  0xd8   :  { %5241 = vmatpush1.bf16.msra.mxu1 %v7325_v53  ;;  %5199 = vmatprep.subr.bf16.mxu0 %v7330_v54  ;;  %v7409_v53 = vld [vmem:[%s11063_s1 + $0x940] ss:$8 sps:$4 sm:$0xff]   ;;  %v7414_v54 = vld [vmem:[%s11063_s1 + $0x834] ss:$8 sps:$4 sm:$0xff]  }
  0xd9   :  { %5242 = vmatprep.subr.bf16.mxu1 %v7333_v55  ;;  %v7417_v55 = vld [vmem:[%s11063_s1 + $0x934] ss:$8 sps:$4 sm:$0xff]  }
  0xdb   :  { %5200 = vmatpush1.bf16.msra.mxu0 %v7328_v56  ;;  %v7412_v56 = vld [vmem:[%s11063_s1 + $0x830] ss:$8 sps:$4 sm:$0xff]  }
  0xdc   :  { %5243 = vmatpush1.bf16.msra.mxu1 %v7331_v57  ;;  %5201 = vmatprep.subr.bf16.mxu0 %v7336_v58  ;;  %v7415_v57 = vld [vmem:[%s11063_s1 + $0x930] ss:$8 sps:$4 sm:$0xff]   ;;  %v7420_v58 = vld [vmem:[%s11063_s1 + $0x824] ss:$8 sps:$4 sm:$0xff]  }
  0xdd   :  { %5244 = vmatprep.subr.bf16.mxu1 %v7339_v59  ;;  %v7423_v59 = vld [vmem:[%s11063_s1 + $0x924] ss:$8 sps:$4 sm:$0xff]  }
  0xdf   :  { %5202 = vmatpush1.bf16.msra.mxu0 %v7334_v60  ;;  %v7418_v60 = vld [vmem:[%s11063_s1 + $0x820] ss:$8 sps:$4 sm:$0xff]  }
  0xe0   :  { %5245 = vmatpush1.bf16.msra.mxu1 %v7337_v61  ;;  %5203 = vmatprep.subr.bf16.mxu0 %v7342_v62  ;;  %v7421_v61 = vld [vmem:[%s11063_s1 + $0x920] ss:$8 sps:$4 sm:$0xff]   ;;  %v7426_v62 = vld [vmem:[%s11063_s1 + $0x814] ss:$8 sps:$4 sm:$0xff]  }
  0xe1   :  { %5246 = vmatprep.subr.bf16.mxu1 %v7345_v63  ;;  %v7429_v63 = vld [vmem:[%s11063_s1 + $0x914] ss:$8 sps:$4 sm:$0xff]  }
  0xe3   :  { %5204 = vmatpush2.bf16.msra.mxu0 %v7340_v0  ;;  %v7424_v0 = vld [vmem:[%s11063_s1 + $0x810] ss:$8 sps:$4 sm:$0xff]  }
  0xe4   :  { %5247 = vmatpush2.bf16.msra.mxu1 %v7343_v1  ;;  %5205 = vmatprep.subr.bf16.mxu0 %v7348_v2  ;;  %v7427_v1 = vld [vmem:[%s11063_s1 + $0x910] ss:$8 sps:$4 sm:$0xff]   ;;  %v7432_v2 = vld [vmem:[%s11063_s1 + $0x804] ss:$8 sps:$4 sm:$0xff]  }
  0xe5   :  { %5248 = vmatprep.subr.bf16.mxu1 %v7351_v3  ;;  %v7435_v3 = vld [vmem:[%s11063_s1 + $0x904] ss:$8 sps:$4 sm:$0xff]  }
  0xe7   :  { %5206 = vmatpush2.bf16.msra.mxu0 %v7346_v4  ;;  %v7430_v4 = vld [vmem:[%s11063_s1 + $0x800] ss:$8 sps:$4 sm:$0xff]  }
  0xe8   :  { %5249 = vmatpush2.bf16.msra.mxu1 %v7349_v5  ;;  %5207 = vmatprep.subr.bf16.mxu0 %v7354_v6  ;;  %v7433_v5 = vld [vmem:[%s11063_s1 + $0x900] ss:$8 sps:$4 sm:$0xff]   ;;  %v7438_v6 = vld [vmem:[%s11063_s1 + $0x8f4] ss:$8 sps:$4 sm:$0xff]  }
  0xe9   :  { %5250 = vmatprep.subr.bf16.mxu1 %v7357_v7  ;;  %v7441_v7 = vld [vmem:[%s11063_s1 + $0x9f4] ss:$8 sps:$4 sm:$0xff]  }
  0xeb   :  { %5208 = vmatpush2.bf16.msra.mxu0 %v7352_v8  ;;  %v7436_v8 = vld [vmem:[%s11063_s1 + $0x8f0] ss:$8 sps:$4 sm:$0xff]  }
  0xec   :  { %5251 = vmatpush2.bf16.msra.mxu1 %v7355_v9  ;;  %5209 = vmatprep.subr.bf16.mxu0 %v7360_v10  ;;  %v7439_v9 = vld [vmem:[%s11063_s1 + $0x9f0] ss:$8 sps:$4 sm:$0xff]   ;;  %v7444_v10 = vld [vmem:[%s11063_s1 + $0x8e4] ss:$8 sps:$4 sm:$0xff]  }
  0xed   :  { %5252 = vmatprep.subr.bf16.mxu1 %v7363_v11  ;;  %v7447_v11 = vld [vmem:[%s11063_s1 + $0x9e4] ss:$8 sps:$4 sm:$0xff]  }
  0xef   :  { %5210 = vmatpush2.bf16.msra.mxu0 %v7358_v12  ;;  %v7442_v12 = vld [vmem:[%s11063_s1 + $0x8e0] ss:$8 sps:$4 sm:$0xff]  }
  0xf0   :  { %5253 = vmatpush2.bf16.msra.mxu1 %v7361_v13  ;;  %5211 = vmatprep.subr.bf16.mxu0 %v7366_v14  ;;  %v7445_v13 = vld [vmem:[%s11063_s1 + $0x9e0] ss:$8 sps:$4 sm:$0xff]   ;;  %v7450_v14 = vld [vmem:[%s11063_s1 + $0x8d4] ss:$8 sps:$4 sm:$0xff]  }
  0xf1   :  { %5254 = vmatprep.subr.bf16.mxu1 %v7369_v15  ;;  %v7453_v15 = vld [vmem:[%s11063_s1 + $0x9d4] ss:$8 sps:$4 sm:$0xff]  }
  0xf3   :  { %5212 = vmatpush2.bf16.msra.mxu0 %v7364_v16  ;;  %v7448_v16 = vld [vmem:[%s11063_s1 + $0x8d0] ss:$8 sps:$4 sm:$0xff]  }
  0xf4   :  { %5255 = vmatpush2.bf16.msra.mxu1 %v7367_v17  ;;  %5213 = vmatprep.subr.bf16.mxu0 %v7372_v18  ;;  %v7451_v17 = vld [vmem:[%s11063_s1 + $0x9d0] ss:$8 sps:$4 sm:$0xff]   ;;  %v7456_v18 = vld [vmem:[%s11063_s1 + $0x8c4] ss:$8 sps:$4 sm:$0xff]  }
  0xf5   :  { %5256 = vmatprep.subr.bf16.mxu1 %v7375_v19  ;;  %v7459_v19 = vld [vmem:[%s11063_s1 + $0x9c4] ss:$8 sps:$4 sm:$0xff]  }
  0xf7   :  { %5214 = vmatpush2.bf16.msra.mxu0 %v7370_v20  ;;  %v7454_v20 = vld [vmem:[%s11063_s1 + $0x8c0] ss:$8 sps:$4 sm:$0xff]  }
  0xf8   :  { %5257 = vmatpush2.bf16.msra.mxu1 %v7373_v21  ;;  %5215 = vmatprep.subr.bf16.mxu0 %v7378_v22  ;;  %v7457_v21 = vld [vmem:[%s11063_s1 + $0x9c0] ss:$8 sps:$4 sm:$0xff]   ;;  %v7462_v22 = vld [vmem:[%s11063_s1 + $0x8b4] ss:$8 sps:$4 sm:$0xff]  }
  0xf9   :  { %5258 = vmatprep.subr.bf16.mxu1 %v7381_v23  ;;  %v7465_v23 = vld [vmem:[%s11063_s1 + $0x9b4] ss:$8 sps:$4 sm:$0xff]  }
  0xfb   :  { %5216 = vmatpush2.bf16.msra.mxu0 %v7376_v29  ;;  %v7460_v29 = vld [vmem:[%s11063_s1 + $0x8b0] ss:$8 sps:$4 sm:$0xff]  }
  0xfc   :  { %5259 = vmatpush2.bf16.msra.mxu1 %v7379_v32  ;;  %5217 = vmatprep.subr.bf16.mxu0 %v7384_v33  ;;  %v7463_v32 = vld [vmem:[%s11063_s1 + $0x9b0] ss:$8 sps:$4 sm:$0xff]   ;;  %v7468_v33 = vld [vmem:[%s11063_s1 + $0x8a4] ss:$8 sps:$4 sm:$0xff]  }
  0xfd   :  { %5260 = vmatprep.subr.bf16.mxu1 %v7387_v35  ;;  %v7471_v35 = vld [vmem:[%s11063_s1 + $0x9a4] ss:$8 sps:$4 sm:$0xff]  }
  0xff   :  { %5218 = vmatpush2.bf16.msra.mxu0 %v7382_v24  ;;  %v7466_v24 = vld [vmem:[%s11063_s1 + $0x8a0] ss:$8 sps:$4 sm:$0xff]  }
 0x100   :  { %5261 = vmatpush2.bf16.msra.mxu1 %v7385_v25  ;;  %5273 = vmatprep.subr.bf16.mxu0 %v7390_v26  ;;  %v7469_v25 = vld [vmem:[%s11063_s1 + $0x9a0] ss:$8 sps:$4 sm:$0xff]   ;;  %v7474_v26 = vld [vmem:[%s11063_s1 + $0x894] ss:$8 sps:$4 sm:$0xff]  }
 0x101   :  { %5316 = vmatprep.subr.bf16.mxu1 %v7393_v27  ;;  %v7477_v27 = vld [vmem:[%s11063_s1 + $0x994] ss:$8 sps:$4 sm:$0xff]  }
 0x102   :  { %5220 = vmatmul.mubr.bf16.vlgmr.msra.gmra.mxu0 %v6161_v40  ;;  %v7475_v40 = vld [vmem:[%s11063_s1 + $0x990] ss:$8 sps:$4 sm:$0xff]  }
 0x103   :  { %5263 = vmatmul.mubr.bf16.vlgmr.msra.gmra.mxu1 %v6163_v41  ;;  %5274 = vmatpush1.bf16.msra.mxu0 %v7388_v37  ;;  %v7472_v37 = vld [vmem:[%s11063_s1 + $0x890] ss:$8 sps:$4 sm:$0xff]   ;;  %v7480_v41 = vld [vmem:[%s11063_s1 + $0x884] ss:$8 sps:$4 sm:$0xff]  }
 0x104   :  { %5317 = vmatpush1.bf16.msra.mxu1 %v7391_v43  ;;  %5275 = vmatprep.subr.bf16.mxu0 %v7396_v28  ;;  %v7483_v43 = vld [vmem:[%s11063_s1 + $0x984] ss:$8 sps:$4 sm:$0xff]   ;;  %v7478_v28 = vld [vmem:[%s11063_s1 + $0x880] ss:$8 sps:$4 sm:$0xff]  }
 0x105   :  { %5318 = vmatprep.subr.bf16.mxu1 %v7399_v30  ;;  %5305 = vmatprep.mubr.bf16.mxu0 %v6166_v31  ;;  %v7481_v30 = vld [vmem:[%s11063_s1 + $0x980] ss:$8 sps:$4 sm:$0xff]   ;;  %v7486_v31 = vld [vmem:[%s11063_s1 + $0xa74] ss:$8 sps:$4 sm:$0xff]  }
 0x106   :  { %5348 = vmatprep.mubr.bf16.mxu1 %v6168_v34  ;;  %v7489_v34 = vld [vmem:[%s11063_s1 + $0xb74] ss:$8 sps:$4 sm:$0xff]  }
 0x107   :  { %5276 = vmatpush1.bf16.msra.mxu0 %v7394_v44  ;;  %v9291_v44 = vld [vmem:[%s11064_s0 + $0x50] sm:$0xff] }
 0x108   :  { %5319 = vmatpush1.bf16.msra.mxu1 %v7397_v45  ;;  %5277 = vmatprep.subr.bf16.mxu0 %v7402_v46  ;;  %v7484_v45 = vld [vmem:[%s11063_s1 + $0xa70] ss:$8 sps:$4 sm:$0xff]   ;;  %v6165_v46 = vcombine.low %v9071_v36, %v9079_v38  ;;  %v7492_v38 = vld [vmem:[%s11063_s1 + $0xa64] ss:$8 sps:$4 sm:$0xff]  }
 0x109   :  { %5320 = vmatprep.subr.bf16.mxu1 %v7405_v47  ;;  %v6167_v47 = vcombine.low %v9084_v39, %v9093_v42  ;;  %v7487_v36 = vld [vmem:[%s11063_s1 + $0xb70] ss:$8 sps:$4 sm:$0xff]   ;;  %v7495_v39 = vld [vmem:[%s11063_s1 + $0xb64] ss:$8 sps:$4 sm:$0xff]   ;;  %v7490_v42 = vld [vmem:[%s11063_s1 + $0xa60] ss:$8 sps:$4 sm:$0xff]  }
 0x10b   :  { %5278 = vmatpush1.bf16.msra.mxu0 %v7400_v48  ;;  %v9303_v48 = vld [vmem:[%s11064_s0 + $0x110] sm:$0xff] }
 0x10c   :  { %5321 = vmatpush1.bf16.msra.mxu1 %v7403_v49  ;;  %5279 = vmatprep.subr.bf16.mxu0 %v7408_v50  ;;  %v9308_v49 = vld [vmem:[%s11064_s0 + $0x58] sm:$0xff] }
 0x10d   :  { %5322 = vmatprep.subr.bf16.mxu1 %v7411_v51  ;;  %v9313_v50 = vld [vmem:[%s11064_s0 + $0x118] sm:$0xff]  ;;  %v7493_v51 = vld [vmem:[%s11063_s1 + $0xb60] ss:$8 sps:$4 sm:$0xff]  }
 0x10f   :  { %5280 = vmatpush1.bf16.msra.mxu0 %v7406_v52  ;;  %v6170_v52 = vcombine.high %v9291_v44, %v9303_v48 }
 0x110   :  { %5323 = vmatpush1.bf16.msra.mxu1 %v7409_v53  ;;  %5281 = vmatprep.subr.bf16.mxu0 %v7414_v54  ;;  %v6172_v53 = vcombine.high %v9308_v49, %v9313_v50  ;;  %v7498_v54 = vld [vmem:[%s11063_s1 + $0xa54] ss:$8 sps:$4 sm:$0xff]  }
 0x111   :  { %5324 = vmatprep.subr.bf16.mxu1 %v7417_v55  ;;  %v7501_v55 = vld [vmem:[%s11063_s1 + $0xb54] ss:$8 sps:$4 sm:$0xff]  }
 0x113   :  { %5282 = vmatpush1.bf16.msra.mxu0 %v7412_v56  ;;  %v7496_v56 = vld [vmem:[%s11063_s1 + $0xa50] ss:$8 sps:$4 sm:$0xff]  }
 0x114   :  { %5325 = vmatpush1.bf16.msra.mxu1 %v7415_v57  ;;  %5283 = vmatprep.subr.bf16.mxu0 %v7420_v58  ;;  %v7499_v57 = vld [vmem:[%s11063_s1 + $0xb50] ss:$8 sps:$4 sm:$0xff]   ;;  %v7504_v58 = vld [vmem:[%s11063_s1 + $0xa44] ss:$8 sps:$4 sm:$0xff]  }
 0x115   :  { %5326 = vmatprep.subr.bf16.mxu1 %v7423_v59  ;;  %v7507_v59 = vld [vmem:[%s11063_s1 + $0xb44] ss:$8 sps:$4 sm:$0xff]  }
 0x117   :  { %5284 = vmatpush1.bf16.msra.mxu0 %v7418_v60  ;;  %v7502_v60 = vld [vmem:[%s11063_s1 + $0xa40] ss:$8 sps:$4 sm:$0xff]  }
 0x118   :  { %5327 = vmatpush1.bf16.msra.mxu1 %v7421_v61  ;;  %5285 = vmatprep.subr.bf16.mxu0 %v7426_v62  ;;  %v7505_v61 = vld [vmem:[%s11063_s1 + $0xb40] ss:$8 sps:$4 sm:$0xff]   ;;  %v7510_v62 = vld [vmem:[%s11063_s1 + $0xa34] ss:$8 sps:$4 sm:$0xff]  }
 0x119   :  { %5328 = vmatprep.subr.bf16.mxu1 %v7429_v63  ;;  %v7513_v63 = vld [vmem:[%s11063_s1 + $0xb34] ss:$8 sps:$4 sm:$0xff]  }
 0x11b   :  { %5286 = vmatpush1.bf16.msra.mxu0 %v7424_v0  ;;  %v7508_v0 = vld [vmem:[%s11063_s1 + $0xa30] ss:$8 sps:$4 sm:$0xff]  }
 0x11c   :  { %5329 = vmatpush1.bf16.msra.mxu1 %v7427_v1  ;;  %5287 = vmatprep.subr.bf16.mxu0 %v7432_v2  ;;  %v7511_v1 = vld [vmem:[%s11063_s1 + $0xb30] ss:$8 sps:$4 sm:$0xff]   ;;  %v7516_v2 = vld [vmem:[%s11063_s1 + $0xa24] ss:$8 sps:$4 sm:$0xff]  }
 0x11d   :  { %5330 = vmatprep.subr.bf16.mxu1 %v7435_v3  ;;  %v7519_v3 = vld [vmem:[%s11063_s1 + $0xb24] ss:$8 sps:$4 sm:$0xff]  }
 0x11f   :  { %5288 = vmatpush1.bf16.msra.mxu0 %v7430_v4  ;;  %v7514_v4 = vld [vmem:[%s11063_s1 + $0xa20] ss:$8 sps:$4 sm:$0xff]  }
 0x120   :  { %5331 = vmatpush1.bf16.msra.mxu1 %v7433_v5  ;;  %5289 = vmatprep.subr.bf16.mxu0 %v7438_v6  ;;  %v7517_v5 = vld [vmem:[%s11063_s1 + $0xb20] ss:$8 sps:$4 sm:$0xff]   ;;  %v7522_v6 = vld [vmem:[%s11063_s1 + $0xa14] ss:$8 sps:$4 sm:$0xff]  }
 0x121   :  { %5332 = vmatprep.subr.bf16.mxu1 %v7441_v7  ;;  %v7525_v7 = vld [vmem:[%s11063_s1 + $0xb14] ss:$8 sps:$4 sm:$0xff]  }
 0x123   :  { %5290 = vmatpush2.bf16.msra.mxu0 %v7436_v8  ;;  %v7520_v8 = vld [vmem:[%s11063_s1 + $0xa10] ss:$8 sps:$4 sm:$0xff]  }
 0x124   :  { %5333 = vmatpush2.bf16.msra.mxu1 %v7439_v9  ;;  %5291 = vmatprep.subr.bf16.mxu0 %v7444_v10  ;;  %v7523_v9 = vld [vmem:[%s11063_s1 + $0xb10] ss:$8 sps:$4 sm:$0xff]   ;;  %v7528_v10 = vld [vmem:[%s11063_s1 + $0xa04] ss:$8 sps:$4 sm:$0xff]  }
 0x125   :  { %5334 = vmatprep.subr.bf16.mxu1 %v7447_v11  ;;  %v7531_v11 = vld [vmem:[%s11063_s1 + $0xb04] ss:$8 sps:$4 sm:$0xff]  }
 0x127   :  { %5292 = vmatpush2.bf16.msra.mxu0 %v7442_v12  ;;  %v7526_v12 = vld [vmem:[%s11063_s1 + $0xa00] ss:$8 sps:$4 sm:$0xff]  }
 0x128   :  { %5335 = vmatpush2.bf16.msra.mxu1 %v7445_v13  ;;  %5293 = vmatprep.subr.bf16.mxu0 %v7450_v14  ;;  %v7529_v13 = vld [vmem:[%s11063_s1 + $0xb00] ss:$8 sps:$4 sm:$0xff]   ;;  %v7534_v14 = vld [vmem:[%s11063_s1 + $0xaf4] ss:$8 sps:$4 sm:$0xff]  }
 0x129   :  { %5336 = vmatprep.subr.bf16.mxu1 %v7453_v15  ;;  %v7537_v15 = vld [vmem:[%s11063_s1 + $0xbf4] ss:$8 sps:$4 sm:$0xff]  }
 0x12b   :  { %5294 = vmatpush2.bf16.msra.mxu0 %v7448_v16  ;;  %v7532_v16 = vld [vmem:[%s11063_s1 + $0xaf0] ss:$8 sps:$4 sm:$0xff]  }
 0x12c   :  { %5337 = vmatpush2.bf16.msra.mxu1 %v7451_v17  ;;  %5295 = vmatprep.subr.bf16.mxu0 %v7456_v18  ;;  %v7535_v17 = vld [vmem:[%s11063_s1 + $0xbf0] ss:$8 sps:$4 sm:$0xff]   ;;  %v7540_v18 = vld [vmem:[%s11063_s1 + $0xae4] ss:$8 sps:$4 sm:$0xff]  }
 0x12d   :  { %5338 = vmatprep.subr.bf16.mxu1 %v7459_v19  ;;  %v7543_v19 = vld [vmem:[%s11063_s1 + $0xbe4] ss:$8 sps:$4 sm:$0xff]  }
 0x12f   :  { %5296 = vmatpush2.bf16.msra.mxu0 %v7454_v20  ;;  %v7538_v20 = vld [vmem:[%s11063_s1 + $0xae0] ss:$8 sps:$4 sm:$0xff]  }
 0x130   :  { %5339 = vmatpush2.bf16.msra.mxu1 %v7457_v21  ;;  %5297 = vmatprep.subr.bf16.mxu0 %v7462_v22  ;;  %v7541_v21 = vld [vmem:[%s11063_s1 + $0xbe0] ss:$8 sps:$4 sm:$0xff]   ;;  %v7546_v22 = vld [vmem:[%s11063_s1 + $0xad4] ss:$8 sps:$4 sm:$0xff]  }
 0x131   :  { %5340 = vmatprep.subr.bf16.mxu1 %v7465_v23  ;;  %v7549_v23 = vld [vmem:[%s11063_s1 + $0xbd4] ss:$8 sps:$4 sm:$0xff]  }
 0x133   :  { %5298 = vmatpush2.bf16.msra.mxu0 %v7460_v29  ;;  %v7544_v29 = vld [vmem:[%s11063_s1 + $0xad0] ss:$8 sps:$4 sm:$0xff]  }
 0x134   :  { %5341 = vmatpush2.bf16.msra.mxu1 %v7463_v32  ;;  %5299 = vmatprep.subr.bf16.mxu0 %v7468_v33  ;;  %v7547_v32 = vld [vmem:[%s11063_s1 + $0xbd0] ss:$8 sps:$4 sm:$0xff]   ;;  %v7552_v33 = vld [vmem:[%s11063_s1 + $0xac4] ss:$8 sps:$4 sm:$0xff]  }
 0x135   :  { %5342 = vmatprep.subr.bf16.mxu1 %v7471_v35  ;;  %v7555_v35 = vld [vmem:[%s11063_s1 + $0xbc4] ss:$8 sps:$4 sm:$0xff]  }
 0x137   :  { %5300 = vmatpush2.bf16.msra.mxu0 %v7466_v24  ;;  %v7550_v24 = vld [vmem:[%s11063_s1 + $0xac0] ss:$8 sps:$4 sm:$0xff]  }
 0x138   :  { %5343 = vmatpush2.bf16.msra.mxu1 %v7469_v25  ;;  %5301 = vmatprep.subr.bf16.mxu0 %v7474_v26  ;;  %v7553_v25 = vld [vmem:[%s11063_s1 + $0xbc0] ss:$8 sps:$4 sm:$0xff]   ;;  %v7558_v26 = vld [vmem:[%s11063_s1 + $0xab4] ss:$8 sps:$4 sm:$0xff]  }
 0x139   :  { %5344 = vmatprep.subr.bf16.mxu1 %v7477_v27  ;;  %v7561_v27 = vld [vmem:[%s11063_s1 + $0xbb4] ss:$8 sps:$4 sm:$0xff]  }
 0x13b   :  { %5302 = vmatpush2.bf16.msra.mxu0 %v7472_v37  ;;  %v7556_v37 = vld [vmem:[%s11063_s1 + $0xab0] ss:$8 sps:$4 sm:$0xff]  }
 0x13c   :  { %5345 = vmatpush2.bf16.msra.mxu1 %v7475_v40  ;;  %5303 = vmatprep.subr.bf16.mxu0 %v7480_v41  ;;  %v7559_v40 = vld [vmem:[%s11063_s1 + $0xbb0] ss:$8 sps:$4 sm:$0xff]   ;;  %v7564_v41 = vld [vmem:[%s11063_s1 + $0xaa4] ss:$8 sps:$4 sm:$0xff]  }
 0x13d   :  { %5346 = vmatprep.subr.bf16.mxu1 %v7483_v43  ;;  %v7567_v43 = vld [vmem:[%s11063_s1 + $0xba4] ss:$8 sps:$4 sm:$0xff]  }
 0x13f   :  { %5304 = vmatpush2.bf16.msra.mxu0 %v7478_v28  ;;  %v7562_v28 = vld [vmem:[%s11063_s1 + $0xaa0] ss:$8 sps:$4 sm:$0xff]  }
 0x140   :  { %5347 = vmatpush2.bf16.msra.mxu1 %v7481_v30  ;;  %5359 = vmatprep.subr.bf16.mxu0 %v7486_v31  ;;  %v7565_v30 = vld [vmem:[%s11063_s1 + $0xba0] ss:$8 sps:$4 sm:$0xff]   ;;  %v7570_v31 = vld [vmem:[%s11063_s1 + $0xa94] ss:$8 sps:$4 sm:$0xff]  }
 0x141   :  { %5402 = vmatprep.subr.bf16.mxu1 %v7489_v34  ;;  %v7573_v34 = vld [vmem:[%s11063_s1 + $0xb94] ss:$8 sps:$4 sm:$0xff]  }
 0x142   :  { %5306 = vmatmul.mubr.bf16.vlgmr.msra.gmra.mxu0 %v6165_v46  ;;  %v7571_v46 = vld [vmem:[%s11063_s1 + $0xb90] ss:$8 sps:$4 sm:$0xff]  }
 0x143   :  { %5349 = vmatmul.mubr.bf16.vlgmr.msra.gmra.mxu1 %v6167_v47  ;;  %5360 = vmatpush1.bf16.msra.mxu0 %v7484_v45  ;;  %v7568_v45 = vld [vmem:[%s11063_s1 + $0xa90] ss:$8 sps:$4 sm:$0xff]   ;;  %v7576_v47 = vld [vmem:[%s11063_s1 + $0xa84] ss:$8 sps:$4 sm:$0xff]  }
 0x144   :  { %5403 = vmatpush1.bf16.msra.mxu1 %v7487_v36  ;;  %5361 = vmatprep.subr.bf16.mxu0 %v7492_v38  ;;  %v7579_v36 = vld [vmem:[%s11063_s1 + $0xb84] ss:$8 sps:$4 sm:$0xff]   ;;  %v7574_v38 = vld [vmem:[%s11063_s1 + $0xa80] ss:$8 sps:$4 sm:$0xff]  }
 0x145   :  { %5404 = vmatprep.subr.bf16.mxu1 %v7495_v39  ;;  %5391 = vmatprep.mubr.bf16.mxu0 %v6170_v52  ;;  %v7577_v39 = vld [vmem:[%s11063_s1 + $0xb80] ss:$8 sps:$4 sm:$0xff]  }
 0x146   :  { %5434 = vmatprep.mubr.bf16.mxu1 %v6172_v53  ;;  %v9511_v52 = vld [vmem:[%s11064_s0 + $0x60] sm:$0xff]  ;;  %v7580_v53 = vld [vmem:[%s11063_s1 + $0xc70] ss:$8 sps:$4 sm:$0xff]  }
 0x147   :  { %5362 = vmatpush1.bf16.msra.mxu0 %v7490_v42  ;;  %v7582_v42 = vld [vmem:[%s11063_s1 + $0xc74] ss:$8 sps:$4 sm:$0xff]  }
 0x148   :  { %5405 = vmatpush1.bf16.msra.mxu1 %v7493_v51  ;;  %5363 = vmatprep.subr.bf16.mxu0 %v7498_v54  ;;  %v7585_v51 = vld [vmem:[%s11063_s1 + $0xd74] ss:$8 sps:$4 sm:$0xff]   ;;  %v6169_v54 = vcombine.low %v9291_v44, %v9303_v48  ;;  %v7583_v44 = vld [vmem:[%s11063_s1 + $0xd70] ss:$8 sps:$4 sm:$0xff]   ;;  %v7588_v48 = vld [vmem:[%s11063_s1 + $0xc64] ss:$8 sps:$4 sm:$0xff]  }
 0x149   :  { %5406 = vmatprep.subr.bf16.mxu1 %v7501_v55  ;;  %v6171_v55 = vcombine.low %v9308_v49, %v9313_v50  ;;  %v7591_v49 = vld [vmem:[%s11063_s1 + $0xd64] ss:$8 sps:$4 sm:$0xff]   ;;  %v7586_v50 = vld [vmem:[%s11063_s1 + $0xc60] ss:$8 sps:$4 sm:$0xff]  }
 0x14b   :  { %5364 = vmatpush1.bf16.msra.mxu0 %v7496_v56  ;;  %v9523_v56 = vld [vmem:[%s11064_s0 + $0x120] sm:$0xff] }
 0x14c   :  { %5407 = vmatpush1.bf16.msra.mxu1 %v7499_v57  ;;  %5365 = vmatprep.subr.bf16.mxu0 %v7504_v58  ;;  %v9528_v57 = vld [vmem:[%s11064_s0 + $0x68] sm:$0xff] }
 0x14d   :  { %5408 = vmatprep.subr.bf16.mxu1 %v7507_v59  ;;  %v9533_v58 = vld [vmem:[%s11064_s0 + $0x128] sm:$0xff] }
 0x14e   :  { %v7589_v59 = vld [vmem:[%s11063_s1 + $0xd60] ss:$8 sps:$4 sm:$0xff]  }
 0x14f   :  { %5366 = vmatpush1.bf16.msra.mxu0 %v7502_v60  ;;  %v6174_v60 = vcombine.high %v9511_v52, %v9523_v56 }
 0x150   :  { %5409 = vmatpush1.bf16.msra.mxu1 %v7505_v61  ;;  %5367 = vmatprep.subr.bf16.mxu0 %v7510_v62  ;;  %v6176_v61 = vcombine.high %v9528_v57, %v9533_v58  ;;  %v7594_v62 = vld [vmem:[%s11063_s1 + $0xc54] ss:$8 sps:$4 sm:$0xff]  }
 0x151   :  { %5410 = vmatprep.subr.bf16.mxu1 %v7513_v63  ;;  %v7597_v63 = vld [vmem:[%s11063_s1 + $0xd54] ss:$8 sps:$4 sm:$0xff]  }
 0x153   :  { %5368 = vmatpush1.bf16.msra.mxu0 %v7508_v0  ;;  %v7592_v0 = vld [vmem:[%s11063_s1 + $0xc50] ss:$8 sps:$4 sm:$0xff]  }
 0x154   :  { %5411 = vmatpush1.bf16.msra.mxu1 %v7511_v1  ;;  %5369 = vmatprep.subr.bf16.mxu0 %v7516_v2  ;;  %v7595_v1 = vld [vmem:[%s11063_s1 + $0xd50] ss:$8 sps:$4 sm:$0xff]   ;;  %v7600_v2 = vld [vmem:[%s11063_s1 + $0xc44] ss:$8 sps:$4 sm:$0xff]  }
 0x155   :  { %5412 = vmatprep.subr.bf16.mxu1 %v7519_v3  ;;  %v7603_v3 = vld [vmem:[%s11063_s1 + $0xd44] ss:$8 sps:$4 sm:$0xff]  }
 0x157   :  { %5370 = vmatpush1.bf16.msra.mxu0 %v7514_v4  ;;  %v7598_v4 = vld [vmem:[%s11063_s1 + $0xc40] ss:$8 sps:$4 sm:$0xff]  }
 0x158   :  { %5413 = vmatpush1.bf16.msra.mxu1 %v7517_v5  ;;  %5371 = vmatprep.subr.bf16.mxu0 %v7522_v6  ;;  %v7601_v5 = vld [vmem:[%s11063_s1 + $0xd40] ss:$8 sps:$4 sm:$0xff]   ;;  %v7606_v6 = vld [vmem:[%s11063_s1 + $0xc34] ss:$8 sps:$4 sm:$0xff]  }
 0x159   :  { %5414 = vmatprep.subr.bf16.mxu1 %v7525_v7  ;;  %v7609_v7 = vld [vmem:[%s11063_s1 + $0xd34] ss:$8 sps:$4 sm:$0xff]  }
 0x15b   :  { %5372 = vmatpush1.bf16.msra.mxu0 %v7520_v8  ;;  %v7604_v8 = vld [vmem:[%s11063_s1 + $0xc30] ss:$8 sps:$4 sm:$0xff]  }
 0x15c   :  { %5415 = vmatpush1.bf16.msra.mxu1 %v7523_v9  ;;  %5373 = vmatprep.subr.bf16.mxu0 %v7528_v10  ;;  %v7607_v9 = vld [vmem:[%s11063_s1 + $0xd30] ss:$8 sps:$4 sm:$0xff]   ;;  %v7612_v10 = vld [vmem:[%s11063_s1 + $0xc24] ss:$8 sps:$4 sm:$0xff]  }
 0x15d   :  { %5416 = vmatprep.subr.bf16.mxu1 %v7531_v11  ;;  %v7615_v11 = vld [vmem:[%s11063_s1 + $0xd24] ss:$8 sps:$4 sm:$0xff]  }
 0x15f   :  { %5374 = vmatpush1.bf16.msra.mxu0 %v7526_v12  ;;  %v7610_v12 = vld [vmem:[%s11063_s1 + $0xc20] ss:$8 sps:$4 sm:$0xff]  }
 0x160   :  { %5417 = vmatpush1.bf16.msra.mxu1 %v7529_v13  ;;  %5375 = vmatprep.subr.bf16.mxu0 %v7534_v14  ;;  %v7613_v13 = vld [vmem:[%s11063_s1 + $0xd20] ss:$8 sps:$4 sm:$0xff]   ;;  %v7618_v14 = vld [vmem:[%s11063_s1 + $0xc14] ss:$8 sps:$4 sm:$0xff]  }
 0x161   :  { %5418 = vmatprep.subr.bf16.mxu1 %v7537_v15  ;;  %v7621_v15 = vld [vmem:[%s11063_s1 + $0xd14] ss:$8 sps:$4 sm:$0xff]  }
 0x163   :  { %5376 = vmatpush2.bf16.msra.mxu0 %v7532_v16  ;;  %v7616_v16 = vld [vmem:[%s11063_s1 + $0xc10] ss:$8 sps:$4 sm:$0xff]  }
 0x164   :  { %5419 = vmatpush2.bf16.msra.mxu1 %v7535_v17  ;;  %5377 = vmatprep.subr.bf16.mxu0 %v7540_v18  ;;  %v7619_v17 = vld [vmem:[%s11063_s1 + $0xd10] ss:$8 sps:$4 sm:$0xff]   ;;  %v7624_v18 = vld [vmem:[%s11063_s1 + $0xc04] ss:$8 sps:$4 sm:$0xff]  }
 0x165   :  { %5420 = vmatprep.subr.bf16.mxu1 %v7543_v19  ;;  %v7627_v19 = vld [vmem:[%s11063_s1 + $0xd04] ss:$8 sps:$4 sm:$0xff]  }
 0x167   :  { %5378 = vmatpush2.bf16.msra.mxu0 %v7538_v20  ;;  %v7622_v20 = vld [vmem:[%s11063_s1 + $0xc00] ss:$8 sps:$4 sm:$0xff]  }
 0x168   :  { %5421 = vmatpush2.bf16.msra.mxu1 %v7541_v21  ;;  %5379 = vmatprep.subr.bf16.mxu0 %v7546_v22  ;;  %v7625_v21 = vld [vmem:[%s11063_s1 + $0xd00] ss:$8 sps:$4 sm:$0xff]   ;;  %v7630_v22 = vld [vmem:[%s11063_s1 + $0xcf4] ss:$8 sps:$4 sm:$0xff]  }
 0x169   :  { %5422 = vmatprep.subr.bf16.mxu1 %v7549_v23  ;;  %v7633_v23 = vld [vmem:[%s11063_s1 + $0xdf4] ss:$8 sps:$4 sm:$0xff]  }
 0x16b   :  { %5380 = vmatpush2.bf16.msra.mxu0 %v7544_v29  ;;  %v7628_v29 = vld [vmem:[%s11063_s1 + $0xcf0] ss:$8 sps:$4 sm:$0xff]  }
 0x16c   :  { %5423 = vmatpush2.bf16.msra.mxu1 %v7547_v32  ;;  %5381 = vmatprep.subr.bf16.mxu0 %v7552_v33  ;;  %v7631_v32 = vld [vmem:[%s11063_s1 + $0xdf0] ss:$8 sps:$4 sm:$0xff]   ;;  %v7636_v33 = vld [vmem:[%s11063_s1 + $0xce4] ss:$8 sps:$4 sm:$0xff]  }
 0x16d   :  { %5424 = vmatprep.subr.bf16.mxu1 %v7555_v35  ;;  %v7639_v35 = vld [vmem:[%s11063_s1 + $0xde4] ss:$8 sps:$4 sm:$0xff]  }
 0x16f   :  { %5382 = vmatpush2.bf16.msra.mxu0 %v7550_v24  ;;  %v7634_v24 = vld [vmem:[%s11063_s1 + $0xce0] ss:$8 sps:$4 sm:$0xff]  }
 0x170   :  { %5425 = vmatpush2.bf16.msra.mxu1 %v7553_v25  ;;  %5383 = vmatprep.subr.bf16.mxu0 %v7558_v26  ;;  %v7637_v25 = vld [vmem:[%s11063_s1 + $0xde0] ss:$8 sps:$4 sm:$0xff]   ;;  %v7642_v26 = vld [vmem:[%s11063_s1 + $0xcd4] ss:$8 sps:$4 sm:$0xff]  }
 0x171   :  { %5426 = vmatprep.subr.bf16.mxu1 %v7561_v27  ;;  %v7645_v27 = vld [vmem:[%s11063_s1 + $0xdd4] ss:$8 sps:$4 sm:$0xff]  }
 0x173   :  { %5384 = vmatpush2.bf16.msra.mxu0 %v7556_v37  ;;  %v7640_v37 = vld [vmem:[%s11063_s1 + $0xcd0] ss:$8 sps:$4 sm:$0xff]  }
 0x174   :  { %5427 = vmatpush2.bf16.msra.mxu1 %v7559_v40  ;;  %5385 = vmatprep.subr.bf16.mxu0 %v7564_v41  ;;  %v7643_v40 = vld [vmem:[%s11063_s1 + $0xdd0] ss:$8 sps:$4 sm:$0xff]   ;;  %v7648_v41 = vld [vmem:[%s11063_s1 + $0xcc4] ss:$8 sps:$4 sm:$0xff]  }
 0x175   :  { %5428 = vmatprep.subr.bf16.mxu1 %v7567_v43  ;;  %v7651_v43 = vld [vmem:[%s11063_s1 + $0xdc4] ss:$8 sps:$4 sm:$0xff]  }
 0x177   :  { %5386 = vmatpush2.bf16.msra.mxu0 %v7562_v28  ;;  %v7646_v28 = vld [vmem:[%s11063_s1 + $0xcc0] ss:$8 sps:$4 sm:$0xff]  }
 0x178   :  { %5429 = vmatpush2.bf16.msra.mxu1 %v7565_v30  ;;  %5387 = vmatprep.subr.bf16.mxu0 %v7570_v31  ;;  %v7649_v30 = vld [vmem:[%s11063_s1 + $0xdc0] ss:$8 sps:$4 sm:$0xff]   ;;  %v7654_v31 = vld [vmem:[%s11063_s1 + $0xcb4] ss:$8 sps:$4 sm:$0xff]  }
 0x179   :  { %5430 = vmatprep.subr.bf16.mxu1 %v7573_v34  ;;  %v7657_v34 = vld [vmem:[%s11063_s1 + $0xdb4] ss:$8 sps:$4 sm:$0xff]  }
 0x17b   :  { %5388 = vmatpush2.bf16.msra.mxu0 %v7568_v45  ;;  %v7652_v45 = vld [vmem:[%s11063_s1 + $0xcb0] ss:$8 sps:$4 sm:$0xff]  }
 0x17c   :  { %5431 = vmatpush2.bf16.msra.mxu1 %v7571_v46  ;;  %5389 = vmatprep.subr.bf16.mxu0 %v7576_v47  ;;  %v7655_v46 = vld [vmem:[%s11063_s1 + $0xdb0] ss:$8 sps:$4 sm:$0xff]   ;;  %v7660_v47 = vld [vmem:[%s11063_s1 + $0xca4] ss:$8 sps:$4 sm:$0xff]  }
 0x17d   :  { %5432 = vmatprep.subr.bf16.mxu1 %v7579_v36  ;;  %v7663_v36 = vld [vmem:[%s11063_s1 + $0xda4] ss:$8 sps:$4 sm:$0xff]  }
 0x17f   :  { %5390 = vmatpush2.bf16.msra.mxu0 %v7574_v38  ;;  %v7658_v38 = vld [vmem:[%s11063_s1 + $0xca0] ss:$8 sps:$4 sm:$0xff]  }
 0x180   :  { %5433 = vmatpush2.bf16.msra.mxu1 %v7577_v39  ;;  %5445 = vmatprep.subr.bf16.mxu0 %v7582_v42  ;;  %v7661_v39 = vld [vmem:[%s11063_s1 + $0xda0] ss:$8 sps:$4 sm:$0xff]   ;;  %v7666_v42 = vld [vmem:[%s11063_s1 + $0xc94] ss:$8 sps:$4 sm:$0xff]  }
 0x181   :  { %5488 = vmatprep.subr.bf16.mxu1 %v7585_v51  ;;  %v7669_v51 = vld [vmem:[%s11063_s1 + $0xd94] ss:$8 sps:$4 sm:$0xff]  }
 0x182   :  { %5392 = vmatmul.mubr.bf16.vlgmr.msra.gmra.mxu0 %v6169_v54  ;;  %v7667_v54 = vld [vmem:[%s11063_s1 + $0xd90] ss:$8 sps:$4 sm:$0xff]  }
 0x183   :  { %5435 = vmatmul.mubr.bf16.vlgmr.msra.gmra.mxu1 %v6171_v55  ;;  %5446 = vmatpush1.bf16.msra.mxu0 %v7580_v53  ;;  %v7664_v53 = vld [vmem:[%s11063_s1 + $0xc90] ss:$8 sps:$4 sm:$0xff]   ;;  %v7672_v55 = vld [vmem:[%s11063_s1 + $0xc84] ss:$8 sps:$4 sm:$0xff]  }
 0x184   :  { %5489 = vmatpush1.bf16.msra.mxu1 %v7583_v44  ;;  %5447 = vmatprep.subr.bf16.mxu0 %v7588_v48  ;;  %v7675_v44 = vld [vmem:[%s11063_s1 + $0xd84] ss:$8 sps:$4 sm:$0xff]   ;;  %v7670_v48 = vld [vmem:[%s11063_s1 + $0xc80] ss:$8 sps:$4 sm:$0xff]  }
 0x185   :  { %5490 = vmatprep.subr.bf16.mxu1 %v7591_v49  ;;  %5477 = vmatprep.mubr.bf16.mxu0 %v6174_v60  ;;  %v7673_v49 = vld [vmem:[%s11063_s1 + $0xd80] ss:$8 sps:$4 sm:$0xff]   ;;  %v9731_v60 = vld [vmem:[%s11064_s0 + $0x70] sm:$0xff] }
 0x186   :  { %5520 = vmatprep.mubr.bf16.mxu1 %v6176_v61  ;;  %v7676_v61 = vld [vmem:[%s11063_s1 + $0xe70] ss:$8 sps:$4 sm:$0xff]  }
 0x187   :  { %5448 = vmatpush1.bf16.msra.mxu0 %v7586_v50  ;;  %v7678_v50 = vld [vmem:[%s11063_s1 + $0xe74] ss:$8 sps:$4 sm:$0xff]  }
 0x188   :  { %5491 = vmatpush1.bf16.msra.mxu1 %v7589_v59  ;;  %5449 = vmatprep.subr.bf16.mxu0 %v7594_v62  ;;  %v7681_v59 = vld [vmem:[%s11063_s1 + $0xf74] ss:$8 sps:$4 sm:$0xff]   ;;  %v6173_v62 = vcombine.low %v9511_v52, %v9523_v56  ;;  %v7679_v52 = vld [vmem:[%s11063_s1 + $0xf70] ss:$8 sps:$4 sm:$0xff]   ;;  %v7684_v56 = vld [vmem:[%s11063_s1 + $0xe64] ss:$8 sps:$4 sm:$0xff]  }
 0x189   :  { %5492 = vmatprep.subr.bf16.mxu1 %v7597_v63  ;;  %v6175_v63 = vcombine.low %v9528_v57, %v9533_v58  ;;  %v7687_v57 = vld [vmem:[%s11063_s1 + $0xf64] ss:$8 sps:$4 sm:$0xff]   ;;  %v7682_v58 = vld [vmem:[%s11063_s1 + $0xe60] ss:$8 sps:$4 sm:$0xff]  }
 0x18b   :  { %5450 = vmatpush1.bf16.msra.mxu0 %v7592_v0  ;;  %v9743_v0 = vld [vmem:[%s11064_s0 + $0x130] sm:$0xff] }
 0x18c   :  { %5493 = vmatpush1.bf16.msra.mxu1 %v7595_v1  ;;  %5451 = vmatprep.subr.bf16.mxu0 %v7600_v2  ;;  %v9748_v1 = vld [vmem:[%s11064_s0 + $0x78] sm:$0xff] }
 0x18d   :  { %5494 = vmatprep.subr.bf16.mxu1 %v7603_v3  ;;  %v9753_v2 = vld [vmem:[%s11064_s0 + $0x138] sm:$0xff]  ;;  %v7685_v3 = vld [vmem:[%s11063_s1 + $0xf60] ss:$8 sps:$4 sm:$0xff]  }
 0x18f   :  { %5452 = vmatpush1.bf16.msra.mxu0 %v7598_v4  ;;  %v6178_v4 = vcombine.high %v9731_v60, %v9743_v0 }
 0x190   :  { %5495 = vmatpush1.bf16.msra.mxu1 %v7601_v5  ;;  %5453 = vmatprep.subr.bf16.mxu0 %v7606_v6  ;;  %v6180_v5 = vcombine.high %v9748_v1, %v9753_v2  ;;  %v7690_v6 = vld [vmem:[%s11063_s1 + $0xe54] ss:$8 sps:$4 sm:$0xff]  }
 0x191   :  { %5496 = vmatprep.subr.bf16.mxu1 %v7609_v7  ;;  %v7693_v7 = vld [vmem:[%s11063_s1 + $0xf54] ss:$8 sps:$4 sm:$0xff]  }
 0x193   :  { %5454 = vmatpush1.bf16.msra.mxu0 %v7604_v8  ;;  %v7688_v8 = vld [vmem:[%s11063_s1 + $0xe50] ss:$8 sps:$4 sm:$0xff]  }
 0x194   :  { %5497 = vmatpush1.bf16.msra.mxu1 %v7607_v9  ;;  %5455 = vmatprep.subr.bf16.mxu0 %v7612_v10  ;;  %v7691_v9 = vld [vmem:[%s11063_s1 + $0xf50] ss:$8 sps:$4 sm:$0xff]   ;;  %v7696_v10 = vld [vmem:[%s11063_s1 + $0xe44] ss:$8 sps:$4 sm:$0xff]  }
 0x195   :  { %5498 = vmatprep.subr.bf16.mxu1 %v7615_v11  ;;  %v7699_v11 = vld [vmem:[%s11063_s1 + $0xf44] ss:$8 sps:$4 sm:$0xff]  }
 0x197   :  { %5456 = vmatpush1.bf16.msra.mxu0 %v7610_v12  ;;  %v7694_v12 = vld [vmem:[%s11063_s1 + $0xe40] ss:$8 sps:$4 sm:$0xff]  }
 0x198   :  { %5499 = vmatpush1.bf16.msra.mxu1 %v7613_v13  ;;  %5457 = vmatprep.subr.bf16.mxu0 %v7618_v14  ;;  %v7697_v13 = vld [vmem:[%s11063_s1 + $0xf40] ss:$8 sps:$4 sm:$0xff]   ;;  %v7702_v14 = vld [vmem:[%s11063_s1 + $0xe34] ss:$8 sps:$4 sm:$0xff]  }
 0x199   :  { %5500 = vmatprep.subr.bf16.mxu1 %v7621_v15  ;;  %v7705_v15 = vld [vmem:[%s11063_s1 + $0xf34] ss:$8 sps:$4 sm:$0xff]  }
 0x19b   :  { %5458 = vmatpush1.bf16.msra.mxu0 %v7616_v16  ;;  %v7700_v16 = vld [vmem:[%s11063_s1 + $0xe30] ss:$8 sps:$4 sm:$0xff]  }
 0x19c   :  { %5501 = vmatpush1.bf16.msra.mxu1 %v7619_v17  ;;  %5459 = vmatprep.subr.bf16.mxu0 %v7624_v18  ;;  %v7703_v17 = vld [vmem:[%s11063_s1 + $0xf30] ss:$8 sps:$4 sm:$0xff]   ;;  %v7708_v18 = vld [vmem:[%s11063_s1 + $0xe24] ss:$8 sps:$4 sm:$0xff]  }
 0x19d   :  { %5502 = vmatprep.subr.bf16.mxu1 %v7627_v19  ;;  %v7711_v19 = vld [vmem:[%s11063_s1 + $0xf24] ss:$8 sps:$4 sm:$0xff]  }
 0x19f   :  { %5460 = vmatpush1.bf16.msra.mxu0 %v7622_v20  ;;  %v7706_v20 = vld [vmem:[%s11063_s1 + $0xe20] ss:$8 sps:$4 sm:$0xff]  }
 0x1a0   :  { %5503 = vmatpush1.bf16.msra.mxu1 %v7625_v21  ;;  %5461 = vmatprep.subr.bf16.mxu0 %v7630_v22  ;;  %v7709_v21 = vld [vmem:[%s11063_s1 + $0xf20] ss:$8 sps:$4 sm:$0xff]   ;;  %v7714_v22 = vld [vmem:[%s11063_s1 + $0xe14] ss:$8 sps:$4 sm:$0xff]  }
 0x1a1   :  { %5504 = vmatprep.subr.bf16.mxu1 %v7633_v23  ;;  %v7717_v23 = vld [vmem:[%s11063_s1 + $0xf14] ss:$8 sps:$4 sm:$0xff]  }
 0x1a3   :  { %5462 = vmatpush2.bf16.msra.mxu0 %v7628_v29  ;;  %v7712_v29 = vld [vmem:[%s11063_s1 + $0xe10] ss:$8 sps:$4 sm:$0xff]  }
 0x1a4   :  { %5505 = vmatpush2.bf16.msra.mxu1 %v7631_v32  ;;  %5463 = vmatprep.subr.bf16.mxu0 %v7636_v33  ;;  %v7715_v32 = vld [vmem:[%s11063_s1 + $0xf10] ss:$8 sps:$4 sm:$0xff]   ;;  %v7720_v33 = vld [vmem:[%s11063_s1 + $0xe04] ss:$8 sps:$4 sm:$0xff]  }
 0x1a5   :  { %5506 = vmatprep.subr.bf16.mxu1 %v7639_v35  ;;  %v7723_v35 = vld [vmem:[%s11063_s1 + $0xf04] ss:$8 sps:$4 sm:$0xff]  }
 0x1a7   :  { %5464 = vmatpush2.bf16.msra.mxu0 %v7634_v24  ;;  %v7718_v24 = vld [vmem:[%s11063_s1 + $0xe00] ss:$8 sps:$4 sm:$0xff]  }
 0x1a8   :  { %5507 = vmatpush2.bf16.msra.mxu1 %v7637_v25  ;;  %5465 = vmatprep.subr.bf16.mxu0 %v7642_v26  ;;  %v7721_v25 = vld [vmem:[%s11063_s1 + $0xf00] ss:$8 sps:$4 sm:$0xff]   ;;  %v7726_v26 = vld [vmem:[%s11063_s1 + $0xef4] ss:$8 sps:$4 sm:$0xff]  }
 0x1a9   :  { %5508 = vmatprep.subr.bf16.mxu1 %v7645_v27  ;;  %v7729_v27 = vld [vmem:[%s11063_s1 + $0xff4] ss:$8 sps:$4 sm:$0xff]  }
 0x1ab   :  { %5466 = vmatpush2.bf16.msra.mxu0 %v7640_v37  ;;  %v7724_v37 = vld [vmem:[%s11063_s1 + $0xef0] ss:$8 sps:$4 sm:$0xff]  }
 0x1ac   :  { %5509 = vmatpush2.bf16.msra.mxu1 %v7643_v40  ;;  %5467 = vmatprep.subr.bf16.mxu0 %v7648_v41  ;;  %v7727_v40 = vld [vmem:[%s11063_s1 + $0xff0] ss:$8 sps:$4 sm:$0xff]   ;;  %v7732_v41 = vld [vmem:[%s11063_s1 + $0xee4] ss:$8 sps:$4 sm:$0xff]  }
 0x1ad   :  { %5510 = vmatprep.subr.bf16.mxu1 %v7651_v43  ;;  %v7735_v43 = vld [vmem:[%s11063_s1 + $0xfe4] ss:$8 sps:$4 sm:$0xff]  }
 0x1af   :  { %5468 = vmatpush2.bf16.msra.mxu0 %v7646_v28  ;;  %v7730_v28 = vld [vmem:[%s11063_s1 + $0xee0] ss:$8 sps:$4 sm:$0xff]  }
 0x1b0   :  { %5511 = vmatpush2.bf16.msra.mxu1 %v7649_v30  ;;  %5469 = vmatprep.subr.bf16.mxu0 %v7654_v31  ;;  %v7733_v30 = vld [vmem:[%s11063_s1 + $0xfe0] ss:$8 sps:$4 sm:$0xff]   ;;  %v7738_v31 = vld [vmem:[%s11063_s1 + $0xed4] ss:$8 sps:$4 sm:$0xff]  }
 0x1b1   :  { %5512 = vmatprep.subr.bf16.mxu1 %v7657_v34  ;;  %v7741_v34 = vld [vmem:[%s11063_s1 + $0xfd4] ss:$8 sps:$4 sm:$0xff]  }
 0x1b3   :  { %5470 = vmatpush2.bf16.msra.mxu0 %v7652_v45  ;;  %v7736_v45 = vld [vmem:[%s11063_s1 + $0xed0] ss:$8 sps:$4 sm:$0xff]  }
 0x1b4   :  { %5513 = vmatpush2.bf16.msra.mxu1 %v7655_v46  ;;  %5471 = vmatprep.subr.bf16.mxu0 %v7660_v47  ;;  %v7739_v46 = vld [vmem:[%s11063_s1 + $0xfd0] ss:$8 sps:$4 sm:$0xff]   ;;  %v7744_v47 = vld [vmem:[%s11063_s1 + $0xec4] ss:$8 sps:$4 sm:$0xff]  }
 0x1b5   :  { %5514 = vmatprep.subr.bf16.mxu1 %v7663_v36  ;;  %v7747_v36 = vld [vmem:[%s11063_s1 + $0xfc4] ss:$8 sps:$4 sm:$0xff]  }
 0x1b7   :  { %5472 = vmatpush2.bf16.msra.mxu0 %v7658_v38  ;;  %v7742_v38 = vld [vmem:[%s11063_s1 + $0xec0] ss:$8 sps:$4 sm:$0xff]  }
 0x1b8   :  { %5515 = vmatpush2.bf16.msra.mxu1 %v7661_v39  ;;  %5473 = vmatprep.subr.bf16.mxu0 %v7666_v42  ;;  %v7745_v39 = vld [vmem:[%s11063_s1 + $0xfc0] ss:$8 sps:$4 sm:$0xff]   ;;  %v7750_v42 = vld [vmem:[%s11063_s1 + $0xeb4] ss:$8 sps:$4 sm:$0xff]  }
 0x1b9   :  { %5516 = vmatprep.subr.bf16.mxu1 %v7669_v51  ;;  %v7753_v51 = vld [vmem:[%s11063_s1 + $0xfb4] ss:$8 sps:$4 sm:$0xff]  }
 0x1bb   :  { %5474 = vmatpush2.bf16.msra.mxu0 %v7664_v53  ;;  %v7748_v53 = vld [vmem:[%s11063_s1 + $0xeb0] ss:$8 sps:$4 sm:$0xff]  }
 0x1bc   :  { %5517 = vmatpush2.bf16.msra.mxu1 %v7667_v54  ;;  %5475 = vmatprep.subr.bf16.mxu0 %v7672_v55  ;;  %v7751_v54 = vld [vmem:[%s11063_s1 + $0xfb0] ss:$8 sps:$4 sm:$0xff]   ;;  %v7756_v55 = vld [vmem:[%s11063_s1 + $0xea4] ss:$8 sps:$4 sm:$0xff]  }
 0x1bd   :  { %5518 = vmatprep.subr.bf16.mxu1 %v7675_v44  ;;  %v7759_v44 = vld [vmem:[%s11063_s1 + $0xfa4] ss:$8 sps:$4 sm:$0xff]  }
 0x1bf   :  { %5476 = vmatpush2.bf16.msra.mxu0 %v7670_v48  ;;  %v7754_v48 = vld [vmem:[%s11063_s1 + $0xea0] ss:$8 sps:$4 sm:$0xff]  }
 0x1c0   :  { %5519 = vmatpush2.bf16.msra.mxu1 %v7673_v49  ;;  %5531 = vmatprep.subr.bf16.mxu0 %v7678_v50  ;;  %v7757_v49 = vld [vmem:[%s11063_s1 + $0xfa0] ss:$8 sps:$4 sm:$0xff]   ;;  %v7762_v50 = vld [vmem:[%s11063_s1 + $0xe94] ss:$8 sps:$4 sm:$0xff]  }
 0x1c1   :  { %5574 = vmatprep.subr.bf16.mxu1 %v7681_v59  ;;  %v7765_v59 = vld [vmem:[%s11063_s1 + $0xf94] ss:$8 sps:$4 sm:$0xff]  }
 0x1c2   :  { %5478 = vmatmul.mubr.bf16.vlgmr.msra.gmra.mxu0 %v6173_v62  ;;  %v7763_v62 = vld [vmem:[%s11063_s1 + $0xf90] ss:$8 sps:$4 sm:$0xff]  }
 0x1c3   :  { %5521 = vmatmul.mubr.bf16.vlgmr.msra.gmra.mxu1 %v6175_v63  ;;  %5532 = vmatpush1.bf16.msra.mxu0 %v7676_v61  ;;  %v7760_v61 = vld [vmem:[%s11063_s1 + $0xe90] ss:$8 sps:$4 sm:$0xff]   ;;  %v7768_v63 = vld [vmem:[%s11063_s1 + $0xe84] ss:$8 sps:$4 sm:$0xff]  }
 0x1c4   :  { %5575 = vmatpush1.bf16.msra.mxu1 %v7679_v52  ;;  %5533 = vmatprep.subr.bf16.mxu0 %v7684_v56  ;;  %v7771_v52 = vld [vmem:[%s11063_s1 + $0xf84] ss:$8 sps:$4 sm:$0xff]   ;;  %v7766_v56 = vld [vmem:[%s11063_s1 + $0xe80] ss:$8 sps:$4 sm:$0xff]  }
 0x1c5   :  { %5576 = vmatprep.subr.bf16.mxu1 %v7687_v57  ;;  %5563 = vmatprep.mubr.bf16.mxu0 %v6178_v4  ;;  %v7769_v57 = vld [vmem:[%s11063_s1 + $0xf80] ss:$8 sps:$4 sm:$0xff]  }
 0x1c6   :  { %5606 = vmatprep.mubr.bf16.mxu1 %v6180_v5  ;;  %v9951_v4 = vld [vmem:[%s11064_s0 + $0x80] sm:$0xff]  ;;  %v6177_v5 = vcombine.low %v9731_v60, %v9743_v0  ;;  %v7772_v60 = vld [vmem:[%s11063_s1 + $0x1070] ss:$8 sps:$4 sm:$0xff]  }
 0x1c7   :  { %5534 = vmatpush1.bf16.msra.mxu0 %v7682_v58  ;;  %v7774_v58 = vld [vmem:[%s11063_s1 + $0x1074] ss:$8 sps:$4 sm:$0xff]   ;;  %v7775_v0 = vld [vmem:[%s11063_s1 + $0x1170] ss:$8 sps:$4 sm:$0xff]  }
 0x1c8   :  { %5577 = vmatpush1.bf16.msra.mxu1 %v7685_v3  ;;  %5535 = vmatprep.subr.bf16.mxu0 %v7690_v6  ;;  %v7777_v3 = vld [vmem:[%s11063_s1 + $0x1174] ss:$8 sps:$4 sm:$0xff]   ;;  %v6179_v6 = vcombine.low %v9748_v1, %v9753_v2  ;;  %v7780_v1 = vld [vmem:[%s11063_s1 + $0x1064] ss:$8 sps:$4 sm:$0xff]  }
 0x1c9   :  { %5578 = vmatprep.subr.bf16.mxu1 %v7693_v7  ;;  %v9960_v7 = vld [vmem:[%s11064_s0 + $0x140] sm:$0xff] }
 0x1ca   :  { %v7783_v2 = vld [vmem:[%s11063_s1 + $0x1164] ss:$8 sps:$4 sm:$0xff]  }
 0x1cb   :  { %5536 = vmatpush1.bf16.msra.mxu0 %v7688_v8  ;;  %v9965_v8 = vld [vmem:[%s11064_s0 + $0x88] sm:$0xff] }
 0x1cc   :  { %5579 = vmatpush1.bf16.msra.mxu1 %v7691_v9  ;;  %5537 = vmatprep.subr.bf16.mxu0 %v7696_v10  ;;  %v9970_v9 = vld [vmem:[%s11064_s0 + $0x148] sm:$0xff]  ;;  %v6182_v10 = vcombine.high %v9951_v4, %v9960_v7 }
 0x1cd   :  { %5580 = vmatprep.subr.bf16.mxu1 %v7699_v11  ;;  %v6184_v11 = vcombine.high %v9965_v8, %v9970_v9 }
 0x1cf   :  { %5538 = vmatpush1.bf16.msra.mxu0 %v7694_v12  ;;  %v7778_v12 = vld [vmem:[%s11063_s1 + $0x1060] ss:$8 sps:$4 sm:$0xff]  }
 0x1d0   :  { %5581 = vmatpush1.bf16.msra.mxu1 %v7697_v13  ;;  %5539 = vmatprep.subr.bf16.mxu0 %v7702_v14  ;;  %v7781_v13 = vld [vmem:[%s11063_s1 + $0x1160] ss:$8 sps:$4 sm:$0xff]   ;;  %v7786_v14 = vld [vmem:[%s11063_s1 + $0x1054] ss:$8 sps:$4 sm:$0xff]  }
 0x1d1   :  { %5582 = vmatprep.subr.bf16.mxu1 %v7705_v15  ;;  %v7789_v15 = vld [vmem:[%s11063_s1 + $0x1154] ss:$8 sps:$4 sm:$0xff]  }
 0x1d3   :  { %5540 = vmatpush1.bf16.msra.mxu0 %v7700_v16  ;;  %v7784_v16 = vld [vmem:[%s11063_s1 + $0x1050] ss:$8 sps:$4 sm:$0xff]  }
 0x1d4   :  { %5583 = vmatpush1.bf16.msra.mxu1 %v7703_v17  ;;  %5541 = vmatprep.subr.bf16.mxu0 %v7708_v18  ;;  %v7787_v17 = vld [vmem:[%s11063_s1 + $0x1150] ss:$8 sps:$4 sm:$0xff]   ;;  %v7792_v18 = vld [vmem:[%s11063_s1 + $0x1044] ss:$8 sps:$4 sm:$0xff]  }
 0x1d5   :  { %5584 = vmatprep.subr.bf16.mxu1 %v7711_v19  ;;  %v7795_v19 = vld [vmem:[%s11063_s1 + $0x1144] ss:$8 sps:$4 sm:$0xff]  }
 0x1d7   :  { %5542 = vmatpush1.bf16.msra.mxu0 %v7706_v20  ;;  %v7790_v20 = vld [vmem:[%s11063_s1 + $0x1040] ss:$8 sps:$4 sm:$0xff]  }
 0x1d8   :  { %5585 = vmatpush1.bf16.msra.mxu1 %v7709_v21  ;;  %5543 = vmatprep.subr.bf16.mxu0 %v7714_v22  ;;  %v7793_v21 = vld [vmem:[%s11063_s1 + $0x1140] ss:$8 sps:$4 sm:$0xff]   ;;  %v7798_v22 = vld [vmem:[%s11063_s1 + $0x1034] ss:$8 sps:$4 sm:$0xff]  }
 0x1d9   :  { %5586 = vmatprep.subr.bf16.mxu1 %v7717_v23  ;;  %v7801_v23 = vld [vmem:[%s11063_s1 + $0x1134] ss:$8 sps:$4 sm:$0xff]  }
 0x1db   :  { %5544 = vmatpush1.bf16.msra.mxu0 %v7712_v29  ;;  %v7796_v29 = vld [vmem:[%s11063_s1 + $0x1030] ss:$8 sps:$4 sm:$0xff]  }
 0x1dc   :  { %5587 = vmatpush1.bf16.msra.mxu1 %v7715_v32  ;;  %5545 = vmatprep.subr.bf16.mxu0 %v7720_v33  ;;  %v7799_v32 = vld [vmem:[%s11063_s1 + $0x1130] ss:$8 sps:$4 sm:$0xff]   ;;  %v7804_v33 = vld [vmem:[%s11063_s1 + $0x1024] ss:$8 sps:$4 sm:$0xff]  }
 0x1dd   :  { %5588 = vmatprep.subr.bf16.mxu1 %v7723_v35  ;;  %v7807_v35 = vld [vmem:[%s11063_s1 + $0x1124] ss:$8 sps:$4 sm:$0xff]  }
 0x1df   :  { %5546 = vmatpush1.bf16.msra.mxu0 %v7718_v24  ;;  %v7802_v24 = vld [vmem:[%s11063_s1 + $0x1020] ss:$8 sps:$4 sm:$0xff]  }
 0x1e0   :  { %5589 = vmatpush1.bf16.msra.mxu1 %v7721_v25  ;;  %5547 = vmatprep.subr.bf16.mxu0 %v7726_v26  ;;  %v7805_v25 = vld [vmem:[%s11063_s1 + $0x1120] ss:$8 sps:$4 sm:$0xff]   ;;  %v7810_v26 = vld [vmem:[%s11063_s1 + $0x1014] ss:$8 sps:$4 sm:$0xff]  }
 0x1e1   :  { %5590 = vmatprep.subr.bf16.mxu1 %v7729_v27  ;;  %v7813_v27 = vld [vmem:[%s11063_s1 + $0x1114] ss:$8 sps:$4 sm:$0xff]  }
 0x1e3   :  { %5548 = vmatpush2.bf16.msra.mxu0 %v7724_v37  ;;  %v7808_v37 = vld [vmem:[%s11063_s1 + $0x1010] ss:$8 sps:$4 sm:$0xff]  }
 0x1e4   :  { %5591 = vmatpush2.bf16.msra.mxu1 %v7727_v40  ;;  %5549 = vmatprep.subr.bf16.mxu0 %v7732_v41  ;;  %v7811_v40 = vld [vmem:[%s11063_s1 + $0x1110] ss:$8 sps:$4 sm:$0xff]   ;;  %v7816_v41 = vld [vmem:[%s11063_s1 + $0x1004] ss:$8 sps:$4 sm:$0xff]  }
 0x1e5   :  { %5592 = vmatprep.subr.bf16.mxu1 %v7735_v43  ;;  %v7819_v43 = vld [vmem:[%s11063_s1 + $0x1104] ss:$8 sps:$4 sm:$0xff]  }
 0x1e7   :  { %5550 = vmatpush2.bf16.msra.mxu0 %v7730_v28  ;;  %v7814_v28 = vld [vmem:[%s11063_s1 + $0x1000] ss:$8 sps:$4 sm:$0xff]  }
 0x1e8   :  { %5593 = vmatpush2.bf16.msra.mxu1 %v7733_v30  ;;  %5551 = vmatprep.subr.bf16.mxu0 %v7738_v31  ;;  %v7817_v30 = vld [vmem:[%s11063_s1 + $0x1100] ss:$8 sps:$4 sm:$0xff]   ;;  %v7822_v31 = vld [vmem:[%s11063_s1 + $0x10f4] ss:$8 sps:$4 sm:$0xff]  }
 0x1e9   :  { %5594 = vmatprep.subr.bf16.mxu1 %v7741_v34  ;;  %v7825_v34 = vld [vmem:[%s11063_s1 + $0x11f4] ss:$8 sps:$4 sm:$0xff]  }
 0x1eb   :  { %5552 = vmatpush2.bf16.msra.mxu0 %v7736_v45  ;;  %v7820_v45 = vld [vmem:[%s11063_s1 + $0x10f0] ss:$8 sps:$4 sm:$0xff]  }
 0x1ec   :  { %5595 = vmatpush2.bf16.msra.mxu1 %v7739_v46  ;;  %5553 = vmatprep.subr.bf16.mxu0 %v7744_v47  ;;  %v7823_v46 = vld [vmem:[%s11063_s1 + $0x11f0] ss:$8 sps:$4 sm:$0xff]   ;;  %v7828_v47 = vld [vmem:[%s11063_s1 + $0x10e4] ss:$8 sps:$4 sm:$0xff]  }
 0x1ed   :  { %5596 = vmatprep.subr.bf16.mxu1 %v7747_v36  ;;  %v7831_v36 = vld [vmem:[%s11063_s1 + $0x11e4] ss:$8 sps:$4 sm:$0xff]  }
 0x1ef   :  { %5554 = vmatpush2.bf16.msra.mxu0 %v7742_v38  ;;  %v7826_v38 = vld [vmem:[%s11063_s1 + $0x10e0] ss:$8 sps:$4 sm:$0xff]  }
 0x1f0   :  { %5597 = vmatpush2.bf16.msra.mxu1 %v7745_v39  ;;  %5555 = vmatprep.subr.bf16.mxu0 %v7750_v42  ;;  %v7829_v39 = vld [vmem:[%s11063_s1 + $0x11e0] ss:$8 sps:$4 sm:$0xff]   ;;  %v7834_v42 = vld [vmem:[%s11063_s1 + $0x10d4] ss:$8 sps:$4 sm:$0xff]  }
 0x1f1   :  { %5598 = vmatprep.subr.bf16.mxu1 %v7753_v51  ;;  %v7837_v51 = vld [vmem:[%s11063_s1 + $0x11d4] ss:$8 sps:$4 sm:$0xff]  }
 0x1f3   :  { %5556 = vmatpush2.bf16.msra.mxu0 %v7748_v53  ;;  %v7832_v53 = vld [vmem:[%s11063_s1 + $0x10d0] ss:$8 sps:$4 sm:$0xff]  }
 0x1f4   :  { %5599 = vmatpush2.bf16.msra.mxu1 %v7751_v54  ;;  %5557 = vmatprep.subr.bf16.mxu0 %v7756_v55  ;;  %v7835_v54 = vld [vmem:[%s11063_s1 + $0x11d0] ss:$8 sps:$4 sm:$0xff]   ;;  %v7840_v55 = vld [vmem:[%s11063_s1 + $0x10c4] ss:$8 sps:$4 sm:$0xff]  }
 0x1f5   :  { %5600 = vmatprep.subr.bf16.mxu1 %v7759_v44  ;;  %v7843_v44 = vld [vmem:[%s11063_s1 + $0x11c4] ss:$8 sps:$4 sm:$0xff]  }
 0x1f7   :  { %5558 = vmatpush2.bf16.msra.mxu0 %v7754_v48  ;;  %v7838_v48 = vld [vmem:[%s11063_s1 + $0x10c0] ss:$8 sps:$4 sm:$0xff]  }
 0x1f8   :  { %5601 = vmatpush2.bf16.msra.mxu1 %v7757_v49  ;;  %5559 = vmatprep.subr.bf16.mxu0 %v7762_v50  ;;  %v7841_v49 = vld [vmem:[%s11063_s1 + $0x11c0] ss:$8 sps:$4 sm:$0xff]   ;;  %v7846_v50 = vld [vmem:[%s11063_s1 + $0x10b4] ss:$8 sps:$4 sm:$0xff]  }
 0x1f9   :  { %5602 = vmatprep.subr.bf16.mxu1 %v7765_v59  ;;  %v7849_v59 = vld [vmem:[%s11063_s1 + $0x11b4] ss:$8 sps:$4 sm:$0xff]  }
 0x1fb   :  { %5560 = vmatpush2.bf16.msra.mxu0 %v7760_v61  ;;  %v7844_v61 = vld [vmem:[%s11063_s1 + $0x10b0] ss:$8 sps:$4 sm:$0xff]  }
 0x1fc   :  { %5603 = vmatpush2.bf16.msra.mxu1 %v7763_v62  ;;  %5561 = vmatprep.subr.bf16.mxu0 %v7768_v63  ;;  %v7847_v62 = vld [vmem:[%s11063_s1 + $0x11b0] ss:$8 sps:$4 sm:$0xff]   ;;  %v7852_v63 = vld [vmem:[%s11063_s1 + $0x10a4] ss:$8 sps:$4 sm:$0xff]  }
 0x1fd   :  { %5604 = vmatprep.subr.bf16.mxu1 %v7771_v52  ;;  %v7855_v52 = vld [vmem:[%s11063_s1 + $0x11a4] ss:$8 sps:$4 sm:$0xff]  }
 0x1ff   :  { %5562 = vmatpush2.bf16.msra.mxu0 %v7766_v56  ;;  %v7850_v56 = vld [vmem:[%s11063_s1 + $0x10a0] ss:$8 sps:$4 sm:$0xff]  }
 0x200   :  { %5605 = vmatpush2.bf16.msra.mxu1 %v7769_v57  ;;  %5617 = vmatprep.subr.bf16.mxu0 %v7774_v58  ;;  %v7853_v57 = vld [vmem:[%s11063_s1 + $0x11a0] ss:$8 sps:$4 sm:$0xff]   ;;  %v7858_v58 = vld [vmem:[%s11063_s1 + $0x1094] ss:$8 sps:$4 sm:$0xff]  }
 0x201   :  { %5660 = vmatprep.subr.bf16.mxu1 %v7777_v3  ;;  %v7861_v3 = vld [vmem:[%s11063_s1 + $0x1194] ss:$8 sps:$4 sm:$0xff]  }
 0x202   :  { %5564 = vmatmul.mubr.bf16.vlgmr.msra.gmra.mxu0 %v6177_v5  ;;  %v7856_v5 = vld [vmem:[%s11063_s1 + $0x1090] ss:$8 sps:$4 sm:$0xff]  }
 0x203   :  { %5607 = vmatmul.mubr.bf16.vlgmr.msra.gmra.mxu1 %v6179_v6  ;;  %5618 = vmatpush1.bf16.msra.mxu0 %v7772_v60  ;;  %v7859_v6 = vld [vmem:[%s11063_s1 + $0x1190] ss:$8 sps:$4 sm:$0xff]   ;;  %v7864_v60 = vld [vmem:[%s11063_s1 + $0x1084] ss:$8 sps:$4 sm:$0xff]  }
 0x204   :  { %5661 = vmatpush1.bf16.msra.mxu1 %v7775_v0  ;;  %5619 = vmatprep.subr.bf16.mxu0 %v7780_v1  ;;  %v7867_v0 = vld [vmem:[%s11063_s1 + $0x1184] ss:$8 sps:$4 sm:$0xff]   ;;  %v7862_v1 = vld [vmem:[%s11063_s1 + $0x1080] ss:$8 sps:$4 sm:$0xff]  }
 0x205   :  { %5662 = vmatprep.subr.bf16.mxu1 %v7783_v2  ;;  %5649 = vmatprep.mubr.bf16.mxu0 %v6182_v10  ;;  %v7865_v2 = vld [vmem:[%s11063_s1 + $0x1180] ss:$8 sps:$4 sm:$0xff]   ;;  %v7870_v10 = vld [vmem:[%s11063_s1 + $0x1274] ss:$8 sps:$4 sm:$0xff]  }
 0x206   :  { %5692 = vmatprep.mubr.bf16.mxu1 %v6184_v11  ;;  %v7873_v11 = vld [vmem:[%s11063_s1 + $0x1374] ss:$8 sps:$4 sm:$0xff]  }
 0x207   :  { %5620 = vmatpush1.bf16.msra.mxu0 %v7778_v12  ;;  %v10171_v12 = vld [vmem:[%s11064_s0 + $0x90] sm:$0xff] }
 0x208   :  { %5663 = vmatpush1.bf16.msra.mxu1 %v7781_v13  ;;  %5621 = vmatprep.subr.bf16.mxu0 %v7786_v14  ;;  %v6181_v13 = vcombine.low %v9951_v4, %v9960_v7  ;;  %v6183_v14 = vcombine.low %v9965_v8, %v9970_v9  ;;  %v7868_v4 = vld [vmem:[%s11063_s1 + $0x1270] ss:$8 sps:$4 sm:$0xff]   ;;  %v7876_v8 = vld [vmem:[%s11063_s1 + $0x1264] ss:$8 sps:$4 sm:$0xff]  }
 0x209   :  { %5664 = vmatprep.subr.bf16.mxu1 %v7789_v15  ;;  %v10180_v15 = vld [vmem:[%s11064_s0 + $0x150] sm:$0xff]  ;;  %v7879_v9 = vld [vmem:[%s11063_s1 + $0x1364] ss:$8 sps:$4 sm:$0xff]  }
 0x20a   :  { %v7871_v7 = vld [vmem:[%s11063_s1 + $0x1370] ss:$8 sps:$4 sm:$0xff]  }
 0x20b   :  { %5622 = vmatpush1.bf16.msra.mxu0 %v7784_v16  ;;  %v10185_v16 = vld [vmem:[%s11064_s0 + $0x98] sm:$0xff] }
 0x20c   :  { %5665 = vmatpush1.bf16.msra.mxu1 %v7787_v17  ;;  %5623 = vmatprep.subr.bf16.mxu0 %v7792_v18  ;;  %v10190_v17 = vld [vmem:[%s11064_s0 + $0x158] sm:$0xff]  ;;  %v6186_v18 = vcombine.high %v10171_v12, %v10180_v15 }
 0x20d   :  { %5666 = vmatprep.subr.bf16.mxu1 %v7795_v19  ;;  %v6188_v19 = vcombine.high %v10185_v16, %v10190_v17 }
 0x20f   :  { %5624 = vmatpush1.bf16.msra.mxu0 %v7790_v20  ;;  %v7874_v20 = vld [vmem:[%s11063_s1 + $0x1260] ss:$8 sps:$4 sm:$0xff]  }
 0x210   :  { %5667 = vmatpush1.bf16.msra.mxu1 %v7793_v21  ;;  %5625 = vmatprep.subr.bf16.mxu0 %v7798_v22  ;;  %v7877_v21 = vld [vmem:[%s11063_s1 + $0x1360] ss:$8 sps:$4 sm:$0xff]   ;;  %v7882_v22 = vld [vmem:[%s11063_s1 + $0x1254] ss:$8 sps:$4 sm:$0xff]  }
 0x211   :  { %5668 = vmatprep.subr.bf16.mxu1 %v7801_v23  ;;  %v7885_v23 = vld [vmem:[%s11063_s1 + $0x1354] ss:$8 sps:$4 sm:$0xff]  }
 0x213   :  { %5626 = vmatpush1.bf16.msra.mxu0 %v7796_v29  ;;  %v7880_v29 = vld [vmem:[%s11063_s1 + $0x1250] ss:$8 sps:$4 sm:$0xff]  }
 0x214   :  { %5669 = vmatpush1.bf16.msra.mxu1 %v7799_v32  ;;  %5627 = vmatprep.subr.bf16.mxu0 %v7804_v33  ;;  %v7883_v32 = vld [vmem:[%s11063_s1 + $0x1350] ss:$8 sps:$4 sm:$0xff]   ;;  %v7888_v33 = vld [vmem:[%s11063_s1 + $0x1244] ss:$8 sps:$4 sm:$0xff]  }
 0x215   :  { %5670 = vmatprep.subr.bf16.mxu1 %v7807_v35  ;;  %v7891_v35 = vld [vmem:[%s11063_s1 + $0x1344] ss:$8 sps:$4 sm:$0xff]  }
 0x217   :  { %5628 = vmatpush1.bf16.msra.mxu0 %v7802_v24  ;;  %v7886_v24 = vld [vmem:[%s11063_s1 + $0x1240] ss:$8 sps:$4 sm:$0xff]  }
 0x218   :  { %5671 = vmatpush1.bf16.msra.mxu1 %v7805_v25  ;;  %5629 = vmatprep.subr.bf16.mxu0 %v7810_v26  ;;  %v7889_v25 = vld [vmem:[%s11063_s1 + $0x1340] ss:$8 sps:$4 sm:$0xff]   ;;  %v7894_v26 = vld [vmem:[%s11063_s1 + $0x1234] ss:$8 sps:$4 sm:$0xff]  }
 0x219   :  { %5672 = vmatprep.subr.bf16.mxu1 %v7813_v27  ;;  %v7897_v27 = vld [vmem:[%s11063_s1 + $0x1334] ss:$8 sps:$4 sm:$0xff]  }
 0x21b   :  { %5630 = vmatpush1.bf16.msra.mxu0 %v7808_v37  ;;  %v7892_v37 = vld [vmem:[%s11063_s1 + $0x1230] ss:$8 sps:$4 sm:$0xff]  }
 0x21c   :  { %5673 = vmatpush1.bf16.msra.mxu1 %v7811_v40  ;;  %5631 = vmatprep.subr.bf16.mxu0 %v7816_v41  ;;  %v7895_v40 = vld [vmem:[%s11063_s1 + $0x1330] ss:$8 sps:$4 sm:$0xff]   ;;  %v7900_v41 = vld [vmem:[%s11063_s1 + $0x1224] ss:$8 sps:$4 sm:$0xff]  }
 0x21d   :  { %5674 = vmatprep.subr.bf16.mxu1 %v7819_v43  ;;  %v7903_v43 = vld [vmem:[%s11063_s1 + $0x1324] ss:$8 sps:$4 sm:$0xff]  }
 0x21f   :  { %5632 = vmatpush1.bf16.msra.mxu0 %v7814_v28  ;;  %v7898_v28 = vld [vmem:[%s11063_s1 + $0x1220] ss:$8 sps:$4 sm:$0xff]  }
 0x220   :  { %5675 = vmatpush1.bf16.msra.mxu1 %v7817_v30  ;;  %5633 = vmatprep.subr.bf16.mxu0 %v7822_v31  ;;  %v7901_v30 = vld [vmem:[%s11063_s1 + $0x1320] ss:$8 sps:$4 sm:$0xff]   ;;  %v7906_v31 = vld [vmem:[%s11063_s1 + $0x1214] ss:$8 sps:$4 sm:$0xff]  }
 0x221   :  { %5676 = vmatprep.subr.bf16.mxu1 %v7825_v34  ;;  %v7909_v34 = vld [vmem:[%s11063_s1 + $0x1314] ss:$8 sps:$4 sm:$0xff]  }
 0x223   :  { %5634 = vmatpush2.bf16.msra.mxu0 %v7820_v45  ;;  %v7904_v45 = vld [vmem:[%s11063_s1 + $0x1210] ss:$8 sps:$4 sm:$0xff]  }
 0x224   :  { %5677 = vmatpush2.bf16.msra.mxu1 %v7823_v46  ;;  %5635 = vmatprep.subr.bf16.mxu0 %v7828_v47  ;;  %v7907_v46 = vld [vmem:[%s11063_s1 + $0x1310] ss:$8 sps:$4 sm:$0xff]   ;;  %v7912_v47 = vld [vmem:[%s11063_s1 + $0x1204] ss:$8 sps:$4 sm:$0xff]  }
 0x225   :  { %5678 = vmatprep.subr.bf16.mxu1 %v7831_v36  ;;  %v7915_v36 = vld [vmem:[%s11063_s1 + $0x1304] ss:$8 sps:$4 sm:$0xff]  }
 0x227   :  { %5636 = vmatpush2.bf16.msra.mxu0 %v7826_v38  ;;  %v7910_v38 = vld [vmem:[%s11063_s1 + $0x1200] ss:$8 sps:$4 sm:$0xff]  }
 0x228   :  { %5679 = vmatpush2.bf16.msra.mxu1 %v7829_v39  ;;  %5637 = vmatprep.subr.bf16.mxu0 %v7834_v42  ;;  %v7913_v39 = vld [vmem:[%s11063_s1 + $0x1300] ss:$8 sps:$4 sm:$0xff]   ;;  %v7918_v42 = vld [vmem:[%s11063_s1 + $0x12f4] ss:$8 sps:$4 sm:$0xff]  }
 0x229   :  { %5680 = vmatprep.subr.bf16.mxu1 %v7837_v51  ;;  %v7921_v51 = vld [vmem:[%s11063_s1 + $0x13f4] ss:$8 sps:$4 sm:$0xff]  }
 0x22b   :  { %5638 = vmatpush2.bf16.msra.mxu0 %v7832_v53  ;;  %v7916_v53 = vld [vmem:[%s11063_s1 + $0x12f0] ss:$8 sps:$4 sm:$0xff]  }
 0x22c   :  { %5681 = vmatpush2.bf16.msra.mxu1 %v7835_v54  ;;  %5639 = vmatprep.subr.bf16.mxu0 %v7840_v55  ;;  %v7919_v54 = vld [vmem:[%s11063_s1 + $0x13f0] ss:$8 sps:$4 sm:$0xff]   ;;  %v7924_v55 = vld [vmem:[%s11063_s1 + $0x12e4] ss:$8 sps:$4 sm:$0xff]  }
 0x22d   :  { %5682 = vmatprep.subr.bf16.mxu1 %v7843_v44  ;;  %v7927_v44 = vld [vmem:[%s11063_s1 + $0x13e4] ss:$8 sps:$4 sm:$0xff]  }
 0x22f   :  { %5640 = vmatpush2.bf16.msra.mxu0 %v7838_v48  ;;  %v7922_v48 = vld [vmem:[%s11063_s1 + $0x12e0] ss:$8 sps:$4 sm:$0xff]  }
 0x230   :  { %5683 = vmatpush2.bf16.msra.mxu1 %v7841_v49  ;;  %5641 = vmatprep.subr.bf16.mxu0 %v7846_v50  ;;  %v7925_v49 = vld [vmem:[%s11063_s1 + $0x13e0] ss:$8 sps:$4 sm:$0xff]   ;;  %v7930_v50 = vld [vmem:[%s11063_s1 + $0x12d4] ss:$8 sps:$4 sm:$0xff]  }
 0x231   :  { %5684 = vmatprep.subr.bf16.mxu1 %v7849_v59  ;;  %v7933_v59 = vld [vmem:[%s11063_s1 + $0x13d4] ss:$8 sps:$4 sm:$0xff]  }
 0x233   :  { %5642 = vmatpush2.bf16.msra.mxu0 %v7844_v61  ;;  %v7928_v61 = vld [vmem:[%s11063_s1 + $0x12d0] ss:$8 sps:$4 sm:$0xff]  }
 0x234   :  { %5685 = vmatpush2.bf16.msra.mxu1 %v7847_v62  ;;  %5643 = vmatprep.subr.bf16.mxu0 %v7852_v63  ;;  %v7931_v62 = vld [vmem:[%s11063_s1 + $0x13d0] ss:$8 sps:$4 sm:$0xff]   ;;  %v7936_v63 = vld [vmem:[%s11063_s1 + $0x12c4] ss:$8 sps:$4 sm:$0xff]  }
 0x235   :  { %5686 = vmatprep.subr.bf16.mxu1 %v7855_v52  ;;  %v7939_v52 = vld [vmem:[%s11063_s1 + $0x13c4] ss:$8 sps:$4 sm:$0xff]  }
 0x237   :  { %5644 = vmatpush2.bf16.msra.mxu0 %v7850_v56  ;;  %v7934_v56 = vld [vmem:[%s11063_s1 + $0x12c0] ss:$8 sps:$4 sm:$0xff]  }
 0x238   :  { %5687 = vmatpush2.bf16.msra.mxu1 %v7853_v57  ;;  %5645 = vmatprep.subr.bf16.mxu0 %v7858_v58  ;;  %v7937_v57 = vld [vmem:[%s11063_s1 + $0x13c0] ss:$8 sps:$4 sm:$0xff]   ;;  %v7942_v58 = vld [vmem:[%s11063_s1 + $0x12b4] ss:$8 sps:$4 sm:$0xff]  }
 0x239   :  { %5688 = vmatprep.subr.bf16.mxu1 %v7861_v3  ;;  %v7945_v3 = vld [vmem:[%s11063_s1 + $0x13b4] ss:$8 sps:$4 sm:$0xff]  }
 0x23b   :  { %5646 = vmatpush2.bf16.msra.mxu0 %v7856_v5  ;;  %v7940_v5 = vld [vmem:[%s11063_s1 + $0x12b0] ss:$8 sps:$4 sm:$0xff]  }
 0x23c   :  { %5689 = vmatpush2.bf16.msra.mxu1 %v7859_v6  ;;  %5647 = vmatprep.subr.bf16.mxu0 %v7864_v60  ;;  %v7943_v6 = vld [vmem:[%s11063_s1 + $0x13b0] ss:$8 sps:$4 sm:$0xff]   ;;  %v7948_v60 = vld [vmem:[%s11063_s1 + $0x12a4] ss:$8 sps:$4 sm:$0xff]  }
 0x23d   :  { %5690 = vmatprep.subr.bf16.mxu1 %v7867_v0  ;;  %v7951_v0 = vld [vmem:[%s11063_s1 + $0x13a4] ss:$8 sps:$4 sm:$0xff]  }
 0x23f   :  { %5648 = vmatpush2.bf16.msra.mxu0 %v7862_v1  ;;  %v7946_v1 = vld [vmem:[%s11063_s1 + $0x12a0] ss:$8 sps:$4 sm:$0xff]  }
 0x240   :  { %5691 = vmatpush2.bf16.msra.mxu1 %v7865_v2  ;;  %5703 = vmatprep.subr.bf16.mxu0 %v7870_v10  ;;  %v7949_v2 = vld [vmem:[%s11063_s1 + $0x13a0] ss:$8 sps:$4 sm:$0xff]   ;;  %v7954_v10 = vld [vmem:[%s11063_s1 + $0x1294] ss:$8 sps:$4 sm:$0xff]  }
 0x241   :  { %5746 = vmatprep.subr.bf16.mxu1 %v7873_v11  ;;  %v7957_v11 = vld [vmem:[%s11063_s1 + $0x1394] ss:$8 sps:$4 sm:$0xff]  }
 0x242   :  { %5650 = vmatmul.mubr.bf16.vlgmr.msra.gmra.mxu0 %v6181_v13  ;;  %v7952_v13 = vld [vmem:[%s11063_s1 + $0x1290] ss:$8 sps:$4 sm:$0xff]  }
 0x243   :  { %5693 = vmatmul.mubr.bf16.vlgmr.msra.gmra.mxu1 %v6183_v14  ;;  %5704 = vmatpush1.bf16.msra.mxu0 %v7868_v4  ;;  %v7955_v14 = vld [vmem:[%s11063_s1 + $0x1390] ss:$8 sps:$4 sm:$0xff]   ;;  %v7960_v4 = vld [vmem:[%s11063_s1 + $0x1284] ss:$8 sps:$4 sm:$0xff]  }
 0x244   :  { %5747 = vmatpush1.bf16.msra.mxu1 %v7871_v7  ;;  %5705 = vmatprep.subr.bf16.mxu0 %v7876_v8  ;;  %v7963_v7 = vld [vmem:[%s11063_s1 + $0x1384] ss:$8 sps:$4 sm:$0xff]   ;;  %v7958_v8 = vld [vmem:[%s11063_s1 + $0x1280] ss:$8 sps:$4 sm:$0xff]  }
 0x245   :  { %5748 = vmatprep.subr.bf16.mxu1 %v7879_v9  ;;  %5735 = vmatprep.mubr.bf16.mxu0 %v6186_v18  ;;  %v7961_v9 = vld [vmem:[%s11063_s1 + $0x1380] ss:$8 sps:$4 sm:$0xff]   ;;  %v7966_v18 = vld [vmem:[%s11063_s1 + $0x1474] ss:$8 sps:$4 sm:$0xff]  }
 0x246   :  { %5778 = vmatprep.mubr.bf16.mxu1 %v6188_v19  ;;  %v7969_v19 = vld [vmem:[%s11063_s1 + $0x1574] ss:$8 sps:$4 sm:$0xff]  }
 0x247   :  { %5706 = vmatpush1.bf16.msra.mxu0 %v7874_v20  ;;  %v10391_v20 = vld [vmem:[%s11064_s0 + $0xa0] sm:$0xff] }
 0x248   :  { %5749 = vmatpush1.bf16.msra.mxu1 %v7877_v21  ;;  %5707 = vmatprep.subr.bf16.mxu0 %v7882_v22  ;;  %v6185_v21 = vcombine.low %v10171_v12, %v10180_v15  ;;  %v6187_v22 = vcombine.low %v10185_v16, %v10190_v17  ;;  %v7964_v12 = vld [vmem:[%s11063_s1 + $0x1470] ss:$8 sps:$4 sm:$0xff]   ;;  %v7972_v16 = vld [vmem:[%s11063_s1 + $0x1464] ss:$8 sps:$4 sm:$0xff]  }
 0x249   :  { %5750 = vmatprep.subr.bf16.mxu1 %v7885_v23  ;;  %v10400_v23 = vld [vmem:[%s11064_s0 + $0x160] sm:$0xff]  ;;  %v7967_v15 = vld [vmem:[%s11063_s1 + $0x1570] ss:$8 sps:$4 sm:$0xff]  }
 0x24a   :  { %v7975_v17 = vld [vmem:[%s11063_s1 + $0x1564] ss:$8 sps:$4 sm:$0xff]  }
 0x24b   :  { %5708 = vmatpush1.bf16.msra.mxu0 %v7880_v29  ;;  %v10405_v29 = vld [vmem:[%s11064_s0 + $0xa8] sm:$0xff] }
 0x24c   :  { %5751 = vmatpush1.bf16.msra.mxu1 %v7883_v32  ;;  %5709 = vmatprep.subr.bf16.mxu0 %v7888_v33  ;;  %v10410_v32 = vld [vmem:[%s11064_s0 + $0x168] sm:$0xff]  ;;  %v6190_v33 = vcombine.high %v10391_v20, %v10400_v23 }
 0x24d   :  { %5752 = vmatprep.subr.bf16.mxu1 %v7891_v35  ;;  %v6192_v35 = vcombine.high %v10405_v29, %v10410_v32 }
 0x24f   :  { %5710 = vmatpush1.bf16.msra.mxu0 %v7886_v24  ;;  %v7970_v24 = vld [vmem:[%s11063_s1 + $0x1460] ss:$8 sps:$4 sm:$0xff]  }
 0x250   :  { %5753 = vmatpush1.bf16.msra.mxu1 %v7889_v25  ;;  %5711 = vmatprep.subr.bf16.mxu0 %v7894_v26  ;;  %v7973_v25 = vld [vmem:[%s11063_s1 + $0x1560] ss:$8 sps:$4 sm:$0xff]   ;;  %v7978_v26 = vld [vmem:[%s11063_s1 + $0x1454] ss:$8 sps:$4 sm:$0xff]  }
 0x251   :  { %5754 = vmatprep.subr.bf16.mxu1 %v7897_v27  ;;  %v7981_v27 = vld [vmem:[%s11063_s1 + $0x1554] ss:$8 sps:$4 sm:$0xff]  }
 0x253   :  { %5712 = vmatpush1.bf16.msra.mxu0 %v7892_v37  ;;  %v7976_v37 = vld [vmem:[%s11063_s1 + $0x1450] ss:$8 sps:$4 sm:$0xff]  }
 0x254   :  { %5755 = vmatpush1.bf16.msra.mxu1 %v7895_v40  ;;  %5713 = vmatprep.subr.bf16.mxu0 %v7900_v41  ;;  %v7979_v40 = vld [vmem:[%s11063_s1 + $0x1550] ss:$8 sps:$4 sm:$0xff]   ;;  %v7984_v41 = vld [vmem:[%s11063_s1 + $0x1444] ss:$8 sps:$4 sm:$0xff]  }
 0x255   :  { %5756 = vmatprep.subr.bf16.mxu1 %v7903_v43  ;;  %v7987_v43 = vld [vmem:[%s11063_s1 + $0x1544] ss:$8 sps:$4 sm:$0xff]  }
 0x257   :  { %5714 = vmatpush1.bf16.msra.mxu0 %v7898_v28  ;;  %v7982_v28 = vld [vmem:[%s11063_s1 + $0x1440] ss:$8 sps:$4 sm:$0xff]  }
 0x258   :  { %5757 = vmatpush1.bf16.msra.mxu1 %v7901_v30  ;;  %5715 = vmatprep.subr.bf16.mxu0 %v7906_v31  ;;  %v7985_v30 = vld [vmem:[%s11063_s1 + $0x1540] ss:$8 sps:$4 sm:$0xff]   ;;  %v7990_v31 = vld [vmem:[%s11063_s1 + $0x1434] ss:$8 sps:$4 sm:$0xff]  }
 0x259   :  { %5758 = vmatprep.subr.bf16.mxu1 %v7909_v34  ;;  %v7993_v34 = vld [vmem:[%s11063_s1 + $0x1534] ss:$8 sps:$4 sm:$0xff]  }
 0x25b   :  { %5716 = vmatpush1.bf16.msra.mxu0 %v7904_v45  ;;  %v7988_v45 = vld [vmem:[%s11063_s1 + $0x1430] ss:$8 sps:$4 sm:$0xff]  }
 0x25c   :  { %5759 = vmatpush1.bf16.msra.mxu1 %v7907_v46  ;;  %5717 = vmatprep.subr.bf16.mxu0 %v7912_v47  ;;  %v7991_v46 = vld [vmem:[%s11063_s1 + $0x1530] ss:$8 sps:$4 sm:$0xff]   ;;  %v7996_v47 = vld [vmem:[%s11063_s1 + $0x1424] ss:$8 sps:$4 sm:$0xff]  }
 0x25d   :  { %5760 = vmatprep.subr.bf16.mxu1 %v7915_v36  ;;  %v7999_v36 = vld [vmem:[%s11063_s1 + $0x1524] ss:$8 sps:$4 sm:$0xff]  }
 0x25f   :  { %5718 = vmatpush1.bf16.msra.mxu0 %v7910_v38  ;;  %v7994_v38 = vld [vmem:[%s11063_s1 + $0x1420] ss:$8 sps:$4 sm:$0xff]  }
 0x260   :  { %5761 = vmatpush1.bf16.msra.mxu1 %v7913_v39  ;;  %5719 = vmatprep.subr.bf16.mxu0 %v7918_v42  ;;  %v7997_v39 = vld [vmem:[%s11063_s1 + $0x1520] ss:$8 sps:$4 sm:$0xff]   ;;  %v8002_v42 = vld [vmem:[%s11063_s1 + $0x1414] ss:$8 sps:$4 sm:$0xff]  }
 0x261   :  { %5762 = vmatprep.subr.bf16.mxu1 %v7921_v51  ;;  %v8005_v51 = vld [vmem:[%s11063_s1 + $0x1514] ss:$8 sps:$4 sm:$0xff]  }
 0x263   :  { %5720 = vmatpush2.bf16.msra.mxu0 %v7916_v53  ;;  %v8000_v53 = vld [vmem:[%s11063_s1 + $0x1410] ss:$8 sps:$4 sm:$0xff]  }
 0x264   :  { %5763 = vmatpush2.bf16.msra.mxu1 %v7919_v54  ;;  %5721 = vmatprep.subr.bf16.mxu0 %v7924_v55  ;;  %v8003_v54 = vld [vmem:[%s11063_s1 + $0x1510] ss:$8 sps:$4 sm:$0xff]   ;;  %v8008_v55 = vld [vmem:[%s11063_s1 + $0x1404] ss:$8 sps:$4 sm:$0xff]  }
 0x265   :  { %5764 = vmatprep.subr.bf16.mxu1 %v7927_v44  ;;  %v8011_v44 = vld [vmem:[%s11063_s1 + $0x1504] ss:$8 sps:$4 sm:$0xff]  }
 0x267   :  { %5722 = vmatpush2.bf16.msra.mxu0 %v7922_v48  ;;  %v8006_v48 = vld [vmem:[%s11063_s1 + $0x1400] ss:$8 sps:$4 sm:$0xff]  }
 0x268   :  { %5765 = vmatpush2.bf16.msra.mxu1 %v7925_v49  ;;  %5723 = vmatprep.subr.bf16.mxu0 %v7930_v50  ;;  %v8009_v49 = vld [vmem:[%s11063_s1 + $0x1500] ss:$8 sps:$4 sm:$0xff]   ;;  %v8014_v50 = vld [vmem:[%s11063_s1 + $0x14f4] ss:$8 sps:$4 sm:$0xff]  }
 0x269   :  { %5766 = vmatprep.subr.bf16.mxu1 %v7933_v59  ;;  %v8017_v59 = vld [vmem:[%s11063_s1 + $0x15f4] ss:$8 sps:$4 sm:$0xff]  }
 0x26b   :  { %5724 = vmatpush2.bf16.msra.mxu0 %v7928_v61  ;;  %v8012_v61 = vld [vmem:[%s11063_s1 + $0x14f0] ss:$8 sps:$4 sm:$0xff]  }
 0x26c   :  { %5767 = vmatpush2.bf16.msra.mxu1 %v7931_v62  ;;  %5725 = vmatprep.subr.bf16.mxu0 %v7936_v63  ;;  %v8015_v62 = vld [vmem:[%s11063_s1 + $0x15f0] ss:$8 sps:$4 sm:$0xff]   ;;  %v8020_v63 = vld [vmem:[%s11063_s1 + $0x14e4] ss:$8 sps:$4 sm:$0xff]  }
 0x26d   :  { %5768 = vmatprep.subr.bf16.mxu1 %v7939_v52  ;;  %v8023_v52 = vld [vmem:[%s11063_s1 + $0x15e4] ss:$8 sps:$4 sm:$0xff]  }
 0x26f   :  { %5726 = vmatpush2.bf16.msra.mxu0 %v7934_v56  ;;  %v8018_v56 = vld [vmem:[%s11063_s1 + $0x14e0] ss:$8 sps:$4 sm:$0xff]  }
 0x270   :  { %5769 = vmatpush2.bf16.msra.mxu1 %v7937_v57  ;;  %5727 = vmatprep.subr.bf16.mxu0 %v7942_v58  ;;  %v8021_v57 = vld [vmem:[%s11063_s1 + $0x15e0] ss:$8 sps:$4 sm:$0xff]   ;;  %v8026_v58 = vld [vmem:[%s11063_s1 + $0x14d4] ss:$8 sps:$4 sm:$0xff]  }
 0x271   :  { %5770 = vmatprep.subr.bf16.mxu1 %v7945_v3  ;;  %v8029_v3 = vld [vmem:[%s11063_s1 + $0x15d4] ss:$8 sps:$4 sm:$0xff]  }
 0x273   :  { %5728 = vmatpush2.bf16.msra.mxu0 %v7940_v5  ;;  %v8024_v5 = vld [vmem:[%s11063_s1 + $0x14d0] ss:$8 sps:$4 sm:$0xff]  }
 0x274   :  { %5771 = vmatpush2.bf16.msra.mxu1 %v7943_v6  ;;  %5729 = vmatprep.subr.bf16.mxu0 %v7948_v60  ;;  %v8027_v6 = vld [vmem:[%s11063_s1 + $0x15d0] ss:$8 sps:$4 sm:$0xff]   ;;  %v8032_v60 = vld [vmem:[%s11063_s1 + $0x14c4] ss:$8 sps:$4 sm:$0xff]  }
 0x275   :  { %5772 = vmatprep.subr.bf16.mxu1 %v7951_v0  ;;  %v8035_v0 = vld [vmem:[%s11063_s1 + $0x15c4] ss:$8 sps:$4 sm:$0xff]  }
 0x277   :  { %5730 = vmatpush2.bf16.msra.mxu0 %v7946_v1  ;;  %v8030_v1 = vld [vmem:[%s11063_s1 + $0x14c0] ss:$8 sps:$4 sm:$0xff]  }
 0x278   :  { %5773 = vmatpush2.bf16.msra.mxu1 %v7949_v2  ;;  %5731 = vmatprep.subr.bf16.mxu0 %v7954_v10  ;;  %v8033_v2 = vld [vmem:[%s11063_s1 + $0x15c0] ss:$8 sps:$4 sm:$0xff]   ;;  %v8038_v10 = vld [vmem:[%s11063_s1 + $0x14b4] ss:$8 sps:$4 sm:$0xff]  }
 0x279   :  { %5774 = vmatprep.subr.bf16.mxu1 %v7957_v11  ;;  %v8041_v11 = vld [vmem:[%s11063_s1 + $0x15b4] ss:$8 sps:$4 sm:$0xff]  }
 0x27b   :  { %5732 = vmatpush2.bf16.msra.mxu0 %v7952_v13  ;;  %v8036_v13 = vld [vmem:[%s11063_s1 + $0x14b0] ss:$8 sps:$4 sm:$0xff]  }
 0x27c   :  { %5775 = vmatpush2.bf16.msra.mxu1 %v7955_v14  ;;  %5733 = vmatprep.subr.bf16.mxu0 %v7960_v4  ;;  %v8039_v14 = vld [vmem:[%s11063_s1 + $0x15b0] ss:$8 sps:$4 sm:$0xff]   ;;  %v8044_v4 = vld [vmem:[%s11063_s1 + $0x14a4] ss:$8 sps:$4 sm:$0xff]  }
 0x27d   :  { %5776 = vmatprep.subr.bf16.mxu1 %v7963_v7  ;;  %v8047_v7 = vld [vmem:[%s11063_s1 + $0x15a4] ss:$8 sps:$4 sm:$0xff]  }
 0x27f   :  { %5734 = vmatpush2.bf16.msra.mxu0 %v7958_v8  ;;  %v8042_v8 = vld [vmem:[%s11063_s1 + $0x14a0] ss:$8 sps:$4 sm:$0xff]  }
 0x280   :  { %5777 = vmatpush2.bf16.msra.mxu1 %v7961_v9  ;;  %5789 = vmatprep.subr.bf16.mxu0 %v7966_v18  ;;  %v8045_v9 = vld [vmem:[%s11063_s1 + $0x15a0] ss:$8 sps:$4 sm:$0xff]   ;;  %v8050_v18 = vld [vmem:[%s11063_s1 + $0x1494] ss:$8 sps:$4 sm:$0xff]  }
 0x281   :  { %5832 = vmatprep.subr.bf16.mxu1 %v7969_v19  ;;  %v8053_v19 = vld [vmem:[%s11063_s1 + $0x1594] ss:$8 sps:$4 sm:$0xff]  }
 0x282   :  { %5736 = vmatmul.mubr.bf16.vlgmr.msra.gmra.mxu0 %v6185_v21  ;;  %v8048_v21 = vld [vmem:[%s11063_s1 + $0x1490] ss:$8 sps:$4 sm:$0xff]  }
 0x283   :  { %5779 = vmatmul.mubr.bf16.vlgmr.msra.gmra.mxu1 %v6187_v22  ;;  %5790 = vmatpush1.bf16.msra.mxu0 %v7964_v12  ;;  %v8051_v22 = vld [vmem:[%s11063_s1 + $0x1590] ss:$8 sps:$4 sm:$0xff]   ;;  %v8056_v12 = vld [vmem:[%s11063_s1 + $0x1484] ss:$8 sps:$4 sm:$0xff]  }
 0x284   :  { %5833 = vmatpush1.bf16.msra.mxu1 %v7967_v15  ;;  %5791 = vmatprep.subr.bf16.mxu0 %v7972_v16  ;;  %v8059_v15 = vld [vmem:[%s11063_s1 + $0x1584] ss:$8 sps:$4 sm:$0xff]   ;;  %v8054_v16 = vld [vmem:[%s11063_s1 + $0x1480] ss:$8 sps:$4 sm:$0xff]  }
 0x285   :  { %5834 = vmatprep.subr.bf16.mxu1 %v7975_v17  ;;  %5821 = vmatprep.mubr.bf16.mxu0 %v6190_v33  ;;  %v8057_v17 = vld [vmem:[%s11063_s1 + $0x1580] ss:$8 sps:$4 sm:$0xff]   ;;  %v8062_v33 = vld [vmem:[%s11063_s1 + $0x1674] ss:$8 sps:$4 sm:$0xff]  }
 0x286   :  { %5864 = vmatprep.mubr.bf16.mxu1 %v6192_v35  ;;  %v8065_v35 = vld [vmem:[%s11063_s1 + $0x1774] ss:$8 sps:$4 sm:$0xff]  }
 0x287   :  { %5792 = vmatpush1.bf16.msra.mxu0 %v7970_v24  ;;  %v10611_v24 = vld [vmem:[%s11064_s0 + $0xb0] sm:$0xff] }
 0x288   :  { %5835 = vmatpush1.bf16.msra.mxu1 %v7973_v25  ;;  %5793 = vmatprep.subr.bf16.mxu0 %v7978_v26  ;;  %v6189_v25 = vcombine.low %v10391_v20, %v10400_v23  ;;  %v6191_v26 = vcombine.low %v10405_v29, %v10410_v32  ;;  %v8060_v20 = vld [vmem:[%s11063_s1 + $0x1670] ss:$8 sps:$4 sm:$0xff]   ;;  %v8068_v29 = vld [vmem:[%s11063_s1 + $0x1664] ss:$8 sps:$4 sm:$0xff]  }
 0x289   :  { %5836 = vmatprep.subr.bf16.mxu1 %v7981_v27  ;;  %v10620_v27 = vld [vmem:[%s11064_s0 + $0x170] sm:$0xff]  ;;  %v8071_v32 = vld [vmem:[%s11063_s1 + $0x1764] ss:$8 sps:$4 sm:$0xff]  }
 0x28a   :  { %v8063_v23 = vld [vmem:[%s11063_s1 + $0x1770] ss:$8 sps:$4 sm:$0xff]  }
 0x28b   :  { %5794 = vmatpush1.bf16.msra.mxu0 %v7976_v37  ;;  %v10625_v37 = vld [vmem:[%s11064_s0 + $0xb8] sm:$0xff] }
 0x28c   :  { %5837 = vmatpush1.bf16.msra.mxu1 %v7979_v40  ;;  %5795 = vmatprep.subr.bf16.mxu0 %v7984_v41  ;;  %v10630_v40 = vld [vmem:[%s11064_s0 + $0x178] sm:$0xff]  ;;  %v6194_v41 = vcombine.high %v10611_v24, %v10620_v27 }
 0x28d   :  { %5838 = vmatprep.subr.bf16.mxu1 %v7987_v43  ;;  %v6196_v43 = vcombine.high %v10625_v37, %v10630_v40 }
 0x28f   :  { %5796 = vmatpush1.bf16.msra.mxu0 %v7982_v28  ;;  %v8066_v28 = vld [vmem:[%s11063_s1 + $0x1660] ss:$8 sps:$4 sm:$0xff]  }
 0x290   :  { %5839 = vmatpush1.bf16.msra.mxu1 %v7985_v30  ;;  %5797 = vmatprep.subr.bf16.mxu0 %v7990_v31  ;;  %v8069_v30 = vld [vmem:[%s11063_s1 + $0x1760] ss:$8 sps:$4 sm:$0xff]   ;;  %v8074_v31 = vld [vmem:[%s11063_s1 + $0x1654] ss:$8 sps:$4 sm:$0xff]  }
 0x291   :  { %5840 = vmatprep.subr.bf16.mxu1 %v7993_v34  ;;  %v8077_v34 = vld [vmem:[%s11063_s1 + $0x1754] ss:$8 sps:$4 sm:$0xff]  }
 0x293   :  { %5798 = vmatpush1.bf16.msra.mxu0 %v7988_v45  ;;  %v8072_v45 = vld [vmem:[%s11063_s1 + $0x1650] ss:$8 sps:$4 sm:$0xff]  }
 0x294   :  { %5841 = vmatpush1.bf16.msra.mxu1 %v7991_v46  ;;  %5799 = vmatprep.subr.bf16.mxu0 %v7996_v47  ;;  %v8075_v46 = vld [vmem:[%s11063_s1 + $0x1750] ss:$8 sps:$4 sm:$0xff]   ;;  %v8080_v47 = vld [vmem:[%s11063_s1 + $0x1644] ss:$8 sps:$4 sm:$0xff]  }
 0x295   :  { %5842 = vmatprep.subr.bf16.mxu1 %v7999_v36  ;;  %v8083_v36 = vld [vmem:[%s11063_s1 + $0x1744] ss:$8 sps:$4 sm:$0xff]  }
 0x297   :  { %5800 = vmatpush1.bf16.msra.mxu0 %v7994_v38  ;;  %v8078_v38 = vld [vmem:[%s11063_s1 + $0x1640] ss:$8 sps:$4 sm:$0xff]  }
 0x298   :  { %5843 = vmatpush1.bf16.msra.mxu1 %v7997_v39  ;;  %5801 = vmatprep.subr.bf16.mxu0 %v8002_v42  ;;  %v8081_v39 = vld [vmem:[%s11063_s1 + $0x1740] ss:$8 sps:$4 sm:$0xff]   ;;  %v8086_v42 = vld [vmem:[%s11063_s1 + $0x1634] ss:$8 sps:$4 sm:$0xff]  }
 0x299   :  { %5844 = vmatprep.subr.bf16.mxu1 %v8005_v51  ;;  %v8089_v51 = vld [vmem:[%s11063_s1 + $0x1734] ss:$8 sps:$4 sm:$0xff]  }
 0x29b   :  { %5802 = vmatpush1.bf16.msra.mxu0 %v8000_v53  ;;  %v8084_v53 = vld [vmem:[%s11063_s1 + $0x1630] ss:$8 sps:$4 sm:$0xff]  }
 0x29c   :  { %5845 = vmatpush1.bf16.msra.mxu1 %v8003_v54  ;;  %5803 = vmatprep.subr.bf16.mxu0 %v8008_v55  ;;  %v8087_v54 = vld [vmem:[%s11063_s1 + $0x1730] ss:$8 sps:$4 sm:$0xff]   ;;  %v8092_v55 = vld [vmem:[%s11063_s1 + $0x1624] ss:$8 sps:$4 sm:$0xff]  }
 0x29d   :  { %5846 = vmatprep.subr.bf16.mxu1 %v8011_v44  ;;  %v8095_v44 = vld [vmem:[%s11063_s1 + $0x1724] ss:$8 sps:$4 sm:$0xff]  }
 0x29f   :  { %5804 = vmatpush1.bf16.msra.mxu0 %v8006_v48  ;;  %v8090_v48 = vld [vmem:[%s11063_s1 + $0x1620] ss:$8 sps:$4 sm:$0xff]  }
 0x2a0   :  { %5847 = vmatpush1.bf16.msra.mxu1 %v8009_v49  ;;  %5805 = vmatprep.subr.bf16.mxu0 %v8014_v50  ;;  %v8093_v49 = vld [vmem:[%s11063_s1 + $0x1720] ss:$8 sps:$4 sm:$0xff]   ;;  %v8098_v50 = vld [vmem:[%s11063_s1 + $0x1614] ss:$8 sps:$4 sm:$0xff]  }
 0x2a1   :  { %5848 = vmatprep.subr.bf16.mxu1 %v8017_v59  ;;  %v8101_v59 = vld [vmem:[%s11063_s1 + $0x1714] ss:$8 sps:$4 sm:$0xff]  }
 0x2a3   :  { %5806 = vmatpush2.bf16.msra.mxu0 %v8012_v61  ;;  %v8096_v61 = vld [vmem:[%s11063_s1 + $0x1610] ss:$8 sps:$4 sm:$0xff]  }
 0x2a4   :  { %5849 = vmatpush2.bf16.msra.mxu1 %v8015_v62  ;;  %5807 = vmatprep.subr.bf16.mxu0 %v8020_v63  ;;  %v8099_v62 = vld [vmem:[%s11063_s1 + $0x1710] ss:$8 sps:$4 sm:$0xff]   ;;  %v8104_v63 = vld [vmem:[%s11063_s1 + $0x1604] ss:$8 sps:$4 sm:$0xff]  }
 0x2a5   :  { %5850 = vmatprep.subr.bf16.mxu1 %v8023_v52  ;;  %v8107_v52 = vld [vmem:[%s11063_s1 + $0x1704] ss:$8 sps:$4 sm:$0xff]  }
 0x2a7   :  { %5808 = vmatpush2.bf16.msra.mxu0 %v8018_v56  ;;  %v8102_v56 = vld [vmem:[%s11063_s1 + $0x1600] ss:$8 sps:$4 sm:$0xff]  }
 0x2a8   :  { %5851 = vmatpush2.bf16.msra.mxu1 %v8021_v57  ;;  %5809 = vmatprep.subr.bf16.mxu0 %v8026_v58  ;;  %v8105_v57 = vld [vmem:[%s11063_s1 + $0x1700] ss:$8 sps:$4 sm:$0xff]   ;;  %v8110_v58 = vld [vmem:[%s11063_s1 + $0x16f4] ss:$8 sps:$4 sm:$0xff]  }
 0x2a9   :  { %5852 = vmatprep.subr.bf16.mxu1 %v8029_v3  ;;  %v8113_v3 = vld [vmem:[%s11063_s1 + $0x17f4] ss:$8 sps:$4 sm:$0xff]  }
 0x2ab   :  { %5810 = vmatpush2.bf16.msra.mxu0 %v8024_v5  ;;  %v8108_v5 = vld [vmem:[%s11063_s1 + $0x16f0] ss:$8 sps:$4 sm:$0xff]  }
 0x2ac   :  { %5853 = vmatpush2.bf16.msra.mxu1 %v8027_v6  ;;  %5811 = vmatprep.subr.bf16.mxu0 %v8032_v60  ;;  %v8111_v6 = vld [vmem:[%s11063_s1 + $0x17f0] ss:$8 sps:$4 sm:$0xff]   ;;  %v8116_v60 = vld [vmem:[%s11063_s1 + $0x16e4] ss:$8 sps:$4 sm:$0xff]  }
 0x2ad   :  { %5854 = vmatprep.subr.bf16.mxu1 %v8035_v0  ;;  %v8119_v0 = vld [vmem:[%s11063_s1 + $0x17e4] ss:$8 sps:$4 sm:$0xff]  }
 0x2af   :  { %5812 = vmatpush2.bf16.msra.mxu0 %v8030_v1  ;;  %v8114_v1 = vld [vmem:[%s11063_s1 + $0x16e0] ss:$8 sps:$4 sm:$0xff]  }
 0x2b0   :  { %5855 = vmatpush2.bf16.msra.mxu1 %v8033_v2  ;;  %5813 = vmatprep.subr.bf16.mxu0 %v8038_v10  ;;  %v8117_v2 = vld [vmem:[%s11063_s1 + $0x17e0] ss:$8 sps:$4 sm:$0xff]   ;;  %v8122_v10 = vld [vmem:[%s11063_s1 + $0x16d4] ss:$8 sps:$4 sm:$0xff]  }
 0x2b1   :  { %5856 = vmatprep.subr.bf16.mxu1 %v8041_v11  ;;  %v8125_v11 = vld [vmem:[%s11063_s1 + $0x17d4] ss:$8 sps:$4 sm:$0xff]  }
 0x2b3   :  { %5814 = vmatpush2.bf16.msra.mxu0 %v8036_v13  ;;  %v8120_v13 = vld [vmem:[%s11063_s1 + $0x16d0] ss:$8 sps:$4 sm:$0xff]  }
 0x2b4   :  { %5857 = vmatpush2.bf16.msra.mxu1 %v8039_v14  ;;  %5815 = vmatprep.subr.bf16.mxu0 %v8044_v4  ;;  %v8123_v14 = vld [vmem:[%s11063_s1 + $0x17d0] ss:$8 sps:$4 sm:$0xff]   ;;  %v8128_v4 = vld [vmem:[%s11063_s1 + $0x16c4] ss:$8 sps:$4 sm:$0xff]  }
 0x2b5   :  { %5858 = vmatprep.subr.bf16.mxu1 %v8047_v7  ;;  %v8131_v7 = vld [vmem:[%s11063_s1 + $0x17c4] ss:$8 sps:$4 sm:$0xff]  }
 0x2b7   :  { %5816 = vmatpush2.bf16.msra.mxu0 %v8042_v8  ;;  %v8126_v8 = vld [vmem:[%s11063_s1 + $0x16c0] ss:$8 sps:$4 sm:$0xff]  }
 0x2b8   :  { %5859 = vmatpush2.bf16.msra.mxu1 %v8045_v9  ;;  %5817 = vmatprep.subr.bf16.mxu0 %v8050_v18  ;;  %v8129_v9 = vld [vmem:[%s11063_s1 + $0x17c0] ss:$8 sps:$4 sm:$0xff]   ;;  %v8134_v18 = vld [vmem:[%s11063_s1 + $0x16b4] ss:$8 sps:$4 sm:$0xff]  }
 0x2b9   :  { %5860 = vmatprep.subr.bf16.mxu1 %v8053_v19  ;;  %v8137_v19 = vld [vmem:[%s11063_s1 + $0x17b4] ss:$8 sps:$4 sm:$0xff]  }
 0x2bb   :  { %5818 = vmatpush2.bf16.msra.mxu0 %v8048_v21  ;;  %v8132_v21 = vld [vmem:[%s11063_s1 + $0x16b0] ss:$8 sps:$4 sm:$0xff]  }
 0x2bc   :  { %5861 = vmatpush2.bf16.msra.mxu1 %v8051_v22  ;;  %5819 = vmatprep.subr.bf16.mxu0 %v8056_v12  ;;  %v8135_v22 = vld [vmem:[%s11063_s1 + $0x17b0] ss:$8 sps:$4 sm:$0xff]   ;;  %v8140_v12 = vld [vmem:[%s11063_s1 + $0x16a4] ss:$8 sps:$4 sm:$0xff]  }
 0x2bd   :  { %5862 = vmatprep.subr.bf16.mxu1 %v8059_v15  ;;  %v8143_v15 = vld [vmem:[%s11063_s1 + $0x17a4] ss:$8 sps:$4 sm:$0xff]  }
 0x2bf   :  { %5820 = vmatpush2.bf16.msra.mxu0 %v8054_v16  ;;  %v8138_v16 = vld [vmem:[%s11063_s1 + $0x16a0] ss:$8 sps:$4 sm:$0xff]  }
 0x2c0   :  { %5863 = vmatpush2.bf16.msra.mxu1 %v8057_v17  ;;  %5875 = vmatprep.subr.bf16.mxu0 %v8062_v33  ;;  %v8141_v17 = vld [vmem:[%s11063_s1 + $0x17a0] ss:$8 sps:$4 sm:$0xff]   ;;  %v8146_v33 = vld [vmem:[%s11063_s1 + $0x1694] ss:$8 sps:$4 sm:$0xff]  }
 0x2c1   :  { %5918 = vmatprep.subr.bf16.mxu1 %v8065_v35  ;;  %v8149_v35 = vld [vmem:[%s11063_s1 + $0x1794] ss:$8 sps:$4 sm:$0xff]  }
 0x2c2   :  { %5822 = vmatmul.mubr.bf16.vlgmr.msra.gmra.mxu0 %v6189_v25  ;;  %v8144_v25 = vld [vmem:[%s11063_s1 + $0x1690] ss:$8 sps:$4 sm:$0xff]  }
 0x2c3   :  { %5865 = vmatmul.mubr.bf16.vlgmr.msra.gmra.mxu1 %v6191_v26  ;;  %5876 = vmatpush1.bf16.msra.mxu0 %v8060_v20  ;;  %v8147_v26 = vld [vmem:[%s11063_s1 + $0x1790] ss:$8 sps:$4 sm:$0xff]   ;;  %v8152_v20 = vld [vmem:[%s11063_s1 + $0x1684] ss:$8 sps:$4 sm:$0xff]  }
 0x2c4   :  { %5919 = vmatpush1.bf16.msra.mxu1 %v8063_v23  ;;  %5877 = vmatprep.subr.bf16.mxu0 %v8068_v29  ;;  %v8155_v23 = vld [vmem:[%s11063_s1 + $0x1784] ss:$8 sps:$4 sm:$0xff]   ;;  %v8150_v29 = vld [vmem:[%s11063_s1 + $0x1680] ss:$8 sps:$4 sm:$0xff]  }
 0x2c5   :  { %5920 = vmatprep.subr.bf16.mxu1 %v8071_v32  ;;  %5907 = vmatprep.mubr.bf16.mxu0 %v6194_v41  ;;  %v8153_v32 = vld [vmem:[%s11063_s1 + $0x1780] ss:$8 sps:$4 sm:$0xff]   ;;  %v6193_v41 = vcombine.low %v10611_v24, %v10620_v27  ;;  %v8158_v24 = vld [vmem:[%s11065_s3 + $0x70] sm:$0xff]  }
 0x2c6   :  { %5950 = vmatprep.mubr.bf16.mxu1 %v6196_v43  ;;  %v6195_v43 = vcombine.low %v10625_v37, %v10630_v40  ;;  %v8159_v27 = vld [vmem:[%s11065_s3 + $0x30] sm:$0xff]   ;;  %v8160_v37 = vld [vmem:[%s11065_s3 + $0x68] sm:$0xff]  }
 0x2c7   :  { %5878 = vmatpush1.bf16.msra.mxu0 %v8066_v28  ;;  %v8156_v28 = vld [vmem:[%s11065_s3 + $0x78] sm:$0xff]   ;;  %v8161_v40 = vld [vmem:[%s11065_s3 + $0x28] sm:$0xff]  }
 0x2c8   :  { %5921 = vmatpush1.bf16.msra.mxu1 %v8069_v30  ;;  %5879 = vmatprep.subr.bf16.mxu0 %v8074_v31  ;;  %v8157_v30 = vld [vmem:[%s11065_s3 + $0x38] sm:$0xff]   ;;  %v8162_v31 = vld [vmem:[%s11065_s3 + $0x60] sm:$0xff]  }
 0x2c9   :  { %5922 = vmatprep.subr.bf16.mxu1 %v8077_v34  ;;  %v8163_v34 = vld [vmem:[%s11065_s3 + $0x20] sm:$0xff]  }
 0x2cb   :  { %5880 = vmatpush1.bf16.msra.mxu0 %v8072_v45  ;;  %v10850_v45 = vpop.f32.mrf.mxu0 }
 0x2cc   :  { %5923 = vmatpush1.bf16.msra.mxu1 %v8075_v46  ;;  %5881 = vmatprep.subr.bf16.mxu0 %v8080_v47  ;;  %v10852_v46 = vpop.f32.mrf.mxu1 }
 0x2cd   :  { %5924 = vmatprep.subr.bf16.mxu1 %v8083_v36  ;;  %v10854_v47 = vpop.f32.mrf.mxu0 }
 0x2ce   :  { %v10856_v36 = vpop.f32.mrf.mxu1 }
 0x2cf   :  { %5882 = vmatpush1.bf16.msra.mxu0 %v8078_v38  ;;  %v10858_v38 = vpop.f32.mrf.mxu0 }
 0x2d0   :  { %5925 = vmatpush1.bf16.msra.mxu1 %v8081_v39  ;;  %5883 = vmatprep.subr.bf16.mxu0 %v8086_v42  ;;  %v10860_v39 = vpop.f32.mrf.mxu1 }
 0x2d1   :  { %5926 = vmatprep.subr.bf16.mxu1 %v8089_v51  ;;  %v10862_v42 = vpop.f32.mrf.mxu0 }
 0x2d2   :  { %v10864_v51 = vpop.f32.mrf.mxu1 }
 0x2d3   :  { %5884 = vmatpush1.bf16.msra.mxu0 %v8084_v53  ;;  %v10866_v53 = vpop.f32.mrf.mxu0 }
 0x2d4   :  { %5927 = vmatpush1.bf16.msra.mxu1 %v8087_v54  ;;  %5885 = vmatprep.subr.bf16.mxu0 %v8092_v55  ;;  %v10868_v54 = vpop.f32.mrf.mxu1 }
 0x2d5   :  { %5928 = vmatprep.subr.bf16.mxu1 %v8095_v44  ;;  %v10870_v55 = vpop.f32.mrf.mxu0 }
 0x2d6   :  { %v10872_v44 = vpop.f32.mrf.mxu1 }
 0x2d7   :  { %5886 = vmatpush1.bf16.msra.mxu0 %v8090_v48  ;;  %v10874_v48 = vpop.f32.mrf.mxu0 }
 0x2d8   :  { %5929 = vmatpush1.bf16.msra.mxu1 %v8093_v49  ;;  %5887 = vmatprep.subr.bf16.mxu0 %v8098_v50  ;;  %v10876_v49 = vpop.f32.mrf.mxu1  ;;  %v8164_v50 = vld [vmem:[%s11065_s3 + $0x58] sm:$0xff]  }
 0x2d9   :  { %5930 = vmatprep.subr.bf16.mxu1 %v8101_v59  ;;  %v8165_v59 = vld [vmem:[%s11065_s3 + $0x18] sm:$0xff]  }
 0x2db   :  { %5888 = vmatpush1.bf16.msra.mxu0 %v8096_v61  ;;  %v10884_v61 = vpop.f32.mrf.mxu0 }
 0x2dc   :  { %5931 = vmatpush1.bf16.msra.mxu1 %v8099_v62  ;;  %5889 = vmatprep.subr.bf16.mxu0 %v8104_v63  ;;  %v10886_v62 = vpop.f32.mrf.mxu1 }
 0x2dd   :  { %5932 = vmatprep.subr.bf16.mxu1 %v8107_v52  ;;  %v10888_v63 = vpop.f32.mrf.mxu0 }
 0x2de   :  { %v10890_v52 = vpop.f32.mrf.mxu1 }
 0x2df   :  { %5890 = vmatpush1.bf16.msra.mxu0 %v8102_v56  ;;  %v8166_v56 = vld [vmem:[%s11065_s3 + $0x50] sm:$0xff]  }
 0x2e0   :  { %5933 = vmatpush1.bf16.msra.mxu1 %v8105_v57  ;;  %5891 = vmatprep.subr.bf16.mxu0 %v8110_v58  ;;  %v8167_v57 = vld [vmem:[%s11065_s3 + $0x10] sm:$0xff]   ;;  %v10898_v58 = vpop.f32.mrf.mxu0 }
 0x2e1   :  { %5934 = vmatprep.subr.bf16.mxu1 %v8113_v3  ;;  %v10900_v3 = vpop.f32.mrf.mxu1 }
 0x2e3   :  { %5892 = vmatpush2.bf16.msra.mxu0 %v8108_v5  ;;  %v8168_v5 = vld [vmem:[%s11065_s3 + $0x48] sm:$0xff]  }
 0x2e4   :  { %5935 = vmatpush2.bf16.msra.mxu1 %v8111_v6  ;;  %5893 = vmatprep.subr.bf16.mxu0 %v8116_v60  ;;  %v8169_v6 = vld [vmem:[%s11065_s3 + $0x8] sm:$0xff]   ;;  %v10908_v60 = vpop.f32.mrf.mxu0 }
 0x2e5   :  { %5936 = vmatprep.subr.bf16.mxu1 %v8119_v0  ;;  %v10910_v0 = vpop.f32.mrf.mxu1 }
 0x2e7   :  { %5894 = vmatpush2.bf16.msra.mxu0 %v8114_v1  ;;  %v8170_v1 = vld [vmem:[%s11065_s3 + $0x40] sm:$0xff]  }
 0x2e8   :  { %5937 = vmatpush2.bf16.msra.mxu1 %v8117_v2  ;;  %5895 = vmatprep.subr.bf16.mxu0 %v8122_v10  ;;  %v8171_v2 = vld [vmem:[%s11065_s3] sm:$0xff]   ;;  %v10918_v10 = vpop.f32.mrf.mxu0 }
 0x2e9   :  { %5938 = vmatprep.subr.bf16.mxu1 %v8125_v11  ;;  %v10920_v11 = vpop.f32.mrf.mxu1 }
 0x2eb   :  { %5896 = vmatpush2.bf16.msra.mxu0 %v8120_v13  ;;  %v10922_v13 = vpop.f32.mrf.mxu0 }
 0x2ec   :  { %5939 = vmatpush2.bf16.msra.mxu1 %v8123_v14  ;;  %5897 = vmatprep.subr.bf16.mxu0 %v8128_v4  ;;  %v10924_v14 = vpop.f32.mrf.mxu1 }
 0x2ed   :  { %5940 = vmatprep.subr.bf16.mxu1 %v8131_v7  ;;  %v10926_v4 = vpop.f32.mrf.mxu0 }
 0x2ee   :  { %v10928_v7 = vpop.f32.mrf.mxu1 }
 0x2ef   :  { %5898 = vmatpush2.bf16.msra.mxu0 %v8126_v8  ;;  %v10930_v8 = vpop.f32.mrf.mxu0 }
 0x2f0   :  { %5941 = vmatpush2.bf16.msra.mxu1 %v8129_v9  ;;  %5899 = vmatprep.subr.bf16.mxu0 %v8134_v18  ;;  %v10932_v9 = vpop.f32.mrf.mxu1 }
 0x2f1   :  { %5942 = vmatprep.subr.bf16.mxu1 %v8137_v19  ;;  %v10934_v18 = vpop.f32.mrf.mxu0 }
 0x2f2   :  { %v10936_v19 = vpop.f32.mrf.mxu1 }
 0x2f3   :  { %5900 = vmatpush2.bf16.msra.mxu0 %v8132_v21  ;;  %v10938_v21 = vpop.f32.mrf.mxu0 }
 0x2f4   :  { %5943 = vmatpush2.bf16.msra.mxu1 %v8135_v22  ;;  %5901 = vmatprep.subr.bf16.mxu0 %v8140_v12  ;;  %v10940_v22 = vpop.f32.mrf.mxu1 }
 0x2f5   :  { %5944 = vmatprep.subr.bf16.mxu1 %v8143_v15  ;;  %v10942_v12 = vpop.f32.mrf.mxu0 }
 0x2f6   :  { %v10944_v15 = vpop.f32.mrf.mxu1 }
 0x2f7   :  { %5902 = vmatpush2.bf16.msra.mxu0 %v8138_v16  ;;  %v10946_v16 = vpop.f32.mrf.mxu0 }
 0x2f8   :  { %5945 = vmatpush2.bf16.msra.mxu1 %v8141_v17  ;;  %5903 = vmatprep.subr.bf16.mxu0 %v8146_v33  ;;  %v10948_v17 = vpop.f32.mrf.mxu1 }
 0x2f9   :  { %5946 = vmatprep.subr.bf16.mxu1 %v8149_v35  ;;  %v10950_v33 = vpop.f32.mrf.mxu0 }
 0x2fa   :  { %v10952_v35 = vpop.f32.mrf.mxu1 }
 0x2fb   :  { %5904 = vmatpush2.bf16.msra.mxu0 %v8144_v25  ;;  %v10954_v25 = vpop.f32.mrf.mxu0 }
 0x2fc   :  { %5947 = vmatpush2.bf16.msra.mxu1 %v8147_v26  ;;  %5905 = vmatprep.subr.bf16.mxu0 %v8152_v20  ;;  %v10956_v26 = vpop.f32.mrf.mxu1 }
 0x2fd   :  { %5948 = vmatprep.subr.bf16.mxu1 %v8155_v23  ;;  %v10958_v20 = vpop.f32.mrf.mxu0 }
 0x2fe   :  { %v10960_v23 = vpop.f32.mrf.mxu1 }
 0x2ff   :  { %5906 = vmatpush2.bf16.msra.mxu0 %v8150_v29  ;;  %v839_v29 = vlaneseq }
 0x300   :  { %5949 = vmatpush2.bf16.msra.mxu1 %v8153_v32  ;;  %6982 = vmatprep.subr.bf16.mxu0 %v8156_v28  ;;  %v10962_v32 = vpop.f32.mrf.mxu0 }
 0x302   :  { %5908 = vmatmul.mubr.bf16.vlgmr.msra.gmra.mxu0 %v6193_v41  ;;  %v10964_v41 = vpop.f32.mrf.mxu1  ;;  %v10966_v28 = vpop.f32.mrf.mxu0 }
 0x303   :  { %5951 = vmatmul.mubr.bf16.vlgmr.msra.gmra.mxu1 %v6195_v43  ;;  %6983 = vmatpush3.bf16.msra.mxu0 %v8157_v30  ;;  %v840_v43 = vshrl.u32 %v839_v29, 7 }
 0x304   :  { %6984 = vmatprep.subr.bf16.mxu0 %v8158_v24  ;;  %v10968_v30 = vpop.f32.mrf.mxu1 }
 0x305   :  { %v845_v24 = vsub.s32 1, %v840_v43 }
 0x307   :  { %6985 = vmatpush3.bf16.msra.mxu0 %v8159_v27  ;;  %v837_v27 = vld [vmem:[%s11066_s2] sm:$0x3] }
 0x308   :  { %6986 = vmatprep.subr.bf16.mxu0 %v8160_v37  ;;  %v841_v37 = vsub.s32 0, %v840_v43 }
 0x30b   :  { %6987 = vmatpush3.bf16.msra.mxu0 %v8161_v40  ;;  %v10973_v40 = vpop.f32.mrf.mxu0 }
 0x30c   :  { %6988 = vmatprep.subr.bf16.mxu0 %v8162_v31  ;;  %v10975_v31 = vpop.f32.mrf.mxu1 }
 0x30d   :  { %11069 = vst [vmem:[#allocation2_spill] sm:$0xff] %v10975_v31 }
 0x30f   :  { %6989 = vmatpush3.bf16.msra.mxu0 %v8163_v34  ;;  %v846_v34 = vrot.slane %v837_v27, %v845_v24 }
 0x310   :  { %6990 = vmatprep.subr.bf16.mxu0 %v8164_v50  ;;  %v842_v50 = vrot.slane %v837_v27, %v841_v37 }
 0x311   :  { %v4970_v43 = vadd.f32 %v10862_v42, %v846_v34 }
 0x313   :  { %6991 = vmatpush3.bf16.msra.mxu0 %v8165_v59  ;;  %v10977_v59 = vpop.f32.mrf.mxu0 }
 0x314   :  { %6992 = vmatprep.subr.bf16.mxu0 %v8166_v56  ;;  %v10979_v56 = vpop.f32.mrf.mxu1 }
 0x315   :  { %11070 = vst [vmem:[#allocation3_spill] sm:$0xff] %v10979_v56 }
 0x317   :  { %6993 = vmatpush3.bf16.msra.mxu0 %v8167_v57  ;;  %v4966_v57 = vadd.f32 %v10854_v47, %v846_v34 }
 0x318   :  { %6994 = vmatprep.subr.bf16.mxu0 %v8168_v5  ;;  %v4964_v5 = vadd.f32 %v10850_v45, %v842_v50 }
 0x319   :  { %v5009_v29 = vadd.f32 %v10856_v36, %v4966_v57  ;;  %v5013_v36 = vadd.f32 %v10864_v51, %v4970_v43 }
 0x31a   :  { %v5007_v24 = vadd.f32 %v10852_v46, %v4964_v5 }
 0x31b   :  { %6995 = vmatpush3.bf16.msra.mxu0 %v8169_v6  ;;  %v10983_v6 = vpop.f32.mrf.mxu0  ;;  %v5052_v45 = vadd.f32 %v10870_v55, %v5009_v29  ;;  %v5056_v42 = vadd.f32 %v10884_v61, %v5013_v36 }
 0x31c   :  { %6996 = vmatprep.subr.bf16.mxu0 %v8170_v1  ;;  %v10985_v1 = vpop.f32.mrf.mxu1  ;;  %v5050_v31 = vadd.f32 %v10866_v53, %v5007_v24 }
 0x31d   :  { %11071 = vst [vmem:[#allocation4_spill] sm:$0xff] %v10985_v1  ;;  %v10991_v27 = vpop.f32.mrf.mxu0  ;;  %v5095_v46 = vadd.f32 %v10872_v44, %v5052_v45  ;;  %v5099_v5 = vadd.f32 %v10886_v62, %v5056_v42 }
 0x31e   :  { %v10993_v37 = vpop.f32.mrf.mxu1  ;;  %v5093_v34 = vadd.f32 %v10868_v54, %v5050_v31 }
 0x31f   :  { %6997 = vmatpush3.bf16.msra.mxu0 %v8171_v2  ;;  %v4968_v2 = vadd.f32 %v10858_v38, %v842_v50  ;;  %v10998_v56 = vpop.f32.mrf.mxu0  ;;  %v5138_v53 = vadd.f32 %v10898_v58, %v5095_v46  ;;  %v5142_v61 = vadd.f32 %v10918_v10, %v5099_v5  ;;  %v11072_v5 = vld [vmem:[#allocation3_spill] sm:$0xff] }
 0x320   :  { %v11000_v1 = vpop.f32.mrf.mxu1  ;;  %v5136_v57 = vadd.f32 %v10888_v63, %v5093_v34 }
 0x321   :  { %v5011_v47 = vadd.f32 %v10860_v39, %v4968_v2  ;;  %v5567_v50 = vpop.f32.mrf.mxu0  ;;  %v5181_v44 = vadd.f32 %v10900_v3, %v5138_v53  ;;  %v5185_v62 = vadd.f32 %v10920_v11, %v5142_v61 }
 0x322   :  { %v11007_v39 = vpop.f32.mrf.mxu1  ;;  %v5179_v54 = vadd.f32 %v10890_v52, %v5136_v57 }
 0x323   :  { %v5054_v38 = vadd.f32 %v10874_v48, %v5011_v47  ;;  %v5569_v48 = vpop.f32.mrf.mxu0  ;;  %v5228_v10 = vadd.f32 %v10934_v18, %v5185_v62 }
 0x324   :  { %v5612_v2 = vpop.f32.mrf.mxu1  ;;  %v5222_v58 = vadd.f32 %v10922_v13, %v5179_v54 }
 0x325   :  { %v5097_v55 = vadd.f32 %v10876_v49, %v5054_v38  ;;  %v5224_v49 = vadd.f32 %v10926_v4, %v5181_v44  ;;  %v5571_v29 = vpop.f32.mrf.mxu0  ;;  %v5271_v11 = vadd.f32 %v10936_v19, %v5228_v10  ;;  %v11074_v44 = vld [vmem:[#allocation4_spill] sm:$0xff] }
 0x326   :  { %v5614_v63 = vpop.f32.mrf.mxu1  ;;  %v5265_v52 = vadd.f32 %v10924_v14, %v5222_v58 }
 0x327   :  { %v5140_v51 = vadd.f32 %v10908_v60, %v5097_v55  ;;  %v5651_v43 = vpop.f32.mrf.mxu0  ;;  %v5267_v3 = vadd.f32 %v10928_v7, %v5224_v49  ;;  %v5314_v7 = vadd.f32 %v10950_v33, %v5271_v11 }
 0x328   :  { %v5694_v24 = vpop.f32.mrf.mxu1  ;;  %v5308_v13 = vadd.f32 %v10938_v21, %v5265_v52 }
 0x329   :  { %v5183_v31 = vadd.f32 %v10910_v0, %v5140_v51  ;;  %v5310_v4 = vadd.f32 %v10942_v12, %v5267_v3  ;;  %v5653_v47 = vpop.f32.mrf.mxu0  ;;  %v5357_v46 = vadd.f32 %v10952_v35, %v5314_v7  ;;  %v11073_v51 = vld [vmem:[#allocation2_spill] sm:$0xff] }
 0x32a   :  { %v5696_v45 = vpop.f32.mrf.mxu1  ;;  %v5351_v18 = vadd.f32 %v10940_v22, %v5308_v13 }
 0x32b   :  { %v5226_v60 = vadd.f32 %v10930_v8, %v5183_v31  ;;  %v5353_v36 = vadd.f32 %v10944_v15, %v5310_v4  ;;  %v5655_v38 = vpop.f32.mrf.mxu0  ;;  %v5400_v33 = vadd.f32 %v10966_v28, %v5357_v46 }
 0x32c   :  { %v5698_v14 = vpop.f32.mrf.mxu1  ;;  %v5394_v21 = vadd.f32 %v10954_v25, %v5351_v18 }
 0x32d   :  { %v5269_v0 = vadd.f32 %v10932_v9, %v5226_v60  ;;  %v5396_v12 = vadd.f32 %v10958_v20, %v5353_v36  ;;  %v5657_v42 = vpop.f32.mrf.mxu0  ;;  %v5443_v35 = vadd.f32 %v10968_v30, %v5400_v33 }
 0x32e   :  { %v5437_v22 = vadd.f32 %v10956_v26, %v5394_v21 }
 0x32f   :  { %v5312_v8 = vadd.f32 %v10946_v16, %v5269_v0  ;;  %v5700_v16 = vpop.f32.mrf.mxu1  ;;  %v5439_v15 = vadd.f32 %v10960_v23, %v5396_v12  ;;  %v5486_v28 = vadd.f32 %v10991_v27, %v5443_v35 }
 0x330   :  { %v5480_v25 = vadd.f32 %v10973_v40, %v5437_v22 }
 0x331   :  { %v5355_v9 = vadd.f32 %v10948_v17, %v5312_v8  ;;  %v5482_v20 = vadd.f32 %v10977_v59, %v5439_v15  ;;  %v5529_v40 = vadd.f32 %v10993_v37, %v5486_v28 }
 0x332   :  { %v5523_v26 = vadd.f32 %v11073_v51, %v5480_v25 }
 0x333   :  { %v5398_v19 = vadd.f32 %v10962_v32, %v5355_v9  ;;  %v5525_v23 = vadd.f32 %v11072_v5, %v5482_v20  ;;  %v5572_v49 = vadd.f32 %v5571_v29, %v5529_v40  ;;  %v6965_v40 = vld [vmem:[%s11067_s4] ss:$0 sm:$0xff] }
 0x335   :  { %v5441_v17 = vadd.f32 %v10964_v41, %v5398_v19  ;;  %v5568_v54 = vadd.f32 %v5567_v50, %v5525_v23  ;;  %v5566_v41 = vadd.f32 %v10998_v56, %v5523_v26  ;;  %v5615_v50 = vadd.f32 %v5614_v63, %v5572_v49 }
 0x337   :  { %v5484_v32 = vadd.f32 %v10983_v6, %v5441_v17  ;;  %v5611_v6 = vadd.f32 %v11007_v39, %v5568_v54  ;;  %v5609_v58 = vadd.f32 %v11000_v1, %v5566_v41  ;;  %v5658_v13 = vadd.f32 %v5657_v42, %v5615_v50 }
 0x339   :  { %v5527_v61 = vadd.f32 %v11074_v44, %v5484_v32  ;;  %v5654_v3 = vadd.f32 %v5653_v47, %v5611_v6  ;;  %v5652_v10 = vadd.f32 %v5651_v43, %v5609_v58  ;;  %v5701_v29 = vadd.f32 %v5700_v16, %v5658_v13 }
 0x33b   :  { %v5570_v30 = vadd.f32 %v5569_v48, %v5527_v61  ;;  %v5697_v56 = vadd.f32 %v5696_v45, %v5654_v3  ;;  %v5695_v11 = vadd.f32 %v5694_v24, %v5652_v10 }
 0x33d   :  { %v5613_v27 = vadd.f32 %v5612_v2, %v5570_v30 }
 0x33f   :  { %v5656_v4 = vadd.f32 %v5655_v38, %v5613_v27 }
 0x341   :  { %v5699_v48 = vadd.f32 %v5698_v14, %v5656_v4 }
 0x342   :  { %v5737_v34 = vpop.f32.mrf.mxu0 }
 0x343   :  { %v5780_v55 = vpop.f32.mrf.mxu1  ;;  %v5738_v39 = vadd.f32 %v5737_v34, %v5695_v11 }
 0x344   :  { %v5739_v53 = vpop.f32.mrf.mxu0 }
 0x345   :  { %v5782_v57 = vpop.f32.mrf.mxu1  ;;  %v5740_v36 = vadd.f32 %v5739_v53, %v5697_v56  ;;  %v5781_v47 = vadd.f32 %v5780_v55, %v5738_v39 }
 0x346   :  { %v5741_v59 = vpop.f32.mrf.mxu0 }
 0x347   :  { %v5784_v31 = vpop.f32.mrf.mxu1  ;;  %v5742_v7 = vadd.f32 %v5741_v59, %v5699_v48  ;;  %v5783_v9 = vadd.f32 %v5782_v57, %v5740_v36 }
 0x348   :  { %v5743_v62 = vpop.f32.mrf.mxu0 }
 0x349   :  { %v5786_v60 = vpop.f32.mrf.mxu1  ;;  %v5744_v2 = vadd.f32 %v5743_v62, %v5701_v29  ;;  %v5785_v43 = vadd.f32 %v5784_v31, %v5742_v7 }
 0x34b   :  { %v5787_v45 = vadd.f32 %v5786_v60, %v5744_v2 }
 0x382   :  { %v5823_v52 = vpop.f32.mrf.mxu0 }
 0x383   :  { %v5866_v0 = vpop.f32.mrf.mxu1  ;;  %v5824_v21 = vadd.f32 %v5823_v52, %v5781_v47 }
 0x384   :  { %v5825_v8 = vpop.f32.mrf.mxu0 }
 0x385   :  { %v5868_v37 = vpop.f32.mrf.mxu1  ;;  %v5826_v12 = vadd.f32 %v5825_v8, %v5783_v9  ;;  %v5867_v15 = vadd.f32 %v5866_v0, %v5824_v21 }
 0x386   :  { %v5827_v1 = vpop.f32.mrf.mxu0 }
 0x387   :  { %v5870_v18 = vpop.f32.mrf.mxu1  ;;  %v5828_v46 = vadd.f32 %v5827_v1, %v5785_v43  ;;  %v5869_v42 = vadd.f32 %v5868_v37, %v5826_v12 }
 0x388   :  { %v5829_v63 = vpop.f32.mrf.mxu0 }
 0x389   :  { %v5872_v38 = vpop.f32.mrf.mxu1  ;;  %v5830_v14 = vadd.f32 %v5829_v63, %v5787_v45  ;;  %v5871_v22 = vadd.f32 %v5870_v18, %v5828_v46 }
 0x38b   :  { %v5873_v55 = vadd.f32 %v5872_v38, %v5830_v14 }
 0x3c2   :  { %v5909_v24 = vpop.f32.mrf.mxu0 }
 0x3c3   :  { %v5952_v19 = vpop.f32.mrf.mxu1  ;;  %v5910_v17 = vadd.f32 %v5909_v24, %v5867_v15 }
 0x3c4   :  { %v5911_v33 = vpop.f32.mrf.mxu0 }
 0x3c5   :  { %v5954_v16 = vpop.f32.mrf.mxu1  ;;  %v5912_v34 = vadd.f32 %v5911_v33, %v5869_v42  ;;  %v5953_v23 = vadd.f32 %v5952_v19, %v5910_v17 }
 0x3c6   :  { %v5913_v20 = vpop.f32.mrf.mxu0 }
 0x3c7   :  { %v5956_v25 = vpop.f32.mrf.mxu1  ;;  %v5914_v35 = vadd.f32 %v5913_v20, %v5871_v22  ;;  %v5955_v53 = vadd.f32 %v5954_v16, %v5912_v34  ;;  %v5961_v54 = vmax.f32 %v5953_v23, 0.0 }
 0x3c8   :  { %v5915_v32 = vpop.f32.mrf.mxu0 }
 0x3c9   :  { %v5957_v57 = vadd.f32 %v5956_v25, %v5914_v35  ;;  %v5916_v5 = vadd.f32 %v5915_v32, %v5873_v55  ;;  %v5958_v28 = vpop.f32.mrf.mxu1  ;;  %v5962_v44 = vmax.f32 %v5955_v53, 0.0 }
 0x3cb   :  { %v5959_v51 = vadd.f32 %v5958_v28, %v5916_v5  ;;  %v5963_v26 = vmax.f32 %v5957_v57, 0.0 }
 0x3cd   :  { %v5964_v61 = vmax.f32 %v5959_v51, 0.0  ;;  %v5965_v59 = vpack.c.bf16 %v5963_v26, %v5961_v54 }
 0x3cf   :  { %v5966_v41 = vpack.c.bf16 %v5964_v61, %v5962_v44 }
 0x3d1   :  { %6134 = vmatprep.mubr.bf16.mxu0 %v5966_v41 }
 0x3d2   :  { %6135 = vmatmul.mubr.bf16.vlgmr.msra.gmra.mxu0 %v5965_v59 }
 0x492   :  { %v6998_v31 = vpop.f32.mrf.mxu0 }
 0x494   :  { %v6999_v30 = vpop.f32.mrf.mxu0 }
 0x495   :  { %v7000_v6 = vadd.f32 %v6999_v30, %v6998_v31 }
 0x496   :  { %v7001_v49 = vpop.f32.mrf.mxu0 }
 0x497   :  { %v6137_v58 = vadd.f32 %v7000_v6, %v6965_v40 }
 0x498   :  { %v7002_v62 = vpop.f32.mrf.mxu0 }
 0x499   :  { %6143 = vst [vmem:[%s11068_s5] sm:$0xff] %v6137_v58  ;;  %v7003_v60 = vadd.f32 %v7002_v62, %v7001_v49 }
 0x49b   :  { %v6140_v27 = vadd.f32 %v7003_v60, %v6965_v40 }
 0x49d   :  { %6144 = vst [vmem:[%s11068_s5 + $0x8] sm:$0xff] %v6140_v27 }

</bundles_post_ra>
